<compile_context>
chip_gen: v6e
topology: v6e:2x2x1
jax: 0.10.0
libtpu: 0.0.40
codegen_flags: <defaults>
</compile_context>

<pallas_src>
import functools

import jax
import jax.numpy as jnp
from jax.experimental import pallas as pl
from jax.experimental.pallas import tpu as pltpu


def resblock_kernel(xpad_ref, w1_ref, b1_ref, w2_ref, b2_ref, out_ref,
                    acc_ref, hpad_ref, *, K, H, W, C, B, res_scale):
    """One block of B images per grid step.

    xpad_ref: (B, H+2p, W+2p, C)  bf16 zero-padded NHWC input
    w*_ref:   (K*K, C, C)         bf16 per-tap weights, laid out (Cin, Cout)
    b*_ref:   (1, C)              f32 bias
    out_ref:  (B, H*W, C)         f32 output (NHWC with H,W flattened to rows)
    acc_ref:  (B*H*W, C)          f32 VMEM accumulator scratch
    hpad_ref: (B, H+2p, W+2p, C)  bf16 VMEM scratch holding padded conv1 output
    """
    p = K // 2
    Hp = H + 2 * p
    Wp = W + 2 * p
    R = B * H * W

    def conv(src_ref, w_ref):
        # K*K tap matmuls, each (R, C) @ (C, C), contracting over C only.
        acc_ref[...] = jnp.zeros_like(acc_ref)
        for kh in range(K):
            for kw in range(K):
                patch = src_ref[:, kh:kh + H, kw:kw + W, :].reshape(R, C)
                acc_ref[...] += jnp.dot(patch, w_ref[kh * K + kw],
                                        preferred_element_type=jnp.float32)
        return acc_ref[...]

    # ---- conv1 + bias + ReLU (elementwise math in f32) ----
    h = jnp.maximum(conv(xpad_ref, w1_ref) + b1_ref[...], 0.0)

    # ---- place conv1 output into the padded scratch for conv2 ----
    # Zero only the halo strips; the interior is fully rewritten every step.
    zrow = jnp.zeros((B, p, Wp, C), jnp.bfloat16)
    zcol = jnp.zeros((B, Hp, p, C), jnp.bfloat16)
    hpad_ref[:, 0:p, :, :] = zrow
    hpad_ref[:, p + H:Hp, :, :] = zrow
    hpad_ref[:, :, 0:p, :] = zcol
    hpad_ref[:, :, p + W:Wp, :] = zcol
    hpad_ref[:, p:p + H, p:p + W, :] = (
        h.astype(jnp.bfloat16).reshape(B, H, W, C))

    # ---- conv2 + bias ----
    y = conv(hpad_ref, w2_ref) + b2_ref[...]

    # ---- scale + residual (residual = centre slice of the padded input) ----
    res = xpad_ref[:, p:p + H, p:p + W, :].reshape(R, C).astype(jnp.float32)
    out = y * res_scale + res
    out_ref[...] = out.reshape(B, H * W, C).astype(out_ref.dtype)


def resblock_pallas(x_nchw, w1, b1, w2, b2, res_scale=1.0, b_tile=1):
    N, C, H, W = x_nchw.shape
    Cout, Cin, K, K2 = w1.shape
    assert Cout == C and Cin == C and K == K2 and K % 2 == 1
    assert N % b_tile == 0
    p = K // 2
    Hp, Wp = H + 2 * p, W + 2 * p

    # NHWC, bf16 MXU operands, single padded copy (also supplies the residual).
    x_nhwc = jnp.transpose(x_nchw, (0, 2, 3, 1)).astype(jnp.bfloat16)
    xpad = jnp.pad(x_nhwc, ((0, 0), (p, p), (p, p), (0, 0)))

    def taps(w):  # (Cout, Cin, K, K) -> (K*K, Cin, Cout), bf16
        return jnp.transpose(w, (2, 3, 1, 0)).reshape(K * K, C, C).astype(
            jnp.bfloat16)

    w1t, w2t = taps(w1), taps(w2)
    b1r = b1.astype(jnp.float32).reshape(1, C)
    b2r = b2.astype(jnp.float32).reshape(1, C)

    kernel = functools.partial(resblock_kernel, K=K, H=H, W=W, C=C, B=b_tile,
                               res_scale=float(res_scale))

    out = pl.pallas_call(
        kernel,
        out_shape=jax.ShapeDtypeStruct((N, H * W, C), jnp.float32),
        grid_spec=pltpu.PrefetchScalarGridSpec(
            num_scalar_prefetch=0,
            grid=(N // b_tile,),
            in_specs=[
                pl.BlockSpec((b_tile, Hp, Wp, C), lambda n: (n, 0, 0, 0)),
                pl.BlockSpec((K * K, C, C), lambda n: (0, 0, 0)),
                pl.BlockSpec((1, C), lambda n: (0, 0)),
                pl.BlockSpec((K * K, C, C), lambda n: (0, 0, 0)),
                pl.BlockSpec((1, C), lambda n: (0, 0)),
            ],
            out_specs=pl.BlockSpec((b_tile, H * W, C), lambda n: (n, 0, 0)),
            scratch_shapes=[
                pltpu.VMEM((b_tile * H * W, C), jnp.float32),
                pltpu.VMEM((b_tile, Hp, Wp, C), jnp.bfloat16),
            ],
        ),
        compiler_params=pltpu.CompilerParams(
            dimension_semantics=("parallel",)),
    )(xpad, w1t, b1r, w2t, b2r)

    # back to NCHW
    return out.reshape(N, H, W, C).transpose(0, 3, 1, 2)


def resblock_ref(x, w1, b1, w2, b2, res_scale):
    """f32 reference matching the kernel's bf16 quantisation points."""
    q = lambda a: a.astype(jnp.bfloat16).astype(jnp.float32)
    xq, w1q, w2q = q(x), q(w1), q(w2)
    dn = jax.lax.conv_dimension_numbers(x.shape, w1.shape,
                                        ('NCHW', 'OIHW', 'NCHW'))
    y = jax.lax.conv_general_dilated(xq, w1q, (1, 1), 'SAME',
                                     dimension_numbers=dn,
                                     precision=jax.lax.Precision.HIGHEST)
    y = jnp.maximum(y + b1[None, :, None, None], 0.0)
    y = q(y)  # kernel rounds the intermediate activation to bf16
    y = jax.lax.conv_general_dilated(y, w2q, (1, 1), 'SAME',
                                     dimension_numbers=dn,
                                     precision=jax.lax.Precision.HIGHEST)
    y = y + b2[None, :, None, None]
    return y * res_scale + xq


if __name__ == "__main__":
    key = jax.random.PRNGKey(0)
    N, C, H, W, K = 2, 4, 16, 16, 3
    res_scale = 1.0  # module default

    k1, k2, k3, k4, k5 = jax.random.split(key, 5)
    x = jax.random.normal(k1, (N, C, H, W), jnp.float32)
    w1 = jax.random.normal(k2, (C, C, K, K), jnp.float32) * 0.1
    b1 = jax.random.normal(k3, (C,), jnp.float32) * 0.1
    w2 = jax.random.normal(k4, (C, C, K, K), jnp.float32) * 0.1
    b2 = jax.random.normal(k5, (C,), jnp.float32) * 0.1

    out = resblock_pallas(x, w1, b1, w2, b2, res_scale)
    out = jax.block_until_ready(out)

    ref = resblock_ref(x, w1, b1, w2, b2, res_scale)
    max_err = float(jnp.max(jnp.abs(out - ref)))
    assert jnp.allclose(out, ref, atol=5e-3, rtol=5e-3), max_err
    print("KERNEL_OK")
</pallas_src>

<mosaic_0001>
module attributes {stable_mosaic.version = 11 : i64} {
  func.func @resblock_kernel(%arg0: i32, %arg1: memref<1x18x18x4xbf16, #tpu.memory_space<vmem>>, %arg2: memref<9x4x4xbf16, #tpu.memory_space<vmem>>, %arg3: memref<1x4xf32, #tpu.memory_space<vmem>>, %arg4: memref<9x4x4xbf16, #tpu.memory_space<vmem>>, %arg5: memref<1x4xf32, #tpu.memory_space<vmem>>, %arg6: memref<1x256x4xf32, #tpu.memory_space<vmem>>, %arg7: memref<256x4xf32, #tpu.memory_space<vmem>>, %arg8: memref<1x18x18x4xbf16, #tpu.memory_space<vmem>>) attributes {dimension_semantics = [#tpu.dimension_semantics<parallel>], iteration_bounds = array<i64: 2>, scalar_prefetch = 0 : i64, scratch_operands = 2 : i64, tpu.core_type = #tpu.core_type<tc>, window_params = [{transform_indices = @transform_0, window_bounds = array<i64: 1, 18, 18, 4>}, {pipeline_mode = #tpu.pipeline_mode<synchronous>, transform_indices = @transform_1, window_bounds = array<i64: 9, 4, 4>}, {pipeline_mode = #tpu.pipeline_mode<synchronous>, transform_indices = @transform_2, window_bounds = array<i64: 1, 4>}, {pipeline_mode = #tpu.pipeline_mode<synchronous>, transform_indices = @transform_3, window_bounds = array<i64: 9, 4, 4>}, {pipeline_mode = #tpu.pipeline_mode<synchronous>, transform_indices = @transform_4, window_bounds = array<i64: 1, 4>}, {transform_indices = @transform_5, window_bounds = array<i64: 1, 256, 4>}]} {
    %cst = arith.constant 0.000000e+00 : f32
    %0 = vector.broadcast %cst : f32 to vector<256x4xf32>
    %c0 = arith.constant 0 : index
    %c0_0 = arith.constant 0 : index
    %1 = vector.load %arg7[%c0, %c0_0] : memref<256x4xf32, #tpu.memory_space<vmem>>, vector<256x4xf32>
    tpu.vector_store %arg7[%c0, %c0_0], %0 {strides = array<i32>} : memref<256x4xf32, #tpu.memory_space<vmem>>, vector<256x4xf32>,
    %c0_1 = arith.constant 0 : index
    %c0_2 = arith.constant 0 : index
    %c0_3 = arith.constant 0 : index
    %c0_4 = arith.constant 0 : index
    %2 = vector.load %arg1[%c0_1, %c0_2, %c0_3, %c0_4] : memref<1x18x18x4xbf16, #tpu.memory_space<vmem>>, vector<1x16x16x4xbf16>
    %3 = vector.shape_cast %2 : vector<1x16x16x4xbf16> to vector<256x4xbf16>
    %c0_5 = arith.constant 0 : index
    %c0_6 = arith.constant 0 : index
    %4 = vector.load %arg7[%c0_5, %c0_6] : memref<256x4xf32, #tpu.memory_space<vmem>>, vector<256x4xf32>
    %c0_7 = arith.constant 0 : index
    %c0_8 = arith.constant 0 : index
    %c0_9 = arith.constant 0 : index
    %5 = vector.load %arg2[%c0_7, %c0_8, %c0_9] : memref<9x4x4xbf16, #tpu.memory_space<vmem>>, vector<1x4x4xbf16>
    %6 = vector.shape_cast %5 : vector<1x4x4xbf16> to vector<4x4xbf16>
    %cst_10 = arith.constant dense<0.000000e+00> : vector<256x4xf32>
    %7 = tpu.matmul %3, %6, %cst_10 {dimension_numbers = #tpu.dot_dimension_numbers<[1], [0], [0], [1], [0, 0, 1, 1], [], []>} : vector<256x4xbf16>, vector<4x4xbf16>, vector<256x4xf32> -> vector<256x4xf32>
    %8 = arith.addf %4, %7 : vector<256x4xf32>
    %c0_11 = arith.constant 0 : index
    %c0_12 = arith.constant 0 : index
    %9 = vector.load %arg7[%c0_11, %c0_12] : memref<256x4xf32, #tpu.memory_space<vmem>>, vector<256x4xf32>
    tpu.vector_store %arg7[%c0_11, %c0_12], %8 {strides = array<i32>} : memref<256x4xf32, #tpu.memory_space<vmem>>, vector<256x4xf32>,
    %c0_13 = arith.constant 0 : index
    %c0_14 = arith.constant 0 : index
    %c1 = arith.constant 1 : index
    %c0_15 = arith.constant 0 : index
    %10 = vector.load %arg1[%c0_13, %c0_14, %c1, %c0_15] : memref<1x18x18x4xbf16, #tpu.memory_space<vmem>>, vector<1x16x16x4xbf16>
    %11 = vector.shape_cast %10 : vector<1x16x16x4xbf16> to vector<256x4xbf16>
    %c0_16 = arith.constant 0 : index
    %c0_17 = arith.constant 0 : index
    %12 = vector.load %arg7[%c0_16, %c0_17] : memref<256x4xf32, #tpu.memory_space<vmem>>, vector<256x4xf32>
    %c1_18 = arith.constant 1 : index
    %c0_19 = arith.constant 0 : index
    %c0_20 = arith.constant 0 : index
    %13 = vector.load %arg2[%c1_18, %c0_19, %c0_20] : memref<9x4x4xbf16, #tpu.memory_space<vmem>>, vector<1x4x4xbf16>
    %14 = vector.shape_cast %13 : vector<1x4x4xbf16> to vector<4x4xbf16>
    %cst_21 = arith.constant dense<0.000000e+00> : vector<256x4xf32>
    %15 = tpu.matmul %11, %14, %cst_21 {dimension_numbers = #tpu.dot_dimension_numbers<[1], [0], [0], [1], [0, 0, 1, 1], [], []>} : vector<256x4xbf16>, vector<4x4xbf16>, vector<256x4xf32> -> vector<256x4xf32>
    %16 = arith.addf %12, %15 : vector<256x4xf32>
    %c0_22 = arith.constant 0 : index
    %c0_23 = arith.constant 0 : index
    %17 = vector.load %arg7[%c0_22, %c0_23] : memref<256x4xf32, #tpu.memory_space<vmem>>, vector<256x4xf32>
    tpu.vector_store %arg7[%c0_22, %c0_23], %16 {strides = array<i32>} : memref<256x4xf32, #tpu.memory_space<vmem>>, vector<256x4xf32>,
    %c0_24 = arith.constant 0 : index
    %c0_25 = arith.constant 0 : index
    %c2 = arith.constant 2 : index
    %c0_26 = arith.constant 0 : index
    %18 = vector.load %arg1[%c0_24, %c0_25, %c2, %c0_26] : memref<1x18x18x4xbf16, #tpu.memory_space<vmem>>, vector<1x16x16x4xbf16>
    %19 = vector.shape_cast %18 : vector<1x16x16x4xbf16> to vector<256x4xbf16>
    %c0_27 = arith.constant 0 : index
    %c0_28 = arith.constant 0 : index
    %20 = vector.load %arg7[%c0_27, %c0_28] : memref<256x4xf32, #tpu.memory_space<vmem>>, vector<256x4xf32>
    %c2_29 = arith.constant 2 : index
    %c0_30 = arith.constant 0 : index
    %c0_31 = arith.constant 0 : index
    %21 = vector.load %arg2[%c2_29, %c0_30, %c0_31] : memref<9x4x4xbf16, #tpu.memory_space<vmem>>, vector<1x4x4xbf16>
    %22 = vector.shape_cast %21 : vector<1x4x4xbf16> to vector<4x4xbf16>
    %cst_32 = arith.constant dense<0.000000e+00> : vector<256x4xf32>
    %23 = tpu.matmul %19, %22, %cst_32 {dimension_numbers = #tpu.dot_dimension_numbers<[1], [0], [0], [1], [0, 0, 1, 1], [], []>} : vector<256x4xbf16>, vector<4x4xbf16>, vector<256x4xf32> -> vector<256x4xf32>
    %24 = arith.addf %20, %23 : vector<256x4xf32>
    %c0_33 = arith.constant 0 : index
    %c0_34 = arith.constant 0 : index
    %25 = vector.load %arg7[%c0_33, %c0_34] : memref<256x4xf32, #tpu.memory_space<vmem>>, vector<256x4xf32>
    tpu.vector_store %arg7[%c0_33, %c0_34], %24 {strides = array<i32>} : memref<256x4xf32, #tpu.memory_space<vmem>>, vector<256x4xf32>,
    %c0_35 = arith.constant 0 : index
    %c1_36 = arith.constant 1 : index
    %c0_37 = arith.constant 0 : index
    %c0_38 = arith.constant 0 : index
    %26 = vector.load %arg1[%c0_35, %c1_36, %c0_37, %c0_38] : memref<1x18x18x4xbf16, #tpu.memory_space<vmem>>, vector<1x16x16x4xbf16>
    %27 = vector.shape_cast %26 : vector<1x16x16x4xbf16> to vector<256x4xbf16>
    %c0_39 = arith.constant 0 : index
    %c0_40 = arith.constant 0 : index
    %28 = vector.load %arg7[%c0_39, %c0_40] : memref<256x4xf32, #tpu.memory_space<vmem>>, vector<256x4xf32>
    %c3 = arith.constant 3 : index
    %c0_41 = arith.constant 0 : index
    %c0_42 = arith.constant 0 : index
    %29 = vector.load %arg2[%c3, %c0_41, %c0_42] : memref<9x4x4xbf16, #tpu.memory_space<vmem>>, vector<1x4x4xbf16>
    %30 = vector.shape_cast %29 : vector<1x4x4xbf16> to vector<4x4xbf16>
    %cst_43 = arith.constant dense<0.000000e+00> : vector<256x4xf32>
    %31 = tpu.matmul %27, %30, %cst_43 {dimension_numbers = #tpu.dot_dimension_numbers<[1], [0], [0], [1], [0, 0, 1, 1], [], []>} : vector<256x4xbf16>, vector<4x4xbf16>, vector<256x4xf32> -> vector<256x4xf32>
    %32 = arith.addf %28, %31 : vector<256x4xf32>
    %c0_44 = arith.constant 0 : index
    %c0_45 = arith.constant 0 : index
    %33 = vector.load %arg7[%c0_44, %c0_45] : memref<256x4xf32, #tpu.memory_space<vmem>>, vector<256x4xf32>
    tpu.vector_store %arg7[%c0_44, %c0_45], %32 {strides = array<i32>} : memref<256x4xf32, #tpu.memory_space<vmem>>, vector<256x4xf32>,
    %c0_46 = arith.constant 0 : index
    %c1_47 = arith.constant 1 : index
    %c1_48 = arith.constant 1 : index
    %c0_49 = arith.constant 0 : index
    %34 = vector.load %arg1[%c0_46, %c1_47, %c1_48, %c0_49] : memref<1x18x18x4xbf16, #tpu.memory_space<vmem>>, vector<1x16x16x4xbf16>
    %35 = vector.shape_cast %34 : vector<1x16x16x4xbf16> to vector<256x4xbf16>
    %c0_50 = arith.constant 0 : index
    %c0_51 = arith.constant 0 : index
    %36 = vector.load %arg7[%c0_50, %c0_51] : memref<256x4xf32, #tpu.memory_space<vmem>>, vector<256x4xf32>
    %c4 = arith.constant 4 : index
    %c0_52 = arith.constant 0 : index
    %c0_53 = arith.constant 0 : index
    %37 = vector.load %arg2[%c4, %c0_52, %c0_53] : memref<9x4x4xbf16, #tpu.memory_space<vmem>>, vector<1x4x4xbf16>
    %38 = vector.shape_cast %37 : vector<1x4x4xbf16> to vector<4x4xbf16>
    %cst_54 = arith.constant dense<0.000000e+00> : vector<256x4xf32>
    %39 = tpu.matmul %35, %38, %cst_54 {dimension_numbers = #tpu.dot_dimension_numbers<[1], [0], [0], [1], [0, 0, 1, 1], [], []>} : vector<256x4xbf16>, vector<4x4xbf16>, vector<256x4xf32> -> vector<256x4xf32>
    %40 = arith.addf %36, %39 : vector<256x4xf32>
    %c0_55 = arith.constant 0 : index
    %c0_56 = arith.constant 0 : index
    %41 = vector.load %arg7[%c0_55, %c0_56] : memref<256x4xf32, #tpu.memory_space<vmem>>, vector<256x4xf32>
    tpu.vector_store %arg7[%c0_55, %c0_56], %40 {strides = array<i32>} : memref<256x4xf32, #tpu.memory_space<vmem>>, vector<256x4xf32>,
    %c0_57 = arith.constant 0 : index
    %c1_58 = arith.constant 1 : index
    %c2_59 = arith.constant 2 : index
    %c0_60 = arith.constant 0 : index
    %42 = vector.load %arg1[%c0_57, %c1_58, %c2_59, %c0_60] : memref<1x18x18x4xbf16, #tpu.memory_space<vmem>>, vector<1x16x16x4xbf16>
    %43 = vector.shape_cast %42 : vector<1x16x16x4xbf16> to vector<256x4xbf16>
    %c0_61 = arith.constant 0 : index
    %c0_62 = arith.constant 0 : index
    %44 = vector.load %arg7[%c0_61, %c0_62] : memref<256x4xf32, #tpu.memory_space<vmem>>, vector<256x4xf32>
    %c5 = arith.constant 5 : index
    %c0_63 = arith.constant 0 : index
    %c0_64 = arith.constant 0 : index
    %45 = vector.load %arg2[%c5, %c0_63, %c0_64] : memref<9x4x4xbf16, #tpu.memory_space<vmem>>, vector<1x4x4xbf16>
    %46 = vector.shape_cast %45 : vector<1x4x4xbf16> to vector<4x4xbf16>
    %cst_65 = arith.constant dense<0.000000e+00> : vector<256x4xf32>
    %47 = tpu.matmul %43, %46, %cst_65 {dimension_numbers = #tpu.dot_dimension_numbers<[1], [0], [0], [1], [0, 0, 1, 1], [], []>} : vector<256x4xbf16>, vector<4x4xbf16>, vector<256x4xf32> -> vector<256x4xf32>
    %48 = arith.addf %44, %47 : vector<256x4xf32>
    %c0_66 = arith.constant 0 : index
    %c0_67 = arith.constant 0 : index
    %49 = vector.load %arg7[%c0_66, %c0_67] : memref<256x4xf32, #tpu.memory_space<vmem>>, vector<256x4xf32>
    tpu.vector_store %arg7[%c0_66, %c0_67], %48 {strides = array<i32>} : memref<256x4xf32, #tpu.memory_space<vmem>>, vector<256x4xf32>,
    %c0_68 = arith.constant 0 : index
    %c2_69 = arith.constant 2 : index
    %c0_70 = arith.constant 0 : index
    %c0_71 = arith.constant 0 : index
    %50 = vector.load %arg1[%c0_68, %c2_69, %c0_70, %c0_71] : memref<1x18x18x4xbf16, #tpu.memory_space<vmem>>, vector<1x16x16x4xbf16>
    %51 = vector.shape_cast %50 : vector<1x16x16x4xbf16> to vector<256x4xbf16>
    %c0_72 = arith.constant 0 : index
    %c0_73 = arith.constant 0 : index
    %52 = vector.load %arg7[%c0_72, %c0_73] : memref<256x4xf32, #tpu.memory_space<vmem>>, vector<256x4xf32>
    %c6 = arith.constant 6 : index
    %c0_74 = arith.constant 0 : index
    %c0_75 = arith.constant 0 : index
    %53 = vector.load %arg2[%c6, %c0_74, %c0_75] : memref<9x4x4xbf16, #tpu.memory_space<vmem>>, vector<1x4x4xbf16>
    %54 = vector.shape_cast %53 : vector<1x4x4xbf16> to vector<4x4xbf16>
    %cst_76 = arith.constant dense<0.000000e+00> : vector<256x4xf32>
    %55 = tpu.matmul %51, %54, %cst_76 {dimension_numbers = #tpu.dot_dimension_numbers<[1], [0], [0], [1], [0, 0, 1, 1], [], []>} : vector<256x4xbf16>, vector<4x4xbf16>, vector<256x4xf32> -> vector<256x4xf32>
    %56 = arith.addf %52, %55 : vector<256x4xf32>
    %c0_77 = arith.constant 0 : index
    %c0_78 = arith.constant 0 : index
    %57 = vector.load %arg7[%c0_77, %c0_78] : memref<256x4xf32, #tpu.memory_space<vmem>>, vector<256x4xf32>
    tpu.vector_store %arg7[%c0_77, %c0_78], %56 {strides = array<i32>} : memref<256x4xf32, #tpu.memory_space<vmem>>, vector<256x4xf32>,
    %c0_79 = arith.constant 0 : index
    %c2_80 = arith.constant 2 : index
    %c1_81 = arith.constant 1 : index
    %c0_82 = arith.constant 0 : index
    %58 = vector.load %arg1[%c0_79, %c2_80, %c1_81, %c0_82] : memref<1x18x18x4xbf16, #tpu.memory_space<vmem>>, vector<1x16x16x4xbf16>
    %59 = vector.shape_cast %58 : vector<1x16x16x4xbf16> to vector<256x4xbf16>
    %c0_83 = arith.constant 0 : index
    %c0_84 = arith.constant 0 : index
    %60 = vector.load %arg7[%c0_83, %c0_84] : memref<256x4xf32, #tpu.memory_space<vmem>>, vector<256x4xf32>
    %c7 = arith.constant 7 : index
    %c0_85 = arith.constant 0 : index
    %c0_86 = arith.constant 0 : index
    %61 = vector.load %arg2[%c7, %c0_85, %c0_86] : memref<9x4x4xbf16, #tpu.memory_space<vmem>>, vector<1x4x4xbf16>
    %62 = vector.shape_cast %61 : vector<1x4x4xbf16> to vector<4x4xbf16>
    %cst_87 = arith.constant dense<0.000000e+00> : vector<256x4xf32>
    %63 = tpu.matmul %59, %62, %cst_87 {dimension_numbers = #tpu.dot_dimension_numbers<[1], [0], [0], [1], [0, 0, 1, 1], [], []>} : vector<256x4xbf16>, vector<4x4xbf16>, vector<256x4xf32> -> vector<256x4xf32>
    %64 = arith.addf %60, %63 : vector<256x4xf32>
    %c0_88 = arith.constant 0 : index
    %c0_89 = arith.constant 0 : index
    %65 = vector.load %arg7[%c0_88, %c0_89] : memref<256x4xf32, #tpu.memory_space<vmem>>, vector<256x4xf32>
    tpu.vector_store %arg7[%c0_88, %c0_89], %64 {strides = array<i32>} : memref<256x4xf32, #tpu.memory_space<vmem>>, vector<256x4xf32>,
    %c0_90 = arith.constant 0 : index
    %c2_91 = arith.constant 2 : index
    %c2_92 = arith.constant 2 : index
    %c0_93 = arith.constant 0 : index
    %66 = vector.load %arg1[%c0_90, %c2_91, %c2_92, %c0_93] : memref<1x18x18x4xbf16, #tpu.memory_space<vmem>>, vector<1x16x16x4xbf16>
    %67 = vector.shape_cast %66 : vector<1x16x16x4xbf16> to vector<256x4xbf16>
    %c0_94 = arith.constant 0 : index
    %c0_95 = arith.constant 0 : index
    %68 = vector.load %arg7[%c0_94, %c0_95] : memref<256x4xf32, #tpu.memory_space<vmem>>, vector<256x4xf32>
    %c8 = arith.constant 8 : index
    %c0_96 = arith.constant 0 : index
    %c0_97 = arith.constant 0 : index
    %69 = vector.load %arg2[%c8, %c0_96, %c0_97] : memref<9x4x4xbf16, #tpu.memory_space<vmem>>, vector<1x4x4xbf16>
    %70 = vector.shape_cast %69 : vector<1x4x4xbf16> to vector<4x4xbf16>
    %cst_98 = arith.constant dense<0.000000e+00> : vector<256x4xf32>
    %71 = tpu.matmul %67, %70, %cst_98 {dimension_numbers = #tpu.dot_dimension_numbers<[1], [0], [0], [1], [0, 0, 1, 1], [], []>} : vector<256x4xbf16>, vector<4x4xbf16>, vector<256x4xf32> -> vector<256x4xf32>
    %72 = arith.addf %68, %71 : vector<256x4xf32>
    %c0_99 = arith.constant 0 : index
    %c0_100 = arith.constant 0 : index
    %73 = vector.load %arg7[%c0_99, %c0_100] : memref<256x4xf32, #tpu.memory_space<vmem>>, vector<256x4xf32>
    tpu.vector_store %arg7[%c0_99, %c0_100], %72 {strides = array<i32>} : memref<256x4xf32, #tpu.memory_space<vmem>>, vector<256x4xf32>,
    %c0_101 = arith.constant 0 : index
    %c0_102 = arith.constant 0 : index
    %74 = vector.load %arg7[%c0_101, %c0_102] : memref<256x4xf32, #tpu.memory_space<vmem>>, vector<256x4xf32>
    %c0_103 = arith.constant 0 : index
    %c0_104 = arith.constant 0 : index
    %75 = vector.load %arg3[%c0_103, %c0_104] : memref<1x4xf32, #tpu.memory_space<vmem>>, vector<1x4xf32>
    %76 = vector.broadcast %75 : vector<1x4xf32> to vector<256x4xf32>
    %77 = arith.addf %74, %76 : vector<256x4xf32>
    %cst_105 = arith.constant 0.000000e+00 : f32
    %78 = vector.broadcast %cst_105 : f32 to vector<256x4xf32>
    %79 = arith.maximumf %77, %78 : vector<256x4xf32>
    %cst_106 = arith.constant 0.000000e+00 : bf16
    %80 = vector.broadcast %cst_106 : bf16 to vector<1x1x18x4xbf16>
    %cst_107 = arith.constant 0.000000e+00 : bf16
    %81 = vector.broadcast %cst_107 : bf16 to vector<1x18x1x4xbf16>
    %c0_108 = arith.constant 0 : index
    %c0_109 = arith.constant 0 : index
    %c0_110 = arith.constant 0 : index
    %c0_111 = arith.constant 0 : index
    %82 = vector.load %arg8[%c0_108, %c0_109, %c0_110, %c0_111] : memref<1x18x18x4xbf16, #tpu.memory_space<vmem>>, vector<1x1x18x4xbf16>
    tpu.vector_store %arg8[%c0_108, %c0_109, %c0_110, %c0_111], %80 {strides = array<i32>} : memref<1x18x18x4xbf16, #tpu.memory_space<vmem>>, vector<1x1x18x4xbf16>,
    %c0_112 = arith.constant 0 : index
    %c17 = arith.constant 17 : index
    %c0_113 = arith.constant 0 : index
    %c0_114 = arith.constant 0 : index
    %83 = vector.load %arg8[%c0_112, %c17, %c0_113, %c0_114] : memref<1x18x18x4xbf16, #tpu.memory_space<vmem>>, vector<1x1x18x4xbf16>
    tpu.vector_store %arg8[%c0_112, %c17, %c0_113, %c0_114], %80 {strides = array<i32>} : memref<1x18x18x4xbf16, #tpu.memory_space<vmem>>, vector<1x1x18x4xbf16>,
    %c0_115 = arith.constant 0 : index
    %c0_116 = arith.constant 0 : index
    %c0_117 = arith.constant 0 : index
    %c0_118 = arith.constant 0 : index
    %84 = vector.load %arg8[%c0_115, %c0_116, %c0_117, %c0_118] : memref<1x18x18x4xbf16, #tpu.memory_space<vmem>>, vector<1x18x1x4xbf16>
    tpu.vector_store %arg8[%c0_115, %c0_116, %c0_117, %c0_118], %81 {strides = array<i32>} : memref<1x18x18x4xbf16, #tpu.memory_space<vmem>>, vector<1x18x1x4xbf16>,
    %c0_119 = arith.constant 0 : index
    %c0_120 = arith.constant 0 : index
    %c17_121 = arith.constant 17 : index
    %c0_122 = arith.constant 0 : index
    %85 = vector.load %arg8[%c0_119, %c0_120, %c17_121, %c0_122] : memref<1x18x18x4xbf16, #tpu.memory_space<vmem>>, vector<1x18x1x4xbf16>
    tpu.vector_store %arg8[%c0_119, %c0_120, %c17_121, %c0_122], %81 {strides = array<i32>} : memref<1x18x18x4xbf16, #tpu.memory_space<vmem>>, vector<1x18x1x4xbf16>,
    %86 = arith.truncf %79 : vector<256x4xf32> to vector<256x4xbf16>
    %87 = vector.shape_cast %86 : vector<256x4xbf16> to vector<1x16x16x4xbf16>
    %c0_123 = arith.constant 0 : index
    %c1_124 = arith.constant 1 : index
    %c1_125 = arith.constant 1 : index
    %c0_126 = arith.constant 0 : index
    %88 = vector.load %arg8[%c0_123, %c1_124, %c1_125, %c0_126] : memref<1x18x18x4xbf16, #tpu.memory_space<vmem>>, vector<1x16x16x4xbf16>
    tpu.vector_store %arg8[%c0_123, %c1_124, %c1_125, %c0_126], %87 {strides = array<i32>} : memref<1x18x18x4xbf16, #tpu.memory_space<vmem>>, vector<1x16x16x4xbf16>,
    %cst_127 = arith.constant 0.000000e+00 : f32
    %89 = vector.broadcast %cst_127 : f32 to vector<256x4xf32>
    %c0_128 = arith.constant 0 : index
    %c0_129 = arith.constant 0 : index
    %90 = vector.load %arg7[%c0_128, %c0_129] : memref<256x4xf32, #tpu.memory_space<vmem>>, vector<256x4xf32>
    tpu.vector_store %arg7[%c0_128, %c0_129], %89 {strides = array<i32>} : memref<256x4xf32, #tpu.memory_space<vmem>>, vector<256x4xf32>,
    %c0_130 = arith.constant 0 : index
    %c0_131 = arith.constant 0 : index
    %c0_132 = arith.constant 0 : index
    %c0_133 = arith.constant 0 : index
    %91 = vector.load %arg8[%c0_130, %c0_131, %c0_132, %c0_133] : memref<1x18x18x4xbf16, #tpu.memory_space<vmem>>, vector<1x16x16x4xbf16>
    %92 = vector.shape_cast %91 : vector<1x16x16x4xbf16> to vector<256x4xbf16>
    %c0_134 = arith.constant 0 : index
    %c0_135 = arith.constant 0 : index
    %93 = vector.load %arg7[%c0_134, %c0_135] : memref<256x4xf32, #tpu.memory_space<vmem>>, vector<256x4xf32>
    %c0_136 = arith.constant 0 : index
    %c0_137 = arith.constant 0 : index
    %c0_138 = arith.constant 0 : index
    %94 = vector.load %arg4[%c0_136, %c0_137, %c0_138] : memref<9x4x4xbf16, #tpu.memory_space<vmem>>, vector<1x4x4xbf16>
    %95 = vector.shape_cast %94 : vector<1x4x4xbf16> to vector<4x4xbf16>
    %cst_139 = arith.constant dense<0.000000e+00> : vector<256x4xf32>
    %96 = tpu.matmul %92, %95, %cst_139 {dimension_numbers = #tpu.dot_dimension_numbers<[1], [0], [0], [1], [0, 0, 1, 1], [], []>} : vector<256x4xbf16>, vector<4x4xbf16>, vector<256x4xf32> -> vector<256x4xf32>
    %97 = arith.addf %93, %96 : vector<256x4xf32>
    %c0_140 = arith.constant 0 : index
    %c0_141 = arith.constant 0 : index
    %98 = vector.load %arg7[%c0_140, %c0_141] : memref<256x4xf32, #tpu.memory_space<vmem>>, vector<256x4xf32>
    tpu.vector_store %arg7[%c0_140, %c0_141], %97 {strides = array<i32>} : memref<256x4xf32, #tpu.memory_space<vmem>>, vector<256x4xf32>,
    %c0_142 = arith.constant 0 : index
    %c0_143 = arith.constant 0 : index
    %c1_144 = arith.constant 1 : index
    %c0_145 = arith.constant 0 : index
    %99 = vector.load %arg8[%c0_142, %c0_143, %c1_144, %c0_145] : memref<1x18x18x4xbf16, #tpu.memory_space<vmem>>, vector<1x16x16x4xbf16>
    %100 = vector.shape_cast %99 : vector<1x16x16x4xbf16> to vector<256x4xbf16>
    %c0_146 = arith.constant 0 : index
    %c0_147 = arith.constant 0 : index
    %101 = vector.load %arg7[%c0_146, %c0_147] : memref<256x4xf32, #tpu.memory_space<vmem>>, vector<256x4xf32>
    %c1_148 = arith.constant 1 : index
    %c0_149 = arith.constant 0 : index
    %c0_150 = arith.constant 0 : index
    %102 = vector.load %arg4[%c1_148, %c0_149, %c0_150] : memref<9x4x4xbf16, #tpu.memory_space<vmem>>, vector<1x4x4xbf16>
    %103 = vector.shape_cast %102 : vector<1x4x4xbf16> to vector<4x4xbf16>
    %cst_151 = arith.constant dense<0.000000e+00> : vector<256x4xf32>
    %104 = tpu.matmul %100, %103, %cst_151 {dimension_numbers = #tpu.dot_dimension_numbers<[1], [0], [0], [1], [0, 0, 1, 1], [], []>} : vector<256x4xbf16>, vector<4x4xbf16>, vector<256x4xf32> -> vector<256x4xf32>
    %105 = arith.addf %101, %104 : vector<256x4xf32>
    %c0_152 = arith.constant 0 : index
    %c0_153 = arith.constant 0 : index
    %106 = vector.load %arg7[%c0_152, %c0_153] : memref<256x4xf32, #tpu.memory_space<vmem>>, vector<256x4xf32>
    tpu.vector_store %arg7[%c0_152, %c0_153], %105 {strides = array<i32>} : memref<256x4xf32, #tpu.memory_space<vmem>>, vector<256x4xf32>,
    %c0_154 = arith.constant 0 : index
    %c0_155 = arith.constant 0 : index
    %c2_156 = arith.constant 2 : index
    %c0_157 = arith.constant 0 : index
    %107 = vector.load %arg8[%c0_154, %c0_155, %c2_156, %c0_157] : memref<1x18x18x4xbf16, #tpu.memory_space<vmem>>, vector<1x16x16x4xbf16>
    %108 = vector.shape_cast %107 : vector<1x16x16x4xbf16> to vector<256x4xbf16>
    %c0_158 = arith.constant 0 : index
    %c0_159 = arith.constant 0 : index
    %109 = vector.load %arg7[%c0_158, %c0_159] : memref<256x4xf32, #tpu.memory_space<vmem>>, vector<256x4xf32>
    %c2_160 = arith.constant 2 : index
    %c0_161 = arith.constant 0 : index
    %c0_162 = arith.constant 0 : index
    %110 = vector.load %arg4[%c2_160, %c0_161, %c0_162] : memref<9x4x4xbf16, #tpu.memory_space<vmem>>, vector<1x4x4xbf16>
    %111 = vector.shape_cast %110 : vector<1x4x4xbf16> to vector<4x4xbf16>
    %cst_163 = arith.constant dense<0.000000e+00> : vector<256x4xf32>
    %112 = tpu.matmul %108, %111, %cst_163 {dimension_numbers = #tpu.dot_dimension_numbers<[1], [0], [0], [1], [0, 0, 1, 1], [], []>} : vector<256x4xbf16>, vector<4x4xbf16>, vector<256x4xf32> -> vector<256x4xf32>
    %113 = arith.addf %109, %112 : vector<256x4xf32>
    %c0_164 = arith.constant 0 : index
    %c0_165 = arith.constant 0 : index
    %114 = vector.load %arg7[%c0_164, %c0_165] : memref<256x4xf32, #tpu.memory_space<vmem>>, vector<256x4xf32>
    tpu.vector_store %arg7[%c0_164, %c0_165], %113 {strides = array<i32>} : memref<256x4xf32, #tpu.memory_space<vmem>>, vector<256x4xf32>,
    %c0_166 = arith.constant 0 : index
    %c1_167 = arith.constant 1 : index
    %c0_168 = arith.constant 0 : index
    %c0_169 = arith.constant 0 : index
    %115 = vector.load %arg8[%c0_166, %c1_167, %c0_168, %c0_169] : memref<1x18x18x4xbf16, #tpu.memory_space<vmem>>, vector<1x16x16x4xbf16>
    %116 = vector.shape_cast %115 : vector<1x16x16x4xbf16> to vector<256x4xbf16>
    %c0_170 = arith.constant 0 : index
    %c0_171 = arith.constant 0 : index
    %117 = vector.load %arg7[%c0_170, %c0_171] : memref<256x4xf32, #tpu.memory_space<vmem>>, vector<256x4xf32>
    %c3_172 = arith.constant 3 : index
    %c0_173 = arith.constant 0 : index
    %c0_174 = arith.constant 0 : index
    %118 = vector.load %arg4[%c3_172, %c0_173, %c0_174] : memref<9x4x4xbf16, #tpu.memory_space<vmem>>, vector<1x4x4xbf16>
    %119 = vector.shape_cast %118 : vector<1x4x4xbf16> to vector<4x4xbf16>
    %cst_175 = arith.constant dense<0.000000e+00> : vector<256x4xf32>
    %120 = tpu.matmul %116, %119, %cst_175 {dimension_numbers = #tpu.dot_dimension_numbers<[1], [0], [0], [1], [0, 0, 1, 1], [], []>} : vector<256x4xbf16>, vector<4x4xbf16>, vector<256x4xf32> -> vector<256x4xf32>
    %121 = arith.addf %117, %120 : vector<256x4xf32>
    %c0_176 = arith.constant 0 : index
    %c0_177 = arith.constant 0 : index
    %122 = vector.load %arg7[%c0_176, %c0_177] : memref<256x4xf32, #tpu.memory_space<vmem>>, vector<256x4xf32>
    tpu.vector_store %arg7[%c0_176, %c0_177], %121 {strides = array<i32>} : memref<256x4xf32, #tpu.memory_space<vmem>>, vector<256x4xf32>,
    %c0_178 = arith.constant 0 : index
    %c1_179 = arith.constant 1 : index
    %c1_180 = arith.constant 1 : index
    %c0_181 = arith.constant 0 : index
    %123 = vector.load %arg8[%c0_178, %c1_179, %c1_180, %c0_181] : memref<1x18x18x4xbf16, #tpu.memory_space<vmem>>, vector<1x16x16x4xbf16>
    %124 = vector.shape_cast %123 : vector<1x16x16x4xbf16> to vector<256x4xbf16>
    %c0_182 = arith.constant 0 : index
    %c0_183 = arith.constant 0 : index
    %125 = vector.load %arg7[%c0_182, %c0_183] : memref<256x4xf32, #tpu.memory_space<vmem>>, vector<256x4xf32>
    %c4_184 = arith.constant 4 : index
    %c0_185 = arith.constant 0 : index
    %c0_186 = arith.constant 0 : index
    %126 = vector.load %arg4[%c4_184, %c0_185, %c0_186] : memref<9x4x4xbf16, #tpu.memory_space<vmem>>, vector<1x4x4xbf16>
    %127 = vector.shape_cast %126 : vector<1x4x4xbf16> to vector<4x4xbf16>
    %cst_187 = arith.constant dense<0.000000e+00> : vector<256x4xf32>
    %128 = tpu.matmul %124, %127, %cst_187 {dimension_numbers = #tpu.dot_dimension_numbers<[1], [0], [0], [1], [0, 0, 1, 1], [], []>} : vector<256x4xbf16>, vector<4x4xbf16>, vector<256x4xf32> -> vector<256x4xf32>
    %129 = arith.addf %125, %128 : vector<256x4xf32>
    %c0_188 = arith.constant 0 : index
    %c0_189 = arith.constant 0 : index
    %130 = vector.load %arg7[%c0_188, %c0_189] : memref<256x4xf32, #tpu.memory_space<vmem>>, vector<256x4xf32>
    tpu.vector_store %arg7[%c0_188, %c0_189], %129 {strides = array<i32>} : memref<256x4xf32, #tpu.memory_space<vmem>>, vector<256x4xf32>,
    %c0_190 = arith.constant 0 : index
    %c1_191 = arith.constant 1 : index
    %c2_192 = arith.constant 2 : index
    %c0_193 = arith.constant 0 : index
    %131 = vector.load %arg8[%c0_190, %c1_191, %c2_192, %c0_193] : memref<1x18x18x4xbf16, #tpu.memory_space<vmem>>, vector<1x16x16x4xbf16>
    %132 = vector.shape_cast %131 : vector<1x16x16x4xbf16> to vector<256x4xbf16>
    %c0_194 = arith.constant 0 : index
    %c0_195 = arith.constant 0 : index
    %133 = vector.load %arg7[%c0_194, %c0_195] : memref<256x4xf32, #tpu.memory_space<vmem>>, vector<256x4xf32>
    %c5_196 = arith.constant 5 : index
    %c0_197 = arith.constant 0 : index
    %c0_198 = arith.constant 0 : index
    %134 = vector.load %arg4[%c5_196, %c0_197, %c0_198] : memref<9x4x4xbf16, #tpu.memory_space<vmem>>, vector<1x4x4xbf16>
    %135 = vector.shape_cast %134 : vector<1x4x4xbf16> to vector<4x4xbf16>
    %cst_199 = arith.constant dense<0.000000e+00> : vector<256x4xf32>
    %136 = tpu.matmul %132, %135, %cst_199 {dimension_numbers = #tpu.dot_dimension_numbers<[1], [0], [0], [1], [0, 0, 1, 1], [], []>} : vector<256x4xbf16>, vector<4x4xbf16>, vector<256x4xf32> -> vector<256x4xf32>
    %137 = arith.addf %133, %136 : vector<256x4xf32>
    %c0_200 = arith.constant 0 : index
    %c0_201 = arith.constant 0 : index
    %138 = vector.load %arg7[%c0_200, %c0_201] : memref<256x4xf32, #tpu.memory_space<vmem>>, vector<256x4xf32>
    tpu.vector_store %arg7[%c0_200, %c0_201], %137 {strides = array<i32>} : memref<256x4xf32, #tpu.memory_space<vmem>>, vector<256x4xf32>,
    %c0_202 = arith.constant 0 : index
    %c2_203 = arith.constant 2 : index
    %c0_204 = arith.constant 0 : index
    %c0_205 = arith.constant 0 : index
    %139 = vector.load %arg8[%c0_202, %c2_203, %c0_204, %c0_205] : memref<1x18x18x4xbf16, #tpu.memory_space<vmem>>, vector<1x16x16x4xbf16>
    %140 = vector.shape_cast %139 : vector<1x16x16x4xbf16> to vector<256x4xbf16>
    %c0_206 = arith.constant 0 : index
    %c0_207 = arith.constant 0 : index
    %141 = vector.load %arg7[%c0_206, %c0_207] : memref<256x4xf32, #tpu.memory_space<vmem>>, vector<256x4xf32>
    %c6_208 = arith.constant 6 : index
    %c0_209 = arith.constant 0 : index
    %c0_210 = arith.constant 0 : index
    %142 = vector.load %arg4[%c6_208, %c0_209, %c0_210] : memref<9x4x4xbf16, #tpu.memory_space<vmem>>, vector<1x4x4xbf16>
    %143 = vector.shape_cast %142 : vector<1x4x4xbf16> to vector<4x4xbf16>
    %cst_211 = arith.constant dense<0.000000e+00> : vector<256x4xf32>
    %144 = tpu.matmul %140, %143, %cst_211 {dimension_numbers = #tpu.dot_dimension_numbers<[1], [0], [0], [1], [0, 0, 1, 1], [], []>} : vector<256x4xbf16>, vector<4x4xbf16>, vector<256x4xf32> -> vector<256x4xf32>
    %145 = arith.addf %141, %144 : vector<256x4xf32>
    %c0_212 = arith.constant 0 : index
    %c0_213 = arith.constant 0 : index
    %146 = vector.load %arg7[%c0_212, %c0_213] : memref<256x4xf32, #tpu.memory_space<vmem>>, vector<256x4xf32>
    tpu.vector_store %arg7[%c0_212, %c0_213], %145 {strides = array<i32>} : memref<256x4xf32, #tpu.memory_space<vmem>>, vector<256x4xf32>,
    %c0_214 = arith.constant 0 : index
    %c2_215 = arith.constant 2 : index
    %c1_216 = arith.constant 1 : index
    %c0_217 = arith.constant 0 : index
    %147 = vector.load %arg8[%c0_214, %c2_215, %c1_216, %c0_217] : memref<1x18x18x4xbf16, #tpu.memory_space<vmem>>, vector<1x16x16x4xbf16>
    %148 = vector.shape_cast %147 : vector<1x16x16x4xbf16> to vector<256x4xbf16>
    %c0_218 = arith.constant 0 : index
    %c0_219 = arith.constant 0 : index
    %149 = vector.load %arg7[%c0_218, %c0_219] : memref<256x4xf32, #tpu.memory_space<vmem>>, vector<256x4xf32>
    %c7_220 = arith.constant 7 : index
    %c0_221 = arith.constant 0 : index
    %c0_222 = arith.constant 0 : index
    %150 = vector.load %arg4[%c7_220, %c0_221, %c0_222] : memref<9x4x4xbf16, #tpu.memory_space<vmem>>, vector<1x4x4xbf16>
    %151 = vector.shape_cast %150 : vector<1x4x4xbf16> to vector<4x4xbf16>
    %cst_223 = arith.constant dense<0.000000e+00> : vector<256x4xf32>
    %152 = tpu.matmul %148, %151, %cst_223 {dimension_numbers = #tpu.dot_dimension_numbers<[1], [0], [0], [1], [0, 0, 1, 1], [], []>} : vector<256x4xbf16>, vector<4x4xbf16>, vector<256x4xf32> -> vector<256x4xf32>
    %153 = arith.addf %149, %152 : vector<256x4xf32>
    %c0_224 = arith.constant 0 : index
    %c0_225 = arith.constant 0 : index
    %154 = vector.load %arg7[%c0_224, %c0_225] : memref<256x4xf32, #tpu.memory_space<vmem>>, vector<256x4xf32>
    tpu.vector_store %arg7[%c0_224, %c0_225], %153 {strides = array<i32>} : memref<256x4xf32, #tpu.memory_space<vmem>>, vector<256x4xf32>,
    %c0_226 = arith.constant 0 : index
    %c2_227 = arith.constant 2 : index
    %c2_228 = arith.constant 2 : index
    %c0_229 = arith.constant 0 : index
    %155 = vector.load %arg8[%c0_226, %c2_227, %c2_228, %c0_229] : memref<1x18x18x4xbf16, #tpu.memory_space<vmem>>, vector<1x16x16x4xbf16>
    %156 = vector.shape_cast %155 : vector<1x16x16x4xbf16> to vector<256x4xbf16>
    %c0_230 = arith.constant 0 : index
    %c0_231 = arith.constant 0 : index
    %157 = vector.load %arg7[%c0_230, %c0_231] : memref<256x4xf32, #tpu.memory_space<vmem>>, vector<256x4xf32>
    %c8_232 = arith.constant 8 : index
    %c0_233 = arith.constant 0 : index
    %c0_234 = arith.constant 0 : index
    %158 = vector.load %arg4[%c8_232, %c0_233, %c0_234] : memref<9x4x4xbf16, #tpu.memory_space<vmem>>, vector<1x4x4xbf16>
    %159 = vector.shape_cast %158 : vector<1x4x4xbf16> to vector<4x4xbf16>
    %cst_235 = arith.constant dense<0.000000e+00> : vector<256x4xf32>
    %160 = tpu.matmul %156, %159, %cst_235 {dimension_numbers = #tpu.dot_dimension_numbers<[1], [0], [0], [1], [0, 0, 1, 1], [], []>} : vector<256x4xbf16>, vector<4x4xbf16>, vector<256x4xf32> -> vector<256x4xf32>
    %161 = arith.addf %157, %160 : vector<256x4xf32>
    %c0_236 = arith.constant 0 : index
    %c0_237 = arith.constant 0 : index
    %162 = vector.load %arg7[%c0_236, %c0_237] : memref<256x4xf32, #tpu.memory_space<vmem>>, vector<256x4xf32>
    tpu.vector_store %arg7[%c0_236, %c0_237], %161 {strides = array<i32>} : memref<256x4xf32, #tpu.memory_space<vmem>>, vector<256x4xf32>,
    %c0_238 = arith.constant 0 : index
    %c0_239 = arith.constant 0 : index
    %163 = vector.load %arg7[%c0_238, %c0_239] : memref<256x4xf32, #tpu.memory_space<vmem>>, vector<256x4xf32>
    %c0_240 = arith.constant 0 : index
    %c0_241 = arith.constant 0 : index
    %164 = vector.load %arg5[%c0_240, %c0_241] : memref<1x4xf32, #tpu.memory_space<vmem>>, vector<1x4xf32>
    %165 = vector.broadcast %164 : vector<1x4xf32> to vector<256x4xf32>
    %166 = arith.addf %163, %165 : vector<256x4xf32>
    %c0_242 = arith.constant 0 : index
    %c1_243 = arith.constant 1 : index
    %c1_244 = arith.constant 1 : index
    %c0_245 = arith.constant 0 : index
    %167 = vector.load %arg1[%c0_242, %c1_243, %c1_244, %c0_245] : memref<1x18x18x4xbf16, #tpu.memory_space<vmem>>, vector<1x16x16x4xbf16>
    %168 = vector.shape_cast %167 : vector<1x16x16x4xbf16> to vector<256x4xbf16>
    %169 = arith.extf %168 : vector<256x4xbf16> to vector<256x4xf32>
    %cst_246 = arith.constant 1.000000e+00 : f32
    %170 = vector.broadcast %cst_246 : f32 to vector<256x4xf32>
    %171 = arith.mulf %166, %170 : vector<256x4xf32>
    %172 = arith.addf %171, %169 : vector<256x4xf32>
    %173 = vector.shape_cast %172 : vector<256x4xf32> to vector<1x256x4xf32>
    %c0_247 = arith.constant 0 : index
    %c0_248 = arith.constant 0 : index
    %c0_249 = arith.constant 0 : index
    %174 = vector.load %arg6[%c0_247, %c0_248, %c0_249] : memref<1x256x4xf32, #tpu.memory_space<vmem>>, vector<1x256x4xf32>
    tpu.vector_store %arg6[%c0_247, %c0_248, %c0_249], %173 {strides = array<i32>} : memref<1x256x4xf32, #tpu.memory_space<vmem>>, vector<1x256x4xf32>,
    return
  }
  func.func @transform_0(%arg0: i32) -> (i32, i32, i32, i32) {
    %c0_i32 = arith.constant 0 : i32
    %c0_i32_0 = arith.constant 0 : i32
    %c0_i32_1 = arith.constant 0 : i32
    %c0_i32_2 = arith.constant 0 : i32
    return %arg0, %c0_i32, %c0_i32_0, %c0_i32_1 : i32, i32, i32, i32
  }
  func.func @transform_1(%arg0: i32) -> (i32, i32, i32) {
    %c0_i32 = arith.constant 0 : i32
    %c0_i32_0 = arith.constant 0 : i32
    %c0_i32_1 = arith.constant 0 : i32
    %c0_i32_2 = arith.constant 0 : i32
    return %c0_i32, %c0_i32_0, %c0_i32_1 : i32, i32, i32
  }
  func.func @transform_2(%arg0: i32) -> (i32, i32) {
    %c0_i32 = arith.constant 0 : i32
    %c0_i32_0 = arith.constant 0 : i32
    %c0_i32_1 = arith.constant 0 : i32
    return %c0_i32, %c0_i32_0 : i32, i32
  }
  func.func @transform_3(%arg0: i32) -> (i32, i32, i32) {
    %c0_i32 = arith.constant 0 : i32
    %c0_i32_0 = arith.constant 0 : i32
    %c0_i32_1 = arith.constant 0 : i32
    %c0_i32_2 = arith.constant 0 : i32
    return %c0_i32, %c0_i32_0, %c0_i32_1 : i32, i32, i32
  }
  func.func @transform_4(%arg0: i32) -> (i32, i32) {
    %c0_i32 = arith.constant 0 : i32
    %c0_i32_0 = arith.constant 0 : i32
    %c0_i32_1 = arith.constant 0 : i32
    return %c0_i32, %c0_i32_0 : i32, i32
  }
  func.func @transform_5(%arg0: i32) -> (i32, i32, i32) {
    %c0_i32 = arith.constant 0 : i32
    %c0_i32_0 = arith.constant 0 : i32
    %c0_i32_1 = arith.constant 0 : i32
    return %arg0, %c0_i32, %c0_i32_0 : i32, i32, i32
  }
}

</mosaic_0001>

<bundles_post_ra>
// kernel: tpu_custom_call.1
= control target key start
LH: loop header
LB: loop body
LE: loop exit
PB: predicated region body
PF: predicated region fallthrough
CT: control target
= control target key end

     0   :  { %s14566_s18 = smov 0   ;;  %s18497_s0 = inlined_call_operand.vmem [shape: bf16[2,18,18,4], index: 0, kind: input, shape index: {}]   ;;  %s18498_s1 = inlined_call_operand.vmem [shape: bf16[9,4,4], index: 1, kind: input, shape index: {}]   ;;  %s18499_s2 = inlined_call_operand.vmem [shape: f32[1,4], index: 2, kind: input, shape index: {}]   ;;  %s18500_s3 = inlined_call_operand.vmem [shape: bf16[9,4,4], index: 3, kind: input, shape index: {}]   ;;  %s18501_s4 = inlined_call_operand.vmem [shape: f32[1,4], index: 4, kind: input, shape index: {}]   ;;  %s18502_s5 = inlined_call_operand.vmem [shape: f32[2,256,4], index: 5, kind: output, shape index: {}]  }
   0x1 LB: > { %s12411_s19 = sadd.s32 4294967295, %s14532_s18   ;;  %p12415_p0 = scmp.ge.s32.totalorder %s14532_s18, 1  ;;  %s14532_s18 = sphi %s14566_s18, %s15_s18  }
   0x2   : > { %p187_p1 = scmp.lt.s32.totalorder %s14532_s18, 3 }
   0x4   : > { %p188_p2 = pnand %p12415_p0, %p187_p1 }
   0x5   : > { %p215_p3 = scmp.lt.s32.totalorder (!%p188_p2), %s12411_s19, 1 }
   0x6   : > { %191 = sbr.rel (%p188_p2) target bundleno = 1138 (0x472), region = 40 }
   0xb   : > { %v323_v0 = vld [vmem:[%s18498_s1] sm:$0x3]  ;;  %vm452_vm0 = vcmask 1041408   ;;  %v12500_v2 = vld [vmem:[%s18498_s1 + $0x4] sm:$0x3]  ;;  %s18522_s19 = smov (!%p215_p3, %s12411_s19), 1 }
   0xc   : > { %14398 = vmatprep.subr.msk.bf16.mxu0 %vm452_vm0, %v323_v0  ;;  %v454_v1 = vsel %vm452_vm0, %v323_v0, 0  ;;  %v12451_v3 = vld [vmem:[%s18498_s1 + $0x2] sm:$0x3]  ;;  %v12565_v5 = vld [vmem:[%s18498_s1 + $0x6] sm:$0x3]  ;;  %s14416_s28 = smul.u32 216, %s18522_s19 }
   0xd   : > { %13787 = vmatpush3.bf16.msra.mxu0 %v454_v1  ;;  %14399 = vmatprep.subr.msk.bf16.mxu1 %vm452_vm0, %v12451_v3  ;;  %v1247_v4 = vsel %vm452_vm0, %v12451_v3, 0  ;;  %vm226_vm1 = vcmask 31744   ;;  %vm729_vm2 = vsmask.f32 3328  ;;  %vm730_vm3 = vsmask.f32 7440 }
   0xe   : > { %14400 = vmatprep.subr.msk.bf16.mxu0 %vm452_vm0, %v12500_v2  ;;  %13821 = vmatpush3.bf16.msra.mxu1 %v1247_v4  ;;  %s14598_s6 = scalar_lea.vmem %s18497_s0, %s14416_s28  ;;  %v12646_v6 = vld [vmem:[%s18498_s1 + $0x8] sm:$0x3]  ;;  %v1816_v9 = vsel %vm452_vm0, %v12500_v2, 0  ;;  %v14610_v11 = vsel %vm452_vm0, %v12565_v5, 0  ;;  %vm14627_vm4 = vmor %vm729_vm2, %vm730_vm3  ;;  %vm1570_vm5 = vcmask 1042432   ;;  %vm1571_vm6 = vcmask 1046532  }
   0xf   : > { %14401 = vmatprep.subr.msk.bf16.mxu1 %vm452_vm0, %v12565_v5  ;;  %v14427_v7 = vld [vmem:[%s14598_s6] sm:$0xff]   ;;  %v14428_v8 = vld [vmem:[%s14598_s6 + $0xc] sm:$0xff]   ;;  %v14429_v10 = vld [vmem:[%s14598_s6 + $0x18] sm:$0xff]   ;;  %v14613_v12 = vsel %vm452_vm0, %v12646_v6, 0  ;;  %vm5707_vm8 = vcmask 24576   ;;  %vm5704_vm13 = vcmask 27648  }
  0x10   : > { %13788 = vmatprep.mubr.msk.bf16.mxu0 %vm226_vm1, %v14427_v7  ;;  %v681_v13 = vld [vmem:[%s14598_s6] sm:$0xf]  ;;  %v682_v14 = vld [vmem:[%s14598_s6 + $0x4] sm:$0xf]  ;;  %v683_v15 = vld [vmem:[%s14598_s6 + $0x8] sm:$0x1] }
  0x11   : > { %13789 = vmatmul.mubr.msk.bf16.vlgmr.msra.gmra.mxu0 %vm226_vm1, %v14428_v8  ;;  %v14430_v16 = vld [vmem:[%s14598_s6 + $0x24] sm:$0xff]   ;;  %v733_v17 = vshrl.u32 %v681_v13, 16  ;;  %v736_v18 = vshll.u32 %v681_v13, 16  ;;  %v742_v19 = vshll.u32 %v682_v14, 16  ;;  %v746_v20 = vshrl.u32 %v682_v14, 16  ;;  %v14431_v38 = vld [vmem:[%s14598_s6 + $0x30] sm:$0xff]   ;;  %vm14757_vm7 = vmor %vm1570_vm5, %vm1571_vm6 }
  0x12   : > { %13855 = vmatpush3.bf16.msra.mxu0 %v1816_v9  ;;  %13792 = vmatprep.mubr.msk.bf16.mxu0 %vm226_vm1, %v14429_v10  ;;  %v684_v21 = vld [vmem:[%s14598_s6 + $0xc] sm:$0xf]  ;;  %v752_v22 = vshll.u32 %v683_v15, 16  ;;  %v685_v23 = vld [vmem:[%s14598_s6 + $0x10] sm:$0xf]  ;;  %v14432_v56 = vld [vmem:[%s14598_s6 + $0x3c] sm:$0xff]  }
  0x13   : > { %14402 = vmatprep.subr.msk.bf16.mxu0 %vm452_vm0, %v12646_v6  ;;  %v686_v24 = vld [vmem:[%s14598_s6 + $0x14] sm:$0x1]  ;;  %v757_v25 = vshrl.u32 %v684_v21, 16  ;;  %v735_v26 = vrot.slane %v733_v17, 4  ;;  %v738_v27 = vrot.slane %v736_v18, 5  ;;  %v744_v28 = vrot.slane %v742_v19, 5 }
  0x14   : > { %v748_v29 = vrot.slane %v746_v20, 4  ;;  %v754_v30 = vrot.slane %v752_v22, 5  ;;  %v760_v32 = vshll.u32 %v684_v21, 16  ;;  %v766_v33 = vshll.u32 %v685_v23, 16  ;;  %v687_v42 = vld [vmem:[%s14598_s6 + $0x18] sm:$0xf] }
  0x15   : > { %v759_v31 = vrot.slane %v757_v25, 4  ;;  %v739_v34 = vor.u32 %v738_v27, %v735_v26  ;;  %v770_v36 = vshrl.u32 %v685_v23, 16  ;;  %v776_v37 = vshll.u32 %v686_v24, 16  ;;  %v688_v47 = vld [vmem:[%s14598_s6 + $0x1c] sm:$0xf]  ;;  %v14433_v1 = vld [vmem:[%s14598_s6 + $0x48] sm:$0xff]  }
  0x16   : > { %v749_v35 = vor.u32 %v748_v29, %v744_v28  ;;  %v762_v40 = vrot.slane %v760_v32, 5  ;;  %v768_v41 = vrot.slane %v766_v33, 5  ;;  %v689_v49 = vld [vmem:[%s14598_s6 + $0x20] sm:$0x1]  ;;  %v781_v50 = vshrl.u32 %v687_v42, 16  ;;  %s13447_s25 = sshll.u32 %s18522_s19, 8 }
  0x17   : > { %v740_v43 = vrot.slane %v739_v34, 4  ;;  %v772_v45 = vrot.slane %v770_v36, 4  ;;  %v778_v46 = vrot.slane %v776_v37, 5  ;;  %v784_v51 = vshll.u32 %v687_v42, 16  ;;  %v690_v58 = vld [vmem:[%s14598_s6 + $0x24] sm:$0xf]  ;;  %s18177_s27 = scalar_lea.vmem %s18502_s5, %s13447_s25 }
  0x18   : > { %v750_v44 = vrot.slane %v749_v35, 4  ;;  %v763_v48 = vor.u32 %v762_v40, %v759_v31  ;;  %v790_v52 = vshll.u32 %v688_v47, 16  ;;  %v794_v57 = vshrl.u32 %v688_v47, 16  ;;  %v691_v59 = vld [vmem:[%s14598_s6 + $0x28] sm:$0xf]  ;;  %v14434_v40 = vld [vmem:[%s14598_s6 + $0x54] sm:$0xff]  }
  0x19   : > { %13793 = vmatmul.mubr.msk.bf16.gmra.mxu0 %vm226_vm1, %v14430_v16  ;;  %v745_v53 = vsel %vm14627_vm4, %v740_v43, %v744_v28  ;;  %v773_v55 = vor.u32 %v772_v45, %v768_v41  ;;  %v783_v62 = vrot.slane %v781_v50, 4  ;;  %v786_v63 = vrot.slane %v784_v51, 5  ;;  %v692_v0 = vld [vmem:[%s14598_s6 + $0x2c] sm:$0x1]  ;;  %v693_v16 = vld [vmem:[%s14598_s6 + $0x30] sm:$0xf] }
  0x1a   : > { %13796 = vmatprep.mubr.msk.bf16.mxu0 %vm226_vm1, %v14431_v38  ;;  %v755_v54 = vsel %vm14627_vm4, %v750_v44, %v754_v30  ;;  %v764_v61 = vrot.slane %v763_v48, 4  ;;  %v792_v3 = vrot.slane %v790_v52, 5  ;;  %v796_v4 = vrot.slane %v794_v57, 4  ;;  %v694_v21 = vld [vmem:[%s14598_s6 + $0x34] sm:$0xf]  ;;  %v14435_v48 = vld [vmem:[%s14598_s6 + $0x60] sm:$0xff]  }
  0x1b   : > { %v12452_v60 = vcombine.low %v745_v53, %v755_v54  ;;  %v774_v2 = vrot.slane %v773_v55, 4  ;;  %v800_v5 = vshll.u32 %v689_v49, 16  ;;  %v787_v7 = vor.u32 %v786_v63, %v783_v62  ;;  %v695_v28 = vld [vmem:[%s14598_s6 + $0x38] sm:$0x1]  ;;  %v696_v31 = vld [vmem:[%s14598_s6 + $0x3c] sm:$0xf] }
  0x1c   : > { %v769_v6 = vsel %vm14627_vm4, %v764_v61, %v768_v41  ;;  %v805_v8 = vshrl.u32 %v690_v58, 16  ;;  %v808_v9 = vshll.u32 %v690_v58, 16  ;;  %v797_v13 = vor.u32 %v796_v4, %v792_v3  ;;  %v697_v36 = vld [vmem:[%s14598_s6 + $0x40] sm:$0xf]  ;;  %v698_v43 = vld [vmem:[%s14598_s6 + $0x44] sm:$0x1] }
  0x1d   : > { %13822 = vmatprep.mubr.msk.bf16.mxu1 %vm226_vm1, %v12452_v60  ;;  %v779_v10 = vsel %vm14627_vm4, %v774_v2, %v778_v46  ;;  %v802_v14 = vrot.slane %v800_v5, 5  ;;  %v814_v15 = vshll.u32 %v691_v59, 16  ;;  %v788_v18 = vrot.slane %v787_v7, 4  ;;  %v699_v60 = vld [vmem:[%s14598_s6 + $0x48] sm:$0xf] }
  0x1e   : > { %v12453_v17 = vcombine.low %v769_v6, %v779_v10  ;;  %v807_v19 = vrot.slane %v805_v8, 4  ;;  %v810_v20 = vrot.slane %v808_v9, 5  ;;  %v798_v22 = vrot.slane %v797_v13, 4  ;;  %v701_v6 = vld [vmem:[%s14598_s6 + $0x50] sm:$0x1] }
  0x1f   : > { %v816_v23 = vrot.slane %v814_v15, 5  ;;  %v818_v24 = vshrl.u32 %v691_v59, 16  ;;  %v824_v25 = vshll.u32 %v692_v0, 16  ;;  %v793_v26 = vsel %vm14627_vm4, %v788_v18, %v792_v3  ;;  %v702_v7 = vld [vmem:[%s14598_s6 + $0x54] sm:$0xf] }
  0x20   : > { %13823 = vmatmul.mubr.msk.bf16.vlgmr.msra.gmra.mxu1 %vm226_vm1, %v12453_v17  ;;  %v811_v27 = vor.u32 %v810_v20, %v807_v19  ;;  %v829_v29 = vshrl.u32 %v693_v16, 16  ;;  %v832_v30 = vshll.u32 %v693_v16, 16  ;;  %v803_v32 = vsel %vm14627_vm4, %v798_v22, %v802_v14  ;;  %v703_v14 = vld [vmem:[%s14598_s6 + $0x58] sm:$0xf]  ;;  %v14436_v20 = vld [vmem:[%s14598_s6 + $0x6c] sm:$0xff]  }
  0x21   : > { %13797 = vmatmul.mubr.msk.bf16.gmra.mxu0 %vm226_vm1, %v14432_v56  ;;  %v820_v33 = vrot.slane %v818_v24, 4  ;;  %v826_v34 = vrot.slane %v824_v25, 5  ;;  %v838_v35 = vshll.u32 %v694_v21, 16  ;;  %13889 = vmatpush3.bf16.msra.mxu1 %v14610_v11  ;;  %v12454_v37 = vcombine.low %v793_v26, %v803_v32  ;;  %v704_v32 = vld [vmem:[%s14598_s6 + $0x5c] sm:$0x1] }
  0x22   : > { %13800 = vmatprep.mubr.msk.bf16.mxu0 %vm226_vm1, %v14433_v1  ;;  %v812_v38 = vrot.slane %v811_v27, 4  ;;  %v831_v41 = vrot.slane %v829_v29, 4  ;;  %v834_v42 = vrot.slane %v832_v30, 5  ;;  %v842_v46 = vshrl.u32 %v694_v21, 16  ;;  %v700_v1 = vld [vmem:[%s14598_s6 + $0x4c] sm:$0xf] }
  0x23   : > { %v821_v44 = vor.u32 %v820_v33, %v816_v23  ;;  %v840_v45 = vrot.slane %v838_v35, 5  ;;  %v848_v47 = vshll.u32 %v695_v28, 16  ;;  %13826 = vmatprep.mubr.msk.bf16.mxu1 %vm226_vm1, %v12454_v37  ;;  %v853_v51 = vshrl.u32 %v696_v31, 16  ;;  %v14437_v28 = vld [vmem:[%s14598_s6 + $0x78] sm:$0xff]  }
  0x24   : > { %v817_v49 = vsel %vm14627_vm4, %v812_v38, %v816_v23  ;;  %v835_v50 = vor.u32 %v834_v42, %v831_v41  ;;  %v856_v11 = vshll.u32 %v696_v31, 16  ;;  %v844_v53 = vrot.slane %v842_v46, 4  ;;  %v705_v38 = vld [vmem:[%s14598_s6 + $0x60] sm:$0xf] }
  0x25   : > { %v822_v52 = vrot.slane %v821_v44, 4  ;;  %v850_v54 = vrot.slane %v848_v47, 5  ;;  %v862_v55 = vshll.u32 %v697_v36, 16  ;;  %v855_v57 = vrot.slane %v853_v51, 4  ;;  %v706_v44 = vld [vmem:[%s14598_s6 + $0x64] sm:$0xf] }
  0x26   : > { %v836_v56 = vrot.slane %v835_v50, 4  ;;  %v858_v58 = vrot.slane %v856_v11, 5  ;;  %v866_v59 = vshrl.u32 %v697_v36, 16  ;;  %v845_v62 = vor.u32 %v844_v53, %v840_v45  ;;  %v708_v50 = vld [vmem:[%s14598_s6 + $0x6c] sm:$0xf] }
  0x27   : > { %v827_v61 = vsel %vm14627_vm4, %v822_v52, %v826_v34  ;;  %v864_v63 = vrot.slane %v862_v55, 5  ;;  %v872_v0 = vshll.u32 %v698_v43, 16  ;;  %v877_v10 = vshrl.u32 %v699_v60, 16 }
  0x28   : > { %v12455_v2 = vcombine.low %v817_v49, %v827_v61  ;;  %v841_v3 = vsel %vm14627_vm4, %v836_v56, %v840_v45  ;;  %v859_v4 = vor.u32 %v858_v58, %v855_v57  ;;  %v868_v5 = vrot.slane %v866_v59, 4  ;;  %v707_v49 = vld [vmem:[%s14598_s6 + $0x68] sm:$0x1] }
  0x29   : > { %13801 = vmatmul.mubr.msk.bf16.gmra.mxu0 %vm226_vm1, %v14434_v40  ;;  %v846_v8 = vrot.slane %v845_v62, 4  ;;  %v874_v9 = vrot.slane %v872_v0, 5  ;;  %v880_v13 = vshll.u32 %v699_v60, 16  ;;  %v886_v17 = vshll.u32 %v700_v1, 16  ;;  %v14438_v60 = vld [vmem:[%s14598_s6 + $0x84] sm:$0xff]  }
  0x2a   : > { %13804 = vmatprep.mubr.msk.bf16.mxu0 %vm226_vm1, %v14435_v48  ;;  %13827 = vmatmul.mubr.msk.bf16.gmra.mxu1 %vm226_vm1, %v12455_v2  ;;  %v860_v15 = vrot.slane %v859_v4, 4  ;;  %v869_v16 = vor.u32 %v868_v5, %v864_v63  ;;  %v890_v18 = vshrl.u32 %v700_v1, 16  ;;  %v879_v21 = vrot.slane %v877_v10, 4  ;;  %v14439_v4 = vld [vmem:[%s14598_s6 + $0x90] sm:$0xff]  }
  0x2b   : > { %v851_v19 = vsel %vm14627_vm4, %v846_v8, %v850_v54  ;;  %v882_v22 = vrot.slane %v880_v13, 5  ;;  %v896_v23 = vshll.u32 %v701_v6, 16  ;;  %v888_v27 = vrot.slane %v886_v17, 5  ;;  %v709_v54 = vld [vmem:[%s14598_s6 + $0x70] sm:$0xf] }
  0x2c   : > { %v12456_v24 = vcombine.low %v841_v3, %v851_v19  ;;  %v865_v25 = vsel %vm14627_vm4, %v860_v15, %v864_v63  ;;  %v870_v26 = vrot.slane %v869_v16, 4  ;;  %v892_v30 = vrot.slane %v890_v18, 4  ;;  %v710_v13 = vld [vmem:[%s14598_s6 + $0x74] sm:$0x1]  ;;  %v711_v16 = vld [vmem:[%s14598_s6 + $0x78] sm:$0xf] }
  0x2d   : > { %v883_v29 = vor.u32 %v882_v22, %v879_v21  ;;  %v898_v31 = vrot.slane %v896_v23, 5  ;;  %v901_v33 = vshrl.u32 %v702_v7, 16  ;;  %v904_v35 = vshll.u32 %v702_v7, 16  ;;  %v712_v21 = vld [vmem:[%s14598_s6 + $0x7c] sm:$0xf] }
  0x2e   : > { %13830 = vmatprep.mubr.msk.bf16.mxu1 %vm226_vm1, %v12456_v24  ;;  %v875_v34 = vsel %vm14627_vm4, %v870_v26, %v874_v9  ;;  %v910_v36 = vshll.u32 %v703_v14, 16  ;;  %v914_v37 = vshrl.u32 %v703_v14, 16  ;;  %v893_v42 = vor.u32 %v892_v30, %v888_v27  ;;  %v713_v26 = vld [vmem:[%s14598_s6 + $0x80] sm:$0x1] }
  0x2f   : > { %v12457_v40 = vcombine.low %v865_v25, %v875_v34  ;;  %v884_v41 = vrot.slane %v883_v29, 4  ;;  %v903_v43 = vrot.slane %v901_v33, 4  ;;  %v906_v45 = vrot.slane %v904_v35, 5 }
  0x30   : > { %v912_v46 = vrot.slane %v910_v36, 5  ;;  %v916_v47 = vrot.slane %v914_v37, 4  ;;  %v920_v48 = vshll.u32 %v704_v32, 16  ;;  %v894_v11 = vrot.slane %v893_v42, 4 }
  0x31   : > { %13805 = vmatmul.mubr.msk.bf16.gmra.mxu0 %vm226_vm1, %v14436_v20  ;;  %v889_v51 = vsel %vm14627_vm4, %v884_v41, %v888_v27  ;;  %v925_v52 = vshrl.u32 %v705_v38, 16  ;;  %v928_v53 = vshll.u32 %v705_v38, 16  ;;  %v907_v55 = vor.u32 %v906_v45, %v903_v43  ;;  %v714_v27 = vld [vmem:[%s14598_s6 + $0x84] sm:$0xf]  ;;  %v14440_v38 = vld [vmem:[%s14598_s6 + $0x9c] sm:$0xff]  }
  0x32   : > { %13808 = vmatprep.mubr.msk.bf16.mxu0 %vm226_vm1, %v14437_v28  ;;  %13831 = vmatmul.mubr.msk.bf16.gmra.mxu1 %vm226_vm1, %v12457_v40  ;;  %v917_v56 = vor.u32 %v916_v47, %v912_v46  ;;  %v922_v57 = vrot.slane %v920_v48, 5  ;;  %v934_v58 = vshll.u32 %v706_v44, 16  ;;  %v899_v59 = vsel %vm14627_vm4, %v894_v11, %v898_v31  ;;  %v14441_v47 = vld [vmem:[%s14598_s6 + $0xa8] sm:$0xff]  }
  0x33   : > { %v927_v61 = vrot.slane %v925_v52, 4  ;;  %v930_v62 = vrot.slane %v928_v53, 5  ;;  %v938_v63 = vshrl.u32 %v706_v44, 16  ;;  %v12458_v0 = vcombine.low %v889_v51, %v899_v59 }
  0x34   : > { %v908_v1 = vrot.slane %v907_v55, 4  ;;  %v918_v2 = vrot.slane %v917_v56, 4  ;;  %v936_v3 = vrot.slane %v934_v58, 5  ;;  %v944_v7 = vshll.u32 %v707_v49, 16 }
  0x35   : > { %v931_v5 = vor.u32 %v930_v62, %v927_v61  ;;  %v940_v6 = vrot.slane %v938_v63, 4  ;;  %v949_v8 = vshrl.u32 %v708_v50, 16  ;;  %13834 = vmatprep.mubr.msk.bf16.mxu1 %vm226_vm1, %v12458_v0  ;;  %v952_v14 = vshll.u32 %v708_v50, 16 }
  0x36   : > { %v913_v9 = vsel %vm14627_vm4, %v908_v1, %v912_v46  ;;  %v923_v10 = vsel %vm14627_vm4, %v918_v2, %v922_v57  ;;  %v958_v15 = vshll.u32 %v709_v54, 16  ;;  %v946_v20 = vrot.slane %v944_v7, 5  ;;  %v715_v46 = vld [vmem:[%s14598_s6 + $0x88] sm:$0xf]  ;;  %v718_v1 = vld [vmem:[%s14598_s6 + $0x94] sm:$0xf] }
  0x37   : > { %v12459_v17 = vcombine.low %v913_v9, %v923_v10  ;;  %v932_v18 = vrot.slane %v931_v5, 4  ;;  %v941_v19 = vor.u32 %v940_v6, %v936_v3  ;;  %v951_v22 = vrot.slane %v949_v8, 4  ;;  %v719_v9 = vld [vmem:[%s14598_s6 + $0x98] sm:$0x1] }
  0x38   : > { %v954_v23 = vrot.slane %v952_v14, 5  ;;  %v960_v24 = vrot.slane %v958_v15, 5  ;;  %v962_v25 = vshrl.u32 %v709_v54, 16  ;;  %v968_v30 = vshll.u32 %v710_v13, 16  ;;  %v716_v54 = vld [vmem:[%s14598_s6 + $0x8c] sm:$0x1] }
  0x39   : > { %13809 = vmatmul.mubr.msk.bf16.gmra.mxu0 %vm226_vm1, %v14438_v60  ;;  %v937_v28 = vsel %vm14627_vm4, %v932_v18, %v936_v3  ;;  %v942_v29 = vrot.slane %v941_v19, 4  ;;  %v973_v31 = vshrl.u32 %v711_v16, 16  ;;  %v976_v34 = vshll.u32 %v711_v16, 16  ;;  %v717_v60 = vld [vmem:[%s14598_s6 + $0x90] sm:$0xf]  ;;  %v14442_v15 = vld [vmem:[%s14598_s6 + $0xb4] sm:$0xff]  }
  0x3a   : > { %13812 = vmatprep.mubr.msk.bf16.mxu0 %vm226_vm1, %v14439_v4  ;;  %13835 = vmatmul.mubr.msk.bf16.gmra.mxu1 %vm226_vm1, %v12459_v17  ;;  %v955_v32 = vor.u32 %v954_v23, %v951_v22  ;;  %v964_v33 = vrot.slane %v962_v25, 4  ;;  %v982_v35 = vshll.u32 %v712_v21, 16  ;;  %v970_v37 = vrot.slane %v968_v30, 5  ;;  %v720_v18 = vld [vmem:[%s14598_s6 + $0x9c] sm:$0xf] }
  0x3b   : > { %v947_v36 = vsel %vm14627_vm4, %v942_v29, %v946_v20  ;;  %v975_v40 = vrot.slane %v973_v31, 4  ;;  %v986_v41 = vshrl.u32 %v712_v21, 16  ;;  %v978_v45 = vrot.slane %v976_v34, 5  ;;  %v721_v23 = vld [vmem:[%s14598_s6 + $0xa0] sm:$0xf] }
  0x3c   : > { %v12460_v42 = vcombine.low %v937_v28, %v947_v36  ;;  %v956_v43 = vrot.slane %v955_v32, 4  ;;  %v965_v44 = vor.u32 %v964_v33, %v960_v24  ;;  %v984_v48 = vrot.slane %v982_v35, 5  ;;  %v722_v28 = vld [vmem:[%s14598_s6 + $0xa4] sm:$0x1]  ;;  %v1474_v33 = vld [vmem:[%s14598_s6] sm:$0xe] }
  0x3d   : > { %v988_v49 = vrot.slane %v986_v41, 4  ;;  %v992_v50 = vshll.u32 %v713_v26, 16  ;;  %v997_v51 = vshrl.u32 %v714_v27, 16  ;;  %v979_v53 = vor.u32 %v978_v45, %v975_v40 }
  0x3e   : > { %13838 = vmatprep.mubr.msk.bf16.mxu1 %vm226_vm1, %v12460_v42  ;;  %v961_v11 = vsel %vm14627_vm4, %v956_v43, %v960_v24  ;;  %v966_v52 = vrot.slane %v965_v44, 4  ;;  %v1000_v55 = vshll.u32 %v714_v27, 16  ;;  %v1006_v59 = vshll.u32 %v715_v46, 16  ;;  %v1476_v44 = vld [vmem:[%s14598_s6 + $0x8] sm:$0x1] }
  0x3f   : > { %v989_v56 = vor.u32 %v988_v49, %v984_v48  ;;  %v994_v57 = vrot.slane %v992_v50, 5  ;;  %v999_v58 = vrot.slane %v997_v51, 4  ;;  %v980_v62 = vrot.slane %v979_v53, 4  ;;  %v1477_v49 = vld [vmem:[%s14598_s6 + $0xc] sm:$0xe] }
  0x40   : > { %v971_v61 = vsel %vm14627_vm4, %v966_v52, %v970_v37  ;;  %v1002_v63 = vrot.slane %v1000_v55, 5  ;;  %v1010_v0 = vshrl.u32 %v715_v46, 16  ;;  %v1008_v4 = vrot.slane %v1006_v59, 5  ;;  %v1479_v59 = vld [vmem:[%s14598_s6 + $0x14] sm:$0x1] }
  0x41   : > { %13813 = vmatmul.mubr.msk.bf16.gmra.mxu0 %vm226_vm1, %v14440_v38  ;;  %v12461_v2 = vcombine.low %v961_v11, %v971_v61  ;;  %v990_v3 = vrot.slane %v989_v56, 4  ;;  %v1016_v5 = vshll.u32 %v716_v54, 16  ;;  %v985_v6 = vsel %vm14627_vm4, %v980_v62, %v984_v48  ;;  %v1475_v38 = vld [vmem:[%s14598_s6 + $0x4] sm:$0xf]  ;;  %v1478_v54 = vld [vmem:[%s14598_s6 + $0x10] sm:$0xf] }
  0x42   : > { %13816 = vmatprep.mubr.msk.bf16.mxu0 %vm226_vm1, %v14441_v47  ;;  %v1003_v7 = vor.u32 %v1002_v63, %v999_v58  ;;  %v1012_v8 = vrot.slane %v1010_v0, 4  ;;  %v1021_v10 = vshrl.u32 %v717_v60, 16  ;;  %v1024_v16 = vshll.u32 %v717_v60, 16  ;;  %v723_v0 = vld [vmem:[%s14598_s6 + $0xa8] sm:$0xf] }
  0x43   : > { %13839 = vmatmul.mubr.msk.bf16.gmra.mxu1 %vm226_vm1, %v12461_v2  ;;  %v995_v13 = vsel %vm14627_vm4, %v990_v3, %v994_v57  ;;  %v1018_v14 = vrot.slane %v1016_v5, 5  ;;  %v1030_v17 = vshll.u32 %v718_v1, 16  ;;  %v1034_v26 = vshrl.u32 %v718_v1, 16  ;;  %v724_v5 = vld [vmem:[%s14598_s6 + $0xac] sm:$0xf] }
  0x44   : > { %v12462_v19 = vcombine.low %v985_v6, %v995_v13  ;;  %v1004_v20 = vrot.slane %v1003_v7, 4  ;;  %v1013_v21 = vor.u32 %v1012_v8, %v1008_v4  ;;  %v1023_v22 = vrot.slane %v1021_v10, 4  ;;  %v725_v6 = vld [vmem:[%s14598_s6 + $0xb0] sm:$0x1] }
  0x45   : > { %v1026_v24 = vrot.slane %v1024_v16, 5  ;;  %v1032_v25 = vrot.slane %v1030_v17, 5  ;;  %v1040_v27 = vshll.u32 %v719_v9, 16  ;;  %v1045_v31 = vshrl.u32 %v720_v18, 16 }
  0x46   : > { %13842 = vmatprep.mubr.msk.bf16.mxu1 %vm226_vm1, %v12462_v19  ;;  %v1009_v29 = vsel %vm14627_vm4, %v1004_v20, %v1008_v4  ;;  %v1014_v30 = vrot.slane %v1013_v21, 4  ;;  %v1048_v32 = vshll.u32 %v720_v18, 16  ;;  %v1036_v35 = vrot.slane %v1034_v26, 4  ;;  %v726_v21 = vld [vmem:[%s14598_s6 + $0xb4] sm:$0xf] }
  0x47   : > { %v1027_v34 = vor.u32 %v1026_v24, %v1023_v22  ;;  %v1042_v36 = vrot.slane %v1040_v27, 5  ;;  %v1054_v37 = vshll.u32 %v721_v23, 16  ;;  %v1047_v41 = vrot.slane %v1045_v31, 4  ;;  %v727_v22 = vld [vmem:[%s14598_s6 + $0xb8] sm:$0xf] }
  0x48   : > { %v1019_v40 = vsel %vm14627_vm4, %v1014_v30, %v1018_v14  ;;  %v1050_v42 = vrot.slane %v1048_v32, 5  ;;  %v1058_v43 = vshrl.u32 %v721_v23, 16  ;;  %v1037_v47 = vor.u32 %v1036_v35, %v1032_v25  ;;  %v728_v27 = vld [vmem:[%s14598_s6 + $0xbc] sm:$0x1] }
  0x49   : > { %13817 = vmatmul.mubr.msk.bf16.gmra.mxu0 %vm226_vm1, %v14442_v15  ;;  %v12463_v45 = vcombine.low %v1009_v29, %v1019_v40  ;;  %v1028_v46 = vrot.slane %v1027_v34, 4  ;;  %v1056_v48 = vrot.slane %v1054_v37, 5  ;;  %v1064_v11 = vshll.u32 %v722_v28, 16  ;;  %v1480_v28 = vld [vmem:[%s14598_s6 + $0x18] sm:$0xe] }
  0x4a   : > { %v1051_v50 = vor.u32 %v1050_v42, %v1047_v41  ;;  %v1060_v51 = vrot.slane %v1058_v43, 4  ;;  %v12484_v53 = vrot.slane %v1474_v33, 9  ;;  %v1038_v56 = vrot.slane %v1037_v47, 4  ;;  %v1481_v33 = vld [vmem:[%s14598_s6 + $0x1c] sm:$0xf] }
  0x4b   : > { %13843 = vmatmul.mubr.msk.bf16.gmra.mxu1 %vm226_vm1, %v12463_v45  ;;  %v1033_v55 = vsel %vm14627_vm4, %v1028_v46, %v1032_v25  ;;  %v1575_v57 = vrot.slane %v1475_v38, 5  ;;  %v1578_v58 = vrot.slane %v1476_v44, 5  ;;  %v1066_v62 = vrot.slane %v1064_v11, 5  ;;  %v1482_v34 = vld [vmem:[%s14598_s6 + $0x20] sm:$0x1] }
  0x4c   : > { %v1052_v60 = vrot.slane %v1051_v50, 4  ;;  %v1061_v61 = vor.u32 %v1060_v51, %v1056_v48  ;;  %v12485_v63 = vrot.slane %v1477_v49, 9  ;;  %v1043_v1 = vsel %vm14627_vm4, %v1038_v56, %v1042_v36  ;;  %v1483_v40 = vld [vmem:[%s14598_s6 + $0x24] sm:$0xe]  ;;  %v1484_v41 = vld [vmem:[%s14598_s6 + $0x28] sm:$0xf] }
  0x4d   : > { %v1576_v2 = vsel %vm14757_vm7, %v12484_v53, %v1575_v57  ;;  %v1577_v3 = vrot.slane %v1575_v57, 4  ;;  %v1582_v4 = vrot.slane %v1478_v54, 5  ;;  %v12464_v7 = vcombine.low %v1033_v55, %v1043_v1  ;;  %v1485_v54 = vld [vmem:[%s14598_s6 + $0x2c] sm:$0x1]  ;;  %v1486_v55 = vld [vmem:[%s14598_s6 + $0x30] sm:$0xe] }
  0x4e   : > { %v1057_v8 = vsel %vm14627_vm4, %v1052_v60, %v1056_v48  ;;  %v1062_v9 = vrot.slane %v1061_v61, 4  ;;  %v1585_v10 = vrot.slane %v1479_v59, 5  ;;  %v1069_v16 = vshrl.u32 %v723_v0, 16  ;;  %v1487_v60 = vld [vmem:[%s14598_s6 + $0x34] sm:$0xf] }
  0x4f   : > { %v1579_v13 = vsel %vm14757_vm7, %v1577_v3, %v1578_v58  ;;  %v1583_v14 = vsel %vm14757_vm7, %v12485_v63, %v1582_v4  ;;  %v1584_v15 = vrot.slane %v1582_v4, 4  ;;  %13846 = vmatprep.mubr.msk.bf16.mxu1 %vm226_vm1, %v12464_v7  ;;  %v1072_v19 = vshll.u32 %v723_v0, 16  ;;  %v1488_v0 = vld [vmem:[%s14598_s6 + $0x38] sm:$0x1]  ;;  %v1489_v1 = vld [vmem:[%s14598_s6 + $0x3c] sm:$0xe] }
  0x50   : > { %v1067_v17 = vsel %vm14627_vm4, %v1062_v9, %v1066_v62  ;;  %v12501_v18 = vcombine.low %v1576_v2, %v1579_v13  ;;  %v1078_v20 = vshll.u32 %v724_v5, 16  ;;  %v1071_v25 = vrot.slane %v1069_v16, 4  ;;  %v1491_v7 = vld [vmem:[%s14598_s6 + $0x44] sm:$0x1]  ;;  %v1493_v16 = vld [vmem:[%s14598_s6 + $0x4c] sm:$0xf] }
  0x51   : > { %v12465_v23 = vcombine.low %v1057_v8, %v1067_v17  ;;  %v1586_v24 = vsel %vm14757_vm7, %v1584_v15, %v1585_v10  ;;  %v1082_v26 = vshrl.u32 %v724_v5, 16  ;;  %v1074_v30 = vrot.slane %v1072_v19, 5  ;;  %v1492_v15 = vld [vmem:[%s14598_s6 + $0x48] sm:$0xe] }
  0x52   : > { %13856 = vmatprep.mubr.msk.bf16.mxu0 %vm226_vm1, %v12501_v18  ;;  %v12502_v29 = vcombine.low %v1583_v14, %v1586_v24  ;;  %v1080_v31 = vrot.slane %v1078_v20, 5  ;;  %v1088_v32 = vshll.u32 %v725_v6, 16  ;;  %v1093_v36 = vshrl.u32 %v726_v21, 16  ;;  %v1490_v6 = vld [vmem:[%s14598_s6 + $0x40] sm:$0xf]  ;;  %v14443_v14 = vld [vmem:[%s14598_s6 + $0xc] sm:$0xff]  }
  0x53   : > { %13847 = vmatmul.mubr.msk.bf16.gmra.mxu1 %vm226_vm1, %v12465_v23  ;;  %v1084_v35 = vrot.slane %v1082_v26, 4  ;;  %v1096_v37 = vshll.u32 %v726_v21, 16  ;;  %v1102_v38 = vshll.u32 %v727_v22, 16  ;;  %v1075_v42 = vor.u32 %v1074_v30, %v1071_v25  ;;  %v1496_v30 = vld [vmem:[%s14598_s6 + $0x58] sm:$0xf] }
  0x54   : > { %13857 = vmatmul.mubr.msk.bf16.vlgmr.msra.gmra.mxu0 %vm226_vm1, %v12502_v29  ;;  %v1090_v43 = vrot.slane %v1088_v32, 5  ;;  %v1106_v44 = vshrl.u32 %v727_v22, 16  ;;  %v1112_v45 = vshll.u32 %v728_v27, 16  ;;  %v1095_v47 = vrot.slane %v1093_v36, 4  ;;  %v1494_v29 = vld [vmem:[%s14598_s6 + $0x50] sm:$0x1] }
  0x55   : > { %13923 = vmatpush3.bf16.msra.mxu0 %v14613_v12  ;;  %v1085_v46 = vor.u32 %v1084_v35, %v1080_v31  ;;  %v1098_v48 = vrot.slane %v1096_v37, 5  ;;  %v1104_v49 = vrot.slane %v1102_v38, 5  ;;  %v1076_v50 = vrot.slane %v1075_v42, 4  ;;  %v1495_v35 = vld [vmem:[%s14598_s6 + $0x54] sm:$0xe] }
  0x56   : > { %v1108_v51 = vrot.slane %v1106_v44, 4  ;;  %v1114_v11 = vrot.slane %v1112_v45, 5  ;;  %v12486_v53 = vrot.slane %v1480_v28, 9  ;;  %v1589_v58 = vrot.slane %v1481_v33, 5  ;;  %v1499_v42 = vld [vmem:[%s14598_s6 + $0x64] sm:$0xf] }
  0x57   : > { %v1086_v56 = vrot.slane %v1085_v46, 4  ;;  %v1099_v57 = vor.u32 %v1098_v48, %v1095_v47  ;;  %v1592_v59 = vrot.slane %v1482_v34, 5  ;;  %v1081_v12 = vsel %vm14627_vm4, %v1076_v50, %v1080_v31  ;;  %v1500_v47 = vld [vmem:[%s14598_s6 + $0x68] sm:$0x1]  ;;  %v14841_v48 = vld [vmem:[%s14598_s6 + $0x70] sm:$0xf] }
  0x58   : > { %v1109_v61 = vor.u32 %v1108_v51, %v1104_v49  ;;  %v12487_v62 = vrot.slane %v1483_v40, 9  ;;  %v1596_v63 = vrot.slane %v1484_v41, 5  ;;  %v1590_v4 = vsel %vm14757_vm7, %v12486_v53, %v1589_v58  ;;  %v1497_v40 = vld [vmem:[%s14598_s6 + $0x5c] sm:$0x1]  ;;  %v1498_v41 = vld [vmem:[%s14598_s6 + $0x60] sm:$0xe] }
  0x59   : > { %v1091_v2 = vsel %vm14627_vm4, %v1086_v56, %v1090_v43  ;;  %v1100_v3 = vrot.slane %v1099_v57, 4  ;;  %v1591_v5 = vrot.slane %v1589_v58, 4  ;;  %v1599_v19 = vrot.slane %v1485_v54, 5  ;;  %v14445_v53 = vld [vmem:[%s14598_s6 + $0x24] sm:$0xff]  }
  0x5a   : > { %v12466_v8 = vcombine.low %v1081_v12, %v1091_v2  ;;  %v1110_v9 = vrot.slane %v1109_v61, 4  ;;  %v1597_v10 = vsel %vm14757_vm7, %v12487_v62, %v1596_v63  ;;  %v1598_v13 = vrot.slane %v1596_v63, 4  ;;  %v14856_v12 = vld [vmem:[%s14598_s6 + $0x74] sm:$0x1] }
  0x5b   : > { %v1105_v17 = vsel %vm14627_vm4, %v1100_v3, %v1104_v49  ;;  %v1593_v18 = vsel %vm14757_vm7, %v1591_v5, %v1592_v59  ;;  %v12488_v20 = vrot.slane %v1486_v55, 9  ;;  %v1603_v23 = vrot.slane %v1487_v60, 5  ;;  %v14444_v49 = vld [vmem:[%s14598_s6 + $0x18] sm:$0xff]   ;;  %v14853_v60 = vld [vmem:[%s14598_s6 + $0x6c] sm:$0xe] }
  0x5c   : > { %13850 = vmatprep.mubr.msk.bf16.mxu1 %vm226_vm1, %v12466_v8  ;;  %v1115_v21 = vsel %vm14627_vm4, %v1110_v9, %v1114_v11  ;;  %v12503_v22 = vcombine.low %v1590_v4, %v1593_v18  ;;  %v1606_v24 = vrot.slane %v1488_v0, 5  ;;  %v1600_v26 = vsel %vm14757_vm7, %v1598_v13, %v1599_v19  ;;  %v14863_v3 = vld [vmem:[%s14598_s6 + $0x78] sm:$0xe]  ;;  %v14866_v4 = vld [vmem:[%s14598_s6 + $0x80] sm:$0x1]  ;;  %v14446_v18 = vld [vmem:[%s14598_s6 + $0x30] sm:$0xff]  }
  0x5d   : > { %v12467_v25 = vcombine.low %v1105_v17, %v1115_v21  ;;  %v12489_v27 = vrot.slane %v1489_v1, 9  ;;  %v1610_v28 = vrot.slane %v1490_v6, 5  ;;  %v12504_v31 = vcombine.low %v1597_v10, %v1600_v26  ;;  %v14860_v1 = vld [vmem:[%s14598_s6 + $0x7c] sm:$0xf]  ;;  %v14869_v5 = vld [vmem:[%s14598_s6 + $0x88] sm:$0xf] }
  0x5e   : > { %13860 = vmatprep.mubr.msk.bf16.mxu0 %vm226_vm1, %v12503_v22  ;;  %v1604_v32 = vsel %vm14757_vm7, %v12488_v20, %v1603_v23  ;;  %v1605_v33 = vrot.slane %v1603_v23, 4  ;;  %v1613_v34 = vrot.slane %v1491_v7, 5  ;;  %v12490_v37 = vrot.slane %v1492_v15, 9  ;;  %v14875_v10 = vld [vmem:[%s14598_s6 + $0x84] sm:$0xe] }
  0x5f   : > { %13851 = vmatmul.mubr.msk.bf16.gmra.mxu1 %vm226_vm1, %v12467_v25  ;;  %v1612_v36 = vrot.slane %v1610_v28, 4  ;;  %v1617_v38 = vrot.slane %v1493_v16, 5  ;;  %13861 = vmatmul.mubr.msk.bf16.gmra.mxu0 %vm226_vm1, %v12504_v31  ;;  %v1611_v44 = vsel %vm14757_vm7, %v12489_v27, %v1610_v28  ;;  %v1620_v45 = vrot.slane %v1494_v29, 5  ;;  %v14906_v23 = vld [vmem:[%s14598_s6 + $0x90] sm:$0xe] }
  0x60   : > { %13890 = vmatprep.mubr.msk.bf16.mxu1 %vm226_vm1, %v14443_v14  ;;  %v1607_v43 = vsel %vm14757_vm7, %v1605_v33, %v1606_v24  ;;  %v1624_v46 = vrot.slane %v1496_v30, 5  ;;  %v12491_v55 = vrot.slane %v1495_v35, 9  ;;  %v1631_v59 = vrot.slane %v1499_v42, 5  ;;  %v14883_v14 = vld [vmem:[%s14598_s6 + $0x8c] sm:$0x1]  ;;  %v14909_v24 = vld [vmem:[%s14598_s6 + $0x3c] sm:$0xff]  }
  0x61   : > { %v12505_v50 = vcombine.low %v1604_v32, %v1607_v43  ;;  %v1614_v51 = vsel %vm14757_vm7, %v1612_v36, %v1613_v34  ;;  %v1619_v11 = vrot.slane %v1617_v38, 4  ;;  %v1618_v54 = vsel %vm14757_vm7, %v12490_v37, %v1617_v38  ;;  %v14924_v28 = vld [vmem:[%s14598_s6 + $0x94] sm:$0xf]  ;;  %v14927_v29 = vld [vmem:[%s14598_s6 + $0x98] sm:$0x1] }
  0x62   : > { %v12506_v56 = vcombine.low %v1611_v44, %v1614_v51  ;;  %v1626_v58 = vrot.slane %v1624_v46, 4  ;;  %v1627_v61 = vrot.slane %v1497_v40, 5  ;;  %v12492_v62 = vrot.slane %v1498_v41, 9  ;;  %v14932_v32 = vld [vmem:[%s14598_s6 + $0x9c] sm:$0xe] }
  0x63   : > { %13864 = vmatprep.mubr.msk.bf16.mxu0 %vm226_vm1, %v12505_v50  ;;  %v1621_v57 = vsel %vm14757_vm7, %v1619_v11, %v1620_v45  ;;  %v1634_v63 = vrot.slane %v1500_v47, 5  ;;  %v1638_v0 = vrot.slane %v14841_v48, 5  ;;  %v1633_v6 = vrot.slane %v1631_v59, 4  ;;  %v14935_v33 = vld [vmem:[%s14598_s6 + $0xa0] sm:$0xf] }
  0x64   : > { %v12507_v2 = vcombine.low %v1618_v54, %v1621_v57  ;;  %v12493_v7 = vrot.slane %v14853_v60, 9  ;;  %v1641_v8 = vrot.slane %v14856_v12, 5  ;;  %v1645_v9 = vrot.slane %v14860_v1, 5  ;;  %v1515_v37 = vld [vmem:[%s14598_s6 + $0xa4] sm:$0x1]  ;;  %v14448_v60 = vld [vmem:[%s14598_s6 + $0x48] sm:$0xff]  }
  0x65   : > { %v14880_v13 = vrot.slane %v1638_v0, 4  ;;  %v1652_v15 = vrot.slane %v14869_v5, 5  ;;  %v12494_v16 = vrot.slane %v14863_v3, 9  ;;  %v1648_v17 = vrot.slane %v14866_v4, 5  ;;  %v12743_v47 = vld [vmem:[%s18498_s1 + $0xa] sm:$0x3] }
  0x66   : > { %v14894_v19 = vsel %vm14757_vm7, %v12491_v55, %v1624_v46  ;;  %v14898_v20 = vsel %vm14757_vm7, %v1626_v58, %v1627_v61  ;;  %v14902_v21 = vrot.slane %v1645_v9, 4  ;;  %v12495_v22 = vrot.slane %v14875_v10, 9  ;;  %14403 = vmatprep.subr.msk.bf16.mxu1 %vm452_vm0, %v12743_v47  ;;  %v1516_v11 = vld [vmem:[%s14598_s6 + $0xa8] sm:$0xe]  ;;  %v14449_v1 = vld [vmem:[%s14598_s6 + $0x54] sm:$0xff]  }
  0x67   : > { %13891 = vmatmul.mubr.msk.bf16.vlgmr.msra.gmra.mxu1 %vm226_vm1, %v14444_v49  ;;  %13865 = vmatmul.mubr.msk.bf16.gmra.mxu0 %vm226_vm1, %v12506_v56  ;;  %v14913_v25 = vsel %vm14757_vm7, %v12492_v62, %v1631_v59  ;;  %v14917_v26 = vsel %vm14757_vm7, %v1633_v6, %v1634_v63  ;;  %v14921_v27 = vrot.slane %v1652_v15, 4  ;;  %v1655_v30 = vrot.slane %v14883_v14, 5  ;;  %v1518_v56 = vld [vmem:[%s14598_s6 + $0xb0] sm:$0x1]  ;;  %v1519_v59 = vld [vmem:[%s14598_s6 + $0xb4] sm:$0xe] }
  0x68   : > { %13894 = vmatprep.mubr.msk.bf16.mxu1 %vm226_vm1, %v14445_v53  ;;  %13868 = vmatprep.mubr.msk.bf16.mxu0 %vm226_vm1, %v12507_v2  ;;  %v1659_v31 = vrot.slane %v14924_v28, 5  ;;  %v14534_v34 = vmov 0.0   ;;  %v12508_v35 = vcombine.low %v14894_v19, %v14898_v20  ;;  %v12496_v36 = vrot.slane %v14906_v23, 9  ;;  %v1517_v53 = vld [vmem:[%s14598_s6 + $0xac] sm:$0xf] }
  0x69   : > { %229 = vst.msk [vmem:[#allocation2 + $0x10] sm:$0xff] %vm226_vm1, %v14534_v34  ;;  %227 = vst.msk [vmem:[#allocation2] sm:$0xff] %vm226_vm1, %v14534_v34  ;;  %v1666_v38 = vrot.slane %v14935_v33, 5  ;;  %v12509_v40 = vcombine.low %v14913_v25, %v14917_v26  ;;  %v1662_v41 = vrot.slane %v14927_v29, 5  ;;  %v12497_v42 = vrot.slane %v14932_v32, 9 }
  0x6a   : > { %228 = vst.msk [vmem:[#allocation2 + $0x8] sm:$0xff] %vm226_vm1, %v14534_v34  ;;  %230 = vst.msk [vmem:[#allocation2 + $0x18] sm:$0xff] %vm226_vm1, %v14534_v34  ;;  %v15016_v43 = vsel %vm14757_vm7, %v12493_v7, %v1638_v0  ;;  %v1642_v44 = vsel %vm14757_vm7, %v14880_v13, %v1641_v8  ;;  %v1661_v45 = vrot.slane %v1659_v31, 4  ;;  %v1669_v46 = vrot.slane %v1515_v37, 5  ;;  %v1520_v63 = vld [vmem:[%s14598_s6 + $0xb8] sm:$0xf] }
  0x6b   : > { %231 = vst.msk [vmem:[#allocation2 + $0x20] sm:$0xff] %vm226_vm1, %v14534_v34  ;;  %232 = vst.msk [vmem:[#allocation2 + $0x28] sm:$0xff] %vm226_vm1, %v14534_v34  ;;  %v15035_v48 = vsel %vm14757_vm7, %v12494_v16, %v1645_v9  ;;  %v15041_v49 = vsel %vm14757_vm7, %v12495_v22, %v1652_v15  ;;  %v1668_v50 = vrot.slane %v1666_v38, 4  ;;  %v3595_v51 = vsel %vm452_vm0, %v12743_v47, 0  ;;  %v1521_v0 = vld [vmem:[%s14598_s6 + $0xbc] sm:$0x1] }
  0x6c   : > { %233 = vst.msk [vmem:[#allocation2 + $0x30] sm:$0xff] %vm226_vm1, %v14534_v34  ;;  %234 = vst.msk [vmem:[#allocation2 + $0x38] sm:$0xff] %vm226_vm1, %v14534_v34  ;;  %v1649_v54 = vsel %vm14757_vm7, %v14902_v21, %v1648_v17  ;;  %v15058_v55 = vsel %vm14757_vm7, %v14921_v27, %v1655_v30  ;;  %v12498_v57 = vrot.slane %v1516_v11, 9  ;;  %v1673_v58 = vrot.slane %v1517_v53, 5  ;;  %13957 = vmatpush3.bf16.msra.mxu1 %v3595_v51  ;;  %v12598_v16 = vld [vmem:[%s14598_s6 + $0xc] sm:$0xf] }
  0x6d   : > { %235 = vst.msk [vmem:[#allocation2 + $0x40] sm:$0xff] %vm226_vm1, %v14534_v34  ;;  %236 = vst.msk [vmem:[#allocation2 + $0x48] sm:$0xff] %vm226_vm1, %v14534_v34  ;;  %v12510_v12 = vcombine.low %v15016_v43, %v1642_v44  ;;  %v15069_v61 = vsel %vm14757_vm7, %v12496_v36, %v1659_v31  ;;  %v1676_v62 = vrot.slane %v1518_v56, 5  ;;  %v15076_v2 = vsel %vm14757_vm7, %v1661_v45, %v1662_v41  ;;  %v12599_v17 = vld [vmem:[%s14598_s6 + $0x10] sm:$0xf]  ;;  %v14450_v41 = vld [vmem:[%s14598_s6 + $0x60] sm:$0xff]  }
  0x6e   : > { %237 = vst.msk [vmem:[#allocation2 + $0x50] sm:$0xff] %vm226_vm1, %v14534_v34  ;;  %238 = vst.msk [vmem:[#allocation2 + $0x58] sm:$0xff] %vm226_vm1, %v14534_v34  ;;  %v1675_v3 = vrot.slane %v1673_v58, 4  ;;  %v12499_v4 = vrot.slane %v1519_v59, 9  ;;  %v1680_v5 = vrot.slane %v1520_v63, 5  ;;  %v12511_v6 = vcombine.low %v15035_v48, %v1649_v54 }
  0x6f   : > { %239 = vst.msk [vmem:[#allocation2 + $0x60] sm:$0xff] %vm226_vm1, %v14534_v34  ;;  %240 = vst.msk [vmem:[#allocation2 + $0x68] sm:$0xff] %vm226_vm1, %v14534_v34  ;;  %13895 = vmatmul.mubr.msk.bf16.gmra.mxu1 %vm226_vm1, %v14446_v18  ;;  %13869 = vmatmul.mubr.msk.bf16.gmra.mxu0 %vm226_vm1, %v12508_v35  ;;  %v12512_v7 = vcombine.low %v15041_v49, %v15058_v55  ;;  %v15083_v8 = vsel %vm14757_vm7, %v12497_v42, %v1666_v38  ;;  %v1683_v15 = vrot.slane %v1521_v0, 5  ;;  %v12600_v19 = vld [vmem:[%s14598_s6 + $0x14] sm:$0x1] }
  0x70   : > { %241 = vst.msk [vmem:[#allocation2 + $0x70] sm:$0xff] %vm226_vm1, %v14534_v34  ;;  %242 = vst.msk [vmem:[#allocation2 + $0x78] sm:$0xff] %vm226_vm1, %v14534_v34  ;;  %13898 = vmatprep.mubr.msk.bf16.mxu1 %vm226_vm1, %v14909_v24  ;;  %13872 = vmatprep.mubr.msk.bf16.mxu0 %vm226_vm1, %v12509_v40  ;;  %v15087_v9 = vsel %vm14757_vm7, %v1668_v50, %v1669_v46  ;;  %v15091_v10 = vsel %vm14757_vm7, %v12498_v57, %v1673_v58  ;;  %v1682_v14 = vrot.slane %v1680_v5, 4  ;;  %v12808_v27 = vld [vmem:[%s18498_s1 + $0xc] sm:$0x3] }
  0x71   : > { %243 = vst.msk [vmem:[#allocation2 + $0x80] sm:$0xff] %vm226_vm1, %v14534_v34  ;;  %244 = vst.msk [vmem:[#allocation2 + $0x88] sm:$0xff] %vm226_vm1, %v14534_v34  ;;  %v15095_v13 = vsel %vm14757_vm7, %v1675_v3, %v1676_v62  ;;  %v12513_v18 = vcombine.low %v15069_v61, %v15076_v2  ;;  %v2515_v20 = vshrl.u32 %v12598_v16, 16  ;;  %v2518_v21 = vshll.u32 %v12598_v16, 16  ;;  %v12601_v28 = vld [vmem:[%s14598_s6 + $0x18] sm:$0xf]  ;;  %14404 = vmatprep.subr.msk.bf16.mxu0 %vm452_vm0, %v12808_v27 }
  0x72   : > { %245 = vst.msk [vmem:[#allocation2 + $0x90] sm:$0xff] %vm226_vm1, %v14534_v34  ;;  %246 = vst.msk [vmem:[#allocation2 + $0x98] sm:$0xff] %vm226_vm1, %v14534_v34  ;;  %v2524_v22 = vshll.u32 %v12599_v17, 16  ;;  %v12514_v23 = vcombine.low %v15083_v8, %v15087_v9  ;;  %v15106_v24 = vsel %vm14757_vm7, %v12499_v4, %v1680_v5  ;;  %v2528_v25 = vshrl.u32 %v12599_v17, 16  ;;  %v12602_v33 = vld [vmem:[%s14598_s6 + $0x1c] sm:$0xf] }
  0x73   : > { %247 = vst.msk [vmem:[#allocation2 + $0xa0] sm:$0xff] %vm226_vm1, %v14534_v34  ;;  %248 = vst.msk [vmem:[#allocation2 + $0xa8] sm:$0xff] %vm226_vm1, %v14534_v34  ;;  %v2534_v26 = vshll.u32 %v12600_v19, 16  ;;  %v12515_v29 = vcombine.low %v15091_v10, %v15095_v13  ;;  %v2517_v30 = vrot.slane %v2515_v20, 4  ;;  %v2520_v31 = vrot.slane %v2518_v21, 5  ;;  %v14451_v46 = vld [vmem:[%s14598_s6 + $0x6c] sm:$0xff]  }
  0x74   : > { %249 = vst.msk [vmem:[#allocation2 + $0xb0] sm:$0xff] %vm226_vm1, %v14534_v34  ;;  %250 = vst.msk [vmem:[#allocation2 + $0xb8] sm:$0xff] %vm226_vm1, %v14534_v34  ;;  %v2526_v32 = vrot.slane %v2524_v22, 5  ;;  %v15121_v35 = vsel %vm14757_vm7, %v1682_v14, %v1683_v15  ;;  %v2530_v36 = vrot.slane %v2528_v25, 4  ;;  %v12603_v37 = vld [vmem:[%s14598_s6 + $0x20] sm:$0x1] }
  0x75   : > { %251 = vst.msk [vmem:[#allocation2 + $0xc0] sm:$0xff] %vm226_vm1, %v14534_v34  ;;  %252 = vst.msk [vmem:[#allocation2 + $0xc8] sm:$0xff] %vm226_vm1, %v14534_v34  ;;  %v2539_v38 = vshrl.u32 %v12601_v28, 16  ;;  %v2542_v40 = vshll.u32 %v12601_v28, 16  ;;  %v2521_v42 = vor.u32 %v2520_v31, %v2517_v30  ;;  %v2548_v43 = vshll.u32 %v12602_v33, 16  ;;  %v14452_v30 = vld [vmem:[%s14598_s6 + $0x78] sm:$0xff]  }
  0x76   : > { %253 = vst.msk [vmem:[#allocation2 + $0xd0] sm:$0xff] %vm226_vm1, %v14534_v34  ;;  %254 = vst.msk [vmem:[#allocation2 + $0xd8] sm:$0xff] %vm226_vm1, %v14534_v34  ;;  %v2552_v44 = vshrl.u32 %v12602_v33, 16  ;;  %v2558_v45 = vshll.u32 %v12603_v37, 16  ;;  %v2531_v47 = vor.u32 %v2530_v36, %v2526_v32  ;;  %v2536_v48 = vrot.slane %v2534_v26, 5  ;;  %v14453_v36 = vld [vmem:[%s14598_s6 + $0x84] sm:$0xff]  }
  0x77   : > { %255 = vst.msk [vmem:[#allocation2 + $0xe0] sm:$0xff] %vm226_vm1, %v14534_v34  ;;  %256 = vst.msk [vmem:[#allocation2 + $0xe8] sm:$0xff] %vm226_vm1, %v14534_v34  ;;  %13899 = vmatmul.mubr.msk.bf16.gmra.mxu1 %vm226_vm1, %v14448_v60  ;;  %13873 = vmatmul.mubr.msk.bf16.gmra.mxu0 %vm226_vm1, %v12510_v12  ;;  %v2541_v50 = vrot.slane %v2539_v38, 4  ;;  %v2544_v51 = vrot.slane %v2542_v40, 5  ;;  %v2522_v11 = vrot.slane %v2521_v42, 4  ;;  %v2550_v53 = vrot.slane %v2548_v43, 5 }
  0x78   : > { %257 = vst.msk [vmem:[#allocation2 + $0xf0] sm:$0xff] %vm226_vm1, %v14534_v34  ;;  %258 = vst.msk [vmem:[#allocation2 + $0xf8] sm:$0xff] %vm226_vm1, %v14534_v34  ;;  %13902 = vmatprep.mubr.msk.bf16.mxu1 %vm226_vm1, %v14449_v1  ;;  %13876 = vmatprep.mubr.msk.bf16.mxu0 %vm226_vm1, %v12511_v6  ;;  %v2554_v54 = vrot.slane %v2552_v44, 4  ;;  %v15128_v56 = vsel %vm452_vm0, %v12808_v27, 0  ;;  %v12516_v57 = vcombine.low %v15106_v24, %v15121_v35  ;;  %v2532_v58 = vrot.slane %v2531_v47, 4 }
  0x79   : > { %v2545_v59 = vor.u32 %v2544_v51, %v2541_v50  ;;  %v2560_v60 = vrot.slane %v2558_v45, 5  ;;  %v12604_v12 = vld [vmem:[%s14598_s6 + $0x24] sm:$0xf]  ;;  %v2527_v62 = vsel %vm14627_vm4, %v2522_v11, %v2526_v32  ;;  %v12605_v0 = vld [vmem:[%s14598_s6 + $0x28] sm:$0xf] }
  0x7a   : > { %v2555_v63 = vor.u32 %v2554_v54, %v2550_v53  ;;  %v12606_v1 = vld [vmem:[%s14598_s6 + $0x2c] sm:$0x1]  ;;  %v2563_v3 = vshrl.u32 %v12604_v12, 16  ;;  %v2566_v4 = vshll.u32 %v12604_v12, 16  ;;  %v2537_v5 = vsel %vm14627_vm4, %v2532_v58, %v2536_v48  ;;  %v12607_v16 = vld [vmem:[%s14598_s6 + $0x30] sm:$0xf] }
  0x7b   : > { %v2546_v6 = vrot.slane %v2545_v59, 4  ;;  %v2572_v14 = vshll.u32 %v12605_v0, 16  ;;  %v2576_v15 = vshrl.u32 %v12605_v0, 16  ;;  %v15141_v17 = vcombine.low %v2527_v62, %v2537_v5  ;;  %v12608_v22 = vld [vmem:[%s14598_s6 + $0x34] sm:$0xf] }
  0x7c   : > { %v2556_v19 = vrot.slane %v2555_v63, 4  ;;  %v2565_v20 = vrot.slane %v2563_v3, 4  ;;  %v2568_v21 = vrot.slane %v2566_v4, 5  ;;  %v2582_v28 = vshll.u32 %v12606_v1, 16  ;;  %v12679_v33 = vld [vmem:[%s14598_s6 + $0xc] sm:$0xe] }
  0x7d   : > { %v2551_v25 = vsel %vm14627_vm4, %v2546_v6, %v2550_v53  ;;  %v2574_v26 = vrot.slane %v2572_v14, 5  ;;  %v2578_v27 = vrot.slane %v2576_v15, 4  ;;  %v2587_v31 = vshrl.u32 %v12607_v16, 16  ;;  %v12680_v42 = vld [vmem:[%s14598_s6 + $0x10] sm:$0xf] }
  0x7e   : > { %v2561_v49 = vsel %vm14627_vm4, %v2556_v19, %v2560_v60  ;;  %v2569_v55 = vor.u32 %v2568_v21, %v2565_v20  ;;  %v2590_v32 = vshll.u32 %v12607_v16, 16  ;;  %v2584_v40 = vrot.slane %v2582_v28, 5  ;;  %v12681_v61 = vld [vmem:[%s14598_s6 + $0x14] sm:$0x1]  ;;  %v12682_v45 = vld [vmem:[%s14598_s6 + $0x18] sm:$0xe] }
  0x7f   : > { %13903 = vmatmul.mubr.msk.bf16.gmra.mxu1 %vm226_vm1, %v14450_v41  ;;  %13877 = vmatmul.mubr.msk.bf16.gmra.mxu0 %vm226_vm1, %v12512_v7  ;;  %v12609_v7 = vld [vmem:[%s14598_s6 + $0x38] sm:$0x1]  ;;  %v15161_v37 = vcombine.low %v2551_v25, %v2561_v49  ;;  %v2579_v38 = vor.u32 %v2578_v27, %v2574_v26  ;;  %v2596_v41 = vshll.u32 %v12608_v22, 16  ;;  %v2600_v44 = vshrl.u32 %v12608_v22, 16  ;;  %v12683_v51 = vld [vmem:[%s14598_s6 + $0x1c] sm:$0xf] }
  0x80   : > { %13906 = vmatprep.mubr.msk.bf16.mxu1 %vm226_vm1, %v14451_v46  ;;  %13880 = vmatprep.mubr.msk.bf16.mxu0 %vm226_vm1, %v12513_v18  ;;  %v2570_v2 = vrot.slane %v2569_v55, 4  ;;  %v2589_v18 = vrot.slane %v2587_v31, 4  ;;  %v2592_v43 = vrot.slane %v2590_v32, 5  ;;  %v2606_v48 = vshll.u32 %v12609_v7, 16  ;;  %v12684_v59 = vld [vmem:[%s14598_s6 + $0x20] sm:$0x1] }
  0x81   : > { %v2580_v46 = vrot.slane %v2579_v38, 4  ;;  %v2598_v47 = vrot.slane %v2596_v41, 5  ;;  %v12727_v50 = vrot.slane %v12679_v33, 9  ;;  %v2602_v54 = vrot.slane %v2600_v44, 4  ;;  %v12610_v60 = vld [vmem:[%s14598_s6 + $0x3c] sm:$0xf] }
  0x82   : > { %v2575_v11 = vsel %vm14627_vm4, %v2570_v2, %v2574_v26  ;;  %v2593_v53 = vor.u32 %v2592_v43, %v2589_v18  ;;  %v3354_v58 = vrot.slane %v12680_v42, 5  ;;  %v2608_v62 = vrot.slane %v2606_v48, 5  ;;  %v12611_v1 = vld [vmem:[%s14598_s6 + $0x40] sm:$0xf]  ;;  %v12612_v9 = vld [vmem:[%s14598_s6 + $0x44] sm:$0x1] }
  0x83   : > { %v2585_v12 = vsel %vm14627_vm4, %v2580_v46, %v2584_v40  ;;  %v3357_v63 = vrot.slane %v12681_v61, 5  ;;  %v12728_v0 = vrot.slane %v12682_v45, 9  ;;  %v2603_v5 = vor.u32 %v2602_v54, %v2598_v47  ;;  %v14454_v26 = vld [vmem:[%s14598_s6 + $0x90] sm:$0xff]   ;;  %v12614_v55 = vld [vmem:[%s14598_s6 + $0x4c] sm:$0xf]  ;;  %v14455_v7 = vld [vmem:[%s14598_s6 + $0x9c] sm:$0xff]  }
  0x84   : > { %v15175_v3 = vcombine.low %v2575_v11, %v2585_v12  ;;  %v2594_v4 = vrot.slane %v2593_v53, 4  ;;  %v15179_v6 = vsel %vm14757_vm7, %v12727_v50, %v3354_v58  ;;  %v3356_v14 = vrot.slane %v3354_v58, 4  ;;  %v12615_v38 = vld [vmem:[%s14598_s6 + $0x50] sm:$0x1]  ;;  %v12685_v2 = vld [vmem:[%s14598_s6 + $0x24] sm:$0xe] }
  0x85   : > { %v3361_v15 = vrot.slane %v12683_v51, 5  ;;  %v3364_v16 = vrot.slane %v12684_v59, 5  ;;  %v2611_v19 = vshrl.u32 %v12610_v60, 16  ;;  %v2604_v8 = vrot.slane %v2603_v5, 4  ;;  %v12686_v18 = vld [vmem:[%s14598_s6 + $0x28] sm:$0xf] }
  0x86   : > { %v2599_v20 = vsel %vm14627_vm4, %v2594_v4, %v2598_v47  ;;  %v2620_v21 = vshll.u32 %v12611_v1, 16  ;;  %v15195_v22 = vsel %vm14757_vm7, %v3356_v14, %v3357_v63  ;;  %v2624_v33 = vshrl.u32 %v12611_v1, 16  ;;  %v12687_v47 = vld [vmem:[%s14598_s6 + $0x2c] sm:$0x1]  ;;  %v12688_v53 = vld [vmem:[%s14598_s6 + $0x30] sm:$0xe] }
  0x87   : > { %13907 = vmatmul.mubr.msk.bf16.gmra.mxu1 %vm226_vm1, %v14452_v30  ;;  %13881 = vmatmul.mubr.msk.bf16.gmra.mxu0 %vm226_vm1, %v12514_v23  ;;  %v2614_v23 = vshll.u32 %v12610_v60, 16  ;;  %v15199_v25 = vsel %vm14757_vm7, %v12728_v0, %v3361_v15  ;;  %v3363_v10 = vrot.slane %v3361_v15, 4  ;;  %v2613_v13 = vrot.slane %v2611_v19, 4  ;;  %v12689_v12 = vld [vmem:[%s14598_s6 + $0x34] sm:$0xf]  ;;  %v14456_v15 = vld [vmem:[%s14598_s6 + $0xa8] sm:$0xff]  }
  0x88   : > { %13910 = vmatprep.mubr.msk.bf16.mxu1 %vm226_vm1, %v14453_v36  ;;  %13884 = vmatprep.mubr.msk.bf16.mxu0 %vm226_vm1, %v12515_v29  ;;  %v12613_v29 = vld [vmem:[%s14598_s6 + $0x48] sm:$0xf]  ;;  %v2609_v27 = vsel %vm14627_vm4, %v2604_v8, %v2608_v62  ;;  %v12744_v28 = vcombine.low %v15179_v6, %v15195_v22  ;;  %v2622_v49 = vrot.slane %v2620_v21, 5  ;;  %v2630_v36 = vshll.u32 %v12612_v9, 16  ;;  %v12690_v35 = vld [vmem:[%s14598_s6 + $0x38] sm:$0x1] }
  0x89   : > { %v2616_v30 = vrot.slane %v2614_v23, 5  ;;  %v15209_v31 = vcombine.low %v2599_v20, %v2609_v27  ;;  %v15213_v32 = vsel %vm14757_vm7, %v3363_v10, %v3364_v16  ;;  %v2635_v42 = vshrl.u32 %v12613_v29, 16  ;;  %v14457_v8 = vld [vmem:[%s14598_s6 + $0xb4] sm:$0xff]  }
  0x8a   : > { %v12745_v40 = vcombine.low %v15199_v25, %v15213_v32  ;;  %v2638_v61 = vshll.u32 %v12613_v29, 16  ;;  %v2626_v43 = vrot.slane %v2624_v33, 4  ;;  %v2632_v44 = vrot.slane %v2630_v36, 5  ;;  %v12617_v10 = vld [vmem:[%s14598_s6 + $0x58] sm:$0xf] }
  0x8b   : > { %v2617_v41 = vor.u32 %v2616_v30, %v2613_v13  ;;  %v2644_v45 = vshll.u32 %v12614_v55, 16  ;;  %v2648_v46 = vshrl.u32 %v12614_v55, 16  ;;  %v2637_v50 = vrot.slane %v2635_v42, 4  ;;  %v12619_v55 = vld [vmem:[%s14598_s6 + $0x60] sm:$0xf] }
  0x8c   : > { %v2640_v51 = vrot.slane %v2638_v61, 5  ;;  %v2654_v11 = vshll.u32 %v12615_v38, 16  ;;  %v2627_v54 = vor.u32 %v2626_v43, %v2622_v49  ;;  %v12729_v60 = vrot.slane %v12685_v2, 9  ;;  %v12621_v43 = vld [vmem:[%s14598_s6 + $0x68] sm:$0x1] }
  0x8d   : > { %v2618_v48 = vrot.slane %v2617_v41, 4  ;;  %v2646_v58 = vrot.slane %v2644_v45, 5  ;;  %v2650_v59 = vrot.slane %v2648_v46, 4  ;;  %v3368_v24 = vrot.slane %v12686_v18, 5  ;;  %v12620_v41 = vld [vmem:[%s14598_s6 + $0x64] sm:$0xf] }
  0x8e   : > { %v2641_v63 = vor.u32 %v2640_v51, %v2637_v50  ;;  %v2656_v0 = vrot.slane %v2654_v11, 5  ;;  %v2628_v1 = vrot.slane %v2627_v54, 4  ;;  %v3371_v5 = vrot.slane %v12687_v47, 5  ;;  %v14458_v54 = vld [vmem:[%s14598_s6 + $0xc0] sm:$0xff]  }
  0x8f   : > { %13911 = vmatmul.mubr.msk.bf16.gmra.mxu1 %vm226_vm1, %v14454_v26  ;;  %13885 = vmatmul.mubr.msk.bf16.gmra.mxu0 %vm226_vm1, %v12516_v57  ;;  %v2623_v62 = vsel %vm14627_vm4, %v2618_v48, %v2622_v49  ;;  %v12616_v57 = vld [vmem:[%s14598_s6 + $0x54] sm:$0xf]  ;;  %v2651_v4 = vor.u32 %v2650_v59, %v2646_v58  ;;  %v12730_v14 = vrot.slane %v12688_v53, 9  ;;  %v3370_v19 = vrot.slane %v3368_v24, 4  ;;  %v12618_v49 = vld [vmem:[%s14598_s6 + $0x5c] sm:$0x1] }
  0x90   : > { %13914 = vmatprep.mubr.msk.bf16.mxu1 %vm226_vm1, %v14455_v7  ;;  %13924 = vmatprep.mubr.msk.bf16.mxu0 %vm226_vm1, %v15141_v17  ;;  %v2642_v16 = vrot.slane %v2641_v63, 4  ;;  %v15238_v17 = vsel %vm14757_vm7, %v12729_v60, %v3368_v24  ;;  %v3375_v20 = vrot.slane %v12689_v12, 5  ;;  %v2633_v9 = vsel %vm14627_vm4, %v2628_v1, %v2632_v44  ;;  %v12691_v48 = vld [vmem:[%s14598_s6 + $0x3c] sm:$0xe]  ;;  %v12692_v53 = vld [vmem:[%s14598_s6 + $0x40] sm:$0xf] }
  0x91   : > { %v2652_v23 = vrot.slane %v2651_v4, 4  ;;  %v3378_v21 = vrot.slane %v12690_v35, 5  ;;  %v2659_v13 = vshrl.u32 %v12616_v57, 16  ;;  %v15244_v29 = vcombine.low %v2623_v62, %v2633_v9  ;;  %v12694_v24 = vld [vmem:[%s14598_s6 + $0x48] sm:$0xe] }
  0x92   : > { %v2647_v26 = vsel %vm14627_vm4, %v2642_v16, %v2646_v58  ;;  %v15250_v27 = vsel %vm14757_vm7, %v3370_v19, %v3371_v5  ;;  %v15254_v30 = vsel %vm14757_vm7, %v12730_v14, %v3375_v20  ;;  %v3377_v36 = vrot.slane %v3375_v20, 4  ;;  %v12695_v5 = vld [vmem:[%s14598_s6 + $0x4c] sm:$0xf]  ;;  %v12696_v20 = vld [vmem:[%s14598_s6 + $0x50] sm:$0x1] }
  0x93   : > { %v2657_v7 = vsel %vm14627_vm4, %v2652_v23, %v2656_v0  ;;  %v12746_v33 = vcombine.low %v15238_v17, %v15250_v27  ;;  %v2661_v38 = vrot.slane %v2659_v13, 4  ;;  %v2662_v61 = vshll.u32 %v12616_v57, 16 }
  0x94   : > { %v15264_v42 = vcombine.low %v2647_v26, %v2657_v7  ;;  %v2668_v2 = vshll.u32 %v12617_v10, 16  ;;  %v2672_v18 = vshrl.u32 %v12617_v10, 16  ;;  %v15272_v44 = vsel %vm14757_vm7, %v3377_v36, %v3378_v21  ;;  %v12622_v10 = vld [vmem:[%s14598_s6 + $0x6c] sm:$0xf]  ;;  %v12623_v7 = vld [vmem:[%s14598_s6 + $0x70] sm:$0xf] }
  0x95   : > { %v2678_v45 = vshll.u32 %v12618_v49, 16  ;;  %v2683_v46 = vshrl.u32 %v12619_v55, 16  ;;  %v2686_v47 = vshll.u32 %v12619_v55, 16  ;;  %v2664_v50 = vrot.slane %v2662_v61, 5 }
  0x96   : > { %v2670_v51 = vrot.slane %v2668_v2, 5  ;;  %v2674_v11 = vrot.slane %v2672_v18, 4  ;;  %v2692_v12 = vshll.u32 %v12620_v41, 16  ;;  %v2696_v63 = vshrl.u32 %v12620_v41, 16  ;;  %v12624_v2 = vld [vmem:[%s14598_s6 + $0x74] sm:$0x1] }
  0x97   : > { %13915 = vmatmul.mubr.msk.bf16.gmra.mxu1 %vm226_vm1, %v14456_v15  ;;  %13925 = vmatmul.mubr.msk.bf16.vlgmr.msra.gmra.mxu0 %vm226_vm1, %v15161_v37  ;;  %v12747_v37 = vcombine.low %v15254_v30, %v15272_v44  ;;  %v2680_v58 = vrot.slane %v2678_v45, 5  ;;  %v2685_v59 = vrot.slane %v2683_v46, 4  ;;  %v2688_v60 = vrot.slane %v2686_v47, 5  ;;  %v12625_v47 = vld [vmem:[%s14598_s6 + $0x78] sm:$0xf] }
  0x98   : > { %13918 = vmatprep.mubr.msk.bf16.mxu1 %vm226_vm1, %v14457_v8  ;;  %13991 = vmatpush3.bf16.msra.mxu0 %v15128_v56  ;;  %v2665_v56 = vor.u32 %v2664_v50, %v2661_v38  ;;  %v2675_v62 = vor.u32 %v2674_v11, %v2670_v51  ;;  %v2702_v0 = vshll.u32 %v12621_v43, 16  ;;  %v2694_v57 = vrot.slane %v2692_v12, 5  ;;  %v12626_v11 = vld [vmem:[%s14598_s6 + $0x7c] sm:$0xf]  ;;  %v12697_v12 = vld [vmem:[%s14598_s6 + $0x54] sm:$0xe] }
  0x99   : > { %13928 = vmatprep.mubr.msk.bf16.mxu0 %vm226_vm1, %v15175_v3  ;;  %v12693_v3 = vld [vmem:[%s14598_s6 + $0x44] sm:$0x1]  ;;  %v2689_v35 = vor.u32 %v2688_v60, %v2685_v59  ;;  %v12731_v1 = vrot.slane %v12691_v48, 9  ;;  %v3382_v4 = vrot.slane %v12692_v53, 5  ;;  %v2698_v16 = vrot.slane %v2696_v63, 4 }
  0x9a   : > { %v2666_v14 = vrot.slane %v2665_v56, 4  ;;  %v2676_v15 = vrot.slane %v2675_v62, 4  ;;  %v2704_v19 = vrot.slane %v2702_v0, 5  ;;  %v3385_v21 = vrot.slane %v12693_v3, 5  ;;  %v12627_v60 = vld [vmem:[%s14598_s6 + $0x80] sm:$0x1] }
  0x9b   : > { %v2690_v8 = vrot.slane %v2689_v35, 4  ;;  %v15288_v9 = vsel %vm14757_vm7, %v12731_v1, %v3382_v4  ;;  %v3384_v23 = vrot.slane %v3382_v4, 4  ;;  %v2699_v49 = vor.u32 %v2698_v16, %v2694_v57  ;;  %v12698_v3 = vld [vmem:[%s14598_s6 + $0x58] sm:$0xf]  ;;  %v12699_v4 = vld [vmem:[%s14598_s6 + $0x5c] sm:$0x1] }
  0x9c   : > { %v2671_v13 = vsel %vm14627_vm4, %v2666_v14, %v2670_v51  ;;  %v2681_v26 = vsel %vm14627_vm4, %v2676_v15, %v2680_v58  ;;  %v12732_v55 = vrot.slane %v12694_v24, 9  ;;  %v3389_v61 = vrot.slane %v12695_v5, 5 }
  0x9d   : > { %v12653_v36 = vcombine.low %v2671_v13, %v2681_v26  ;;  %v2695_v38 = vsel %vm14627_vm4, %v2690_v8, %v2694_v57  ;;  %v15307_v41 = vsel %vm14757_vm7, %v3384_v23, %v3385_v21  ;;  %v3392_v22 = vrot.slane %v12696_v20, 5  ;;  %v12702_v26 = vld [vmem:[%s14598_s6 + $0x68] sm:$0x1] }
  0x9e   : > { %v12748_v6 = vcombine.low %v15288_v9, %v15307_v41  ;;  %v15316_v18 = vsel %vm14757_vm7, %v12732_v55, %v3389_v61  ;;  %v3391_v43 = vrot.slane %v3389_v61, 4  ;;  %v2710_v45 = vshll.u32 %v12622_v10, 16 }
  0x9f   : > { %13919 = vmatmul.mubr.msk.bf16.gmra.mxu1 %vm226_vm1, %v14458_v54  ;;  %13929 = vmatmul.mubr.msk.bf16.gmra.mxu0 %vm226_vm1, %v15209_v31  ;;  %v2700_v31 = vrot.slane %v2699_v49, 4  ;;  %v2716_v46 = vshll.u32 %v12623_v7, 16  ;;  %v2720_v50 = vshrl.u32 %v12623_v7, 16  ;;  %v2726_v51 = vshll.u32 %v12624_v2, 16  ;;  %v12628_v49 = vld [vmem:[%s14598_s6 + $0x84] sm:$0xf] }
  0xa0   : > { %13958 = vmatprep.mubr.msk.bf16.mxu1 %vm226_vm1, %v12744_v28  ;;  %13932 = vmatprep.mubr.msk.bf16.mxu0 %vm226_vm1, %v15244_v29  ;;  %v2707_v28 = vshrl.u32 %v12622_v10, 16  ;;  %v15326_v54 = vsel %vm14757_vm7, %v3391_v43, %v3392_v22  ;;  %v2712_v58 = vrot.slane %v2710_v45, 5  ;;  %v2731_v0 = vshrl.u32 %v12625_v47, 16 }
  0xa1   : > { %v2705_v29 = vsel %vm14627_vm4, %v2700_v31, %v2704_v19  ;;  %v2718_v59 = vrot.slane %v2716_v46, 5  ;;  %v12749_v56 = vcombine.low %v15316_v18, %v15326_v54  ;;  %v2722_v62 = vrot.slane %v2720_v50, 4  ;;  %v12700_v19 = vld [vmem:[%s14598_s6 + $0x60] sm:$0xe] }
  0xa2   : > { %v2709_v48 = vrot.slane %v2707_v28, 4  ;;  %v15322_v53 = vcombine.low %v2695_v38, %v2705_v29  ;;  %v2728_v63 = vrot.slane %v2726_v51, 5  ;;  %v2734_v35 = vshll.u32 %v12625_v47, 16  ;;  %v12629_v28 = vld [vmem:[%s14598_s6 + $0x88] sm:$0xf] }
  0xa3   : > { %v2740_v57 = vshll.u32 %v12626_v11, 16  ;;  %v2744_v1 = vshrl.u32 %v12626_v11, 16  ;;  %v2723_v5 = vor.u32 %v2722_v62, %v2718_v59  ;;  %v2733_v14 = vrot.slane %v2731_v0, 4  ;;  %v12630_v47 = vld [vmem:[%s14598_s6 + $0x8c] sm:$0x1] }
  0xa4   : > { %v2713_v24 = vor.u32 %v2712_v58, %v2709_v48  ;;  %v2750_v15 = vshll.u32 %v12627_v60, 16  ;;  %v12733_v16 = vrot.slane %v12697_v12, 9  ;;  %v2736_v8 = vrot.slane %v2734_v35, 5  ;;  %v12631_v48 = vld [vmem:[%s14598_s6 + $0x90] sm:$0xf] }
  0xa5   : > { %v2742_v25 = vrot.slane %v2740_v57, 5  ;;  %v2746_v32 = vrot.slane %v2744_v1, 4  ;;  %v2724_v23 = vrot.slane %v2723_v5, 4  ;;  %v3396_v10 = vrot.slane %v12698_v3, 5  ;;  %v12633_v60 = vld [vmem:[%s14598_s6 + $0x98] sm:$0x1] }
  0xa6   : > { %v2714_v20 = vrot.slane %v2713_v24, 4  ;;  %v2752_v21 = vrot.slane %v2750_v15, 5  ;;  %v3399_v13 = vrot.slane %v12699_v4, 5  ;;  %v2737_v17 = vor.u32 %v2736_v8, %v2733_v14  ;;  %v12703_v3 = vld [vmem:[%s14598_s6 + $0x6c] sm:$0xe] }
  0xa7   : > { %13959 = vmatmul.mubr.msk.bf16.vlgmr.msra.gmra.mxu1 %vm226_vm1, %v12745_v40  ;;  %13933 = vmatmul.mubr.msk.bf16.gmra.mxu0 %vm226_vm1, %v15264_v42  ;;  %v12701_v40 = vld [vmem:[%s14598_s6 + $0x64] sm:$0xf]  ;;  %v2747_v27 = vor.u32 %v2746_v32, %v2742_v25  ;;  %v2729_v55 = vsel %vm14627_vm4, %v2724_v23, %v2728_v63  ;;  %v15355_v7 = vsel %vm14757_vm7, %v12733_v16, %v3396_v10  ;;  %v3406_v22 = vrot.slane %v12702_v26, 5  ;;  %v15388_v24 = vld [vmem:[%s18498_s1 + $0xe] sm:$0x3] }
  0xa8   : > { %13962 = vmatprep.mubr.msk.bf16.mxu1 %vm226_vm1, %v12746_v33  ;;  %13936 = vmatprep.mubr.msk.bf16.mxu0 %vm226_vm1, %v12653_v36  ;;  %v2719_v42 = vsel %vm14627_vm4, %v2714_v20, %v2718_v59  ;;  %v12734_v33 = vrot.slane %v12700_v19, 9  ;;  %v3398_v36 = vrot.slane %v3396_v10, 4  ;;  %v3403_v38 = vrot.slane %v12701_v40, 5  ;;  %v12632_v59 = vld [vmem:[%s14598_s6 + $0x94] sm:$0xf] }
  0xa9   : > { %v12655_v61 = vcombine.low %v2719_v42, %v2729_v55  ;;  %v2738_v2 = vrot.slane %v2737_v17, 4  ;;  %v2748_v31 = vrot.slane %v2747_v27, 4  ;;  %v2755_v29 = vshrl.u32 %v12628_v49, 16  ;;  %v12704_v57 = vld [vmem:[%s14598_s6 + $0x70] sm:$0xf]  ;;  %14405 = vmatprep.subr.msk.bf16.mxu1 %vm452_vm0, %v15388_v24 }
  0xaa   : > { %v15360_v43 = vsel %vm14757_vm7, %v3398_v36, %v3399_v13  ;;  %v15364_v45 = vsel %vm14757_vm7, %v12734_v33, %v3403_v38  ;;  %v3405_v46 = vrot.slane %v3403_v38, 4  ;;  %v2758_v58 = vshll.u32 %v12628_v49, 16  ;;  %v12705_v14 = vld [vmem:[%s14598_s6 + $0x74] sm:$0x1]  ;;  %v12706_v16 = vld [vmem:[%s14598_s6 + $0x78] sm:$0xe] }
  0xab   : > { %v2743_v50 = vsel %vm14627_vm4, %v2738_v2, %v2742_v25  ;;  %v2753_v51 = vsel %vm14627_vm4, %v2748_v31, %v2752_v21  ;;  %v12750_v11 = vcombine.low %v15355_v7, %v15360_v43  ;;  %v2757_v63 = vrot.slane %v2755_v29, 4  ;;  %v12707_v32 = vld [vmem:[%s14598_s6 + $0x7c] sm:$0xf]  ;;  %v12708_v13 = vld [vmem:[%s14598_s6 + $0x80] sm:$0x1] }
  0xac   : > { %v12656_v12 = vcombine.low %v2743_v50, %v2753_v51  ;;  %v15382_v62 = vsel %vm14757_vm7, %v3405_v46, %v3406_v22  ;;  %v2764_v0 = vshll.u32 %v12629_v28, 16  ;;  %v2760_v44 = vrot.slane %v2758_v58, 5  ;;  %v12634_v33 = vld [vmem:[%s14598_s6 + $0x9c] sm:$0xf]  ;;  %v12635_v38 = vld [vmem:[%s14598_s6 + $0xa0] sm:$0xf] }
  0xad   : > { %v12751_v30 = vcombine.low %v15364_v45, %v15382_v62  ;;  %v2774_v35 = vshll.u32 %v12630_v47, 16  ;;  %v2779_v4 = vshrl.u32 %v12631_v48, 16  ;;  %v2782_v5 = vshll.u32 %v12631_v48, 16  ;;  %v12638_v51 = vld [vmem:[%s14598_s6 + $0xac] sm:$0xf] }
  0xae   : > { %v2766_v1 = vrot.slane %v2764_v0, 5  ;;  %v2761_v9 = vor.u32 %v2760_v44, %v2757_v63  ;;  %v2792_v15 = vshrl.u32 %v12632_v59, 16  ;;  %v2798_v25 = vshll.u32 %v12633_v60, 16  ;;  %v15437_v63 = vld [vmem:[%s18498_s1 + $0x10] sm:$0x3] }
  0xaf   : > { %13963 = vmatmul.mubr.msk.bf16.gmra.mxu1 %vm226_vm1, %v12747_v37  ;;  %13937 = vmatmul.mubr.msk.bf16.gmra.mxu0 %vm226_vm1, %v15322_v53  ;;  %v2768_v37 = vshrl.u32 %v12629_v28, 16  ;;  %v2788_v53 = vshll.u32 %v12632_v59, 16  ;;  %v2781_v19 = vrot.slane %v2779_v4, 4  ;;  %v2784_v20 = vrot.slane %v2782_v5, 5  ;;  %v12636_v28 = vld [vmem:[%s14598_s6 + $0xa4] sm:$0x1] }
  0xb0   : > { %13966 = vmatprep.mubr.msk.bf16.mxu1 %vm226_vm1, %v12748_v6  ;;  %13940 = vmatprep.mubr.msk.bf16.mxu0 %vm226_vm1, %v12655_v61  ;;  %v2776_v6 = vrot.slane %v2774_v35, 5  ;;  %v2762_v40 = vrot.slane %v2761_v9, 4  ;;  %v2794_v21 = vrot.slane %v2792_v15, 4  ;;  %v12735_v10 = vrot.slane %v12703_v3, 9  ;;  %v12709_v5 = vld [vmem:[%s14598_s6 + $0x84] sm:$0xe] }
  0xb1   : > { %v2770_v41 = vrot.slane %v2768_v37, 4  ;;  %v2790_v8 = vrot.slane %v2788_v53, 5  ;;  %v2785_v26 = vor.u32 %v2784_v20, %v2781_v19  ;;  %v2800_v42 = vrot.slane %v2798_v25, 5  ;;  %14406 = vmatprep.subr.msk.bf16.mxu0 %vm452_vm0, %v15437_v63 }
  0xb2   : > { %v3410_v17 = vrot.slane %v12704_v57, 5  ;;  %v3413_v27 = vrot.slane %v12705_v14, 5  ;;  %v2767_v49 = vsel %vm14627_vm4, %v2762_v40, %v2766_v1  ;;  %v12736_v36 = vrot.slane %v12706_v16, 9 }
  0xb3   : > { %v2771_v23 = vor.u32 %v2770_v41, %v2766_v1  ;;  %v2795_v7 = vor.u32 %v2794_v21, %v2790_v8  ;;  %v2786_v61 = vrot.slane %v2785_v26, 4  ;;  %v3417_v22 = vrot.slane %v12707_v32, 5  ;;  %v12712_v21 = vld [vmem:[%s14598_s6 + $0x90] sm:$0xe] }
  0xb4   : > { %v3411_v2 = vsel %vm14757_vm7, %v12735_v10, %v3410_v17  ;;  %v3412_v31 = vrot.slane %v3410_v17, 4  ;;  %v3420_v18 = vrot.slane %v12708_v13, 5  ;;  %v2803_v54 = vshrl.u32 %v12634_v33, 16  ;;  %v12713_v10 = vld [vmem:[%s14598_s6 + $0x94] sm:$0xf] }
  0xb5   : > { %v2772_v55 = vrot.slane %v2771_v23, 4  ;;  %v2796_v46 = vrot.slane %v2795_v7, 4  ;;  %v2791_v29 = vsel %vm14627_vm4, %v2786_v61, %v2790_v8  ;;  %v15428_v50 = vsel %vm14757_vm7, %v12736_v36, %v3417_v22  ;;  %v12711_v8 = vld [vmem:[%s14598_s6 + $0x8c] sm:$0x1] }
  0xb6   : > { %v3414_v48 = vsel %vm14757_vm7, %v3412_v31, %v3413_v27  ;;  %v3419_v59 = vrot.slane %v3417_v22, 4  ;;  %v2805_v60 = vrot.slane %v2803_v54, 4  ;;  %v2806_v3 = vshll.u32 %v12634_v33, 16  ;;  %v12714_v27 = vld [vmem:[%s14598_s6 + $0x98] sm:$0x1] }
  0xb7   : > { %13967 = vmatmul.mubr.msk.bf16.gmra.mxu1 %vm226_vm1, %v12749_v56  ;;  %13941 = vmatmul.mubr.msk.bf16.gmra.mxu0 %vm226_vm1, %v12656_v12  ;;  %v2777_v43 = vsel %vm14627_vm4, %v2772_v55, %v2776_v6  ;;  %v12637_v56 = vld [vmem:[%s14598_s6 + $0xa8] sm:$0xf]  ;;  %v12752_v58 = vcombine.low %v3411_v2, %v3414_v48  ;;  %v12639_v12 = vld [vmem:[%s14598_s6 + $0xb0] sm:$0x1]  ;;  %v2812_v44 = vshll.u32 %v12635_v38, 16  ;;  %v2816_v37 = vshrl.u32 %v12635_v38, 16 }
  0xb8   : > { %13970 = vmatprep.mubr.msk.bf16.mxu1 %vm226_vm1, %v12750_v11  ;;  %v12657_v47 = vcombine.low %v2767_v49, %v2777_v43  ;;  %v2801_v11 = vsel %vm14627_vm4, %v2796_v46, %v2800_v42  ;;  %v3421_v35 = vsel %vm14757_vm7, %v3419_v59, %v3420_v18  ;;  %v2822_v57 = vshll.u32 %v12636_v28, 16  ;;  %v12710_v6 = vld [vmem:[%s14598_s6 + $0x88] sm:$0xf]  ;;  %v12640_v49 = vld [vmem:[%s14598_s6 + $0xb4] sm:$0xf] }
  0xb9   : > { %v12658_v0 = vcombine.low %v2791_v29, %v2801_v11  ;;  %v2827_v1 = vshrl.u32 %v12637_v56, 16  ;;  %v2830_v4 = vshll.u32 %v12637_v56, 16  ;;  %v12753_v53 = vcombine.low %v15428_v50, %v3421_v35  ;;  %v12641_v54 = vld [vmem:[%s14598_s6 + $0xb8] sm:$0xf]  ;;  %v12642_v56 = vld [vmem:[%s14598_s6 + $0xbc] sm:$0x1] }
  0xba   : > { %13944 = vmatprep.mubr.msk.bf16.mxu0 %vm226_vm1, %v12657_v47  ;;  %v2808_v14 = vrot.slane %v2806_v3, 5  ;;  %v2814_v9 = vrot.slane %v2812_v44, 5  ;;  %v2818_v41 = vrot.slane %v2816_v37, 4  ;;  %v2824_v15 = vrot.slane %v2822_v57, 5  ;;  %v12644_v11 = vld [vmem:[%s14598_s6 + $0xc4] sm:$0xf] }
  0xbb   : > { %v2829_v16 = vrot.slane %v2827_v1, 4  ;;  %v2832_v19 = vrot.slane %v2830_v4, 5  ;;  %v2836_v20 = vshll.u32 %v12638_v51, 16  ;;  %v2840_v40 = vshrl.u32 %v12638_v51, 16  ;;  %v12643_v51 = vld [vmem:[%s14598_s6 + $0xc0] sm:$0xf] }
  0xbc   : > { %v2809_v25 = vor.u32 %v2808_v14, %v2805_v60  ;;  %v2819_v32 = vor.u32 %v2818_v41, %v2814_v9  ;;  %v2846_v23 = vshll.u32 %v12639_v12, 16  ;;  %v12737_v42 = vrot.slane %v12709_v5, 9  ;;  %v12715_v35 = vld [vmem:[%s14598_s6 + $0x9c] sm:$0xe]  ;;  %v12716_v14 = vld [vmem:[%s14598_s6 + $0xa0] sm:$0xf] }
  0xbd   : > { %v2833_v13 = vor.u32 %v2832_v19, %v2829_v16  ;;  %v2838_v26 = vrot.slane %v2836_v20, 5  ;;  %v3424_v17 = vrot.slane %v12710_v6, 5  ;;  %v2842_v62 = vrot.slane %v2840_v40, 4  ;;  %v12718_v16 = vld [vmem:[%s14598_s6 + $0xa8] sm:$0xe] }
  0xbe   : > { %v2810_v33 = vrot.slane %v2809_v25, 4  ;;  %v2820_v45 = vrot.slane %v2819_v32, 4  ;;  %v3427_v38 = vrot.slane %v12711_v8, 5  ;;  %v12738_v22 = vrot.slane %v12712_v21, 9 }
  0xbf   : > { %13971 = vmatmul.mubr.msk.bf16.gmra.mxu1 %vm226_vm1, %v12751_v30  ;;  %13945 = vmatmul.mubr.msk.bf16.gmra.mxu0 %vm226_vm1, %v12658_v0  ;;  %v2848_v30 = vrot.slane %v2846_v23, 5  ;;  %v2834_v55 = vrot.slane %v2833_v13, 4  ;;  %v3425_v7 = vsel %vm14757_vm7, %v12737_v42, %v3424_v17  ;;  %v3426_v36 = vrot.slane %v3424_v17, 4  ;;  %v12645_v0 = vld [vmem:[%s14598_s6 + $0xc8] sm:$0x1] }
  0xc0   : > { %13974 = vmatprep.mubr.msk.bf16.mxu1 %vm226_vm1, %v12752_v58  ;;  %v2815_v61 = vsel %vm14627_vm4, %v2810_v33, %v2814_v9  ;;  %v2825_v2 = vsel %vm14627_vm4, %v2820_v45, %v2824_v15  ;;  %v2843_v31 = vor.u32 %v2842_v62, %v2838_v26  ;;  %v3431_v18 = vrot.slane %v12713_v10, 5  ;;  %v12717_v15 = vld [vmem:[%s14598_s6 + $0xa4] sm:$0x1]  ;;  %v12719_v17 = vld [vmem:[%s14598_s6 + $0xac] sm:$0xf] }
  0xc1   : > { %v12659_v28 = vcombine.low %v2815_v61, %v2825_v2  ;;  %v2839_v43 = vsel %vm14627_vm4, %v2834_v55, %v2838_v26  ;;  %v3428_v46 = vsel %vm14757_vm7, %v3426_v36, %v3427_v38  ;;  %v3434_v48 = vrot.slane %v12714_v27, 5  ;;  %v293_v27 = vld [vmem:[#allocation2 + $0x10] sm:$0xff]  ;;  %v12722_v2 = vld [vmem:[%s14598_s6 + $0xb8] sm:$0xf] }
  0xc2   : > { %v2844_v47 = vrot.slane %v2843_v31, 4  ;;  %v12754_v29 = vcombine.low %v3425_v7, %v3428_v46  ;;  %v4808_v50 = vsel %vm452_vm0, %v15388_v24, 0  ;;  %v3432_v58 = vsel %vm14757_vm7, %v12738_v22, %v3431_v18  ;;  %v12721_v61 = vld [vmem:[%s14598_s6 + $0xb4] sm:$0xe] }
  0xc3   : > { %13948 = vmatprep.mubr.msk.bf16.mxu0 %vm226_vm1, %v12659_v28  ;;  %v3433_v59 = vrot.slane %v3431_v18, 4  ;;  %14025 = vmatpush3.bf16.msra.mxu1 %v4808_v50  ;;  %v2851_v60 = vshrl.u32 %v12640_v49, 16  ;;  %v2854_v12 = vshll.u32 %v12640_v49, 16  ;;  %v2860_v24 = vshll.u32 %v12641_v54, 16  ;;  %v12720_v49 = vld [vmem:[%s14598_s6 + $0xb0] sm:$0x1] }
  0xc4   : > { %v2849_v3 = vsel %vm14627_vm4, %v2844_v47, %v2848_v30  ;;  %v2864_v44 = vshrl.u32 %v12641_v54, 16  ;;  %v2870_v37 = vshll.u32 %v12642_v56, 16  ;;  %v2875_v20 = vshrl.u32 %v12643_v51, 16  ;;  %v12723_v18 = vld [vmem:[%s14598_s6 + $0xbc] sm:$0x1]  ;;  %v291_v50 = vld [vmem:[#allocation2] sm:$0xff] }
  0xc5   : > { %v12660_v57 = vcombine.low %v2839_v43, %v2849_v3  ;;  %v3435_v1 = vsel %vm14757_vm7, %v3433_v59, %v3434_v48  ;;  %v2853_v4 = vrot.slane %v2851_v60, 4  ;;  %v2856_v5 = vrot.slane %v2854_v12, 5  ;;  %v12724_v54 = vld [vmem:[%s14598_s6 + $0xc0] sm:$0xe]  ;;  %v14459_v59 = vld [vmem:[%s14598_s6 + $0x18] sm:$0xff]  }
  0xc6   : > { %v12755_v9 = vcombine.low %v3432_v58, %v3435_v1  ;;  %v2866_v41 = vrot.slane %v2864_v44, 4  ;;  %v2872_v6 = vrot.slane %v2870_v37, 5  ;;  %v2878_v8 = vshll.u32 %v12643_v51, 16  ;;  %v12725_v51 = vld [vmem:[%s14598_s6 + $0xc4] sm:$0xf] }
  0xc7   : > { %13975 = vmatmul.mubr.msk.bf16.gmra.mxu1 %vm226_vm1, %v12753_v53  ;;  %v2862_v53 = vrot.slane %v2860_v24, 5  ;;  %13949 = vmatmul.mubr.msk.bf16.gmra.mxu0 %vm226_vm1, %v12660_v57  ;;  %v2857_v19 = vor.u32 %v2856_v5, %v2853_v4  ;;  %v2884_v25 = vshll.u32 %v12644_v11, 16  ;;  %v2888_v40 = vshrl.u32 %v12644_v11, 16  ;;  %v294_v57 = vld [vmem:[#allocation2 + $0x18] sm:$0xff] }
  0xc8   : > { %13978 = vmatprep.mubr.msk.bf16.mxu1 %vm226_vm1, %v12754_v29  ;;  %v2894_v23 = vshll.u32 %v12645_v0, 16  ;;  %v12739_v21 = vrot.slane %v12715_v35, 9  ;;  %v2877_v13 = vrot.slane %v2875_v20, 4  ;;  %v2880_v26 = vrot.slane %v2878_v8, 5  ;;  %v12726_v35 = vld [vmem:[%s14598_s6 + $0xc8] sm:$0x1] }
  0xc9   : > { %v2867_v32 = vor.u32 %v2866_v41, %v2862_v53  ;;  %v2858_v10 = vrot.slane %v2857_v19, 4  ;;  %v2886_v42 = vrot.slane %v2884_v25, 5  ;;  %v2890_v45 = vrot.slane %v2888_v40, 4  ;;  %v297_v19 = vld [vmem:[#allocation2 + $0x30] sm:$0xff]  ;;  %v12842_v20 = vld [vmem:[%s14598_s6 + $0x1c] sm:$0xf] }
  0xca   : > { %v2896_v62 = vrot.slane %v2894_v23, 5  ;;  %v3438_v30 = vrot.slane %v12716_v14, 5  ;;  %v2881_v7 = vor.u32 %v2880_v26, %v2877_v13  ;;  %v3441_v36 = vrot.slane %v12717_v15, 5  ;;  %v12844_v13 = vld [vmem:[%s14598_s6 + $0x24] sm:$0xf] }
  0xcb   : > { %v2868_v33 = vrot.slane %v2867_v32, 4  ;;  %v2863_v55 = vsel %vm14627_vm4, %v2858_v10, %v2862_v53  ;;  %v12740_v38 = vrot.slane %v12718_v16, 9  ;;  %v2891_v22 = vor.u32 %v2890_v45, %v2886_v42  ;;  %v12841_v53 = vld [vmem:[%s14598_s6 + $0x18] sm:$0xf]  ;;  %v295_v10 = vld [vmem:[#allocation2 + $0x20] sm:$0xff] }
  0xcc   : > { %v3439_v28 = vsel %vm14757_vm7, %v12739_v21, %v3438_v30  ;;  %v3440_v43 = vrot.slane %v3438_v30, 4  ;;  %v2882_v47 = vrot.slane %v2881_v7, 4  ;;  %v3445_v29 = vrot.slane %v12719_v17, 5  ;;  %v12843_v21 = vld [vmem:[%s14598_s6 + $0x20] sm:$0x1] }
  0xcd   : > { %v2873_v31 = vsel %vm14627_vm4, %v2868_v33, %v2872_v6  ;;  %v3448_v48 = vrot.slane %v12720_v49, 5  ;;  %v2892_v11 = vrot.slane %v2891_v22, 4  ;;  %v15508_v12 = vsel %vm452_vm0, %v15437_v63, 0 }
  0xce   : > { %v12661_v56 = vcombine.low %v2863_v55, %v2873_v31  ;;  %v3442_v58 = vsel %vm14757_vm7, %v3440_v43, %v3441_v36  ;;  %v2887_v3 = vsel %vm14627_vm4, %v2882_v47, %v2886_v42  ;;  %v3446_v44 = vsel %vm14757_vm7, %v12740_v38, %v3445_v29 }
  0xcf   : > { %13979 = vmatmul.mubr.msk.bf16.gmra.mxu1 %vm226_vm1, %v12755_v9  ;;  %v12756_v24 = vcombine.low %v3439_v28, %v3442_v58  ;;  %v3447_v37 = vrot.slane %v3445_v29, 4  ;;  %v2897_v1 = vsel %vm14627_vm4, %v2892_v11, %v2896_v62  ;;  %v12741_v63 = vrot.slane %v12721_v61, 9  ;;  %v292_v9 = vld [vmem:[#allocation2 + $0x8] sm:$0xff] }
  0xd0   : > { %13952 = vmatprep.mubr.msk.bf16.mxu0 %vm226_vm1, %v12661_v56  ;;  %v3452_v4 = vrot.slane %v12722_v2, 5  ;;  %v3455_v5 = vrot.slane %v12723_v18, 5  ;;  %v12662_v41 = vcombine.low %v2887_v3, %v2897_v1  ;;  %v12742_v16 = vrot.slane %v12724_v54, 9  ;;  %v12845_v61 = vld [vmem:[%s14598_s6 + $0x28] sm:$0xf]  ;;  %v301_v3 = vld [vmem:[#allocation2 + $0x50] sm:$0xff] }
  0xd1   : > { %v13790_v46 = vpop.f32.mrf.mxu0  ;;  %13982 = vmatprep.mubr.msk.bf16.mxu1 %vm226_vm1, %v12756_v24  ;;  %v3449_v6 = vsel %vm14757_vm7, %v3447_v37, %v3448_v48  ;;  %v3459_v40 = vrot.slane %v12725_v51, 5  ;;  %v3462_v26 = vrot.slane %v12726_v35, 5  ;;  %v4297_v49 = vshll.u32 %v12841_v53, 16  ;;  %v14460_v18 = vld [vmem:[%s14598_s6 + $0x24] sm:$0xff]   ;;  %v298_v48 = vld [vmem:[#allocation2 + $0x38] sm:$0xff] }
  0xd2   : > { %v619_v60 = vadd.f32 %v13790_v46, %v293_v27  ;;  %v12757_v8 = vcombine.low %v3446_v44, %v3449_v6  ;;  %v3453_v25 = vsel %vm14757_vm7, %v12741_v63, %v3452_v4  ;;  %v3454_v32 = vrot.slane %v3452_v4, 4  ;;  %13953 = vmatmul.mubr.msk.bf16.gmra.mxu0 %vm226_vm1, %v12662_v41  ;;  %v12846_v46 = vld [vmem:[%s14598_s6 + $0x2c] sm:$0x1] }
  0xd3   : > { %v490_v0 = vpop.f32.mrf.mxu0  ;;  %v4294_v27 = vshrl.u32 %v12841_v53, 16  ;;  %13992 = vmatprep.mubr.msk.bf16.mxu0 %vm226_vm1, %v14459_v59  ;;  %v3460_v45 = vsel %vm14757_vm7, %v12742_v16, %v3459_v40  ;;  %v3461_v62 = vrot.slane %v3459_v40, 4  ;;  %v4303_v38 = vshll.u32 %v12842_v20, 16 }
  0xd4   : > { %651 = vst.msk [vmem:[#allocation2 + $0x10] sm:$0xff] %vm226_vm1, %v619_v60  ;;  %v617_v15 = vadd.f32 %v490_v0, %v291_v50  ;;  %v3456_v33 = vsel %vm14757_vm7, %v3454_v32, %v3455_v5  ;;  %v4299_v31 = vrot.slane %v4297_v49, 5  ;;  %v4307_v22 = vshrl.u32 %v12842_v20, 16  ;;  %v14461_v50 = vld [vmem:[%s14598_s6 + $0x30] sm:$0xff]   ;;  %v296_v0 = vld [vmem:[#allocation2 + $0x28] sm:$0xff]  ;;  %v14462_v49 = vld [vmem:[%s14598_s6 + $0x3c] sm:$0xff]  }
  0xd5   : > { %v13791_v14 = vpop.f32.mrf.mxu0  ;;  %v12758_v55 = vcombine.low %v3453_v25, %v3456_v33  ;;  %v4296_v36 = vrot.slane %v4294_v27, 4  ;;  %v3463_v2 = vsel %vm14757_vm7, %v3461_v62, %v3462_v26  ;;  %v4313_v28 = vshll.u32 %v12843_v21, 16  ;;  %v12849_v32 = vld [vmem:[%s14598_s6 + $0x38] sm:$0x1] }
  0xd6   : > { %649 = vst.msk [vmem:[#allocation2] sm:$0xff] %vm226_vm1, %v617_v15  ;;  %v620_v42 = vadd.f32 %v13791_v14, %v294_v57  ;;  %v12759_v54 = vcombine.low %v3460_v45, %v3463_v2  ;;  %v4305_v56 = vrot.slane %v4303_v38, 5  ;;  %v4318_v29 = vshrl.u32 %v12844_v13, 16  ;;  %v12847_v57 = vld [vmem:[%s14598_s6 + $0x30] sm:$0xf]  ;;  %v299_v45 = vld [vmem:[#allocation2 + $0x40] sm:$0xff] }
  0xd7   : > { %v493_v23 = vpop.f32.mrf.mxu0  ;;  %13983 = vmatmul.mubr.msk.bf16.gmra.mxu1 %vm226_vm1, %v12757_v8  ;;  %v4300_v51 = vor.u32 %v4299_v31, %v4296_v36  ;;  %v4309_v11 = vrot.slane %v4307_v22, 4  ;;  %v4315_v58 = vrot.slane %v4313_v28, 5  ;;  %v4321_v59 = vshll.u32 %v12844_v13, 16  ;;  %v14463_v28 = vld [vmem:[%s14598_s6 + $0x48] sm:$0xff]  }
  0xd8   : > { %v618_v17 = vadd.f32 %v493_v23, %v292_v9  ;;  %652 = vst.msk [vmem:[#allocation2 + $0x18] sm:$0xff] %vm226_vm1, %v620_v42  ;;  %13986 = vmatprep.mubr.msk.bf16.mxu1 %vm226_vm1, %v12758_v55  ;;  %v4320_v24 = vrot.slane %v4318_v29, 4  ;;  %v4327_v44 = vshll.u32 %v12845_v61, 16  ;;  %v4331_v37 = vshrl.u32 %v12845_v61, 16  ;;  %v12848_v9 = vld [vmem:[%s14598_s6 + $0x34] sm:$0xf] }
  0xd9   : > { %v13794_v30 = vpop.f32.mrf.mxu0  ;;  %v4337_v35 = vshll.u32 %v12846_v46, 16  ;;  %v4301_v1 = vrot.slane %v4300_v51, 4  ;;  %v4310_v63 = vor.u32 %v4309_v11, %v4305_v56  ;;  %v4323_v4 = vrot.slane %v4321_v59, 5  ;;  %v12852_v11 = vld [vmem:[%s14598_s6 + $0x44] sm:$0x1]  ;;  %v300_v59 = vld [vmem:[#allocation2 + $0x48] sm:$0xff] }
  0xda   : > { %650 = vst.msk [vmem:[#allocation2 + $0x8] sm:$0xff] %vm226_vm1, %v618_v17  ;;  %v623_v7 = vadd.f32 %v13794_v30, %v297_v19  ;;  %13993 = vmatmul.mubr.msk.bf16.vlgmr.msra.gmra.mxu0 %vm226_vm1, %v14460_v18  ;;  %v4329_v41 = vrot.slane %v4327_v44, 5  ;;  %v4333_v6 = vrot.slane %v4331_v37, 4  ;;  %v4342_v40 = vshrl.u32 %v12847_v57, 16  ;;  %v12850_v30 = vld [vmem:[%s14598_s6 + $0x3c] sm:$0xf] }
  0xdb   : > { %v506_v43 = vpop.f32.mrf.mxu0  ;;  %v1118_v53 = vld [vmem:[#allocation2 + $0x10] sm:$0xff]  ;;  %v4339_v15 = vrot.slane %v4337_v35, 5  ;;  %14059 = vmatpush3.bf16.msra.mxu0 %v15508_v12  ;;  %v4306_v19 = vsel %vm14627_vm4, %v4301_v1, %v4305_v56  ;;  %v4311_v20 = vrot.slane %v4310_v63, 4  ;;  %v4324_v8 = vor.u32 %v4323_v4, %v4320_v24  ;;  %13996 = vmatprep.mubr.msk.bf16.mxu0 %vm226_vm1, %v14461_v50  ;;  %v12851_v18 = vld [vmem:[%s14598_s6 + $0x40] sm:$0xf] }
  0xdc   : > { %655 = vst.msk [vmem:[#allocation2 + $0x30] sm:$0xff] %vm226_vm1, %v623_v7  ;;  %v621_v47 = vadd.f32 %v506_v43, %v295_v10  ;;  %v4334_v21 = vor.u32 %v4333_v6, %v4329_v41  ;;  %v4345_v13 = vshll.u32 %v12847_v57, 16  ;;  %v4351_v26 = vshll.u32 %v12848_v9, 16  ;;  %v305_v37 = vld [vmem:[#allocation2 + $0x70] sm:$0xff] }
  0xdd   : > { %v13795_v60 = vpop.f32.mrf.mxu0  ;;  %v1116_v10 = vld [vmem:[#allocation2] sm:$0xff]  ;;  %v4316_v42 = vsel %vm14627_vm4, %v4311_v20, %v4315_v58  ;;  %v4325_v27 = vrot.slane %v4324_v8, 4  ;;  %v4344_v33 = vrot.slane %v4342_v40, 4  ;;  %v4355_v43 = vshrl.u32 %v12848_v9, 16 }
  0xde   : > { %653 = vst.msk [vmem:[#allocation2 + $0x20] sm:$0xff] %vm226_vm1, %v621_v47  ;;  %v624_v5 = vadd.f32 %v13795_v60, %v298_v48  ;;  %v12890_v55 = vcombine.low %v4306_v19, %v4316_v42  ;;  %v4335_v7 = vrot.slane %v4334_v21, 4  ;;  %v4347_v61 = vrot.slane %v4345_v13, 5 }
  0xdf   : > { %v509_v14 = vpop.f32.mrf.mxu0  ;;  %13987 = vmatmul.mubr.msk.bf16.gmra.mxu1 %vm226_vm1, %v12759_v54  ;;  %v1119_v38 = vld [vmem:[#allocation2 + $0x18] sm:$0xff]  ;;  %v15563_v2 = vrot.slane %v4351_v26, 5  ;;  %v4330_v31 = vsel %vm14627_vm4, %v4325_v27, %v4329_v41  ;;  %v4361_v46 = vshll.u32 %v12849_v32, 16  ;;  %v4366_v58 = vshrl.u32 %v12850_v30, 16 }
  0xe0   : > { %v622_v16 = vadd.f32 %v509_v14, %v296_v0  ;;  %656 = vst.msk [vmem:[#allocation2 + $0x38] sm:$0xff] %vm226_vm1, %v624_v5  ;;  %v13824_v23 = vpop.f32.mrf.mxu1  ;;  %v302_v54 = vld [vmem:[#allocation2 + $0x58] sm:$0xff]  ;;  %14026 = vmatprep.mubr.msk.bf16.mxu1 %vm226_vm1, %v12890_v55  ;;  %v4340_v47 = vsel %vm14627_vm4, %v4335_v7, %v4339_v15  ;;  %v4348_v50 = vor.u32 %v4347_v61, %v4344_v33  ;;  %v4369_v63 = vshll.u32 %v12850_v30, 16  ;;  %v12853_v5 = vld [vmem:[%s14598_s6 + $0x48] sm:$0xf] }
  0xe1   : > { %v13798_v25 = vpop.f32.mrf.mxu0  ;;  %v1412_v17 = vadd.f32 %v13824_v23, %v1118_v53  ;;  %v1117_v48 = vld [vmem:[#allocation2 + $0x8] sm:$0xff]  ;;  %v12891_v60 = vcombine.low %v4330_v31, %v4340_v47  ;;  %v4363_v24 = vrot.slane %v4361_v46, 5  ;;  %v4368_v1 = vrot.slane %v4366_v58, 4  ;;  %v12855_v55 = vld [vmem:[%s14598_s6 + $0x50] sm:$0x1] }
  0xe2   : > { %654 = vst.msk [vmem:[#allocation2 + $0x28] sm:$0xff] %vm226_vm1, %v622_v16  ;;  %v627_v12 = vadd.f32 %v13798_v25, %v301_v3  ;;  %v1283_v36 = vpop.f32.mrf.mxu1  ;;  %v4357_v3 = vrot.slane %v4355_v43, 4  ;;  %13997 = vmatmul.mubr.msk.bf16.gmra.mxu0 %vm226_vm1, %v14462_v49  ;;  %v4349_v57 = vrot.slane %v4348_v50, 4  ;;  %v4375_v4 = vshll.u32 %v12851_v18, 16  ;;  %v12854_v15 = vld [vmem:[%s14598_s6 + $0x4c] sm:$0xf] }
  0xe3   : > { %v522_v62 = vpop.f32.mrf.mxu0  ;;  %1444 = vst.msk [vmem:[#allocation2 + $0x10] sm:$0xff] %vm226_vm1, %v1412_v17  ;;  %v1410_v22 = vadd.f32 %v1283_v36, %v1116_v10  ;;  %14000 = vmatprep.mubr.msk.bf16.mxu0 %vm226_vm1, %v14463_v28  ;;  %v4379_v53 = vshrl.u32 %v12851_v18, 16  ;;  %v4385_v41 = vshll.u32 %v12852_v11, 16  ;;  %v1122_v19 = vld [vmem:[#allocation2 + $0x30] sm:$0xff]  ;;  %v4371_v20 = vrot.slane %v4369_v63, 5  ;;  %v14465_v17 = vld [vmem:[%s14598_s6 + $0x60] sm:$0xff]  }
  0xe4   : > { %659 = vst.msk [vmem:[#allocation2 + $0x50] sm:$0xff] %vm226_vm1, %v627_v12  ;;  %v13825_v29 = vpop.f32.mrf.mxu1  ;;  %v625_v51 = vadd.f32 %v522_v62, %v299_v45  ;;  %v4358_v9 = vor.u32 %v4357_v3, %v15563_v2  ;;  %v4354_v16 = vsel %vm14627_vm4, %v4349_v57, %v15563_v2  ;;  %v4377_v8 = vrot.slane %v4375_v4, 5  ;;  %v14464_v12 = vld [vmem:[%s14598_s6 + $0x54] sm:$0xff]   ;;  %v303_v36 = vld [vmem:[#allocation2 + $0x60] sm:$0xff] }
  0xe5   : > { %v13799_v56 = vpop.f32.mrf.mxu0  ;;  %1442 = vst.msk [vmem:[#allocation2] sm:$0xff] %vm226_vm1, %v1410_v22  ;;  %v1413_v0 = vadd.f32 %v13825_v29, %v1119_v38  ;;  %v4381_v40 = vrot.slane %v4379_v53, 4  ;;  %v4387_v23 = vrot.slane %v4385_v41, 5  ;;  %v4372_v26 = vor.u32 %v4371_v20, %v4368_v1  ;;  %v1120_v42 = vld [vmem:[#allocation2 + $0x20] sm:$0xff]  ;;  %v12856_v38 = vld [vmem:[%s14598_s6 + $0x54] sm:$0xf] }
  0xe6   : > { %v1286_v35 = vpop.f32.mrf.mxu1  ;;  %657 = vst.msk [vmem:[#allocation2 + $0x40] sm:$0xff] %vm226_vm1, %v625_v51  ;;  %v628_v25 = vadd.f32 %v13799_v56, %v302_v54  ;;  %v4359_v32 = vrot.slane %v4358_v9, 4  ;;  %v4390_v33 = vshrl.u32 %v12853_v5, 16  ;;  %v4393_v45 = vshll.u32 %v12853_v5, 16  ;;  %v12857_v18 = vld [vmem:[%s14598_s6 + $0x58] sm:$0xf] }
  0xe7   : > { %v525_v44 = vpop.f32.mrf.mxu0  ;;  %14027 = vmatmul.mubr.msk.bf16.vlgmr.msra.gmra.mxu1 %vm226_vm1, %v12891_v60  ;;  %1445 = vst.msk [vmem:[#allocation2 + $0x18] sm:$0xff] %vm226_vm1, %v1413_v0  ;;  %v1411_v14 = vadd.f32 %v1286_v35, %v1117_v48  ;;  %v4382_v49 = vor.u32 %v4381_v40, %v4377_v8  ;;  %v4399_v7 = vshll.u32 %v12854_v15, 16  ;;  %v4373_v31 = vrot.slane %v4372_v26, 4  ;;  %v1123_v28 = vld [vmem:[#allocation2 + $0x38] sm:$0xff]  ;;  %v14466_v41 = vld [vmem:[%s14598_s6 + $0x6c] sm:$0xff]  }
  0xe8   : > { %v626_v21 = vadd.f32 %v525_v44, %v300_v59  ;;  %660 = vst.msk [vmem:[#allocation2 + $0x58] sm:$0xff] %vm226_vm1, %v628_v25  ;;  %v4364_v62 = vsel %vm14627_vm4, %v4359_v32, %v4363_v24  ;;  %v4392_v43 = vrot.slane %v4390_v33, 4  ;;  %v4395_v46 = vrot.slane %v4393_v45, 5  ;;  %v12858_v44 = vld [vmem:[%s14598_s6 + $0x5c] sm:$0x1]  ;;  %v309_v20 = vld [vmem:[#allocation2 + $0x90] sm:$0xff] }
  0xe9   : > { %v13802_v6 = vpop.f32.mrf.mxu0  ;;  %1443 = vst.msk [vmem:[#allocation2 + $0x8] sm:$0xff] %vm226_vm1, %v1411_v14  ;;  %v12892_v2 = vcombine.low %v4354_v16, %v4364_v62  ;;  %v4383_v54 = vrot.slane %v4382_v49, 4  ;;  %v15598_v47 = vrot.slane %v4399_v7, 5  ;;  %v4403_v29 = vshrl.u32 %v12854_v15, 16  ;;  %v1121_v11 = vld [vmem:[#allocation2 + $0x28] sm:$0xff]  ;;  %v306_v9 = vld [vmem:[#allocation2 + $0x78] sm:$0xff] }
  0xea   : > { %v13828_v13 = vpop.f32.mrf.mxu1  ;;  %v631_v27 = vadd.f32 %v13802_v6, %v305_v37  ;;  %658 = vst.msk [vmem:[#allocation2 + $0x48] sm:$0xff] %vm226_vm1, %v626_v21  ;;  %14001 = vmatmul.mubr.msk.bf16.gmra.mxu0 %vm226_vm1, %v14464_v12  ;;  %v4378_v50 = vsel %vm14627_vm4, %v4373_v31, %v4377_v8  ;;  %v4396_v58 = vor.u32 %v4395_v46, %v4392_v43  ;;  %v4409_v59 = vshll.u32 %v12855_v55, 16  ;;  %v12859_v12 = vld [vmem:[%s14598_s6 + $0x60] sm:$0xf] }
  0xeb   : > { %v538_v10 = vpop.f32.mrf.mxu0  ;;  %v1416_v30 = vadd.f32 %v13828_v13, %v1122_v19  ;;  %14030 = vmatprep.mubr.msk.bf16.mxu1 %vm226_vm1, %v12892_v2  ;;  %v4388_v0 = vsel %vm14627_vm4, %v4383_v54, %v4387_v23  ;;  %14004 = vmatprep.mubr.msk.bf16.mxu0 %vm226_vm1, %v14465_v17  ;;  %v4405_v24 = vrot.slane %v4403_v29, 4  ;;  %v4414_v37 = vshrl.u32 %v12856_v38, 16  ;;  %v1126_v5 = vld [vmem:[#allocation2 + $0x50] sm:$0xff]  ;;  %v304_v19 = vld [vmem:[#allocation2 + $0x68] sm:$0xff]  ;;  %v307_v29 = vld [vmem:[#allocation2 + $0x80] sm:$0xff] }
  0xec   : > { %v1299_v22 = vpop.f32.mrf.mxu1  ;;  %663 = vst.msk [vmem:[#allocation2 + $0x70] sm:$0xff] %vm226_vm1, %v631_v27  ;;  %v629_v60 = vadd.f32 %v538_v10, %v303_v36  ;;  %v12893_v57 = vcombine.low %v4378_v50, %v4388_v0  ;;  %v4397_v63 = vrot.slane %v4396_v58, 4  ;;  %v4411_v4 = vrot.slane %v4409_v59, 5  ;;  %v14467_v27 = vld [vmem:[%s14598_s6 + $0x78] sm:$0xff]   ;;  %v12860_v36 = vld [vmem:[%s14598_s6 + $0x64] sm:$0xf] }
  0xed   : > { %v13803_v61 = vpop.f32.mrf.mxu0  ;;  %1448 = vst.msk [vmem:[#allocation2 + $0x30] sm:$0xff] %vm226_vm1, %v1416_v30  ;;  %v1414_v56 = vadd.f32 %v1299_v22, %v1120_v42  ;;  %v4417_v14 = vshll.u32 %v12856_v38, 16  ;;  %v4406_v6 = vor.u32 %v4405_v24, %v15598_v47  ;;  %v4416_v15 = vrot.slane %v4414_v37, 4  ;;  %v1124_v10 = vld [vmem:[#allocation2 + $0x40] sm:$0xff]  ;;  %v12862_v58 = vld [vmem:[%s14598_s6 + $0x6c] sm:$0xf] }
  0xee   : > { %v13829_v51 = vpop.f32.mrf.mxu1  ;;  %661 = vst.msk [vmem:[#allocation2 + $0x60] sm:$0xff] %vm226_vm1, %v629_v60  ;;  %v4423_v16 = vshll.u32 %v12857_v18, 16  ;;  %v4402_v25 = vsel %vm14627_vm4, %v4397_v63, %v15598_v47  ;;  %v4427_v23 = vshrl.u32 %v12857_v18, 16  ;;  %v4433_v21 = vshll.u32 %v12858_v44, 16 }
  0xef   : > { %v541_v48 = vpop.f32.mrf.mxu0  ;;  %1446 = vst.msk [vmem:[#allocation2 + $0x20] sm:$0xff] %vm226_vm1, %v1414_v56  ;;  %v1417_v3 = vadd.f32 %v13829_v51, %v1123_v28  ;;  %14031 = vmatmul.mubr.msk.bf16.gmra.mxu1 %vm226_vm1, %v12893_v57  ;;  %v4419_v40 = vrot.slane %v4417_v14, 5  ;;  %v4407_v13 = vrot.slane %v4406_v6, 4  ;;  %v632_v17 = vadd.f32 %v13803_v61, %v306_v9  ;;  %v1127_v7 = vld [vmem:[#allocation2 + $0x58] sm:$0xff]  ;;  %v12861_v61 = vld [vmem:[%s14598_s6 + $0x68] sm:$0x1] }
  0xf0   : > { %v1302_v1 = vpop.f32.mrf.mxu1  ;;  %v4425_v42 = vrot.slane %v4423_v16, 5  ;;  %v4429_v62 = vrot.slane %v4427_v23, 4  ;;  %v4435_v30 = vrot.slane %v4433_v21, 5  ;;  %v630_v55 = vadd.f32 %v541_v48, %v304_v19  ;;  %v14468_v9 = vld [vmem:[%s14598_s6 + $0x84] sm:$0xff]   ;;  %v310_v19 = vld [vmem:[#allocation2 + $0x98] sm:$0xff]  ;;  %v14469_v23 = vld [vmem:[%s14598_s6 + $0x90] sm:$0xff]  }
  0xf1   : > { %v13806_v35 = vpop.f32.mrf.mxu0  ;;  %1449 = vst.msk [vmem:[#allocation2 + $0x38] sm:$0xff] %vm226_vm1, %v1417_v3  ;;  %v1415_v53 = vadd.f32 %v1302_v1, %v1121_v11  ;;  %v4420_v45 = vor.u32 %v4419_v40, %v4416_v15  ;;  %v4412_v38 = vsel %vm14627_vm4, %v4407_v13, %v4411_v4  ;;  %664 = vst.msk [vmem:[#allocation2 + $0x78] sm:$0xff] %vm226_vm1, %v632_v17  ;;  %v4438_v22 = vshrl.u32 %v12859_v12, 16  ;;  %v1125_v56 = vld [vmem:[#allocation2 + $0x48] sm:$0xff]  ;;  %v12863_v4 = vld [vmem:[%s14598_s6 + $0x70] sm:$0xf] }
  0xf2   : > { %v13832_v32 = vpop.f32.mrf.mxu1  ;;  %v635_v31 = vadd.f32 %v13806_v35, %v309_v20  ;;  %14005 = vmatmul.mubr.msk.bf16.gmra.mxu0 %vm226_vm1, %v14466_v41  ;;  %v12894_v43 = vcombine.low %v4402_v25, %v4412_v38  ;;  %v4430_v18 = vor.u32 %v4429_v62, %v4425_v42  ;;  %662 = vst.msk [vmem:[#allocation2 + $0x68] sm:$0xff] %vm226_vm1, %v630_v55  ;;  %v4441_v47 = vshll.u32 %v12859_v12, 16  ;;  %v12864_v15 = vld [vmem:[%s14598_s6 + $0x74] sm:$0x1]  ;;  %v308_v17 = vld [vmem:[#allocation2 + $0x88] sm:$0xff] }
  0xf3   : > { %v554_v8 = vpop.f32.mrf.mxu0  ;;  %1447 = vst.msk [vmem:[#allocation2 + $0x28] sm:$0xff] %vm226_vm1, %v1415_v53  ;;  %v1420_v26 = vadd.f32 %v13832_v32, %v1126_v5  ;;  %v4421_v46 = vrot.slane %v4420_v45, 4  ;;  %14008 = vmatprep.mubr.msk.bf16.mxu0 %vm226_vm1, %v14467_v27  ;;  %v4440_v50 = vrot.slane %v4438_v22, 4  ;;  %v4447_v51 = vshll.u32 %v12860_v36, 16  ;;  %v1130_v37 = vld [vmem:[#allocation2 + $0x70] sm:$0xff] }
  0xf4   : > { %v1315_v49 = vpop.f32.mrf.mxu1  ;;  %667 = vst.msk [vmem:[#allocation2 + $0x90] sm:$0xff] %vm226_vm1, %v635_v31  ;;  %v4451_v11 = vshrl.u32 %v12860_v36, 16  ;;  %14034 = vmatprep.mubr.msk.bf16.mxu1 %vm226_vm1, %v12894_v43  ;;  %v4431_v0 = vrot.slane %v4430_v18, 4  ;;  %v4443_v24 = vrot.slane %v4441_v47, 5  ;;  %v4457_v44 = vshll.u32 %v12861_v61, 16  ;;  %v313_v55 = vld [vmem:[#allocation2 + $0xb0] sm:$0xff] }
  0xf5   : > { %v15620_v33 = vpop.f32.mrf.mxu0  ;;  %1452 = vst.msk [vmem:[#allocation2 + $0x50] sm:$0xff] %vm226_vm1, %v1420_v26  ;;  %v1418_v2 = vadd.f32 %v1315_v49, %v1124_v10  ;;  %v4426_v60 = vsel %vm14627_vm4, %v4421_v46, %v4425_v42  ;;  %v4449_v57 = vrot.slane %v4447_v51, 5  ;;  %v633_v63 = vadd.f32 %v554_v8, %v307_v29  ;;  %v1128_v40 = vld [vmem:[#allocation2 + $0x60] sm:$0xff]  ;;  %v12865_v43 = vld [vmem:[%s14598_s6 + $0x78] sm:$0xf] }
  0xf6   : > { %v13833_v54 = vpop.f32.mrf.mxu1  ;;  %v4453_v1 = vrot.slane %v4451_v11, 4  ;;  %v4436_v14 = vsel %vm14627_vm4, %v4431_v0, %v4435_v30  ;;  %v4444_v53 = vor.u32 %v4443_v24, %v4440_v50  ;;  %v4459_v41 = vrot.slane %v4457_v44, 5  ;;  %v12867_v47 = vld [vmem:[%s14598_s6 + $0x80] sm:$0x1]  ;;  %v12868_v44 = vld [vmem:[%s14598_s6 + $0x84] sm:$0xf] }
  0xf7   : > { %v15628_v28 = vpop.f32.mrf.mxu0  ;;  %1450 = vst.msk [vmem:[#allocation2 + $0x40] sm:$0xff] %vm226_vm1, %v1418_v2  ;;  %v1421_v48 = vadd.f32 %v13833_v54, %v1127_v7  ;;  %v4462_v16 = vshrl.u32 %v12862_v58, 16  ;;  %v12895_v20 = vcombine.low %v4426_v60, %v4436_v14  ;;  %665 = vst.msk [vmem:[#allocation2 + $0x80] sm:$0xff] %vm226_vm1, %v633_v63  ;;  %v4465_v32 = vshll.u32 %v12862_v58, 16  ;;  %v311_v60 = vld [vmem:[#allocation2 + $0xa0] sm:$0xff] }
  0xf8   : > { %v1318_v3 = vpop.f32.mrf.mxu1  ;;  %v4454_v25 = vor.u32 %v4453_v1, %v4449_v57  ;;  %v4445_v10 = vrot.slane %v4444_v53, 4  ;;  %v4471_v13 = vshll.u32 %v12863_v4, 16  ;;  %v4475_v26 = vshrl.u32 %v12863_v4, 16  ;;  %v1131_v49 = vld [vmem:[#allocation2 + $0x78] sm:$0xff] }
  0xf9   : > { %v15636_v59 = vpop.f32.mrf.mxu0  ;;  %1453 = vst.msk [vmem:[#allocation2 + $0x58] sm:$0xff] %vm226_vm1, %v1421_v48  ;;  %v1419_v35 = vadd.f32 %v1318_v3, %v1125_v56  ;;  %v4464_v12 = vrot.slane %v4462_v16, 4  ;;  %14035 = vmatmul.mubr.msk.bf16.gmra.mxu1 %vm226_vm1, %v12895_v20  ;;  %v4467_v45 = vrot.slane %v4465_v32, 5  ;;  %v4481_v62 = vshll.u32 %v12864_v15, 16  ;;  %v1129_v22 = vld [vmem:[#allocation2 + $0x68] sm:$0xff] }
  0xfa   : > { %v13836_v6 = vpop.f32.mrf.mxu1  ;;  %v4455_v27 = vrot.slane %v4454_v25, 4  ;;  %v636_v30 = vadd.f32 %v15620_v33, %v310_v19  ;;  %14009 = vmatmul.mubr.msk.bf16.gmra.mxu0 %vm226_vm1, %v14468_v9  ;;  %v4450_v36 = vsel %vm14627_vm4, %v4445_v10, %v4449_v57  ;;  %v4473_v38 = vrot.slane %v4471_v13, 5  ;;  %v12866_v56 = vld [vmem:[%s14598_s6 + $0x7c] sm:$0xf]  ;;  %v12869_v15 = vld [vmem:[%s14598_s6 + $0x88] sm:$0xf] }
  0xfb   : > { %v15643_v5 = vpop.f32.mrf.mxu0  ;;  %1451 = vst.msk [vmem:[#allocation2 + $0x48] sm:$0xff] %vm226_vm1, %v1419_v35  ;;  %v1424_v8 = vadd.f32 %v13836_v6, %v1130_v37  ;;  %v4477_v2 = vrot.slane %v4475_v26, 4  ;;  %v4468_v46 = vor.u32 %v4467_v45, %v4464_v12  ;;  %v4483_v18 = vrot.slane %v4481_v62, 5  ;;  %14012 = vmatprep.mubr.msk.bf16.mxu0 %vm226_vm1, %v14469_v23  ;;  %v1134_v4 = vld [vmem:[#allocation2 + $0x90] sm:$0xff]  ;;  %v14471_v16 = vld [vmem:[%s14598_s6 + $0xa8] sm:$0xff]   ;;  %v314_v23 = vld [vmem:[#allocation2 + $0xb8] sm:$0xff] }
  0xfc   : > { %v1331_v42 = vpop.f32.mrf.mxu1  ;;  %v4460_v33 = vsel %vm14627_vm4, %v4455_v27, %v4459_v41  ;;  %668 = vst.msk [vmem:[#allocation2 + $0x98] sm:$0xff] %vm226_vm1, %v636_v30  ;;  %v634_v54 = vadd.f32 %v15628_v28, %v308_v17  ;;  %v639_v11 = vadd.f32 %v15636_v59, %v313_v55  ;;  %v4486_v3 = vshrl.u32 %v12865_v43, 16  ;;  %v14470_v59 = vld [vmem:[%s14598_s6 + $0x9c] sm:$0xff]  }
  0xfd   : > { %v15652_v21 = vpop.f32.mrf.mxu0  ;;  %1456 = vst.msk [vmem:[#allocation2 + $0x70] sm:$0xff] %vm226_vm1, %v1424_v8  ;;  %v1422_v31 = vadd.f32 %v1331_v42, %v1128_v40  ;;  %v12896_v48 = vcombine.low %v4450_v36, %v4460_v33  ;;  %v4478_v50 = vor.u32 %v4477_v2, %v4473_v38  ;;  %v4469_v0 = vrot.slane %v4468_v46, 4  ;;  %v12870_v40 = vld [vmem:[%s14598_s6 + $0x8c] sm:$0x1] }
  0xfe   : > { %v13837_v61 = vpop.f32.mrf.mxu1  ;;  %666 = vst.msk [vmem:[#allocation2 + $0x88] sm:$0xff] %vm226_vm1, %v634_v54  ;;  %v4489_v24 = vshll.u32 %v12865_v43, 16  ;;  %671 = vst.msk [vmem:[#allocation2 + $0xb0] sm:$0xff] %vm226_vm1, %v639_v11  ;;  %v4495_v57 = vshll.u32 %v12866_v56, 16  ;;  %v4499_v1 = vshrl.u32 %v12866_v56, 16  ;;  %v4505_v63 = vshll.u32 %v12867_v47, 16 }
  0xff   : > { %v15657_v7 = vpop.f32.mrf.mxu0  ;;  %1454 = vst.msk [vmem:[#allocation2 + $0x60] sm:$0xff] %vm226_vm1, %v1422_v31  ;;  %v1425_v51 = vadd.f32 %v13837_v61, %v1131_v49  ;;  %14038 = vmatprep.mubr.msk.bf16.mxu1 %vm226_vm1, %v12896_v48  ;;  %v4479_v35 = vrot.slane %v4478_v50, 4  ;;  %v4474_v14 = vsel %vm14627_vm4, %v4469_v0, %v4473_v38  ;;  %v4488_v9 = vrot.slane %v4486_v3, 4  ;;  %v1132_v30 = vld [vmem:[#allocation2 + $0x80] sm:$0xff]  ;;  %v312_v49 = vld [vmem:[#allocation2 + $0xa8] sm:$0xff]  ;;  %v317_v56 = vld [vmem:[#allocation2 + $0xd0] sm:$0xff] }
 0x100   : > { %v1334_v58 = vpop.f32.mrf.mxu1  ;;  %v4491_v53 = vrot.slane %v4489_v24, 5  ;;  %v637_v41 = vadd.f32 %v15643_v5, %v311_v60  ;;  %v4497_v25 = vrot.slane %v4495_v57, 5  ;;  %v4501_v8 = vrot.slane %v4499_v1, 4 }
 0x101   : > { %v15670_v29 = vpop.f32.mrf.mxu0  ;;  %v1423_v28 = vadd.f32 %v1334_v58, %v1129_v22  ;;  %1457 = vst.msk [vmem:[#allocation2 + $0x78] sm:$0xff] %vm226_vm1, %v1425_v51  ;;  %v4484_v20 = vsel %vm14627_vm4, %v4479_v35, %v4483_v18  ;;  %v4507_v32 = vrot.slane %v4505_v63, 5  ;;  %v4510_v26 = vshrl.u32 %v12868_v44, 16  ;;  %v12871_v22 = vld [vmem:[%s14598_s6 + $0x90] sm:$0xf] }
 0x102   : > { %v12897_v10 = vcombine.low %v4474_v14, %v4484_v20  ;;  %v4492_v12 = vor.u32 %v4491_v53, %v4488_v9  ;;  %669 = vst.msk [vmem:[#allocation2 + $0xa0] sm:$0xff] %vm226_vm1, %v637_v41  ;;  %14013 = vmatmul.mubr.msk.bf16.gmra.mxu0 %vm226_vm1, %v14470_v59  ;;  %v4502_v17 = vor.u32 %v4501_v8, %v4497_v25  ;;  %v4513_v27 = vshll.u32 %v12868_v44, 16  ;;  %v12872_v58 = vld [vmem:[%s14598_s6 + $0x94] sm:$0xf]  ;;  %v12873_v35 = vld [vmem:[%s14598_s6 + $0x98] sm:$0x1] }
 0x103   : > { %v15676_v37 = vpop.f32.mrf.mxu0  ;;  %1455 = vst.msk [vmem:[#allocation2 + $0x68] sm:$0xff] %vm226_vm1, %v1423_v28  ;;  %v13840_v6 = vpop.f32.mrf.mxu1  ;;  %v4519_v45 = vshll.u32 %v12869_v15, 16  ;;  %v4523_v62 = vshrl.u32 %v12869_v15, 16  ;;  %v4512_v36 = vrot.slane %v4510_v26, 4  ;;  %v4529_v38 = vshll.u32 %v12870_v40, 16  ;;  %v1135_v31 = vld [vmem:[#allocation2 + $0x98] sm:$0xff]  ;;  %14016 = vmatprep.mubr.msk.bf16.mxu0 %vm226_vm1, %v14471_v16 }
 0x104   : > { %v1428_v13 = vadd.f32 %v13840_v6, %v1134_v4  ;;  %14039 = vmatmul.mubr.msk.bf16.gmra.mxu1 %vm226_vm1, %v12897_v10  ;;  %v4493_v55 = vrot.slane %v4492_v12, 4  ;;  %v640_v2 = vadd.f32 %v15652_v21, %v314_v23  ;;  %v4503_v33 = vrot.slane %v4502_v17, 4  ;;  %v14472_v44 = vld [vmem:[%s14598_s6 + $0xb4] sm:$0xff]   ;;  %v315_v59 = vld [vmem:[#allocation2 + $0xc0] sm:$0xff]  ;;  %v12874_v14 = vld [vmem:[%s14598_s6 + $0x9c] sm:$0xf] }
 0x105   : > { %v15688_v19 = vpop.f32.mrf.mxu0  ;;  %v1347_v5 = vpop.f32.mrf.mxu1  ;;  %v4515_v46 = vrot.slane %v4513_v27, 5  ;;  %v4521_v18 = vrot.slane %v4519_v45, 5  ;;  %v4525_v54 = vrot.slane %v4523_v62, 4  ;;  %v1133_v47 = vld [vmem:[#allocation2 + $0x88] sm:$0xff]  ;;  %v4531_v21 = vrot.slane %v4529_v38, 5  ;;  %v14473_v9 = vld [vmem:[%s14598_s6 + $0xc0] sm:$0xff]  }
 0x106   : > { %1460 = vst.msk [vmem:[#allocation2 + $0x90] sm:$0xff] %vm226_vm1, %v1428_v13  ;;  %v4498_v48 = vsel %vm14627_vm4, %v4493_v55, %v4497_v25  ;;  %672 = vst.msk [vmem:[#allocation2 + $0xb8] sm:$0xff] %vm226_vm1, %v640_v2  ;;  %v1426_v50 = vadd.f32 %v1347_v5, %v1132_v30  ;;  %v638_v51 = vadd.f32 %v15657_v7, %v312_v49  ;;  %v4534_v63 = vshrl.u32 %v12871_v22, 16  ;;  %v1138_v16 = vld [vmem:[#allocation2 + $0xb0] sm:$0xff]  ;;  %v12875_v40 = vld [vmem:[%s14598_s6 + $0xa0] sm:$0xf] }
 0x107   : > { %v15694_v42 = vpop.f32.mrf.mxu0  ;;  %v13841_v61 = vpop.f32.mrf.mxu1  ;;  %v4508_v0 = vsel %vm14627_vm4, %v4503_v33, %v4507_v32  ;;  %v4516_v28 = vor.u32 %v4515_v46, %v4512_v36  ;;  %v4526_v3 = vor.u32 %v4525_v54, %v4521_v18  ;;  %v643_v7 = vadd.f32 %v15670_v29, %v317_v56  ;;  %v12876_v5 = vld [vmem:[%s14598_s6 + $0xa4] sm:$0x1]  ;;  %v318_v17 = vld [vmem:[#allocation2 + $0xd8] sm:$0xff]  ;;  %v321_v56 = vld [vmem:[#allocation2 + $0xf0] sm:$0xff] }
 0x108   : > { %v1429_v24 = vadd.f32 %v13841_v61, %v1135_v31  ;;  %v12898_v57 = vcombine.low %v4498_v48, %v4508_v0  ;;  %1458 = vst.msk [vmem:[#allocation2 + $0x80] sm:$0xff] %vm226_vm1, %v1426_v50  ;;  %670 = vst.msk [vmem:[#allocation2 + $0xa8] sm:$0xff] %vm226_vm1, %v638_v51  ;;  %v4537_v6 = vshll.u32 %v12871_v22, 16  ;;  %v4543_v15 = vshll.u32 %v12872_v58, 16 }
 0x109   : > { %v15702_v43 = vpop.f32.mrf.mxu0  ;;  %v1350_v11 = vpop.f32.mrf.mxu1  ;;  %v4517_v53 = vrot.slane %v4516_v28, 4  ;;  %v4527_v41 = vrot.slane %v4526_v3, 4  ;;  %675 = vst.msk [vmem:[#allocation2 + $0xd0] sm:$0xff] %vm226_vm1, %v643_v7  ;;  %v4536_v29 = vrot.slane %v4534_v63, 4  ;;  %v4547_v25 = vshrl.u32 %v12872_v58, 16  ;;  %v1136_v2 = vld [vmem:[#allocation2 + $0xa0] sm:$0xff] }
 0x10a   : > { %v1427_v1 = vadd.f32 %v1350_v11, %v1133_v47  ;;  %1461 = vst.msk [vmem:[#allocation2 + $0x98] sm:$0xff] %vm226_vm1, %v1429_v24  ;;  %14042 = vmatprep.mubr.msk.bf16.mxu1 %vm226_vm1, %v12898_v57  ;;  %v4553_v8 = vshll.u32 %v12873_v35, 16  ;;  %v641_v32 = vadd.f32 %v15676_v37, %v315_v59  ;;  %14017 = vmatmul.mubr.msk.bf16.gmra.mxu0 %vm226_vm1, %v14472_v44  ;;  %v4539_v13 = vrot.slane %v4537_v6, 5  ;;  %v14474_v58 = vld [vmem:[%s14598_s6 + $0xcc] sm:$0xff]   ;;  %v319_v6 = vld [vmem:[#allocation2 + $0xe0] sm:$0xff] }
 0x10b   : > { %v15709_v60 = vpop.f32.mrf.mxu0  ;;  %v13844_v4 = vpop.f32.mrf.mxu1  ;;  %v4522_v10 = vsel %vm14627_vm4, %v4517_v53, %v4521_v18  ;;  %v4532_v12 = vsel %vm14627_vm4, %v4527_v41, %v4531_v21  ;;  %v4545_v26 = vrot.slane %v4543_v15, 5  ;;  %v4549_v45 = vrot.slane %v4547_v25, 4  ;;  %14020 = vmatprep.mubr.msk.bf16.mxu0 %vm226_vm1, %v14473_v9  ;;  %v316_v18 = vld [vmem:[#allocation2 + $0xc8] sm:$0xff]  ;;  %v12879_v63 = vld [vmem:[%s14598_s6 + $0xb0] sm:$0x1] }
 0x10c   : > { %1459 = vst.msk [vmem:[#allocation2 + $0x88] sm:$0xff] %vm226_vm1, %v1427_v1  ;;  %v12899_v27 = vcombine.low %v4522_v10, %v4532_v12  ;;  %v4555_v62 = vrot.slane %v4553_v8, 5  ;;  %673 = vst.msk [vmem:[#allocation2 + $0xc0] sm:$0xff] %vm226_vm1, %v641_v32  ;;  %v1432_v37 = vadd.f32 %v13844_v4, %v1138_v16  ;;  %v4540_v49 = vor.u32 %v4539_v13, %v4536_v29  ;;  %v12878_v1 = vld [vmem:[%s14598_s6 + $0xac] sm:$0xf] }
 0x10d   : > { %v15721_v20 = vpop.f32.mrf.mxu0  ;;  %v1363_v23 = vpop.f32.mrf.mxu1  ;;  %v4558_v55 = vshrl.u32 %v12874_v14, 16  ;;  %v4561_v36 = vshll.u32 %v12874_v14, 16  ;;  %v4567_v38 = vshll.u32 %v12875_v40, 16  ;;  %v4550_v61 = vor.u32 %v4549_v45, %v4545_v26  ;;  %v1139_v54 = vld [vmem:[#allocation2 + $0xb8] sm:$0xff]  ;;  %v12880_v8 = vld [vmem:[%s14598_s6 + $0xb4] sm:$0xf] }
 0x10e   : > { %14043 = vmatmul.mubr.msk.bf16.gmra.mxu1 %vm226_vm1, %v12899_v27  ;;  %1464 = vst.msk [vmem:[#allocation2 + $0xb0] sm:$0xff] %vm226_vm1, %v1432_v37  ;;  %v4571_v22 = vshrl.u32 %v12875_v40, 16  ;;  %v4577_v33 = vshll.u32 %v12876_v5, 16  ;;  %v644_v46 = vadd.f32 %v15688_v19, %v318_v17  ;;  %v4541_v48 = vrot.slane %v4540_v49, 4  ;;  %v12877_v19 = vld [vmem:[%s14598_s6 + $0xa8] sm:$0xf] }
 0x10f   : > { %v13845_v30 = vpop.f32.mrf.mxu1  ;;  %v15736_v31 = vpop.f32.mrf.mxu0  ;;  %v4560_v21 = vrot.slane %v4558_v55, 4  ;;  %v4563_v50 = vrot.slane %v4561_v36, 5  ;;  %v4569_v51 = vrot.slane %v4567_v38, 5  ;;  %v1137_v11 = vld [vmem:[#allocation2 + $0xa8] sm:$0xff]  ;;  %v4551_v0 = vrot.slane %v4550_v61, 4  ;;  %v322_v38 = vld [vmem:[#allocation2 + $0xf8] sm:$0xff] }
 0x110   : > { %v4573_v28 = vrot.slane %v4571_v22, 4  ;;  %v4579_v3 = vrot.slane %v4577_v33, 5  ;;  %676 = vst.msk [vmem:[#allocation2 + $0xd8] sm:$0xff] %vm226_vm1, %v644_v46  ;;  %v1430_v24 = vadd.f32 %v1363_v23, %v1136_v2  ;;  %v4546_v35 = vsel %vm14627_vm4, %v4541_v48, %v4545_v26  ;;  %v1142_v12 = vld [vmem:[#allocation2 + $0xd0] sm:$0xff]  ;;  %v12881_v45 = vld [vmem:[%s14598_s6 + $0xb8] sm:$0xf] }
 0x111   : > { %v1366_v47 = vpop.f32.mrf.mxu1  ;;  %v4564_v59 = vor.u32 %v4563_v50, %v4560_v21  ;;  %v642_v57 = vadd.f32 %v15694_v42, %v316_v18  ;;  %v1433_v7 = vadd.f32 %v13845_v30, %v1139_v54  ;;  %v4556_v14 = vsel %vm14627_vm4, %v4551_v0, %v4555_v62  ;;  %v12882_v36 = vld [vmem:[%s14598_s6 + $0xbc] sm:$0x1]  ;;  %v12922_v48 = vld [vmem:[%s14598_s6 + $0x18] sm:$0xe] }
 0x112   : > { %v4574_v9 = vor.u32 %v4573_v28, %v4569_v51  ;;  %1462 = vst.msk [vmem:[#allocation2 + $0xa0] sm:$0xff] %vm226_vm1, %v1430_v24  ;;  %v647_v53 = vadd.f32 %v15702_v43, %v321_v56  ;;  %v1431_v41 = vadd.f32 %v1366_v47, %v1137_v11  ;;  %v12900_v16 = vcombine.low %v4546_v35, %v4556_v14  ;;  %v12923_v28 = vld [vmem:[%s14598_s6 + $0x1c] sm:$0xf] }
 0x113   : > { %v13848_v44 = vpop.f32.mrf.mxu1  ;;  %v4565_v29 = vrot.slane %v4564_v59, 4  ;;  %674 = vst.msk [vmem:[#allocation2 + $0xc8] sm:$0xff] %vm226_vm1, %v642_v57  ;;  %1465 = vst.msk [vmem:[#allocation2 + $0xb8] sm:$0xff] %vm226_vm1, %v1433_v7  ;;  %14021 = vmatmul.mubr.msk.bf16.gmra.mxu0 %vm226_vm1, %v14474_v58  ;;  %v4582_v42 = vshrl.u32 %v12877_v19, 16  ;;  %v4585_v25 = vshll.u32 %v12877_v19, 16  ;;  %v4591_v43 = vshll.u32 %v12878_v1, 16 }
 0x114   : > { %v15749_v4 = vpop.f32.mrf.mxu0  ;;  %v4575_v40 = vrot.slane %v4574_v9, 4  ;;  %679 = vst.msk [vmem:[#allocation2 + $0xf0] sm:$0xff] %vm226_vm1, %v647_v53  ;;  %1463 = vst.msk [vmem:[#allocation2 + $0xa8] sm:$0xff] %vm226_vm1, %v1431_v41  ;;  %v4595_v23 = vshrl.u32 %v12878_v1, 16  ;;  %v4601_v10 = vshll.u32 %v12879_v63, 16  ;;  %14046 = vmatprep.mubr.msk.bf16.mxu1 %vm226_vm1, %v12900_v16  ;;  %v645_v27 = vadd.f32 %v15709_v60, %v319_v6  ;;  %v320_v60 = vld [vmem:[#allocation2 + $0xe8] sm:$0xff] }
 0x115   : > { %v1379_v15 = vpop.f32.mrf.mxu1  ;;  %v4570_v26 = vsel %vm14627_vm4, %v4565_v29, %v4569_v51  ;;  %v4584_v5 = vrot.slane %v4582_v42, 4  ;;  %v4587_v17 = vrot.slane %v4585_v25, 5  ;;  %v4593_v30 = vrot.slane %v4591_v43, 5  ;;  %v1140_v47 = vld [vmem:[#allocation2 + $0xc0] sm:$0xff]  ;;  %v12926_v16 = vld [vmem:[%s14598_s6 + $0x28] sm:$0xf] }
 0x116   : > { %v15759_v32 = vpop.f32.mrf.mxu0  ;;  %v4580_v37 = vsel %vm14627_vm4, %v4575_v40, %v4579_v3  ;;  %v4597_v49 = vrot.slane %v4595_v23, 4  ;;  %v4603_v55 = vrot.slane %v4601_v10, 5  ;;  %677 = vst.msk [vmem:[#allocation2 + $0xe0] sm:$0xff] %vm226_vm1, %v645_v27  ;;  %v1436_v22 = vadd.f32 %v13848_v44, %v1142_v12  ;;  %v12924_v59 = vld [vmem:[%s14598_s6 + $0x20] sm:$0x1]  ;;  %v1687_v40 = vld [vmem:[#allocation2 + $0x10] sm:$0xff] }
 0x117   : > { %v13849_v13 = vpop.f32.mrf.mxu1  ;;  %v12901_v2 = vcombine.low %v4570_v26, %v4580_v37  ;;  %v4588_v61 = vor.u32 %v4587_v17, %v4584_v5  ;;  %v4606_v33 = vshrl.u32 %v12880_v8, 16  ;;  %v4609_v18 = vshll.u32 %v12880_v8, 16  ;;  %v1143_v0 = vld [vmem:[#allocation2 + $0xd8] sm:$0xff]  ;;  %v12925_v6 = vld [vmem:[%s14598_s6 + $0x24] sm:$0xe] }
 0x118   : > { %v15768_v62 = vpop.f32.mrf.mxu0  ;;  %v4598_v46 = vor.u32 %v4597_v49, %v4593_v30  ;;  %v4615_v54 = vshll.u32 %v12881_v45, 16  ;;  %v4619_v56 = vshrl.u32 %v12881_v45, 16  ;;  %1468 = vst.msk [vmem:[#allocation2 + $0xd0] sm:$0xff] %vm226_vm1, %v1436_v22  ;;  %v4625_v11 = vshll.u32 %v12882_v36, 16  ;;  %v12927_v29 = vld [vmem:[%s14598_s6 + $0x2c] sm:$0x1] }
 0x119   : > { %v1382_v21 = vpop.f32.mrf.mxu1  ;;  %14047 = vmatmul.mubr.msk.bf16.gmra.mxu1 %vm226_vm1, %v12901_v2  ;;  %v4589_v50 = vrot.slane %v4588_v61, 4  ;;  %v4608_v51 = vrot.slane %v4606_v33, 4  ;;  %v648_v58 = vadd.f32 %v15721_v20, %v322_v38  ;;  %v4611_v19 = vrot.slane %v4609_v18, 5  ;;  %v12883_v43 = vld [vmem:[%s14598_s6 + $0xc0] sm:$0xf] }
 0x11a   : > { %v15779_v3 = vpop.f32.mrf.mxu0  ;;  %v4599_v24 = vrot.slane %v4598_v46, 4  ;;  %v4617_v44 = vrot.slane %v4615_v54, 5  ;;  %v4621_v35 = vrot.slane %v4619_v56, 4  ;;  %v4627_v7 = vrot.slane %v4625_v11, 5  ;;  %v1141_v63 = vld [vmem:[#allocation2 + $0xc8] sm:$0xff] }
 0x11b   : > { %v4594_v57 = vsel %vm14627_vm4, %v4589_v50, %v4593_v30  ;;  %680 = vst.msk [vmem:[#allocation2 + $0xf8] sm:$0xff] %vm226_vm1, %v648_v58  ;;  %v1434_v1 = vadd.f32 %v1379_v15, %v1140_v47  ;;  %v646_v20 = vadd.f32 %v15736_v31, %v320_v60  ;;  %v4612_v9 = vor.u32 %v4611_v19, %v4608_v51  ;;  %v12884_v30 = vld [vmem:[%s14598_s6 + $0xc4] sm:$0xf]  ;;  %v12885_v38 = vld [vmem:[%s14598_s6 + $0xc8] sm:$0x1]  ;;  %v1146_v61 = vld [vmem:[#allocation2 + $0xf0] sm:$0xff] }
 0x11c   : > { %v4604_v14 = vsel %vm14627_vm4, %v4599_v24, %v4603_v55  ;;  %v4622_v53 = vor.u32 %v4621_v35, %v4617_v44  ;;  %v1437_v41 = vadd.f32 %v13849_v13, %v1143_v0  ;;  %v12970_v15 = vrot.slane %v12922_v48, 9  ;;  %v1685_v50 = vld [vmem:[#allocation2] sm:$0xff]  ;;  %v12886_v51 = vld [vmem:[%s14598_s6 + $0xcc] sm:$0xf]  ;;  %v12887_v19 = vld [vmem:[%s14598_s6 + $0xd0] sm:$0xf] }
 0x11d   : > { %v12902_v25 = vcombine.low %v4594_v57, %v4604_v14  ;;  %1466 = vst.msk [vmem:[#allocation2 + $0xc0] sm:$0xff] %vm226_vm1, %v1434_v1  ;;  %678 = vst.msk [vmem:[#allocation2 + $0xe8] sm:$0xff] %vm226_vm1, %v646_v20  ;;  %v5133_v8 = vrot.slane %v12923_v28, 5  ;;  %v5136_v31 = vrot.slane %v12924_v59, 5  ;;  %v4613_v10 = vrot.slane %v4612_v9, 4  ;;  %v1144_v20 = vld [vmem:[#allocation2 + $0xe0] sm:$0xff] }
 0x11e   : > { %v4623_v12 = vrot.slane %v4622_v53, 4  ;;  %1469 = vst.msk [vmem:[#allocation2 + $0xd8] sm:$0xff] %vm226_vm1, %v1437_v41  ;;  %v1435_v13 = vadd.f32 %v1382_v21, %v1141_v63  ;;  %v1981_v26 = vadd.f32 %v15749_v4, %v1687_v40  ;;  %v12971_v45 = vrot.slane %v12925_v6, 9 }
 0x11f   : > { %v13852_v42 = vpop.f32.mrf.mxu1  ;;  %v15794_v23 = vpop.f32.mrf.mxu0  ;;  %14050 = vmatprep.mubr.msk.bf16.mxu1 %vm226_vm1, %v12902_v25  ;;  %v5134_v17 = vsel %vm14757_vm7, %v12970_v15, %v5133_v8  ;;  %v5135_v27 = vrot.slane %v5133_v8, 4  ;;  %v5140_v37 = vrot.slane %v12926_v16, 5  ;;  %v4618_v55 = vsel %vm14627_vm4, %v4613_v10, %v4617_v44  ;;  %v12888_v44 = vld [vmem:[%s14598_s6 + $0xd4] sm:$0x1]  ;;  %v1688_v25 = vld [vmem:[#allocation2 + $0x18] sm:$0xff] }
 0x120   : > { %v4628_v36 = vsel %vm14627_vm4, %v4623_v12, %v4627_v7  ;;  %1467 = vst.msk [vmem:[#allocation2 + $0xc8] sm:$0xff] %vm226_vm1, %v1435_v13  ;;  %2013 = vst.msk [vmem:[#allocation2 + $0x10] sm:$0xff] %vm226_vm1, %v1981_v26  ;;  %v5143_v4 = vrot.slane %v12927_v29, 5  ;;  %v4630_v2 = vshrl.u32 %v12883_v43, 16  ;;  %v4633_v48 = vshll.u32 %v12883_v43, 16 }
 0x121   : > { %v1395_v5 = vpop.f32.mrf.mxu1  ;;  %v15802_v49 = vpop.f32.mrf.mxu0  ;;  %v12903_v33 = vcombine.low %v4618_v55, %v4628_v36  ;;  %v5137_v60 = vsel %vm14757_vm7, %v5135_v27, %v5136_v31  ;;  %v5141_v46 = vsel %vm14757_vm7, %v12971_v45, %v5140_v37  ;;  %v5142_v18 = vrot.slane %v5140_v37, 4  ;;  %v12928_v12 = vld [vmem:[%s14598_s6 + $0x30] sm:$0xe]  ;;  %v12929_v13 = vld [vmem:[%s14598_s6 + $0x34] sm:$0xf] }
 0x122   : > { %v12987_v56 = vcombine.low %v5134_v17, %v5137_v60  ;;  %v4632_v47 = vrot.slane %v4630_v2, 4  ;;  %v4639_v21 = vshll.u32 %v12884_v30, 16  ;;  %v4643_v0 = vshrl.u32 %v12884_v30, 16  ;;  %v1147_v15 = vld [vmem:[#allocation2 + $0xf8] sm:$0xff]  ;;  %v1686_v2 = vld [vmem:[#allocation2 + $0x8] sm:$0xff] }
 0x123   : > { %v13853_v22 = vpop.f32.mrf.mxu1  ;;  %v15815_v54 = vpop.f32.mrf.mxu0  ;;  %14051 = vmatmul.mubr.msk.bf16.gmra.mxu1 %vm226_vm1, %v12903_v33  ;;  %v5144_v58 = vsel %vm14757_vm7, %v5142_v18, %v5143_v4  ;;  %v4649_v28 = vshll.u32 %v12885_v38, 16  ;;  %v1440_v24 = vadd.f32 %v13852_v42, %v1146_v61  ;;  %v4635_v57 = vrot.slane %v4633_v48, 5  ;;  %v12930_v30 = vld [vmem:[%s14598_s6 + $0x38] sm:$0x1]  ;;  %v12932_v48 = vld [vmem:[%s14598_s6 + $0x40] sm:$0xf] }
 0x124   : > { %14060 = vmatprep.mubr.msk.bf16.mxu0 %vm226_vm1, %v12987_v56  ;;  %v12988_v59 = vcombine.low %v5141_v46, %v5144_v58  ;;  %v4641_v7 = vrot.slane %v4639_v21, 5  ;;  %v1979_v1 = vadd.f32 %v15759_v32, %v1685_v50  ;;  %v4645_v14 = vrot.slane %v4643_v0, 4  ;;  %v1145_v61 = vld [vmem:[#allocation2 + $0xe8] sm:$0xff]  ;;  %v1691_v58 = vld [vmem:[#allocation2 + $0x30] sm:$0xff]  ;;  %v12933_v0 = vld [vmem:[%s14598_s6 + $0x44] sm:$0x1] }
 0x125   : > { %v15818_v11 = vpop.f32.mrf.mxu1  ;;  %v15825_v35 = vpop.f32.mrf.mxu0  ;;  %v4651_v9 = vrot.slane %v4649_v28, 5  ;;  %1472 = vst.msk [vmem:[#allocation2 + $0xf0] sm:$0xff] %vm226_vm1, %v1440_v24  ;;  %v4654_v53 = vshrl.u32 %v12886_v51, 16  ;;  %v4657_v41 = vshll.u32 %v12886_v51, 16  ;;  %v4636_v16 = vor.u32 %v4635_v57, %v4632_v47  ;;  %v12931_v47 = vld [vmem:[%s14598_s6 + $0x3c] sm:$0xe] }
 0x126   : > { %14061 = vmatmul.mubr.msk.bf16.vlgmr.msra.gmra.mxu0 %vm226_vm1, %v12988_v59  ;;  %2011 = vst.msk [vmem:[#allocation2] sm:$0xff] %vm226_vm1, %v1979_v1  ;;  %v4663_v29 = vshll.u32 %v12887_v19, 16  ;;  %v4667_v32 = vshrl.u32 %v12887_v19, 16  ;;  %v4673_v42 = vshll.u32 %v12888_v44, 16  ;;  %v4646_v31 = vor.u32 %v4645_v14, %v4641_v7  ;;  %v1689_v59 = vld [vmem:[#allocation2 + $0x20] sm:$0xff] }
 0x127   : > { %v15829_v63 = vpop.f32.mrf.mxu1  ;;  %v15832_v6 = vpop.f32.mrf.mxu0  ;;  %v4656_v40 = vrot.slane %v4654_v53, 4  ;;  %v4659_v43 = vrot.slane %v4657_v41, 5  ;;  %v1438_v10 = vadd.f32 %v1395_v5, %v1144_v20  ;;  %v4637_v17 = vrot.slane %v4636_v16, 4  ;;  %v2078_v57 = vld [vmem:[#allocation2 + $0x10] sm:$0xff]  ;;  %v1692_v53 = vld [vmem:[#allocation2 + $0x38] sm:$0xff] }
 0x128   : > { %v4665_v27 = vrot.slane %v4663_v29, 5  ;;  %v4669_v45 = vrot.slane %v4667_v32, 4  ;;  %v4675_v37 = vrot.slane %v4673_v42, 5  ;;  %v4647_v36 = vrot.slane %v4646_v31, 4  ;;  %v12934_v16 = vld [vmem:[%s14598_s6 + $0x48] sm:$0xe] }
 0x129   : > { %v15836_v8 = vpop.f32.mrf.mxu1  ;;  %v15840_v26 = vpop.f32.mrf.mxu0  ;;  %v4660_v4 = vor.u32 %v4659_v43, %v4656_v40  ;;  %1470 = vst.msk [vmem:[#allocation2 + $0xe0] sm:$0xff] %vm226_vm1, %v1438_v10  ;;  %v1982_v38 = vadd.f32 %v15768_v62, %v1688_v25  ;;  %v1441_v5 = vadd.f32 %v13853_v22, %v1147_v15  ;;  %v4642_v60 = vsel %vm14627_vm4, %v4637_v17, %v4641_v7  ;;  %v12935_v25 = vld [vmem:[%s14598_s6 + $0x4c] sm:$0xf]  ;;  %v12936_v15 = vld [vmem:[%s14598_s6 + $0x50] sm:$0x1] }
 0x12a   : > { %v4670_v46 = vor.u32 %v4669_v45, %v4665_v27  ;;  %v1980_v18 = vadd.f32 %v15779_v3, %v1686_v2  ;;  %v12972_v56 = vrot.slane %v12928_v12, 9  ;;  %v4652_v62 = vsel %vm14627_vm4, %v4647_v36, %v4651_v9  ;;  %v12938_v17 = vld [vmem:[%s14598_s6 + $0x58] sm:$0xf]  ;;  %v1690_v36 = vld [vmem:[#allocation2 + $0x28] sm:$0xff]  ;;  %v1695_v2 = vld [vmem:[#allocation2 + $0x50] sm:$0xff] }
 0x12b   : > { %v15843_v55 = vpop.f32.mrf.mxu1  ;;  %v15847_v33 = vpop.f32.mrf.mxu0  ;;  %v4661_v22 = vrot.slane %v4660_v4, 4  ;;  %2014 = vst.msk [vmem:[#allocation2 + $0x18] sm:$0xff] %vm226_vm1, %v1982_v38  ;;  %1473 = vst.msk [vmem:[#allocation2 + $0xf8] sm:$0xff] %vm226_vm1, %v1441_v5  ;;  %v5147_v50 = vrot.slane %v12929_v13, 5  ;;  %v5150_v51 = vrot.slane %v12930_v30, 5  ;;  %v12904_v3 = vcombine.low %v4642_v60, %v4652_v62  ;;  %v1694_v62 = vld [vmem:[#allocation2 + $0x48] sm:$0xff] }
 0x12c   : > { %v4671_v24 = vrot.slane %v4670_v46, 4  ;;  %2012 = vst.msk [vmem:[#allocation2 + $0x8] sm:$0xff] %vm226_vm1, %v1980_v18  ;;  %v1439_v19 = vadd.f32 %v15818_v11, %v1145_v61  ;;  %v1985_v44 = vadd.f32 %v15794_v23, %v1691_v58  ;;  %v12973_v9 = vrot.slane %v12931_v47, 9  ;;  %v12937_v13 = vld [vmem:[%s14598_s6 + $0x54] sm:$0xe]  ;;  %v1693_v47 = vld [vmem:[#allocation2 + $0x40] sm:$0xff] }
 0x12d   : > { %v15854_v21 = vpop.f32.mrf.mxu1  ;;  %v15861_v28 = vpop.f32.mrf.mxu0  ;;  %v4666_v1 = vsel %vm14627_vm4, %v4661_v22, %v4665_v27  ;;  %v5148_v20 = vsel %vm14757_vm7, %v12972_v56, %v5147_v50  ;;  %v5149_v14 = vrot.slane %v5147_v50, 4  ;;  %v2076_v41 = vld [vmem:[#allocation2] sm:$0xff]  ;;  %14054 = vmatprep.mubr.msk.bf16.mxu1 %vm226_vm1, %v12904_v3  ;;  %v5154_v29 = vrot.slane %v12932_v48, 5  ;;  %v12939_v61 = vld [vmem:[%s14598_s6 + $0x5c] sm:$0x1] }
 0x12e   : > { %v4676_v23 = vsel %vm14627_vm4, %v4671_v24, %v4675_v37  ;;  %1471 = vst.msk [vmem:[#allocation2 + $0xe8] sm:$0xff] %vm226_vm1, %v1439_v19  ;;  %2017 = vst.msk [vmem:[#allocation2 + $0x30] sm:$0xff] %vm226_vm1, %v1985_v44  ;;  %v5157_v32 = vrot.slane %v12933_v0, 5  ;;  %v1983_v42 = vadd.f32 %v15802_v49, %v1689_v59  ;;  %v2404_v10 = vadd.f32 %v15829_v63, %v2078_v57  ;;  %v1696_v48 = vld [vmem:[#allocation2 + $0x58] sm:$0xff]  ;;  %v12941_v24 = vld [vmem:[%s14598_s6 + $0x64] sm:$0xf] }
 0x12f   : > { %v15866_v7 = vpop.f32.mrf.mxu1  ;;  %v15873_v11 = vpop.f32.mrf.mxu0  ;;  %v12905_v40 = vcombine.low %v4666_v1, %v4676_v23  ;;  %v5151_v43 = vsel %vm14757_vm7, %v5149_v14, %v5150_v51  ;;  %v1986_v12 = vadd.f32 %v15815_v54, %v1692_v53  ;;  %v5155_v49 = vsel %vm14757_vm7, %v12973_v9, %v5154_v29  ;;  %v12942_v1 = vld [vmem:[%s14598_s6 + $0x68] sm:$0x1]  ;;  %v15939_v23 = vld [vmem:[%s14598_s6 + $0x70] sm:$0xf] }
 0x130   : > { %v12989_v45 = vcombine.low %v5148_v20, %v5151_v43  ;;  %v5156_v37 = vrot.slane %v5154_v29, 4  ;;  %2015 = vst.msk [vmem:[#allocation2 + $0x20] sm:$0xff] %vm226_vm1, %v1983_v42  ;;  %v2402_v30 = vadd.f32 %v15836_v8, %v2076_v41  ;;  %2436 = vst.msk [vmem:[#allocation2 + $0x10] sm:$0xff] %vm226_vm1, %v2404_v10  ;;  %v1984_v54 = vadd.f32 %v15825_v35, %v1690_v36  ;;  %v15927_v20 = vld [vmem:[%s14598_s6 + $0x6c] sm:$0xe] }
 0x131   : > { %v15883_v31 = vpop.f32.mrf.mxu1  ;;  %v15891_v27 = vpop.f32.mrf.mxu0  ;;  %14055 = vmatmul.mubr.msk.bf16.gmra.mxu1 %vm226_vm1, %v12905_v40  ;;  %2018 = vst.msk [vmem:[#allocation2 + $0x38] sm:$0xff] %vm226_vm1, %v1986_v12  ;;  %v12974_v63 = vrot.slane %v12934_v16, 9  ;;  %v5161_v38 = vrot.slane %v12935_v25, 5  ;;  %v5164_v5 = vrot.slane %v12936_v15, 5  ;;  %v1989_v18 = vadd.f32 %v15832_v6, %v1695_v2  ;;  %v12940_v6 = vld [vmem:[%s14598_s6 + $0x60] sm:$0xe] }
 0x132   : > { %14064 = vmatprep.mubr.msk.bf16.mxu0 %vm226_vm1, %v12989_v45  ;;  %v5158_v8 = vsel %vm14757_vm7, %v5156_v37, %v5157_v32  ;;  %2434 = vst.msk [vmem:[#allocation2] sm:$0xff] %vm226_vm1, %v2402_v30  ;;  %v2079_v46 = vld [vmem:[#allocation2 + $0x18] sm:$0xff]  ;;  %v12975_v35 = vrot.slane %v12937_v13, 9  ;;  %v5168_v56 = vrot.slane %v12938_v17, 5  ;;  %2016 = vst.msk [vmem:[#allocation2 + $0x28] sm:$0xff] %vm226_vm1, %v1984_v54  ;;  %v1990_v41 = vadd.f32 %v15847_v33, %v1696_v48  ;;  %v1699_v40 = vld [vmem:[#allocation2 + $0x70] sm:$0xff] }
 0x133   : > { %v15897_v4 = vpop.f32.mrf.mxu1  ;;  %v15904_v60 = vpop.f32.mrf.mxu0  ;;  %v12990_v50 = vcombine.low %v5155_v49, %v5158_v8  ;;  %v2405_v51 = vadd.f32 %v15843_v55, %v2079_v46  ;;  %v5162_v58 = vsel %vm14757_vm7, %v12974_v63, %v5161_v38  ;;  %v5163_v0 = vrot.slane %v5161_v38, 4  ;;  %v2077_v3 = vld [vmem:[#allocation2 + $0x8] sm:$0xff]  ;;  %2021 = vst.msk [vmem:[#allocation2 + $0x50] sm:$0xff] %vm226_vm1, %v1989_v18  ;;  %v15942_v29 = vld [vmem:[%s14598_s6 + $0x74] sm:$0x1]  ;;  %v1697_v17 = vld [vmem:[#allocation2 + $0x60] sm:$0xff] }
 0x134   : > { %v2403_v44 = vadd.f32 %v15854_v21, %v2077_v3  ;;  %v15923_v59 = vsel %vm14757_vm7, %v12975_v35, %v5168_v56  ;;  %v5170_v57 = vrot.slane %v5168_v56, 4  ;;  %v5171_v55 = vrot.slane %v12939_v61, 5  ;;  %2022 = vst.msk [vmem:[#allocation2 + $0x58] sm:$0xff] %vm226_vm1, %v1990_v41  ;;  %v12947_v38 = vld [vmem:[%s14598_s6 + $0x7c] sm:$0xf]  ;;  %v1698_v8 = vld [vmem:[#allocation2 + $0x68] sm:$0xff] }
 0x135   : > { %v15911_v22 = vpop.f32.mrf.mxu1  ;;  %v1903_v19 = vpop.f32.mrf.mxu0  ;;  %14065 = vmatmul.mubr.msk.bf16.gmra.mxu0 %vm226_vm1, %v12990_v50  ;;  %2437 = vst.msk [vmem:[#allocation2 + $0x18] sm:$0xff] %vm226_vm1, %v2405_v51  ;;  %v5165_v9 = vsel %vm14757_vm7, %v5163_v0, %v5164_v5  ;;  %v1987_v21 = vadd.f32 %v15840_v26, %v1693_v47  ;;  %v2082_v53 = vld [vmem:[#allocation2 + $0x30] sm:$0xff]  ;;  %v1988_v16 = vadd.f32 %v15861_v28, %v1694_v62  ;;  %v12976_v15 = vrot.slane %v12940_v6, 9  ;;  %v12948_v46 = vld [vmem:[%s14598_s6 + $0x80] sm:$0x1] }
 0x136   : > { %v12991_v42 = vcombine.low %v5162_v58, %v5165_v9  ;;  %2435 = vst.msk [vmem:[#allocation2 + $0x8] sm:$0xff] %vm226_vm1, %v2403_v44  ;;  %v5172_v25 = vsel %vm14757_vm7, %v5170_v57, %v5171_v55  ;;  %v2408_v26 = vadd.f32 %v15866_v7, %v2082_v53  ;;  %v5175_v10 = vrot.slane %v12941_v24, 5  ;;  %v12946_v7 = vld [vmem:[%s14598_s6 + $0x78] sm:$0xe]  ;;  %v15979_v0 = vld [vmem:[%s14598_s6 + $0x88] sm:$0xf] }
 0x137   : > { %v15929_v14 = vpop.f32.mrf.mxu1  ;;  %v15944_v32 = vpop.f32.mrf.mxu0  ;;  %v12992_v28 = vcombine.low %v15923_v59, %v5172_v25  ;;  %2019 = vst.msk [vmem:[#allocation2 + $0x40] sm:$0xff] %vm226_vm1, %v1987_v21  ;;  %v2080_v43 = vld [vmem:[#allocation2 + $0x20] sm:$0xff]  ;;  %2020 = vst.msk [vmem:[#allocation2 + $0x48] sm:$0xff] %vm226_vm1, %v1988_v16  ;;  %v5178_v12 = vrot.slane %v12942_v1, 5  ;;  %v1993_v13 = vadd.f32 %v15873_v11, %v1699_v40  ;;  %v12977_v30 = vrot.slane %v15927_v20, 9 }
 0x138   : > { %14068 = vmatprep.mubr.msk.bf16.mxu0 %vm226_vm1, %v12991_v42  ;;  %2440 = vst.msk [vmem:[#allocation2 + $0x30] sm:$0xff] %vm226_vm1, %v2408_v26  ;;  %v2406_v49 = vadd.f32 %v15883_v31, %v2080_v43  ;;  %v2083_v37 = vld [vmem:[#allocation2 + $0x38] sm:$0xff]  ;;  %v5182_v36 = vrot.slane %v15939_v23, 5  ;;  %v5185_v54 = vrot.slane %v15942_v29, 5  ;;  %v5176_v5 = vsel %vm14757_vm7, %v12976_v15, %v5175_v10  ;;  %v15999_v20 = vld [vmem:[%s14598_s6 + $0x8c] sm:$0x1] }
 0x139   : > { %v15950_v33 = vpop.f32.mrf.mxu1  ;;  %v1916_v45 = vpop.f32.mrf.mxu0  ;;  %v2409_v11 = vadd.f32 %v15897_v4, %v2083_v37  ;;  %v5177_v2 = vrot.slane %v5175_v10, 4  ;;  %2025 = vst.msk [vmem:[#allocation2 + $0x70] sm:$0xff] %vm226_vm1, %v1993_v13  ;;  %v1991_v61 = vadd.f32 %v15891_v27, %v1697_v17  ;;  %v1700_v31 = vld [vmem:[#allocation2 + $0x78] sm:$0xff]  ;;  %v2081_v35 = vld [vmem:[#allocation2 + $0x28] sm:$0xff]  ;;  %v1992_v4 = vadd.f32 %v1903_v19, %v1698_v8  ;;  %v1703_v19 = vld [vmem:[#allocation2 + $0x90] sm:$0xff] }
 0x13a   : > { %2438 = vst.msk [vmem:[#allocation2 + $0x20] sm:$0xff] %vm226_vm1, %v2406_v49  ;;  %v5184_v56 = vrot.slane %v5182_v36, 4  ;;  %v1994_v47 = vadd.f32 %v15904_v60, %v1700_v31  ;;  %v2407_v27 = vadd.f32 %v15911_v22, %v2081_v35  ;;  %v2086_v50 = vld [vmem:[#allocation2 + $0x50] sm:$0xff]  ;;  %v12978_v51 = vrot.slane %v12946_v7, 9  ;;  %v15985_v22 = vld [vmem:[%s14598_s6 + $0x84] sm:$0xe] }
 0x13b   : > { %v13901_v63 = vpop.f32.mrf.mxu1  ;;  %v13875_v18 = vpop.f32.mrf.mxu0  ;;  %2441 = vst.msk [vmem:[#allocation2 + $0x38] sm:$0xff] %vm226_vm1, %v2409_v11  ;;  %v5179_v62 = vsel %vm14757_vm7, %v5177_v2, %v5178_v12  ;;  %2023 = vst.msk [vmem:[#allocation2 + $0x60] sm:$0xff] %vm226_vm1, %v1991_v61  ;;  %v5189_v58 = vrot.slane %v12947_v38, 5  ;;  %v2412_v6 = vadd.f32 %v15929_v14, %v2086_v50  ;;  %v5192_v24 = vrot.slane %v12948_v46, 5  ;;  %v1701_v14 = vld [vmem:[#allocation2 + $0x80] sm:$0xff]  ;;  %v2087_v41 = vld [vmem:[#allocation2 + $0x58] sm:$0xff] }
 0x13c   : > { %v12993_v60 = vcombine.low %v5176_v5, %v5179_v62  ;;  %2026 = vst.msk [vmem:[#allocation2 + $0x78] sm:$0xff] %vm226_vm1, %v1994_v47  ;;  %2024 = vst.msk [vmem:[#allocation2 + $0x68] sm:$0xff] %vm226_vm1, %v1992_v4  ;;  %v15991_v59 = vsel %vm14757_vm7, %v12977_v30, %v5182_v36  ;;  %v15995_v57 = vsel %vm14757_vm7, %v5184_v56, %v5185_v54  ;;  %v16002_v9 = vld [vmem:[%s14598_s6 + $0x94] sm:$0xf]  ;;  %v5196_v29 = vrot.slane %v15979_v0, 5  ;;  %v1702_v49 = vld [vmem:[#allocation2 + $0x88] sm:$0xff] }
 0x13d   : > { %v2310_v48 = vpop.f32.mrf.mxu1  ;;  %v1919_v3 = vpop.f32.mrf.mxu0  ;;  %14069 = vmatmul.mubr.msk.bf16.gmra.mxu0 %vm226_vm1, %v12992_v28  ;;  %2439 = vst.msk [vmem:[#allocation2 + $0x28] sm:$0xff] %vm226_vm1, %v2407_v27  ;;  %v5191_v55 = vrot.slane %v5189_v58, 4  ;;  %v1997_v1 = vadd.f32 %v15944_v32, %v1703_v19  ;;  %2444 = vst.msk [vmem:[#allocation2 + $0x50] sm:$0xff] %vm226_vm1, %v2412_v6  ;;  %v16008_v16 = vsel %vm14757_vm7, %v12978_v51, %v5189_v58  ;;  %v1704_v28 = vld [vmem:[#allocation2 + $0x98] sm:$0xff]  ;;  %v12952_v43 = vld [vmem:[%s14598_s6 + $0x90] sm:$0xe] }
 0x13e   : > { %14072 = vmatprep.mubr.msk.bf16.mxu0 %vm226_vm1, %v12993_v60  ;;  %v2084_v53 = vld [vmem:[#allocation2 + $0x40] sm:$0xff]  ;;  %v2085_v23 = vld [vmem:[#allocation2 + $0x48] sm:$0xff]  ;;  %v1995_v32 = vadd.f32 %v1916_v45, %v1701_v14  ;;  %v2413_v26 = vadd.f32 %v13901_v63, %v2087_v41  ;;  %v12954_v10 = vld [vmem:[%s14598_s6 + $0x98] sm:$0x1]  ;;  %v12994_v13 = vcombine.low %v15991_v59, %v15995_v57  ;;  %v12979_v17 = vrot.slane %v15985_v22, 9 }
 0x13f   : > { %v13904_v44 = vpop.f32.mrf.mxu1  ;;  %v13878_v21 = vpop.f32.mrf.mxu0  ;;  %v2410_v25 = vadd.f32 %v15950_v33, %v2084_v53  ;;  %v5193_v15 = vsel %vm14757_vm7, %v5191_v55, %v5192_v24  ;;  %2029 = vst.msk [vmem:[#allocation2 + $0x90] sm:$0xff] %vm226_vm1, %v1997_v1  ;;  %v2411_v40 = vadd.f32 %v2310_v48, %v2085_v23  ;;  %v5199_v7 = vrot.slane %v15999_v20, 5  ;;  %v1707_v38 = vld [vmem:[#allocation2 + $0xb0] sm:$0xff]  ;;  %v16034_v62 = vld [vmem:[%s14598_s6 + $0xac] sm:$0xf]  ;;  %v1705_v51 = vld [vmem:[#allocation2 + $0xa0] sm:$0xff] }
 0x140   : > { %2027 = vst.msk [vmem:[#allocation2 + $0x80] sm:$0xff] %vm226_vm1, %v1995_v32  ;;  %v2090_v33 = vld [vmem:[#allocation2 + $0x70] sm:$0xff]  ;;  %v1998_v45 = vadd.f32 %v13875_v18, %v1704_v28  ;;  %2445 = vst.msk [vmem:[#allocation2 + $0x58] sm:$0xff] %vm226_vm1, %v2413_v26  ;;  %v12995_v30 = vcombine.low %v16008_v16, %v5193_v15  ;;  %v1996_v54 = vadd.f32 %v1919_v3, %v1702_v49  ;;  %v5203_v63 = vrot.slane %v16002_v9, 5  ;;  %v16029_v18 = vld [vmem:[%s14598_s6 + $0xa0] sm:$0xf] }
 0x141   : > { %v2323_v42 = vpop.f32.mrf.mxu1  ;;  %v1932_v12 = vpop.f32.mrf.mxu0  ;;  %2442 = vst.msk [vmem:[#allocation2 + $0x40] sm:$0xff] %vm226_vm1, %v2410_v25  ;;  %2443 = vst.msk [vmem:[#allocation2 + $0x48] sm:$0xff] %vm226_vm1, %v2411_v40  ;;  %v2416_v36 = vadd.f32 %v13904_v44, %v2090_v33  ;;  %v5198_v5 = vrot.slane %v5196_v29, 4  ;;  %v12980_v61 = vrot.slane %v12952_v43, 9  ;;  %v5206_v31 = vrot.slane %v12954_v10, 5  ;;  %v1708_v0 = vld [vmem:[#allocation2 + $0xb8] sm:$0xff] }
 0x142   : > { %2030 = vst.msk [vmem:[#allocation2 + $0x98] sm:$0xff] %vm226_vm1, %v1998_v45  ;;  %v2088_v2 = vld [vmem:[#allocation2 + $0x60] sm:$0xff]  ;;  %v2001_v8 = vadd.f32 %v13878_v21, %v1707_v38  ;;  %2028 = vst.msk [vmem:[#allocation2 + $0x88] sm:$0xff] %vm226_vm1, %v1996_v54  ;;  %v5205_v47 = vrot.slane %v5203_v63, 4  ;;  %v1706_v3 = vld [vmem:[#allocation2 + $0xa8] sm:$0xff]  ;;  %v16040_v60 = vsel %vm14757_vm7, %v12979_v17, %v5196_v29  ;;  %v1999_v24 = vadd.f32 %v1932_v12, %v1705_v51 }
 0x143   : > { %v13905_v37 = vpop.f32.mrf.mxu1  ;;  %v13879_v11 = vpop.f32.mrf.mxu0  ;;  %2448 = vst.msk [vmem:[#allocation2 + $0x70] sm:$0xff] %vm226_vm1, %v2416_v36  ;;  %v2414_v35 = vadd.f32 %v2323_v42, %v2088_v2  ;;  %v2091_v56 = vld [vmem:[#allocation2 + $0x78] sm:$0xff]  ;;  %v2089_v4 = vld [vmem:[#allocation2 + $0x68] sm:$0xff]  ;;  %v5200_v59 = vsel %vm14757_vm7, %v5198_v5, %v5199_v7  ;;  %v5204_v57 = vsel %vm14757_vm7, %v12980_v61, %v5203_v63  ;;  %v12957_v1 = vld [vmem:[%s14598_s6 + $0xa4] sm:$0x1]  ;;  %v5210_v20 = vrot.slane %v16029_v18, 5 }
 0x144   : > { %v2417_v27 = vadd.f32 %v13905_v37, %v2091_v56  ;;  %2033 = vst.msk [vmem:[#allocation2 + $0xb0] sm:$0xff] %vm226_vm1, %v2001_v8  ;;  %v16044_v6 = vld [vmem:[%s14598_s6 + $0x9c] sm:$0xe]  ;;  %v2002_v19 = vadd.f32 %v13879_v11, %v1708_v0  ;;  %v5207_v55 = vsel %vm14757_vm7, %v5205_v47, %v5206_v31  ;;  %v1711_v21 = vld [vmem:[#allocation2 + $0xd0] sm:$0xff]  ;;  %2031 = vst.msk [vmem:[#allocation2 + $0xa0] sm:$0xff] %vm226_vm1, %v1999_v24  ;;  %v5217_v23 = vrot.slane %v16034_v62, 5 }
 0x145   : > { %v2326_v46 = vpop.f32.mrf.mxu1  ;;  %v1935_v48 = vpop.f32.mrf.mxu0  ;;  %14073 = vmatmul.mubr.msk.bf16.gmra.mxu0 %vm226_vm1, %v12994_v13  ;;  %2446 = vst.msk [vmem:[#allocation2 + $0x60] sm:$0xff] %vm226_vm1, %v2414_v35  ;;  %v12958_v16 = vld [vmem:[%s14598_s6 + $0xa8] sm:$0xe]  ;;  %v12960_v26 = vld [vmem:[%s14598_s6 + $0xb0] sm:$0x1]  ;;  %v12996_v15 = vcombine.low %v16040_v60, %v5200_v59  ;;  %v12997_v40 = vcombine.low %v5204_v57, %v5207_v55  ;;  %v12981_v28 = vrot.slane %v16044_v6, 9 }
 0x146   : > { %v2415_v50 = vadd.f32 %v2326_v46, %v2089_v4  ;;  %v2000_v22 = vadd.f32 %v1935_v48, %v1706_v3  ;;  %14076 = vmatprep.mubr.msk.bf16.mxu0 %vm226_vm1, %v12995_v30  ;;  %2449 = vst.msk [vmem:[#allocation2 + $0x78] sm:$0xff] %vm226_vm1, %v2417_v27  ;;  %v2094_v14 = vld [vmem:[#allocation2 + $0x90] sm:$0xff]  ;;  %2034 = vst.msk [vmem:[#allocation2 + $0xb8] sm:$0xff] %vm226_vm1, %v2002_v19  ;;  %v5213_v43 = vrot.slane %v12957_v1, 5  ;;  %v1709_v12 = vld [vmem:[#allocation2 + $0xc0] sm:$0xff]  ;;  %v5212_v17 = vrot.slane %v5210_v20, 4 }
 0x147   : > { %v13908_v58 = vpop.f32.mrf.mxu1  ;;  %v13882_v44 = vpop.f32.mrf.mxu0  ;;  %v2092_v41 = vld [vmem:[#allocation2 + $0x80] sm:$0xff]  ;;  %v12982_v33 = vrot.slane %v12958_v16, 9  ;;  %v16069_v37 = vld [vmem:[%s14598_s6 + $0xb8] sm:$0xf]  ;;  %v5219_v54 = vrot.slane %v5217_v23, 4  ;;  %v5220_v63 = vrot.slane %v12960_v26, 5  ;;  %v5211_v35 = vsel %vm14757_vm7, %v12981_v28, %v5210_v20 }
 0x148   : > { %2447 = vst.msk [vmem:[#allocation2 + $0x68] sm:$0xff] %vm226_vm1, %v2415_v50  ;;  %v2420_v53 = vadd.f32 %v13908_v58, %v2094_v14  ;;  %2032 = vst.msk [vmem:[#allocation2 + $0xa8] sm:$0xff] %vm226_vm1, %v2000_v22  ;;  %v2005_v29 = vadd.f32 %v13882_v44, %v1711_v21  ;;  %v1712_v36 = vld [vmem:[#allocation2 + $0xd8] sm:$0xff]  ;;  %v1710_v2 = vld [vmem:[#allocation2 + $0xc8] sm:$0xff]  ;;  %v5214_v48 = vsel %vm14757_vm7, %v5212_v17, %v5213_v43  ;;  %v5224_v50 = vrot.slane %v16069_v37, 5 }
 0x149   : > { %v2339_v9 = vpop.f32.mrf.mxu1  ;;  %v1948_v32 = vpop.f32.mrf.mxu0  ;;  %v2095_v10 = vld [vmem:[#allocation2 + $0x98] sm:$0xff]  ;;  %v2093_v45 = vld [vmem:[#allocation2 + $0x88] sm:$0xff]  ;;  %v6455_v31 = vld [vmem:[%s18500_s3] sm:$0x3]  ;;  %v5218_v62 = vsel %vm14757_vm7, %v12982_v33, %v5217_v23  ;;  %v5221_v60 = vsel %vm14757_vm7, %v5219_v54, %v5220_v63  ;;  %vm5714_vm9 = vsmask.f32 256 }
 0x14a   : > { %v2418_v42 = vadd.f32 %v2339_v9, %v2092_v41  ;;  %2452 = vst.msk [vmem:[#allocation2 + $0x90] sm:$0xff] %vm226_vm1, %v2420_v53  ;;  %2037 = vst.msk [vmem:[#allocation2 + $0xd0] sm:$0xff] %vm226_vm1, %v2005_v29  ;;  %v2003_v30 = vadd.f32 %v1948_v32, %v1709_v12  ;;  %v16077_v18 = vld [vmem:[%s14598_s6 + $0xc4] sm:$0xf]  ;;  %14407 = vmatprep.subr.msk.bf16.mxu1 %vm452_vm0, %v6455_v31  ;;  %v1715_v47 = vld [vmem:[#allocation2 + $0xf0] sm:$0xff]  ;;  %v6585_v59 = vsel %vm452_vm0, %v6455_v31, 0 }
 0x14b   : > { %v13909_v25 = vpop.f32.mrf.mxu1  ;;  %v13883_v13 = vpop.f32.mrf.mxu0  ;;  %v2098_v11 = vld [vmem:[#allocation2 + $0xb0] sm:$0xff]  ;;  %v2096_v51 = vld [vmem:[#allocation2 + $0xa0] sm:$0xff]  ;;  %v12963_v6 = vld [vmem:[%s14598_s6 + $0xbc] sm:$0x1]  ;;  %v5231_v19 = vrot.slane %v16077_v18, 5  ;;  %14093 = vmatpush3.bf16.msra.mxu1 %v6585_v59  ;;  %v12998_v9 = vcombine.low %v5211_v35, %v5214_v48  ;;  %v12999_v23 = vcombine.low %v5218_v62, %v5221_v60  ;;  %v5226_v29 = vrot.slane %v5224_v50, 4 }
 0x14c   : > { %2450 = vst.msk [vmem:[#allocation2 + $0x80] sm:$0xff] %vm226_vm1, %v2418_v42  ;;  %v2421_v7 = vadd.f32 %v13909_v25, %v2095_v10  ;;  %v2006_v5 = vadd.f32 %v13883_v13, %v1712_v36  ;;  %2035 = vst.msk [vmem:[#allocation2 + $0xc0] sm:$0xff] %vm226_vm1, %v2003_v30  ;;  %v12961_v27 = vld [vmem:[%s14598_s6 + $0xb4] sm:$0xe]  ;;  %v1713_v22 = vld [vmem:[#allocation2 + $0xe0] sm:$0xff]  ;;  %v5227_v32 = vrot.slane %v12963_v6, 5 }
 0x14d   : > { %v2342_v49 = vpop.f32.mrf.mxu1  ;;  %v1951_v61 = vpop.f32.mrf.mxu0  ;;  %14077 = vmatmul.mubr.msk.bf16.gmra.mxu0 %vm226_vm1, %v12996_v15  ;;  %v2099_v0 = vld [vmem:[#allocation2 + $0xb8] sm:$0xff]  ;;  %v12964_v55 = vld [vmem:[%s14598_s6 + $0xc0] sm:$0xe]  ;;  %v12966_v1 = vld [vmem:[%s14598_s6 + $0xc8] sm:$0x1]  ;;  %v12983_v21 = vrot.slane %v12961_v27, 9 }
 0x14e   : > { %v2419_v38 = vadd.f32 %v2342_v49, %v2093_v45  ;;  %2453 = vst.msk [vmem:[#allocation2 + $0x98] sm:$0xff] %vm226_vm1, %v2421_v7  ;;  %v2004_v46 = vadd.f32 %v1951_v61, %v1710_v2  ;;  %2038 = vst.msk [vmem:[#allocation2 + $0xd8] sm:$0xff] %vm226_vm1, %v2006_v5  ;;  %14080 = vmatprep.mubr.msk.bf16.mxu0 %vm226_vm1, %v12997_v40  ;;  %v1716_v41 = vld [vmem:[#allocation2 + $0xf8] sm:$0xff]  ;;  %v12984_v15 = vrot.slane %v12964_v55, 9  ;;  %v5233_v40 = vrot.slane %v5231_v19, 4  ;;  %v1714_v12 = vld [vmem:[#allocation2 + $0xe8] sm:$0xff] }
 0x14f   : > { %v13912_v8 = vpop.f32.mrf.mxu1  ;;  %v13886_v4 = vpop.f32.mrf.mxu0  ;;  %v2097_v20 = vld [vmem:[#allocation2 + $0xa8] sm:$0xff]  ;;  %v5234_v28 = vrot.slane %v12966_v1, 5  ;;  %v12968_v10 = vld [vmem:[%s14598_s6 + $0xd0] sm:$0xf]  ;;  %v5225_v30 = vsel %vm14757_vm7, %v12983_v21, %v5224_v50  ;;  %v5228_v36 = vsel %vm14757_vm7, %v5226_v29, %v5227_v32  ;;  %v12969_v31 = vld [vmem:[%s14598_s6 + $0xd4] sm:$0x1] }
 0x150   : > { %2451 = vst.msk [vmem:[#allocation2 + $0x88] sm:$0xff] %vm226_vm1, %v2419_v38  ;;  %v2424_v56 = vadd.f32 %v13912_v8, %v2098_v11  ;;  %2036 = vst.msk [vmem:[#allocation2 + $0xc8] sm:$0xff] %vm226_vm1, %v2004_v46  ;;  %v2009_v3 = vadd.f32 %v13886_v4, %v1715_v47  ;;  %v2900_v49 = vld [vmem:[#allocation2 + $0x10] sm:$0xff]  ;;  %v12967_v54 = vld [vmem:[%s14598_s6 + $0xcc] sm:$0xe]  ;;  %v5238_v63 = vrot.slane %v12968_v10, 5  ;;  %v5232_v2 = vsel %vm14757_vm7, %v12984_v15, %v5231_v19 }
 0x151   : > { %v2355_v58 = vpop.f32.mrf.mxu1  ;;  %v1964_v44 = vpop.f32.mrf.mxu0  ;;  %v2102_v25 = vld [vmem:[#allocation2 + $0xd0] sm:$0xff]  ;;  %v5235_v61 = vsel %vm14757_vm7, %v5233_v40, %v5234_v28  ;;  %v2898_v46 = vld [vmem:[#allocation2] sm:$0xff]  ;;  %v13000_v4 = vcombine.low %v5225_v30, %v5228_v36  ;;  %v12985_v48 = vrot.slane %v12967_v54, 9  ;;  %v2901_v27 = vld [vmem:[#allocation2 + $0x18] sm:$0xff]  ;;  %vm5770_vm11 = vsmask.f32 7938 }
 0x152   : > { %2456 = vst.msk [vmem:[#allocation2 + $0xb0] sm:$0xff] %vm226_vm1, %v2424_v56  ;;  %v2422_v24 = vadd.f32 %v2355_v58, %v2096_v51  ;;  %2041 = vst.msk [vmem:[#allocation2 + $0xf0] sm:$0xff] %vm226_vm1, %v2009_v3  ;;  %v2007_v14 = vadd.f32 %v1964_v44, %v1713_v22  ;;  %v13001_v51 = vcombine.low %v5232_v2, %v5235_v61  ;;  %v5240_v58 = vrot.slane %v5238_v63, 4  ;;  %v2899_v19 = vld [vmem:[#allocation2 + $0x8] sm:$0xff]  ;;  %v2904_v1 = vld [vmem:[#allocation2 + $0x30] sm:$0xff] }
 0x153   : > { %v13913_v57 = vpop.f32.mrf.mxu1  ;;  %v13887_v16 = vpop.f32.mrf.mxu0  ;;  %v2100_v7 = vld [vmem:[#allocation2 + $0xc0] sm:$0xff]  ;;  %v2905_v40 = vld [vmem:[#allocation2 + $0x38] sm:$0xff]  ;;  %v2908_v30 = vld [vmem:[#allocation2 + $0x50] sm:$0xff]  ;;  %vm5922_vm15 = vsmask.f32 4368 }
 0x154   : > { %2454 = vst.msk [vmem:[#allocation2 + $0xa0] sm:$0xff] %vm226_vm1, %v2422_v24  ;;  %v2425_v53 = vadd.f32 %v13913_v57, %v2099_v0  ;;  %2039 = vst.msk [vmem:[#allocation2 + $0xe0] sm:$0xff] %vm226_vm1, %v2007_v14  ;;  %v2010_v26 = vadd.f32 %v13887_v16, %v1716_v41  ;;  %v5241_v0 = vrot.slane %v12969_v31, 5  ;;  %v5239_v14 = vsel %vm14757_vm7, %v12985_v48, %v5238_v63 }
 0x155   : > { %v2358_v42 = vpop.f32.mrf.mxu1  ;;  %v1967_v13 = vpop.f32.mrf.mxu0  ;;  %14081 = vmatmul.mubr.msk.bf16.gmra.mxu0 %vm226_vm1, %v12998_v9  ;;  %v2103_v11 = vld [vmem:[#allocation2 + $0xd8] sm:$0xff]  ;;  %vm16168_vm10 = vmand %vm5707_vm8, %vm5714_vm9 }
 0x156   : > { %2457 = vst.msk [vmem:[#allocation2 + $0xb8] sm:$0xff] %vm226_vm1, %v2425_v53  ;;  %v2423_v43 = vadd.f32 %v2358_v42, %v2097_v20  ;;  %2042 = vst.msk [vmem:[#allocation2 + $0xf8] sm:$0xff] %vm226_vm1, %v2010_v26  ;;  %v2008_v33 = vadd.f32 %v1967_v13, %v1714_v12  ;;  %14084 = vmatprep.mubr.msk.bf16.mxu0 %vm226_vm1, %v12999_v23  ;;  %v5242_v9 = vsel %vm14757_vm7, %v5240_v58, %v5241_v0  ;;  %v2902_v23 = vld [vmem:[#allocation2 + $0x20] sm:$0xff] }
 0x157   : > { %v13916_v17 = vpop.f32.mrf.mxu1  ;;  %v13926_v37 = vpop.f32.mrf.mxu0  ;;  %v2101_v56 = vld [vmem:[#allocation2 + $0xc8] sm:$0xff]  ;;  %v13002_v26 = vcombine.low %v5239_v14, %v5242_v9  ;;  %v2913_v14 = vld [vmem:[#allocation2 + $0x78] sm:$0xff]  ;;  %vm16178_vm12 = vmand %vm5707_vm8, %vm5770_vm11 }
 0x158   : > { %2455 = vst.msk [vmem:[#allocation2 + $0xa8] sm:$0xff] %vm226_vm1, %v2423_v43  ;;  %v2428_v45 = vadd.f32 %v13916_v17, %v2102_v25  ;;  %2040 = vst.msk [vmem:[#allocation2 + $0xe8] sm:$0xff] %vm226_vm1, %v2008_v33  ;;  %v3194_v5 = vadd.f32 %v13926_v37, %v2900_v49  ;;  %v2903_v17 = vld [vmem:[#allocation2 + $0x28] sm:$0xff] }
 0x159   : > { %v2371_v38 = vpop.f32.mrf.mxu1  ;;  %v3065_v18 = vpop.f32.mrf.mxu0  ;;  %v2106_v60 = vld [vmem:[#allocation2 + $0xf0] sm:$0xff]  ;;  %vm16391_vm14 = vmand %vm5704_vm13, %vm5770_vm11 }
 0x15a   : > { %2460 = vst.msk [vmem:[#allocation2 + $0xd0] sm:$0xff] %vm226_vm1, %v2428_v45  ;;  %v2426_v8 = vadd.f32 %v2371_v38, %v2100_v7  ;;  %3226 = vst.msk [vmem:[#allocation2 + $0x10] sm:$0xff] %vm226_vm1, %v3194_v5  ;;  %v3192_v47 = vadd.f32 %v3065_v18, %v2898_v46  ;;  %v2906_v5 = vld [vmem:[#allocation2 + $0x40] sm:$0xff]  ;;  %v2909_v18 = vld [vmem:[#allocation2 + $0x58] sm:$0xff] }
 0x15b   : > { %v13917_v35 = vpop.f32.mrf.mxu1  ;;  %v13927_v50 = vpop.f32.mrf.mxu0  ;;  %v2104_v59 = vld [vmem:[#allocation2 + $0xe0] sm:$0xff]  ;;  %vm16402_vm2 = vmor %vm5714_vm9, %vm5922_vm15 }
 0x15c   : > { %2458 = vst.msk [vmem:[#allocation2 + $0xc0] sm:$0xff] %vm226_vm1, %v2426_v8  ;;  %v2429_v62 = vadd.f32 %v13917_v35, %v2103_v11  ;;  %3224 = vst.msk [vmem:[#allocation2] sm:$0xff] %vm226_vm1, %v3192_v47  ;;  %v3195_v6 = vadd.f32 %v13927_v50, %v2901_v27 }
 0x15d   : > { %v2374_v3 = vpop.f32.mrf.mxu1  ;;  %v3068_v22 = vpop.f32.mrf.mxu0  ;;  %14085 = vmatmul.mubr.msk.bf16.gmra.mxu0 %vm226_vm1, %v13000_v4  ;;  %v2107_v53 = vld [vmem:[#allocation2 + $0xf8] sm:$0xff] }
 0x15e   : > { %2461 = vst.msk [vmem:[#allocation2 + $0xd8] sm:$0xff] %vm226_vm1, %v2429_v62  ;;  %v2427_v24 = vadd.f32 %v2374_v3, %v2101_v56  ;;  %3227 = vst.msk [vmem:[#allocation2 + $0x18] sm:$0xff] %vm226_vm1, %v3195_v6  ;;  %v3193_v57 = vadd.f32 %v3068_v22, %v2899_v19  ;;  %14088 = vmatprep.mubr.msk.bf16.mxu0 %vm226_vm1, %v13001_v51  ;;  %v2907_v62 = vld [vmem:[#allocation2 + $0x48] sm:$0xff]  ;;  %v2912_v3 = vld [vmem:[#allocation2 + $0x70] sm:$0xff] }
 0x15f   : > { %v13920_v44 = vpop.f32.mrf.mxu1  ;;  %v13930_v20 = vpop.f32.mrf.mxu0  ;;  %v2105_v42 = vld [vmem:[#allocation2 + $0xe8] sm:$0xff] }
 0x160   : > { %2459 = vst.msk [vmem:[#allocation2 + $0xc8] sm:$0xff] %vm226_vm1, %v2427_v24  ;;  %v2432_v55 = vadd.f32 %v13920_v44, %v2106_v60  ;;  %3225 = vst.msk [vmem:[#allocation2 + $0x8] sm:$0xff] %vm226_vm1, %v3193_v57  ;;  %v3198_v41 = vadd.f32 %v13930_v20, %v2904_v1  ;;  %v2910_v44 = vld [vmem:[#allocation2 + $0x60] sm:$0xff] }
 0x161   : > { %v2387_v21 = vpop.f32.mrf.mxu1  ;;  %v3081_v29 = vpop.f32.mrf.mxu0  ;;  %v3466_v10 = vld [vmem:[#allocation2 + $0x10] sm:$0xff] }
 0x162   : > { %2464 = vst.msk [vmem:[#allocation2 + $0xf0] sm:$0xff] %vm226_vm1, %v2432_v55  ;;  %v2430_v16 = vadd.f32 %v2387_v21, %v2104_v59  ;;  %3230 = vst.msk [vmem:[#allocation2 + $0x30] sm:$0xff] %vm226_vm1, %v3198_v41  ;;  %v3196_v25 = vadd.f32 %v3081_v29, %v2902_v23  ;;  %v2911_v23 = vld [vmem:[#allocation2 + $0x68] sm:$0xff] }
 0x163   : > { %v13921_v32 = vpop.f32.mrf.mxu1  ;;  %v13931_v28 = vpop.f32.mrf.mxu0  ;;  %v3464_v45 = vld [vmem:[#allocation2] sm:$0xff] }
 0x164   : > { %2462 = vst.msk [vmem:[#allocation2 + $0xe0] sm:$0xff] %vm226_vm1, %v2430_v16  ;;  %v2433_v15 = vadd.f32 %v13921_v32, %v2107_v53  ;;  %3228 = vst.msk [vmem:[#allocation2 + $0x20] sm:$0xff] %vm226_vm1, %v3196_v25  ;;  %v3199_v12 = vadd.f32 %v13931_v28, %v2905_v40 }
 0x165   : > { %v2390_v43 = vpop.f32.mrf.mxu1  ;;  %v3084_v7 = vpop.f32.mrf.mxu0  ;;  %14089 = vmatmul.mubr.msk.bf16.gmra.mxu0 %vm226_vm1, %v13002_v26  ;;  %v3467_v63 = vld [vmem:[#allocation2 + $0x18] sm:$0xff] }
 0x166   : > { %2465 = vst.msk [vmem:[#allocation2 + $0xf8] sm:$0xff] %vm226_vm1, %v2433_v15  ;;  %v2431_v13 = vadd.f32 %v2390_v43, %v2105_v42  ;;  %3231 = vst.msk [vmem:[#allocation2 + $0x38] sm:$0xff] %vm226_vm1, %v3199_v12  ;;  %v3197_v49 = vadd.f32 %v3084_v7, %v2903_v17  ;;  %v2916_v15 = vld [vmem:[#allocation2 + $0x90] sm:$0xff] }
 0x167   : > { %v13960_v33 = vpop.f32.mrf.mxu1  ;;  %v13934_v36 = vpop.f32.mrf.mxu0  ;;  %v3465_v31 = vld [vmem:[#allocation2 + $0x8] sm:$0xff] }
 0x168   : > { %2463 = vst.msk [vmem:[#allocation2 + $0xe8] sm:$0xff] %vm226_vm1, %v2431_v13  ;;  %v3760_v37 = vadd.f32 %v13960_v33, %v3466_v10  ;;  %3229 = vst.msk [vmem:[#allocation2 + $0x28] sm:$0xff] %vm226_vm1, %v3197_v49  ;;  %v3202_v38 = vadd.f32 %v13934_v36, %v2908_v30  ;;  %v2914_v13 = vld [vmem:[#allocation2 + $0x80] sm:$0xff] }
 0x169   : > { %v3631_v54 = vpop.f32.mrf.mxu1  ;;  %v3097_v2 = vpop.f32.mrf.mxu0  ;;  %v3470_v47 = vld [vmem:[#allocation2 + $0x30] sm:$0xff] }
 0x16a   : > { %3792 = vst.msk [vmem:[#allocation2 + $0x10] sm:$0xff] %vm226_vm1, %v3760_v37  ;;  %v3758_v11 = vadd.f32 %v3631_v54, %v3464_v45  ;;  %3234 = vst.msk [vmem:[#allocation2 + $0x50] sm:$0xff] %vm226_vm1, %v3202_v38  ;;  %v3200_v8 = vadd.f32 %v3097_v2, %v2906_v5  ;;  %v2917_v37 = vld [vmem:[#allocation2 + $0x98] sm:$0xff] }
 0x16b   : > { %v13961_v61 = vpop.f32.mrf.mxu1  ;;  %v13935_v35 = vpop.f32.mrf.mxu0  ;;  %v3468_v51 = vld [vmem:[#allocation2 + $0x20] sm:$0xff] }
 0x16c   : > { %3790 = vst.msk [vmem:[#allocation2] sm:$0xff] %vm226_vm1, %v3758_v11  ;;  %v3761_v46 = vadd.f32 %v13961_v61, %v3467_v63  ;;  %3232 = vst.msk [vmem:[#allocation2 + $0x40] sm:$0xff] %vm226_vm1, %v3200_v8  ;;  %v3203_v4 = vadd.f32 %v13935_v35, %v2909_v18  ;;  %v2915_v11 = vld [vmem:[#allocation2 + $0x88] sm:$0xff]  ;;  %v2920_v35 = vld [vmem:[#allocation2 + $0xb0] sm:$0xff] }
 0x16d   : > { %v3634_v56 = vpop.f32.mrf.mxu1  ;;  %v3100_v27 = vpop.f32.mrf.mxu0  ;;  %v3471_v24 = vld [vmem:[#allocation2 + $0x38] sm:$0xff] }
 0x16e   : > { %3793 = vst.msk [vmem:[#allocation2 + $0x18] sm:$0xff] %vm226_vm1, %v3761_v46  ;;  %v3759_v48 = vadd.f32 %v3634_v56, %v3465_v31  ;;  %3235 = vst.msk [vmem:[#allocation2 + $0x58] sm:$0xff] %vm226_vm1, %v3203_v4  ;;  %v3201_v58 = vadd.f32 %v3100_v27, %v2907_v62  ;;  %v5719_v46 = vld [vmem:[#allocation3 + $0xc] sm:$0x1] }
 0x16f   : > { %v13964_v50 = vpop.f32.mrf.mxu1  ;;  %v13938_v60 = vpop.f32.mrf.mxu0  ;;  %v3469_v55 = vld [vmem:[#allocation2 + $0x28] sm:$0xff] }
 0x170   : > { %3791 = vst.msk [vmem:[#allocation2 + $0x8] sm:$0xff] %vm226_vm1, %v3759_v48  ;;  %v3764_v0 = vadd.f32 %v13964_v50, %v3470_v47  ;;  %3233 = vst.msk [vmem:[#allocation2 + $0x48] sm:$0xff] %vm226_vm1, %v3201_v58  ;;  %v3206_v19 = vadd.f32 %v13938_v60, %v2912_v3  ;;  %v5720_v47 = vsel %vm16168_vm10, 0, %v5719_v46 }
 0x171   : > { %v3647_v6 = vpop.f32.mrf.mxu1  ;;  %v3113_v59 = vpop.f32.mrf.mxu0  ;;  %v3474_v53 = vld [vmem:[#allocation2 + $0x50] sm:$0xff]  ;;  %5721 = vst [vmem:[#allocation3 + $0xc] sm:$0x1] %v5720_v47 }
 0x172   : > { %3796 = vst.msk [vmem:[#allocation2 + $0x30] sm:$0xff] %vm226_vm1, %v3764_v0  ;;  %v3762_v22 = vadd.f32 %v3647_v6, %v3468_v51  ;;  %3238 = vst.msk [vmem:[#allocation2 + $0x70] sm:$0xff] %vm226_vm1, %v3206_v19  ;;  %v3204_v1 = vadd.f32 %v3113_v59, %v2910_v44  ;;  %v2918_v51 = vld [vmem:[#allocation2 + $0xa0] sm:$0xff]  ;;  %v2921_v19 = vld [vmem:[#allocation2 + $0xb8] sm:$0xff] }
 0x173   : > { %v13965_v57 = vpop.f32.mrf.mxu1  ;;  %v13939_v9 = vpop.f32.mrf.mxu0  ;;  %v3472_v42 = vld [vmem:[#allocation2 + $0x40] sm:$0xff] }
 0x174   : > { %3794 = vst.msk [vmem:[#allocation2 + $0x20] sm:$0xff] %vm226_vm1, %v3762_v22  ;;  %v3765_v20 = vadd.f32 %v13965_v57, %v3471_v24  ;;  %3236 = vst.msk [vmem:[#allocation2 + $0x60] sm:$0xff] %vm226_vm1, %v3204_v1  ;;  %v3207_v41 = vadd.f32 %v13939_v9, %v2913_v14  ;;  %v5778_v6 = vld [vmem:[#allocation3 + $0x20] sm:$0x1]  ;;  %v5775_v1 = vld [vmem:[#allocation3 + $0x14] sm:$0x1] }
 0x175   : > { %v3650_v21 = vpop.f32.mrf.mxu1  ;;  %v3116_v29 = vpop.f32.mrf.mxu0  ;;  %v3475_v43 = vld [vmem:[#allocation2 + $0x58] sm:$0xff]  ;;  %v5779_v44 = vsel %vm16178_vm12, 0, %v5778_v6  ;;  %v2919_v14 = vld [vmem:[#allocation2 + $0xa8] sm:$0xff] }
 0x176   : > { %3797 = vst.msk [vmem:[#allocation2 + $0x38] sm:$0xff] %vm226_vm1, %v3765_v20  ;;  %v3763_v16 = vadd.f32 %v3650_v21, %v3469_v55  ;;  %3239 = vst.msk [vmem:[#allocation2 + $0x78] sm:$0xff] %vm226_vm1, %v3207_v41  ;;  %v3205_v25 = vadd.f32 %v3116_v29, %v2911_v23  ;;  %v5776_v21 = vsel %vm16178_vm12, 0, %v5775_v1  ;;  %v5722_v23 = vld [vmem:[#allocation3 + $0x18] sm:$0x1] }
 0x177   : > { %v13968_v32 = vpop.f32.mrf.mxu1  ;;  %v13942_v40 = vpop.f32.mrf.mxu0  ;;  %v3473_v33 = vld [vmem:[#allocation2 + $0x48] sm:$0xff]  ;;  %5780 = vst [vmem:[#allocation3 + $0x20] sm:$0x1] %v5779_v44  ;;  %5777 = vst [vmem:[#allocation3 + $0x14] sm:$0x1] %v5776_v21 }
 0x178   : > { %3795 = vst.msk [vmem:[#allocation2 + $0x28] sm:$0xff] %vm226_vm1, %v3763_v16  ;;  %v3768_v26 = vadd.f32 %v13968_v32, %v3474_v53  ;;  %3237 = vst.msk [vmem:[#allocation2 + $0x68] sm:$0xff] %vm226_vm1, %v3205_v25  ;;  %v3210_v10 = vadd.f32 %v13942_v40, %v2916_v15  ;;  %v5723_v32 = vsel %vm16168_vm10, 0, %v5722_v23  ;;  %v2924_v40 = vld [vmem:[#allocation2 + $0xd0] sm:$0xff] }
 0x179   : > { %v3663_v28 = vpop.f32.mrf.mxu1  ;;  %v3129_v17 = vpop.f32.mrf.mxu0  ;;  %v3478_v54 = vld [vmem:[#allocation2 + $0x70] sm:$0xff]  ;;  %5724 = vst [vmem:[#allocation3 + $0x18] sm:$0x1] %v5723_v32 }
 0x17a   : > { %3800 = vst.msk [vmem:[#allocation2 + $0x50] sm:$0xff] %vm226_vm1, %v3768_v26  ;;  %v3766_v12 = vadd.f32 %v3663_v28, %v3472_v42  ;;  %3242 = vst.msk [vmem:[#allocation2 + $0x90] sm:$0xff] %vm226_vm1, %v3210_v10  ;;  %v3208_v45 = vadd.f32 %v3129_v17, %v2914_v13  ;;  %v5725_v26 = vld [vmem:[#allocation3 + $0x24] sm:$0x1]  ;;  %v5784_v17 = vld [vmem:[#allocation3 + $0x38] sm:$0x1] }
 0x17b   : > { %v13969_v7 = vpop.f32.mrf.mxu1  ;;  %v13943_v30 = vpop.f32.mrf.mxu0  ;;  %v3476_v61 = vld [vmem:[#allocation2 + $0x60] sm:$0xff] }
 0x17c   : > { %3798 = vst.msk [vmem:[#allocation2 + $0x40] sm:$0xff] %vm226_vm1, %v3766_v12  ;;  %v3769_v49 = vadd.f32 %v13969_v7, %v3475_v43  ;;  %3240 = vst.msk [vmem:[#allocation2 + $0x80] sm:$0xff] %vm226_vm1, %v3208_v45  ;;  %v3211_v63 = vadd.f32 %v13943_v30, %v2917_v37  ;;  %v5726_v43 = vsel %vm16168_vm10, 0, %v5725_v26  ;;  %v2929_v26 = vld [vmem:[#allocation2 + $0xf8] sm:$0xff] }
 0x17d   : > { %v3666_v36 = vpop.f32.mrf.mxu1  ;;  %v3132_v5 = vpop.f32.mrf.mxu0  ;;  %v3479_v48 = vld [vmem:[#allocation2 + $0x78] sm:$0xff]  ;;  %5727 = vst [vmem:[#allocation3 + $0x24] sm:$0x1] %v5726_v43 }
 0x17e   : > { %3801 = vst.msk [vmem:[#allocation2 + $0x58] sm:$0xff] %vm226_vm1, %v3769_v49  ;;  %v3767_v38 = vadd.f32 %v3666_v36, %v3473_v33  ;;  %3243 = vst.msk [vmem:[#allocation2 + $0x98] sm:$0xff] %vm226_vm1, %v3211_v63  ;;  %v3209_v31 = vadd.f32 %v3132_v5, %v2915_v11  ;;  %v2922_v33 = vld [vmem:[#allocation2 + $0xc0] sm:$0xff]  ;;  %v5785_v49 = vsel %vm16178_vm12, 0, %v5784_v17  ;;  %v2927_v17 = vld [vmem:[#allocation2 + $0xe8] sm:$0xff] }
 0x17f   : > { %v13972_v2 = vpop.f32.mrf.mxu1  ;;  %v13946_v56 = vpop.f32.mrf.mxu0  ;;  %v3477_v3 = vld [vmem:[#allocation2 + $0x68] sm:$0xff]  ;;  %5786 = vst [vmem:[#allocation3 + $0x38] sm:$0x1] %v5785_v49 }
 0x180   : > { %3799 = vst.msk [vmem:[#allocation2 + $0x48] sm:$0xff] %vm226_vm1, %v3767_v38  ;;  %v3772_v18 = vadd.f32 %v13972_v2, %v3478_v54  ;;  %3241 = vst.msk [vmem:[#allocation2 + $0x88] sm:$0xff] %vm226_vm1, %v3209_v31  ;;  %v3214_v62 = vadd.f32 %v13946_v56, %v2920_v35  ;;  %v5781_v54 = vld [vmem:[#allocation3 + $0x2c] sm:$0x1]  ;;  %v2925_v38 = vld [vmem:[#allocation2 + $0xd8] sm:$0xff]  ;;  %v14535_v2 = vmov 0  }
 0x181   : > { %v3679_v4 = vpop.f32.mrf.mxu1  ;;  %v3145_v58 = vpop.f32.mrf.mxu0  ;;  %v3482_v57 = vld [vmem:[#allocation2 + $0x90] sm:$0xff]  ;;  %v5782_v5 = vsel %vm16178_vm12, 0, %v5781_v54  ;;  %5705 = vst.msk [vmem:[#allocation3] sm:$0xf] %vm5704_vm13, %v14535_v2  ;;  %5706 = vst.msk [vmem:[#allocation3 + $0x4] sm:$0xf] %vm5704_vm13, %v14535_v2 }
 0x182   : > { %3804 = vst.msk [vmem:[#allocation2 + $0x70] sm:$0xff] %vm226_vm1, %v3772_v18  ;;  %v3770_v50 = vadd.f32 %v3679_v4, %v3476_v61  ;;  %3246 = vst.msk [vmem:[#allocation2 + $0xb0] sm:$0xff] %vm226_vm1, %v3214_v62  ;;  %v3212_v60 = vadd.f32 %v3145_v58, %v2918_v51  ;;  %v2923_v35 = vld [vmem:[#allocation2 + $0xc8] sm:$0xff]  ;;  %v5731_v62 = vld [vmem:[#allocation3 + $0x3c] sm:$0x1] }
 0x183   : > { %v13973_v0 = vpop.f32.mrf.mxu1  ;;  %v13947_v22 = vpop.f32.mrf.mxu0  ;;  %v3480_v41 = vld [vmem:[#allocation2 + $0x80] sm:$0xff]  ;;  %5708 = vst.msk [vmem:[#allocation3 + $0x8] sm:$0x1] %vm5707_vm8, %v14535_v2  ;;  %5712 = vst.msk [vmem:[#allocation3 + $0xd4] sm:$0x1] %vm5707_vm8, %v14535_v2  ;;  %v5732_v51 = vsel %vm16168_vm10, 0, %v5731_v62 }
 0x184   : > { %3802 = vst.msk [vmem:[#allocation2 + $0x60] sm:$0xff] %vm226_vm1, %v3770_v50  ;;  %v3773_v24 = vadd.f32 %v13973_v0, %v3479_v48  ;;  %3244 = vst.msk [vmem:[#allocation2 + $0xa0] sm:$0xff] %vm226_vm1, %v3212_v60  ;;  %v3215_v55 = vadd.f32 %v13947_v22, %v2921_v19  ;;  %v3858_v62 = vld [vmem:[#allocation2 + $0x18] sm:$0xff] }
 0x185   : > { %v3682_v59 = vpop.f32.mrf.mxu1  ;;  %v3148_v9 = vpop.f32.mrf.mxu0  ;;  %v3483_v25 = vld [vmem:[#allocation2 + $0x98] sm:$0xff]  ;;  %5710 = vst.msk [vmem:[#allocation3 + $0xcc] sm:$0xf] %vm5704_vm13, %v14535_v2  ;;  %5711 = vst.msk [vmem:[#allocation3 + $0xd0] sm:$0xf] %vm5704_vm13, %v14535_v2 }
 0x186   : > { %3805 = vst.msk [vmem:[#allocation2 + $0x78] sm:$0xff] %vm226_vm1, %v3773_v24  ;;  %v3771_v20 = vadd.f32 %v3682_v59, %v3477_v3  ;;  %3247 = vst.msk [vmem:[#allocation2 + $0xb8] sm:$0xff] %vm226_vm1, %v3215_v55  ;;  %v3213_v16 = vadd.f32 %v3148_v9, %v2919_v14  ;;  %v5790_v3 = vld [vmem:[#allocation3 + $0x50] sm:$0x1] }
 0x187   : > { %v13976_v53 = vpop.f32.mrf.mxu1  ;;  %v13950_v28 = vpop.f32.mrf.mxu0  ;;  %v3481_v13 = vld [vmem:[#allocation2 + $0x88] sm:$0xff]  ;;  %5783 = vst [vmem:[#allocation3 + $0x2c] sm:$0x1] %v5782_v5  ;;  %5733 = vst [vmem:[#allocation3 + $0x3c] sm:$0x1] %v5732_v51  ;;  %v5791_v6 = vsel %vm16178_vm12, 0, %v5790_v3 }
 0x188   : > { %3803 = vst.msk [vmem:[#allocation2 + $0x68] sm:$0xff] %vm226_vm1, %v3771_v20  ;;  %v3776_v29 = vadd.f32 %v13976_v53, %v3482_v57  ;;  %3245 = vst.msk [vmem:[#allocation2 + $0xa8] sm:$0xff] %vm226_vm1, %v3213_v16  ;;  %v3218_v12 = vadd.f32 %v13950_v28, %v2924_v40  ;;  %v5728_v24 = vld [vmem:[#allocation3 + $0x30] sm:$0x1]  ;;  %v5716_v44 = vld [vmem:[#allocation3] sm:$0x1] }
 0x189   : > { %v3695_v42 = vpop.f32.mrf.mxu1  ;;  %v3161_v45 = vpop.f32.mrf.mxu0  ;;  %v3486_v36 = vld [vmem:[#allocation2 + $0xb0] sm:$0xff]  ;;  %5792 = vst [vmem:[#allocation3 + $0x50] sm:$0x1] %v5791_v6  ;;  %v5729_v59 = vsel %vm16168_vm10, 0, %v5728_v24  ;;  %v5787_v20 = vld [vmem:[#allocation3 + $0x44] sm:$0x1] }
 0x18a   : > { %3808 = vst.msk [vmem:[#allocation2 + $0x90] sm:$0xff] %vm226_vm1, %v3776_v29  ;;  %v3774_v15 = vadd.f32 %v3695_v42, %v3480_v41  ;;  %3250 = vst.msk [vmem:[#allocation2 + $0xd0] sm:$0xff] %vm226_vm1, %v3218_v12  ;;  %v3216_v30 = vadd.f32 %v3161_v45, %v2922_v33  ;;  %v2928_v57 = vld [vmem:[#allocation2 + $0xf0] sm:$0xff]  ;;  %v5717_v14 = vsel %vm16168_vm10, 0, %v5716_v44  ;;  %v5788_v41 = vsel %vm16178_vm12, 0, %v5787_v20  ;;  %v2926_v16 = vld [vmem:[#allocation2 + $0xe0] sm:$0xff] }
 0x18b   : > { %v13977_v10 = vpop.f32.mrf.mxu1  ;;  %v13951_v11 = vpop.f32.mrf.mxu0  ;;  %v3484_v46 = vld [vmem:[#allocation2 + $0xa0] sm:$0xff]  ;;  %5730 = vst [vmem:[#allocation3 + $0x30] sm:$0x1] %v5729_v59  ;;  %5718 = vst [vmem:[#allocation3] sm:$0x1] %v5717_v14 }
 0x18c   : > { %3806 = vst.msk [vmem:[#allocation2 + $0x80] sm:$0xff] %vm226_vm1, %v3774_v15  ;;  %v3777_v7 = vadd.f32 %v13977_v10, %v3483_v25  ;;  %3248 = vst.msk [vmem:[#allocation2 + $0xc0] sm:$0xff] %vm226_vm1, %v3216_v30  ;;  %v3219_v31 = vadd.f32 %v13951_v11, %v2925_v38  ;;  %v5737_v28 = vld [vmem:[#allocation3 + $0x54] sm:$0x1]  ;;  %v5796_v5 = vld [vmem:[#allocation3 + $0x68] sm:$0x1] }
 0x18d   : > { %v3698_v37 = vpop.f32.mrf.mxu1  ;;  %v3164_v56 = vpop.f32.mrf.mxu0  ;;  %v3487_v48 = vld [vmem:[#allocation2 + $0xb8] sm:$0xff]  ;;  %5789 = vst [vmem:[#allocation3 + $0x44] sm:$0x1] %v5788_v41  ;;  %v13084_v51 = vld [vmem:[%s18500_s3 + $0x2] sm:$0x3]  ;;  %v3861_v41 = vld [vmem:[#allocation2 + $0x30] sm:$0xff] }
 0x18e   : > { %3809 = vst.msk [vmem:[#allocation2 + $0x98] sm:$0xff] %vm226_vm1, %v3777_v7  ;;  %v3775_v63 = vadd.f32 %v3698_v37, %v3481_v13  ;;  %3251 = vst.msk [vmem:[#allocation2 + $0xd8] sm:$0xff] %vm226_vm1, %v3219_v31  ;;  %v3217_v4 = vadd.f32 %v3164_v56, %v2923_v35  ;;  %v5738_v13 = vsel %vm16168_vm10, 0, %v5737_v28  ;;  %v3857_v37 = vld [vmem:[#allocation2 + $0x10] sm:$0xff]  ;;  %v3855_v31 = vld [vmem:[#allocation2] sm:$0xff]  ;;  %14408 = vmatprep.subr.msk.bf16.mxu0 %vm452_vm0, %v13084_v51  ;;  %v7375_v6 = vsel %vm452_vm0, %v13084_v51, 0 }
 0x18f   : > { %v13980_v61 = vpop.f32.mrf.mxu1  ;;  %v3485_v0 = vld [vmem:[#allocation2 + $0xa8] sm:$0xff]  ;;  %5739 = vst [vmem:[#allocation3 + $0x54] sm:$0x1] %v5738_v13  ;;  %14127 = vmatpush3.bf16.msra.mxu0 %v7375_v6  ;;  %v6813_v59 = vld [vmem:[#allocation3 + $0x4] sm:$0xf]  ;;  %v3865_v51 = vld [vmem:[#allocation2 + $0x50] sm:$0xff] }
 0x190   : > { %3807 = vst.msk [vmem:[#allocation2 + $0x88] sm:$0xff] %vm226_vm1, %v3775_v63  ;;  %v3780_v18 = vadd.f32 %v13980_v61, %v3486_v36  ;;  %3249 = vst.msk [vmem:[#allocation2 + $0xc8] sm:$0xff] %vm226_vm1, %v3217_v4  ;;  %v5772_v63 = vld [vmem:[#allocation3 + $0x8] sm:$0x1]  ;;  %v5793_v4 = vld [vmem:[#allocation3 + $0x5c] sm:$0x1] }
 0x191   : > { %v3711_v47 = vpop.f32.mrf.mxu1  ;;  %v3490_v22 = vld [vmem:[#allocation2 + $0xd0] sm:$0xff]  ;;  %v5773_v2 = vsel %vm16178_vm12, 0, %v5772_v63 }
 0x192   : > { %3812 = vst.msk [vmem:[#allocation2 + $0xb0] sm:$0xff] %vm226_vm1, %v3780_v18  ;;  %v3778_v50 = vadd.f32 %v3711_v47, %v3484_v46  ;;  %v13954_v55 = vpop.f32.mrf.mxu0  ;;  %v14475_v54 = vld [vmem:[#allocation3] sm:$0xff]   ;;  %v5797_v18 = vsel %vm16178_vm12, 0, %v5796_v5  ;;  %5774 = vst [vmem:[#allocation3 + $0x8] sm:$0x1] %v5773_v2 }
 0x193   : > { %v13981_v58 = vpop.f32.mrf.mxu1  ;;  %v3222_v9 = vadd.f32 %v13954_v55, %v2928_v57  ;;  %v3488_v53 = vld [vmem:[#allocation2 + $0xc0] sm:$0xff]  ;;  %14094 = vmatprep.mubr.msk.bf16.mxu1 %vm226_vm1, %v14475_v54  ;;  %5798 = vst [vmem:[#allocation3 + $0x68] sm:$0x1] %v5797_v18 }
 0x194   : > { %3810 = vst.msk [vmem:[#allocation2 + $0xa0] sm:$0xff] %vm226_vm1, %v3778_v50  ;;  %v3781_v60 = vadd.f32 %v13981_v58, %v3487_v48  ;;  %v3177_v23 = vpop.f32.mrf.mxu0  ;;  %v5794_v58 = vsel %vm16178_vm12, 0, %v5793_v4  ;;  %v6812_v24 = vld [vmem:[#allocation3] sm:$0xf] }
 0x195   : > { %v3714_v19 = vpop.f32.mrf.mxu1  ;;  %3254 = vst.msk [vmem:[#allocation2 + $0xf0] sm:$0xff] %vm226_vm1, %v3222_v9  ;;  %v3220_v32 = vadd.f32 %v3177_v23, %v2926_v16  ;;  %v3491_v25 = vld [vmem:[#allocation2 + $0xd8] sm:$0xff]  ;;  %5795 = vst [vmem:[#allocation3 + $0x5c] sm:$0x1] %v5794_v58  ;;  %v6861_v57 = vshrl.u32 %v6812_v24, 16  ;;  %v6864_v55 = vshll.u32 %v6812_v24, 16 }
 0x196   : > { %3813 = vst.msk [vmem:[#allocation2 + $0xb8] sm:$0xff] %vm226_vm1, %v3781_v60  ;;  %v3779_v1 = vadd.f32 %v3714_v19, %v3485_v0  ;;  %v13955_v15 = vpop.f32.mrf.mxu0  ;;  %v6870_v9 = vshll.u32 %v6813_v59, 16  ;;  %v5743_v23 = vld [vmem:[#allocation3 + $0x6c] sm:$0x1] }
 0x197   : > { %v13984_v21 = vpop.f32.mrf.mxu1  ;;  %3252 = vst.msk [vmem:[#allocation2 + $0xe0] sm:$0xff] %vm226_vm1, %v3220_v32  ;;  %v3223_v43 = vadd.f32 %v13955_v15, %v2929_v26  ;;  %v3489_v12 = vld [vmem:[#allocation2 + $0xc8] sm:$0xff]  ;;  %v6866_v32 = vrot.slane %v6864_v55, 5  ;;  %v5744_v15 = vsel %vm16168_vm10, 0, %v5743_v23  ;;  %v5749_v55 = vld [vmem:[#allocation3 + $0x84] sm:$0x1] }
 0x198   : > { %3811 = vst.msk [vmem:[#allocation2 + $0xa8] sm:$0xff] %vm226_vm1, %v3779_v1  ;;  %v3784_v29 = vadd.f32 %v13984_v21, %v3490_v22  ;;  %v3180_v7 = vpop.f32.mrf.mxu0  ;;  %v3856_v22 = vld [vmem:[#allocation2 + $0x8] sm:$0xff]  ;;  %v6874_v21 = vshrl.u32 %v6813_v59, 16  ;;  %v6872_v28 = vrot.slane %v6870_v9, 5  ;;  %5745 = vst [vmem:[#allocation3 + $0x6c] sm:$0x1] %v5744_v15 }
 0x199   : > { %v3727_v42 = vpop.f32.mrf.mxu1  ;;  %3255 = vst.msk [vmem:[#allocation2 + $0xf8] sm:$0xff] %vm226_vm1, %v3223_v43  ;;  %v3221_v45 = vadd.f32 %v3180_v7, %v2927_v17  ;;  %v3859_v43 = vld [vmem:[#allocation2 + $0x20] sm:$0xff] }
 0x19a   : > { %3816 = vst.msk [vmem:[#allocation2 + $0xd0] sm:$0xff] %vm226_vm1, %v3784_v29  ;;  %v3782_v40 = vadd.f32 %v3727_v42, %v3488_v53  ;;  %v13994_v36 = vpop.f32.mrf.mxu0  ;;  %v6863_v29 = vrot.slane %v6861_v57, 4  ;;  %v6876_v17 = vrot.slane %v6874_v21, 4  ;;  %v5750_v21 = vsel %vm16168_vm10, 0, %v5749_v55  ;;  %v3872_v55 = vld [vmem:[#allocation2 + $0x88] sm:$0xff] }
 0x19b   : > { %v13985_v10 = vpop.f32.mrf.mxu1  ;;  %3253 = vst.msk [vmem:[#allocation2 + $0xe8] sm:$0xff] %vm226_vm1, %v3221_v45  ;;  %v4183_v38 = vadd.f32 %v13994_v36, %v3857_v37  ;;  %v3862_v37 = vld [vmem:[#allocation2 + $0x38] sm:$0xff]  ;;  %5751 = vst [vmem:[#allocation3 + $0x84] sm:$0x1] %v5750_v21 }
 0x19c   : > { %3814 = vst.msk [vmem:[#allocation2 + $0xc0] sm:$0xff] %vm226_vm1, %v3782_v40  ;;  %v3785_v33 = vadd.f32 %v13985_v10, %v3491_v25  ;;  %v3494_v61 = vld [vmem:[#allocation2 + $0xf0] sm:$0xff]  ;;  %v4054_v46 = vpop.f32.mrf.mxu0  ;;  %v6814_v40 = vld [vmem:[#allocation3 + $0x8] sm:$0x1]  ;;  %v6867_v13 = vor.u32 %v6866_v32, %v6863_v29  ;;  %v6877_v63 = vor.u32 %v6876_v17, %v6872_v28 }
 0x19d   : > { %v3730_v49 = vpop.f32.mrf.mxu1  ;;  %4215 = vst.msk [vmem:[#allocation2 + $0x10] sm:$0xff] %vm226_vm1, %v4183_v38  ;;  %v4181_v56 = vadd.f32 %v4054_v46, %v3855_v31  ;;  %v6880_v7 = vshll.u32 %v6814_v40, 16  ;;  %v3860_v31 = vld [vmem:[#allocation2 + $0x28] sm:$0xff] }
 0x19e   : > { %3817 = vst.msk [vmem:[#allocation2 + $0xd8] sm:$0xff] %vm226_vm1, %v3785_v33  ;;  %v3783_v30 = vadd.f32 %v3730_v49, %v3489_v12  ;;  %v3492_v48 = vld [vmem:[#allocation2 + $0xe0] sm:$0xff]  ;;  %v13995_v50 = vpop.f32.mrf.mxu0  ;;  %v6868_v54 = vrot.slane %v6867_v13, 4  ;;  %v3864_v29 = vld [vmem:[#allocation2 + $0x48] sm:$0xff] }
 0x19f   : > { %v13988_v11 = vpop.f32.mrf.mxu1  ;;  %4213 = vst.msk [vmem:[#allocation2] sm:$0xff] %vm226_vm1, %v4181_v56  ;;  %v4184_v3 = vadd.f32 %v13995_v50, %v3858_v62  ;;  %v6882_v38 = vrot.slane %v6880_v7, 5  ;;  %v5799_v50 = vld [vmem:[#allocation3 + $0x74] sm:$0x1]  ;;  %v5805_v40 = vld [vmem:[#allocation3 + $0x8c] sm:$0x1] }
 0x1a0   : > { %3815 = vst.msk [vmem:[#allocation2 + $0xc8] sm:$0xff] %vm226_vm1, %v3783_v30  ;;  %v3788_v35 = vadd.f32 %v13988_v11, %v3494_v61  ;;  %v3495_v19 = vld [vmem:[#allocation2 + $0xf8] sm:$0xff]  ;;  %v4057_v44 = vpop.f32.mrf.mxu0  ;;  %v5802_v61 = vld [vmem:[#allocation3 + $0x80] sm:$0x1]  ;;  %v6873_v56 = vsel %vm14627_vm4, %v6868_v54, %v6872_v28  ;;  %v5806_v13 = vsel %vm16178_vm12, 0, %v5805_v40 }
 0x1a1   : > { %v3743_v47 = vpop.f32.mrf.mxu1  ;;  %4216 = vst.msk [vmem:[#allocation2 + $0x18] sm:$0xff] %vm226_vm1, %v4184_v3  ;;  %v4182_v20 = vadd.f32 %v4057_v44, %v3856_v22  ;;  %v5800_v3 = vsel %vm16178_vm12, 0, %v5799_v50  ;;  %v3863_v22 = vld [vmem:[#allocation2 + $0x40] sm:$0xff]  ;;  %5807 = vst [vmem:[#allocation3 + $0x8c] sm:$0x1] %v5806_v13  ;;  %v3870_v54 = vld [vmem:[#allocation2 + $0x78] sm:$0xff] }
 0x1a2   : > { %3820 = vst.msk [vmem:[#allocation2 + $0xf0] sm:$0xff] %vm226_vm1, %v3788_v35  ;;  %v3786_v0 = vadd.f32 %v3743_v47, %v3492_v48  ;;  %v3493_v53 = vld [vmem:[#allocation2 + $0xe8] sm:$0xff]  ;;  %v13998_v16 = vpop.f32.mrf.mxu0  ;;  %v5803_v35 = vsel %vm16178_vm12, 0, %v5802_v61  ;;  %v6878_v47 = vrot.slane %v6877_v63, 4  ;;  %5801 = vst [vmem:[#allocation3 + $0x74] sm:$0x1] %v5800_v3 }
 0x1a3   : > { %v13989_v60 = vpop.f32.mrf.mxu1  ;;  %4214 = vst.msk [vmem:[#allocation2 + $0x8] sm:$0xff] %vm226_vm1, %v4182_v20  ;;  %v4187_v25 = vadd.f32 %v13998_v16, %v3861_v41  ;;  %5804 = vst [vmem:[#allocation3 + $0x80] sm:$0x1] %v5803_v35  ;;  %v3866_v20 = vld [vmem:[#allocation2 + $0x58] sm:$0xff]  ;;  %v3868_v61 = vld [vmem:[#allocation2 + $0x68] sm:$0xff] }
 0x1a4   : > { %3818 = vst.msk [vmem:[#allocation2 + $0xe0] sm:$0xff] %vm226_vm1, %v3786_v0  ;;  %v3789_v1 = vadd.f32 %v13989_v60, %v3495_v19  ;;  %v4070_v10 = vpop.f32.mrf.mxu0  ;;  %v4679_v12 = vld [vmem:[#allocation2 + $0x10] sm:$0xff]  ;;  %v6883_v60 = vsel %vm14627_vm4, %v6878_v47, %v6882_v38  ;;  %v5808_v16 = vld [vmem:[#allocation3 + $0x98] sm:$0x1]  ;;  %v5734_v38 = vld [vmem:[#allocation3 + $0x48] sm:$0x1] }
 0x1a5   : > { %v3746_v14 = vpop.f32.mrf.mxu1  ;;  %4219 = vst.msk [vmem:[#allocation2 + $0x30] sm:$0xff] %vm226_vm1, %v4187_v25  ;;  %v4185_v33 = vadd.f32 %v4070_v10, %v3859_v43  ;;  %v13085_v19 = vcombine.low %v6873_v56, %v6883_v60  ;;  %v5809_v25 = vsel %vm16178_vm12, 0, %v5808_v16  ;;  %v3869_v43 = vld [vmem:[#allocation2 + $0x70] sm:$0xff] }
 0x1a6   : > { %3821 = vst.msk [vmem:[#allocation2 + $0xf8] sm:$0xff] %vm226_vm1, %v3789_v1  ;;  %v3787_v42 = vadd.f32 %v3746_v14, %v3493_v53  ;;  %v13999_v30 = vpop.f32.mrf.mxu0  ;;  %v4677_v36 = vld [vmem:[#allocation2] sm:$0xff]  ;;  %5810 = vst [vmem:[#allocation3 + $0x98] sm:$0x1] %v5809_v25  ;;  %v3873_v47 = vld [vmem:[#allocation2 + $0x90] sm:$0xff] }
 0x1a7   : > { %v14028_v26 = vpop.f32.mrf.mxu1  ;;  %4217 = vst.msk [vmem:[#allocation2 + $0x20] sm:$0xff] %vm226_vm1, %v4185_v33  ;;  %v4188_v11 = vadd.f32 %v13999_v30, %v3862_v37  ;;  %14128 = vmatprep.mubr.msk.bf16.mxu0 %vm226_vm1, %v13085_v19  ;;  %v16294_v33 = vld [vmem:[%s18500_s3 + $0x4] sm:$0x3]  ;;  %v3874_v19 = vld [vmem:[#allocation2 + $0x98] sm:$0xff] }
 0x1a8   : > { %3819 = vst.msk [vmem:[#allocation2 + $0xe8] sm:$0xff] %vm226_vm1, %v3787_v42  ;;  %v4973_v45 = vadd.f32 %v14028_v26, %v4679_v12  ;;  %v4073_v46 = vpop.f32.mrf.mxu0  ;;  %v4680_v18 = vld [vmem:[#allocation2 + $0x18] sm:$0xff]  ;;  %14409 = vmatprep.subr.msk.bf16.mxu1 %vm452_vm0, %v16294_v33 }
 0x1a9   : > { %v4844_v49 = vpop.f32.mrf.mxu1  ;;  %4220 = vst.msk [vmem:[#allocation2 + $0x38] sm:$0xff] %vm226_vm1, %v4188_v11  ;;  %v4186_v4 = vadd.f32 %v4073_v46, %v3860_v31 }
 0x1aa   : > { %5005 = vst.msk [vmem:[#allocation2 + $0x10] sm:$0xff] %vm226_vm1, %v4973_v45  ;;  %v4971_v5 = vadd.f32 %v4844_v49, %v4677_v36  ;;  %v14002_v58 = vpop.f32.mrf.mxu0  ;;  %v4678_v0 = vld [vmem:[#allocation2 + $0x8] sm:$0xff]  ;;  %v3867_v49 = vld [vmem:[#allocation2 + $0x60] sm:$0xff] }
 0x1ab   : > { %v14029_v2 = vpop.f32.mrf.mxu1  ;;  %4218 = vst.msk [vmem:[#allocation2 + $0x28] sm:$0xff] %vm226_vm1, %v4186_v4  ;;  %v4191_v6 = vadd.f32 %v14002_v58, %v3865_v51  ;;  %v3871_v58 = vld [vmem:[#allocation2 + $0x80] sm:$0xff] }
 0x1ac   : > { %5003 = vst.msk [vmem:[#allocation2] sm:$0xff] %vm226_vm1, %v4971_v5  ;;  %v4974_v48 = vadd.f32 %v14029_v2, %v4680_v18  ;;  %v4086_v44 = vpop.f32.mrf.mxu0  ;;  %v4683_v59 = vld [vmem:[#allocation2 + $0x30] sm:$0xff]  ;;  %v5735_v2 = vsel %vm16168_vm10, 0, %v5734_v38 }
 0x1ad   : > { %v4847_v62 = vpop.f32.mrf.mxu1  ;;  %4223 = vst.msk [vmem:[#allocation2 + $0x50] sm:$0xff] %vm226_vm1, %v4191_v6  ;;  %v4189_v57 = vadd.f32 %v4086_v44, %v3863_v22  ;;  %5736 = vst [vmem:[#allocation3 + $0x48] sm:$0x1] %v5735_v2 }
 0x1ae   : > { %5006 = vst.msk [vmem:[#allocation2 + $0x18] sm:$0xff] %vm226_vm1, %v4974_v48  ;;  %v4972_v24 = vadd.f32 %v4847_v62, %v4678_v0  ;;  %v14003_v14 = vpop.f32.mrf.mxu0  ;;  %v4681_v9 = vld [vmem:[#allocation2 + $0x20] sm:$0xff] }
 0x1af   : > { %v14032_v1 = vpop.f32.mrf.mxu1  ;;  %4221 = vst.msk [vmem:[#allocation2 + $0x40] sm:$0xff] %vm226_vm1, %v4189_v57  ;;  %v4192_v41 = vadd.f32 %v14003_v14, %v3866_v20 }
 0x1b0   : > { %5004 = vst.msk [vmem:[#allocation2 + $0x8] sm:$0xff] %vm226_vm1, %v4972_v24  ;;  %v4977_v53 = vadd.f32 %v14032_v1, %v4683_v59  ;;  %v4089_v32 = vpop.f32.mrf.mxu0  ;;  %v4684_v42 = vld [vmem:[#allocation2 + $0x38] sm:$0xff] }
 0x1b1   : > { %v4860_v23 = vpop.f32.mrf.mxu1  ;;  %4224 = vst.msk [vmem:[#allocation2 + $0x58] sm:$0xff] %vm226_vm1, %v4192_v41  ;;  %v4190_v15 = vadd.f32 %v4089_v32, %v3864_v29 }
 0x1b2   : > { %5009 = vst.msk [vmem:[#allocation2 + $0x30] sm:$0xff] %vm226_vm1, %v4977_v53  ;;  %v4975_v26 = vadd.f32 %v4860_v23, %v4681_v9  ;;  %v14006_v10 = vpop.f32.mrf.mxu0  ;;  %v4682_v12 = vld [vmem:[#allocation2 + $0x28] sm:$0xff]  ;;  %v3877_v9 = vld [vmem:[#allocation2 + $0xb0] sm:$0xff]  ;;  %v5755_v53 = vld [vmem:[#allocation3 + $0x9c] sm:$0x1] }
 0x1b3   : > { %v14033_v28 = vpop.f32.mrf.mxu1  ;;  %4222 = vst.msk [vmem:[#allocation2 + $0x48] sm:$0xff] %vm226_vm1, %v4190_v15  ;;  %v4195_v7 = vadd.f32 %v14006_v10, %v3869_v43  ;;  %v5756_v29 = vsel %vm16168_vm10, 0, %v5755_v53  ;;  %v3878_v43 = vld [vmem:[#allocation2 + $0xb8] sm:$0xff]  ;;  %v3883_v53 = vld [vmem:[#allocation2 + $0xe0] sm:$0xff] }
 0x1b4   : > { %5007 = vst.msk [vmem:[#allocation2 + $0x20] sm:$0xff] %vm226_vm1, %v4975_v26  ;;  %v4978_v17 = vadd.f32 %v14033_v28, %v4684_v42  ;;  %v4102_v37 = vpop.f32.mrf.mxu0  ;;  %v4687_v11 = vld [vmem:[#allocation2 + $0x50] sm:$0xff]  ;;  %v3875_v42 = vld [vmem:[#allocation2 + $0xa0] sm:$0xff]  ;;  %5757 = vst [vmem:[#allocation3 + $0x9c] sm:$0x1] %v5756_v29 }
 0x1b5   : > { %v4863_v45 = vpop.f32.mrf.mxu1  ;;  %4227 = vst.msk [vmem:[#allocation2 + $0x70] sm:$0xff] %vm226_vm1, %v4195_v7  ;;  %v4193_v36 = vadd.f32 %v4102_v37, %v3867_v49 }
 0x1b6   : > { %5010 = vst.msk [vmem:[#allocation2 + $0x38] sm:$0xff] %vm226_vm1, %v4978_v17  ;;  %v4976_v30 = vadd.f32 %v4863_v45, %v4682_v12  ;;  %v14007_v63 = vpop.f32.mrf.mxu0  ;;  %v4685_v18 = vld [vmem:[#allocation2 + $0x40] sm:$0xff]  ;;  %v3876_v45 = vld [vmem:[#allocation2 + $0xa8] sm:$0xff] }
 0x1b7   : > { %4225 = vst.msk [vmem:[#allocation2 + $0x60] sm:$0xff] %vm226_vm1, %v4193_v36  ;;  %v4196_v5 = vadd.f32 %v14007_v63, %v3870_v54  ;;  %v5740_v36 = vld [vmem:[#allocation3 + $0x60] sm:$0x1]  ;;  %v3881_v63 = vld [vmem:[#allocation2 + $0xd0] sm:$0xff] }
 0x1b8   : > { %5008 = vst.msk [vmem:[#allocation2 + $0x28] sm:$0xff] %vm226_vm1, %v4976_v30  ;;  %v4105_v31 = vpop.f32.mrf.mxu0  ;;  %v4688_v62 = vld [vmem:[#allocation2 + $0x58] sm:$0xff] }
 0x1b9   : > { %v14036_v46 = vpop.f32.mrf.mxu1  ;;  %4228 = vst.msk [vmem:[#allocation2 + $0x78] sm:$0xff] %vm226_vm1, %v4196_v5  ;;  %v4194_v35 = vadd.f32 %v4105_v31, %v3868_v61  ;;  %v3879_v61 = vld [vmem:[#allocation2 + $0xc0] sm:$0xff] }
 0x1ba   : > { %v4981_v56 = vadd.f32 %v14036_v46, %v4687_v11  ;;  %v14010_v4 = vpop.f32.mrf.mxu0  ;;  %v4686_v60 = vld [vmem:[#allocation2 + $0x48] sm:$0xff]  ;;  %v5741_v11 = vsel %vm16168_vm10, 0, %v5740_v36 }
 0x1bb   : > { %v4876_v48 = vpop.f32.mrf.mxu1  ;;  %4226 = vst.msk [vmem:[#allocation2 + $0x68] sm:$0xff] %vm226_vm1, %v4194_v35  ;;  %v4199_v50 = vadd.f32 %v14010_v4, %v3873_v47  ;;  %5742 = vst [vmem:[#allocation3 + $0x60] sm:$0x1] %v5741_v11  ;;  %v3882_v4 = vld [vmem:[#allocation2 + $0xd8] sm:$0xff] }
 0x1bc   : > { %5013 = vst.msk [vmem:[#allocation2 + $0x50] sm:$0xff] %vm226_vm1, %v4981_v56  ;;  %v4979_v51 = vadd.f32 %v4876_v48, %v4685_v18  ;;  %v4118_v0 = vpop.f32.mrf.mxu0  ;;  %v4691_v20 = vld [vmem:[#allocation2 + $0x70] sm:$0xff] }
 0x1bd   : > { %v14037_v3 = vpop.f32.mrf.mxu1  ;;  %4231 = vst.msk [vmem:[#allocation2 + $0x90] sm:$0xff] %vm226_vm1, %v4199_v50  ;;  %v4197_v6 = vadd.f32 %v4118_v0, %v3871_v58  ;;  %v5814_v56 = vld [vmem:[#allocation3 + $0xb0] sm:$0x1] }
 0x1be   : > { %5011 = vst.msk [vmem:[#allocation2 + $0x40] sm:$0xff] %vm226_vm1, %v4979_v51  ;;  %v4982_v24 = vadd.f32 %v14037_v3, %v4688_v62  ;;  %v14011_v22 = vpop.f32.mrf.mxu0  ;;  %v4689_v16 = vld [vmem:[#allocation2 + $0x60] sm:$0xff]  ;;  %v5815_v62 = vsel %vm16178_vm12, 0, %v5814_v56  ;;  %v3880_v3 = vld [vmem:[#allocation2 + $0xc8] sm:$0xff] }
 0x1bf   : > { %v4879_v44 = vpop.f32.mrf.mxu1  ;;  %4229 = vst.msk [vmem:[#allocation2 + $0x80] sm:$0xff] %vm226_vm1, %v4197_v6  ;;  %v4200_v59 = vadd.f32 %v14011_v22, %v3874_v19  ;;  %5816 = vst [vmem:[#allocation3 + $0xb0] sm:$0x1] %v5815_v62  ;;  %v5811_v22 = vld [vmem:[#allocation3 + $0xa4] sm:$0x1]  ;;  %v5245_v62 = vld [vmem:[#allocation2 + $0x10] sm:$0xff] }
 0x1c0   : > { %5014 = vst.msk [vmem:[#allocation2 + $0x58] sm:$0xff] %vm226_vm1, %v4982_v24  ;;  %v4980_v57 = vadd.f32 %v4879_v44, %v4686_v60  ;;  %v4121_v1 = vpop.f32.mrf.mxu0  ;;  %v4692_v15 = vld [vmem:[#allocation2 + $0x78] sm:$0xff] }
 0x1c1   : > { %4232 = vst.msk [vmem:[#allocation2 + $0x98] sm:$0xff] %vm226_vm1, %v4200_v59  ;;  %v4198_v14 = vadd.f32 %v4121_v1, %v3872_v55  ;;  %v3885_v59 = vld [vmem:[#allocation2 + $0xf0] sm:$0xff]  ;;  %v5812_v55 = vsel %vm16178_vm12, 0, %v5811_v22  ;;  %v5764_v1 = vld [vmem:[#allocation3 + $0xc0] sm:$0x1] }
 0x1c2   : > { %5012 = vst.msk [vmem:[#allocation2 + $0x48] sm:$0xff] %vm226_vm1, %v4980_v57  ;;  %v14014_v21 = vpop.f32.mrf.mxu0  ;;  %v4690_v13 = vld [vmem:[#allocation2 + $0x68] sm:$0xff]  ;;  %5813 = vst [vmem:[#allocation3 + $0xa4] sm:$0x1] %v5812_v55 }
 0x1c3   : > { %4230 = vst.msk [vmem:[#allocation2 + $0x88] sm:$0xff] %vm226_vm1, %v4198_v14  ;;  %v4203_v23 = vadd.f32 %v14014_v21, %v3877_v9  ;;  %v5765_v9 = vsel %vm16168_vm10, 0, %v5764_v1  ;;  %v5244_v55 = vld [vmem:[#allocation2 + $0x8] sm:$0xff] }
 0x1c4   : > { %v14040_v41 = vpop.f32.mrf.mxu1  ;;  %v4134_v25 = vpop.f32.mrf.mxu0  ;;  %v4695_v5 = vld [vmem:[#allocation2 + $0x90] sm:$0xff]  ;;  %5766 = vst [vmem:[#allocation3 + $0xc0] sm:$0x1] %v5765_v9 }
 0x1c5   : > { %v4985_v32 = vadd.f32 %v14040_v41, %v4691_v20  ;;  %4235 = vst.msk [vmem:[#allocation2 + $0xb0] sm:$0xff] %vm226_vm1, %v4203_v23  ;;  %v4201_v40 = vadd.f32 %v4134_v25, %v3875_v42  ;;  %v3886_v42 = vld [vmem:[#allocation2 + $0xf8] sm:$0xff] }
 0x1c6   : > { %v4892_v26 = vpop.f32.mrf.mxu1  ;;  %v14015_v10 = vpop.f32.mrf.mxu0  ;;  %v4693_v18 = vld [vmem:[#allocation2 + $0x80] sm:$0xff] }
 0x1c7   : > { %5017 = vst.msk [vmem:[#allocation2 + $0x70] sm:$0xff] %vm226_vm1, %v4985_v32  ;;  %v4983_v28 = vadd.f32 %v4892_v26, %v4689_v16  ;;  %4233 = vst.msk [vmem:[#allocation2 + $0xa0] sm:$0xff] %vm226_vm1, %v4201_v40  ;;  %v4204_v17 = vadd.f32 %v14015_v10, %v3878_v43  ;;  %v5761_v16 = vld [vmem:[#allocation3 + $0xb4] sm:$0x1]  ;;  %v3884_v43 = vld [vmem:[#allocation2 + $0xe8] sm:$0xff] }
 0x1c8   : > { %v14041_v12 = vpop.f32.mrf.mxu1  ;;  %v4137_v49 = vpop.f32.mrf.mxu0  ;;  %v4696_v51 = vld [vmem:[#allocation2 + $0x98] sm:$0xff]  ;;  %v5762_v29 = vsel %vm16168_vm10, 0, %v5761_v16 }
 0x1c9   : > { %5015 = vst.msk [vmem:[#allocation2 + $0x60] sm:$0xff] %vm226_vm1, %v4983_v28  ;;  %v4986_v7 = vadd.f32 %v14041_v12, %v4692_v15  ;;  %4236 = vst.msk [vmem:[#allocation2 + $0xb8] sm:$0xff] %vm226_vm1, %v4204_v17  ;;  %v4202_v30 = vadd.f32 %v4137_v49, %v3876_v45  ;;  %v5746_v15 = vld [vmem:[#allocation3 + $0x78] sm:$0x1] }
 0x1ca   : > { %v4895_v37 = vpop.f32.mrf.mxu1  ;;  %v14018_v38 = vpop.f32.mrf.mxu0  ;;  %v4694_v24 = vld [vmem:[#allocation2 + $0x88] sm:$0xff]  ;;  %5763 = vst [vmem:[#allocation3 + $0xb4] sm:$0x1] %v5762_v29  ;;  %v5747_v12 = vsel %vm16168_vm10, 0, %v5746_v15 }
 0x1cb   : > { %5018 = vst.msk [vmem:[#allocation2 + $0x78] sm:$0xff] %vm226_vm1, %v4986_v7  ;;  %v4984_v54 = vadd.f32 %v4895_v37, %v4690_v13  ;;  %4234 = vst.msk [vmem:[#allocation2 + $0xa8] sm:$0xff] %vm226_vm1, %v4202_v30  ;;  %v4207_v2 = vadd.f32 %v14018_v38, %v3881_v63  ;;  %v5820_v7 = vld [vmem:[#allocation3 + $0xc8] sm:$0x1] }
 0x1cc   : > { %v4150_v31 = vpop.f32.mrf.mxu0  ;;  %v4699_v32 = vld [vmem:[#allocation2 + $0xb0] sm:$0xff]  ;;  %5748 = vst [vmem:[#allocation3 + $0x78] sm:$0x1] %v5747_v12  ;;  %v5821_v37 = vsel %vm16178_vm12, 0, %v5820_v7 }
 0x1cd   : > { %5016 = vst.msk [vmem:[#allocation2 + $0x68] sm:$0xff] %vm226_vm1, %v4984_v54  ;;  %4239 = vst.msk [vmem:[#allocation2 + $0xd0] sm:$0xff] %vm226_vm1, %v4207_v2  ;;  %v4205_v35 = vadd.f32 %v4150_v31, %v3879_v61 }
 0x1ce   : > { %v14044_v46 = vpop.f32.mrf.mxu1  ;;  %v14019_v48 = vpop.f32.mrf.mxu0  ;;  %v4697_v28 = vld [vmem:[#allocation2 + $0xa0] sm:$0xff]  ;;  %5822 = vst [vmem:[#allocation3 + $0xc8] sm:$0x1] %v5821_v37 }
 0x1cf   : > { %v4989_v47 = vadd.f32 %v14044_v46, %v4695_v5  ;;  %4237 = vst.msk [vmem:[#allocation2 + $0xc0] sm:$0xff] %vm226_vm1, %v4205_v35  ;;  %v4208_v58 = vadd.f32 %v14019_v48, %v3882_v4  ;;  %v5817_v5 = vld [vmem:[#allocation3 + $0xbc] sm:$0x1]  ;;  %v5752_v35 = vld [vmem:[#allocation3 + $0x90] sm:$0x1] }
 0x1d0   : > { %v4908_v50 = vpop.f32.mrf.mxu1  ;;  %v4153_v60 = vpop.f32.mrf.mxu0  ;;  %v4700_v49 = vld [vmem:[#allocation2 + $0xb8] sm:$0xff]  ;;  %v5818_v61 = vsel %vm16178_vm12, 0, %v5817_v5  ;;  %v5753_v4 = vsel %vm16168_vm10, 0, %v5752_v35  ;;  %v5247_v5 = vld [vmem:[#allocation2 + $0x20] sm:$0xff] }
 0x1d1   : > { %5021 = vst.msk [vmem:[#allocation2 + $0x90] sm:$0xff] %vm226_vm1, %v4989_v47  ;;  %v4987_v0 = vadd.f32 %v4908_v50, %v4693_v18  ;;  %4240 = vst.msk [vmem:[#allocation2 + $0xd8] sm:$0xff] %vm226_vm1, %v4208_v58  ;;  %v4206_v19 = vadd.f32 %v4153_v60, %v3880_v3  ;;  %v5243_v60 = vld [vmem:[#allocation2] sm:$0xff] }
 0x1d2   : > { %v14045_v6 = vpop.f32.mrf.mxu1  ;;  %v4698_v54 = vld [vmem:[#allocation2 + $0xa8] sm:$0xff]  ;;  %5819 = vst [vmem:[#allocation3 + $0xbc] sm:$0x1] %v5818_v61  ;;  %5754 = vst [vmem:[#allocation3 + $0x90] sm:$0x1] %v5753_v4  ;;  %v5250_v4 = vld [vmem:[#allocation2 + $0x38] sm:$0xff] }
 0x1d3   : > { %5019 = vst.msk [vmem:[#allocation2 + $0x80] sm:$0xff] %vm226_vm1, %v4987_v0  ;;  %v4990_v44 = vadd.f32 %v14045_v6, %v4696_v51  ;;  %v14022_v57 = vpop.f32.mrf.mxu0  ;;  %4238 = vst.msk [vmem:[#allocation2 + $0xc8] sm:$0xff] %vm226_vm1, %v4206_v19 }
 0x1d4   : > { %v4911_v20 = vpop.f32.mrf.mxu1  ;;  %v4211_v14 = vadd.f32 %v14022_v57, %v3885_v59  ;;  %v4703_v2 = vld [vmem:[#allocation2 + $0xd0] sm:$0xff] }
 0x1d5   : > { %5022 = vst.msk [vmem:[#allocation2 + $0x98] sm:$0xff] %vm226_vm1, %v4990_v44  ;;  %v4988_v21 = vadd.f32 %v4911_v20, %v4694_v24  ;;  %v4166_v41 = vpop.f32.mrf.mxu0  ;;  %v5246_v44 = vld [vmem:[#allocation2 + $0x18] sm:$0xff]  ;;  %v5758_v20 = vld [vmem:[#allocation3 + $0xa8] sm:$0x1] }
 0x1d6   : > { %4243 = vst.msk [vmem:[#allocation2 + $0xf0] sm:$0xff] %vm226_vm1, %v4211_v14  ;;  %v4209_v23 = vadd.f32 %v4166_v41, %v3883_v53  ;;  %v4701_v46 = vld [vmem:[#allocation2 + $0xc0] sm:$0xff]  ;;  %v5759_v9 = vsel %vm16168_vm10, 0, %v5758_v20  ;;  %v5253_v20 = vld [vmem:[#allocation2 + $0x50] sm:$0xff] }
 0x1d7   : > { %5020 = vst.msk [vmem:[#allocation2 + $0x88] sm:$0xff] %vm226_vm1, %v4988_v21  ;;  %v14023_v25 = vpop.f32.mrf.mxu0  ;;  %v16370_v21 = vld [vmem:[%s18499_s2] ss:$0 sm:$0xff]  ;;  %5760 = vst [vmem:[#allocation3 + $0xa8] sm:$0x1] %v5759_v9 }
 0x1d8   : > { %4241 = vst.msk [vmem:[#allocation2 + $0xe0] sm:$0xff] %vm226_vm1, %v4209_v23  ;;  %v4212_v26 = vadd.f32 %v14023_v25, %v3886_v42  ;;  %v4704_v47 = vld [vmem:[#allocation2 + $0xd8] sm:$0xff] }
 0x1d9   : > { %v14048_v40 = vpop.f32.mrf.mxu1  ;;  %v4169_v10 = vpop.f32.mrf.mxu0 }
 0x1da   : > { %v4993_v13 = vadd.f32 %v14048_v40, %v4699_v32  ;;  %4244 = vst.msk [vmem:[#allocation2 + $0xf8] sm:$0xff] %vm226_vm1, %v4212_v26  ;;  %v4210_v17 = vadd.f32 %v4169_v10, %v3884_v43  ;;  %v4702_v58 = vld [vmem:[#allocation2 + $0xc8] sm:$0xff] }
 0x1db   : > { %v4924_v45 = vpop.f32.mrf.mxu1 }
 0x1dc   : > { %5025 = vst.msk [vmem:[#allocation2 + $0xb0] sm:$0xff] %vm226_vm1, %v4993_v13  ;;  %v4991_v30 = vadd.f32 %v4924_v45, %v4697_v28  ;;  %4242 = vst.msk [vmem:[#allocation2 + $0xe8] sm:$0xff] %vm226_vm1, %v4210_v17  ;;  %v5249_v45 = vld [vmem:[#allocation2 + $0x30] sm:$0xff] }
 0x1dd   : > { %v14049_v36 = vpop.f32.mrf.mxu1  ;;  %v4707_v53 = vld [vmem:[#allocation2 + $0xf0] sm:$0xff] }
 0x1de   : > { %5023 = vst.msk [vmem:[#allocation2 + $0xa0] sm:$0xff] %vm226_vm1, %v4991_v30  ;;  %v4994_v63 = vadd.f32 %v14049_v36, %v4700_v49 }
 0x1df   : > { %v4927_v38 = vpop.f32.mrf.mxu1  ;;  %v4705_v29 = vld [vmem:[#allocation2 + $0xe0] sm:$0xff] }
 0x1e0   : > { %5026 = vst.msk [vmem:[#allocation2 + $0xb8] sm:$0xff] %vm226_vm1, %v4994_v63  ;;  %v4992_v11 = vadd.f32 %v4927_v38, %v4698_v54 }
 0x1e1   : > { %v4708_v40 = vld [vmem:[#allocation2 + $0xf8] sm:$0xff] }
 0x1e2   : > { %5024 = vst.msk [vmem:[#allocation2 + $0xa8] sm:$0xff] %vm226_vm1, %v4992_v11 }
 0x1e3   : > { %v14052_v31 = vpop.f32.mrf.mxu1  ;;  %v4706_v7 = vld [vmem:[#allocation2 + $0xe8] sm:$0xff] }
 0x1e4   : > { %v4997_v18 = vadd.f32 %v14052_v31, %v4703_v2 }
 0x1e5   : > { %v4940_v56 = vpop.f32.mrf.mxu1 }
 0x1e6   : > { %5029 = vst.msk [vmem:[#allocation2 + $0xd0] sm:$0xff] %vm226_vm1, %v4997_v18  ;;  %v4995_v48 = vadd.f32 %v4940_v56, %v4701_v46  ;;  %v14062_v50 = vpop.f32.mrf.mxu0 }
 0x1e7   : > { %v14053_v51 = vpop.f32.mrf.mxu1  ;;  %v5539_v0 = vadd.f32 %v14062_v50, %v5245_v62 }
 0x1e8   : > { %5027 = vst.msk [vmem:[#allocation2 + $0xc0] sm:$0xff] %vm226_vm1, %v4995_v48  ;;  %v4998_v3 = vadd.f32 %v14053_v51, %v4704_v47  ;;  %v5410_v6 = vpop.f32.mrf.mxu0 }
 0x1e9   : > { %v4943_v24 = vpop.f32.mrf.mxu1  ;;  %5571 = vst.msk [vmem:[#allocation2 + $0x10] sm:$0xff] %vm226_vm1, %v5539_v0  ;;  %v5537_v19 = vadd.f32 %v5410_v6, %v5243_v60 }
 0x1ea   : > { %5030 = vst.msk [vmem:[#allocation2 + $0xd8] sm:$0xff] %vm226_vm1, %v4998_v3  ;;  %v4996_v22 = vadd.f32 %v4943_v24, %v4702_v58  ;;  %v14063_v59 = vpop.f32.mrf.mxu0  ;;  %v6254_v58 = vld [vmem:[#allocation3 + $0x18] sm:$0xf]  ;;  %v5248_v24 = vld [vmem:[#allocation2 + $0x28] sm:$0xff] }
 0x1eb   : > { %5569 = vst.msk [vmem:[#allocation2] sm:$0xff] %vm226_vm1, %v5537_v19  ;;  %v5540_v57 = vadd.f32 %v14063_v59, %v5246_v44 }
 0x1ec   : > { %5028 = vst.msk [vmem:[#allocation2 + $0xc8] sm:$0xff] %vm226_vm1, %v4996_v22  ;;  %v5413_v1 = vpop.f32.mrf.mxu0  ;;  %v6247_v22 = vld [vmem:[#allocation3 + $0xc] sm:$0xf] }
 0x1ed   : > { %5572 = vst.msk [vmem:[#allocation2 + $0x18] sm:$0xff] %vm226_vm1, %v5540_v57  ;;  %v5538_v14 = vadd.f32 %v5413_v1, %v5244_v55 }
 0x1ef   : > { %5570 = vst.msk [vmem:[#allocation2 + $0x8] sm:$0xff] %vm226_vm1, %v5538_v14 }
 0x1f0   : > { %v5603_v41 = vld [vmem:[#allocation2 + $0x10] sm:$0xff] }
 0x1f1   : > { %v5642_v16 = vadd.f32 %v16370_v21, %v5603_v41  ;;  %6361 = vst.msk [vmem:[#allocation2 + $0x10] sm:$0xff] %vm226_vm1, %v14534_v34  ;;  %v14056_v23 = vpop.f32.mrf.mxu1 }
 0x1f2   : > { %v5001_v32 = vadd.f32 %v14056_v23, %v4707_v53  ;;  %v5601_v42 = vld [vmem:[#allocation2] sm:$0xff] }
 0x1f3   : > { %v5674_v25 = vmax.f32 %v5642_v16, 0.0  ;;  %v5640_v26 = vadd.f32 %v16370_v21, %v5601_v42  ;;  %6359 = vst.msk [vmem:[#allocation2] sm:$0xff] %vm226_vm1, %v14534_v34  ;;  %v4956_v15 = vpop.f32.mrf.mxu1  ;;  %v6258_v53 = vld [vmem:[#allocation3 + $0x20] sm:$0x1] }
 0x1f4   : > { %5033 = vst.msk [vmem:[#allocation2 + $0xf0] sm:$0xff] %vm226_vm1, %v5001_v32  ;;  %v4999_v28 = vadd.f32 %v4956_v15, %v4705_v29  ;;  %v5604_v43 = vld [vmem:[#allocation2 + $0x18] sm:$0xff]  ;;  %v5251_v15 = vld [vmem:[#allocation2 + $0x40] sm:$0xff] }
 0x1f5   : > { %v13450_v10 = vpack.c.bf16 %v5674_v25, %v5674_v25  ;;  %v5672_v12 = vmax.f32 %v5640_v26, 0.0  ;;  %v5643_v13 = vadd.f32 %v16370_v21, %v5604_v43  ;;  %6362 = vst.msk [vmem:[#allocation2 + $0x18] sm:$0xff] %vm226_vm1, %v14534_v34  ;;  %v14057_v17 = vpop.f32.mrf.mxu1  ;;  %v14066_v49 = vpop.f32.mrf.mxu0 }
 0x1f6   : > { %5031 = vst.msk [vmem:[#allocation2 + $0xe0] sm:$0xff] %vm226_vm1, %v4999_v28  ;;  %v5002_v37 = vadd.f32 %v14057_v17, %v4708_v40  ;;  %v5602_v30 = vld [vmem:[#allocation2 + $0x8] sm:$0xff]  ;;  %v5543_v36 = vadd.f32 %v14066_v49, %v5249_v45 }
 0x1f7   : > { %v5942_v54 = vshrl.u32 %v13450_v10, 16  ;;  %v13448_v63 = vpack.c.bf16 %v5672_v12, %v5672_v12  ;;  %v5675_v38 = vmax.f32 %v5643_v13, 0.0  ;;  %6360 = vst.msk [vmem:[#allocation2 + $0x8] sm:$0xff] %vm226_vm1, %v14534_v34  ;;  %v4959_v11 = vpop.f32.mrf.mxu1  ;;  %v5426_v2 = vpop.f32.mrf.mxu0  ;;  %v5641_v61 = vadd.f32 %v16370_v21, %v5602_v30 }
 0x1f8   : > { %5034 = vst.msk [vmem:[#allocation2 + $0xf8] sm:$0xff] %vm226_vm1, %v5002_v37  ;;  %v5000_v31 = vadd.f32 %v4959_v11, %v4706_v7  ;;  %5575 = vst.msk [vmem:[#allocation2 + $0x30] sm:$0xff] %vm226_vm1, %v5543_v36  ;;  %v5541_v46 = vadd.f32 %v5426_v2, %v5247_v5  ;;  %v5945_v35 = vshll.u32 %v13450_v10, 16  ;;  %v6251_v7 = vld [vmem:[#allocation3 + $0x14] sm:$0x1] }
 0x1f9   : > { %v5944_v18 = vrot.slane %v5942_v54, 7  ;;  %v5925_v56 = vshrl.u32 %v13448_v63, 16  ;;  %v13451_v47 = vpack.c.bf16 %v5675_v38, %v5675_v38  ;;  %v14067_v48 = vpop.f32.mrf.mxu0  ;;  %v5673_v50 = vmax.f32 %v5641_v61, 0.0  ;;  %v5254_v38 = vld [vmem:[#allocation2 + $0x58] sm:$0xff] }
 0x1fa   : > { %5032 = vst.msk [vmem:[#allocation2 + $0xe8] sm:$0xff] %vm226_vm1, %v5000_v31  ;;  %5573 = vst.msk [vmem:[#allocation2 + $0x20] sm:$0xff] %vm226_vm1, %v5541_v46  ;;  %v5544_v51 = vadd.f32 %v14067_v48, %v5250_v4  ;;  %v5928_v60 = vshll.u32 %v13448_v63, 16 }
 0x1fb   : > { %v5947_v0 = vor.u32 %v5945_v35, %v5944_v18  ;;  %v5927_v3 = vrot.slane %v5925_v56, 7  ;;  %v5950_v6 = vshrl.u32 %v13451_v47, 16  ;;  %v5429_v19 = vpop.f32.mrf.mxu0  ;;  %v13449_v44 = vpack.c.bf16 %v5673_v50, %v5673_v50  ;;  %v5252_v35 = vld [vmem:[#allocation2 + $0x48] sm:$0xff] }
 0x1fc   : > { %5576 = vst.msk [vmem:[#allocation2 + $0x38] sm:$0xff] %vm226_vm1, %v5544_v51  ;;  %v5542_v59 = vadd.f32 %v5429_v19, %v5248_v24  ;;  %v5953_v1 = vshll.u32 %v13451_v47, 16  ;;  %v5948_v29 = vrot.slane %v5944_v18, 4  ;;  %v16433_v50 = vsel %vm452_vm0, %v16294_v33, 0 }
 0x1fd   : > { %v5930_v57 = vor.u32 %v5928_v60, %v5927_v3  ;;  %v5952_v55 = vrot.slane %v5950_v6, 7  ;;  %v14070_v14 = vpop.f32.mrf.mxu0  ;;  %v6255_v9 = vsel %vm16391_vm14, %v5947_v0, %v6254_v58  ;;  %v5933_v16 = vshrl.u32 %v13449_v44, 16  ;;  %v5257_v60 = vld [vmem:[#allocation2 + $0x70] sm:$0xff]  ;;  %v13166_v6 = vld [vmem:[%s18500_s3 + $0x6] sm:$0x3] }
 0x1fe   : > { %5574 = vst.msk [vmem:[#allocation2 + $0x28] sm:$0xff] %vm226_vm1, %v5542_v59  ;;  %v5547_v23 = vadd.f32 %v14070_v14, %v5253_v20  ;;  %6256 = vst [vmem:[#allocation3 + $0x18] sm:$0xf] %v6255_v9  ;;  %v5936_v43 = vshll.u32 %v13449_v44, 16  ;;  %v5931_v13 = vrot.slane %v5927_v3, 4  ;;  %14410 = vmatprep.subr.msk.bf16.mxu0 %vm452_vm0, %v13166_v6  ;;  %v5255_v20 = vld [vmem:[#allocation2 + $0x60] sm:$0xff] }
 0x1ff   : > { %v6248_v32 = vsel %vm16391_vm14, %v5930_v57, %v6247_v22  ;;  %v5955_v42 = vor.u32 %v5953_v1, %v5952_v55  ;;  %v5957_v25 = vrot.slane %v5952_v55, 4  ;;  %v5607_v26 = vld [vmem:[#allocation2 + $0x30] sm:$0xff]  ;;  %v5442_v40 = vpop.f32.mrf.mxu0  ;;  %v5935_v28 = vrot.slane %v5933_v16, 7 }
 0x200   : > { %6249 = vst [vmem:[#allocation3 + $0xc] sm:$0xf] %v6248_v32  ;;  %v5646_v10 = vadd.f32 %v16370_v21, %v5607_v26  ;;  %6365 = vst.msk [vmem:[#allocation2 + $0x30] sm:$0xff] %vm226_vm1, %v14534_v34  ;;  %v5545_v12 = vadd.f32 %v5442_v40, %v5251_v15  ;;  %v6261_v15 = vld [vmem:[#allocation3 + $0x24] sm:$0xf] }
 0x201   : > { %5579 = vst.msk [vmem:[#allocation2 + $0x50] sm:$0xff] %vm226_vm1, %v5547_v23  ;;  %v6259_v17 = vsel %vm16168_vm10, %v5957_v25, %v6258_v53  ;;  %v5605_v45 = vld [vmem:[#allocation2 + $0x20] sm:$0xff]  ;;  %v14071_v49 = vpop.f32.mrf.mxu0  ;;  %v5956_v37 = vsel %vm16402_vm2, %v5948_v29, %v5955_v42  ;;  %v5938_v30 = vor.u32 %v5936_v43, %v5935_v28  ;;  %v5940_v36 = vrot.slane %v5935_v28, 4 }
 0x202   : > { %6260 = vst [vmem:[#allocation3 + $0x20] sm:$0x1] %v6259_v17  ;;  %v5678_v54 = vmax.f32 %v5646_v10, 0.0  ;;  %v5644_v63 = vadd.f32 %v16370_v21, %v5605_v45  ;;  %6363 = vst.msk [vmem:[#allocation2 + $0x20] sm:$0xff] %vm226_vm1, %v14534_v34  ;;  %v5548_v5 = vadd.f32 %v14071_v49, %v5254_v38  ;;  %v5256_v38 = vld [vmem:[#allocation2 + $0x68] sm:$0xff] }
 0x203   : > { %5577 = vst.msk [vmem:[#allocation2 + $0x40] sm:$0xff] %vm226_vm1, %v5545_v12  ;;  %v5608_v11 = vld [vmem:[#allocation2 + $0x38] sm:$0xff]  ;;  %v5445_v2 = vpop.f32.mrf.mxu0  ;;  %v5939_v61 = vsel %vm16402_vm2, %v5931_v13, %v5938_v30  ;;  %v6252_v31 = vsel %vm16168_vm10, %v5940_v36, %v6251_v7 }
 0x204   : > { %6257 = vst.msk [vmem:[#allocation3 + $0x1c] sm:$0xf] %vm5704_vm13, %v5956_v37  ;;  %v13454_v46 = vpack.c.bf16 %v5678_v54, %v5678_v54  ;;  %v5676_v18 = vmax.f32 %v5644_v63, 0.0  ;;  %6250 = vst.msk [vmem:[#allocation3 + $0x10] sm:$0xf] %vm5704_vm13, %v5939_v61  ;;  %v5647_v56 = vadd.f32 %v16370_v21, %v5608_v11  ;;  %v5546_v4 = vadd.f32 %v5445_v2, %v5252_v35  ;;  %v5258_v63 = vld [vmem:[#allocation2 + $0x78] sm:$0xff] }
 0x205   : > { %6366 = vst.msk [vmem:[#allocation2 + $0x38] sm:$0xff] %vm226_vm1, %v14534_v34  ;;  %6253 = vst [vmem:[#allocation3 + $0x14] sm:$0x1] %v6252_v31  ;;  %v5606_v47 = vld [vmem:[#allocation2 + $0x28] sm:$0xff]  ;;  %v14074_v48 = vpop.f32.mrf.mxu0  ;;  %v6272_v61 = vld [vmem:[#allocation3 + $0x38] sm:$0x1] }
 0x206   : > { %5580 = vst.msk [vmem:[#allocation2 + $0x58] sm:$0xff] %vm226_vm1, %v5548_v5  ;;  %v5976_v51 = vshrl.u32 %v13454_v46, 16  ;;  %v5979_v58 = vshll.u32 %v13454_v46, 16  ;;  %v13452_v0 = vpack.c.bf16 %v5676_v18, %v5676_v18  ;;  %v5645_v3 = vadd.f32 %v16370_v21, %v5606_v47  ;;  %6364 = vst.msk [vmem:[#allocation2 + $0x28] sm:$0xff] %vm226_vm1, %v14534_v34 }
 0x207   : > { %v5679_v24 = vmax.f32 %v5647_v56, 0.0  ;;  %5578 = vst.msk [vmem:[#allocation2 + $0x48] sm:$0xff] %vm226_vm1, %v5546_v4  ;;  %v5551_v22 = vadd.f32 %v14074_v48, %v5257_v60  ;;  %v5458_v33 = vpop.f32.mrf.mxu0  ;;  %v16442_v44 = vld [vmem:[#allocation3 + $0xc] sm:$0xf] }
 0x208   : > { %v5611_v19 = vld [vmem:[#allocation2 + $0x50] sm:$0xff]  ;;  %v16445_v59 = vrot.slane %v5976_v51, 7  ;;  %v5959_v57 = vshrl.u32 %v13452_v0, 16  ;;  %v5962_v55 = vshll.u32 %v13452_v0, 16  ;;  %v5677_v1 = vmax.f32 %v5645_v3, 0.0 }
 0x209   : > { %6369 = vst.msk [vmem:[#allocation2 + $0x50] sm:$0xff] %vm226_vm1, %v14534_v34  ;;  %v13455_v14 = vpack.c.bf16 %v5679_v24, %v5679_v24  ;;  %v5650_v9 = vadd.f32 %v16370_v21, %v5611_v19  ;;  %5583 = vst.msk [vmem:[#allocation2 + $0x70] sm:$0xff] %vm226_vm1, %v5551_v22  ;;  %v5549_v16 = vadd.f32 %v5458_v33, %v5255_v20  ;;  %v14075_v23 = vpop.f32.mrf.mxu0  ;;  %v6885_v29 = vshrl.u32 %v16442_v44, 16  ;;  %v6265_v48 = vld [vmem:[#allocation3 + $0x2c] sm:$0x1] }
 0x20a   : > { %v5609_v53 = vld [vmem:[#allocation2 + $0x40] sm:$0xff]  ;;  %v16453_v32 = vor.u32 %v5979_v58, %v16445_v59  ;;  %v5982_v42 = vrot.slane %v16445_v59, 4  ;;  %v16456_v25 = vrot.slane %v5959_v57, 7  ;;  %v13453_v26 = vpack.c.bf16 %v5677_v1, %v5677_v1  ;;  %v13199_v20 = vld [vmem:[%s18500_s3 + $0x8] sm:$0x3] }
 0x20b   : > { %6367 = vst.msk [vmem:[#allocation2 + $0x40] sm:$0xff] %vm226_vm1, %v14534_v34  ;;  %v5984_v40 = vshrl.u32 %v13455_v14, 16  ;;  %v5987_v28 = vshll.u32 %v13455_v14, 16  ;;  %v5682_v43 = vmax.f32 %v5650_v9, 0.0  ;;  %v5648_v10 = vadd.f32 %v16370_v21, %v5609_v53  ;;  %5581 = vst.msk [vmem:[#allocation2 + $0x60] sm:$0xff] %vm226_vm1, %v5549_v16  ;;  %v5461_v12 = vpop.f32.mrf.mxu0  ;;  %v14476_v5 = vld [vmem:[#allocation3 + $0xc] sm:$0xff]  }
 0x20c   : > { %v5964_v13 = vor.u32 %v5962_v55, %v16456_v25  ;;  %v5965_v17 = vrot.slane %v16456_v25, 4  ;;  %v5967_v7 = vshrl.u32 %v13453_v26, 16  ;;  %v5970_v45 = vshll.u32 %v13453_v26, 16  ;;  %v14477_v56 = vld [vmem:[#allocation3 + $0x18] sm:$0xff]   ;;  %14095 = vmatmul.mubr.msk.bf16.vlgmr.msra.gmra.mxu1 %vm226_vm1, %v14476_v5 }
 0x20d   : > { %v5612_v49 = vld [vmem:[#allocation2 + $0x58] sm:$0xff]  ;;  %v5986_v37 = vrot.slane %v5984_v40, 7  ;;  %v13458_v30 = vpack.c.bf16 %v5682_v43, %v5682_v43  ;;  %v5680_v36 = vmax.f32 %v5648_v10, 0.0  ;;  %v14078_v11 = vpop.f32.mrf.mxu0  ;;  %v5552_v18 = vadd.f32 %v14075_v23, %v5258_v63  ;;  %14161 = vmatpush3.bf16.msra.mxu1 %v16433_v50  ;;  %14098 = vmatprep.mubr.msk.bf16.mxu1 %vm226_vm1, %v14477_v56  ;;  %v5261_v43 = vld [vmem:[#allocation2 + $0x90] sm:$0xff] }
 0x20e   : > { %v5651_v54 = vadd.f32 %v16370_v21, %v5612_v49  ;;  %6370 = vst.msk [vmem:[#allocation2 + $0x58] sm:$0xff] %vm226_vm1, %v14534_v34  ;;  %v6262_v2 = vsel %vm16391_vm14, %v5964_v13, %v6261_v15  ;;  %v5969_v31 = vrot.slane %v5967_v7, 7  ;;  %v5610_v46 = vld [vmem:[#allocation2 + $0x48] sm:$0xff]  ;;  %v5550_v35 = vadd.f32 %v5461_v12, %v5256_v38  ;;  %14411 = vmatprep.subr.msk.bf16.mxu1 %vm452_vm0, %v13199_v20  ;;  %v6275_v15 = vld [vmem:[#allocation3 + $0x3c] sm:$0xf]  ;;  %v5259_v49 = vld [vmem:[#allocation2 + $0x80] sm:$0xff] }
 0x20f   : > { %6263 = vst [vmem:[#allocation3 + $0x24] sm:$0xf] %v6262_v2  ;;  %v16469_v47 = vor.u32 %v5987_v28, %v5986_v37  ;;  %v5991_v4 = vrot.slane %v5986_v37, 4  ;;  %v6010_v51 = vshrl.u32 %v13458_v30, 16  ;;  %v6013_v58 = vshll.u32 %v13458_v30, 16  ;;  %6368 = vst.msk [vmem:[#allocation2 + $0x48] sm:$0xff] %vm226_vm1, %v14534_v34  ;;  %v5474_v0 = vpop.f32.mrf.mxu0 }
 0x210   : > { %v16474_v3 = vor.u32 %v5970_v45, %v5969_v31  ;;  %v5974_v60 = vrot.slane %v5969_v31, 4  ;;  %v13456_v6 = vpack.c.bf16 %v5680_v36, %v5680_v36  ;;  %v5683_v24 = vmax.f32 %v5651_v54, 0.0  ;;  %v5615_v19 = vld [vmem:[#allocation2 + $0x70] sm:$0xff]  ;;  %5584 = vst.msk [vmem:[#allocation2 + $0x78] sm:$0xff] %vm226_vm1, %v5552_v18  ;;  %5582 = vst.msk [vmem:[#allocation2 + $0x68] sm:$0xff] %vm226_vm1, %v5550_v35 }
 0x211   : > { %v6273_v22 = vsel %vm16168_vm10, %v5991_v4, %v6272_v61  ;;  %v16482_v33 = vrot.slane %v6010_v51, 7  ;;  %v5649_v57 = vadd.f32 %v16370_v21, %v5610_v46  ;;  %v5654_v55 = vadd.f32 %v16370_v21, %v5615_v19  ;;  %6373 = vst.msk [vmem:[#allocation2 + $0x70] sm:$0xff] %vm226_vm1, %v14534_v34  ;;  %v14079_v1 = vpop.f32.mrf.mxu0  ;;  %v6286_v37 = vld [vmem:[#allocation3 + $0x50] sm:$0x1] }
 0x212   : > { %6274 = vst [vmem:[#allocation3 + $0x38] sm:$0x1] %v6273_v22  ;;  %v6266_v50 = vsel %vm16168_vm10, %v5974_v60, %v6265_v48  ;;  %v5993_v14 = vshrl.u32 %v13456_v6, 16  ;;  %v5996_v9 = vshll.u32 %v13456_v6, 16  ;;  %v13459_v53 = vpack.c.bf16 %v5683_v24, %v5683_v24  ;;  %v5613_v16 = vld [vmem:[#allocation2 + $0x60] sm:$0xff] }
 0x213   : > { %6267 = vst [vmem:[#allocation3 + $0x2c] sm:$0x1] %v6266_v50  ;;  %v16495_v23 = vor.u32 %v6013_v58, %v16482_v33  ;;  %v6016_v26 = vrot.slane %v16482_v33, 4  ;;  %v5681_v40 = vmax.f32 %v5649_v57, 0.0  ;;  %v5686_v28 = vmax.f32 %v5654_v55, 0.0  ;;  %6371 = vst.msk [vmem:[#allocation2 + $0x60] sm:$0xff] %vm226_vm1, %v14534_v34  ;;  %v5477_v10 = vpop.f32.mrf.mxu0 }
 0x214   : > { %v16500_v12 = vrot.slane %v5993_v14, 7  ;;  %v6018_v13 = vshrl.u32 %v13459_v53, 16  ;;  %v6021_v7 = vshll.u32 %v13459_v53, 16  ;;  %v5652_v45 = vadd.f32 %v16370_v21, %v5613_v16  ;;  %v5262_v57 = vld [vmem:[#allocation2 + $0x98] sm:$0xff]  ;;  %v6279_v50 = vld [vmem:[#allocation3 + $0x44] sm:$0x1] }
 0x215   : > { %v13457_v30 = vpack.c.bf16 %v5681_v40, %v5681_v40  ;;  %v13462_v36 = vpack.c.bf16 %v5686_v28, %v5686_v28  ;;  %v5555_v54 = vadd.f32 %v14078_v11, %v5261_v43  ;;  %v5553_v63 = vadd.f32 %v5474_v0, %v5259_v49  ;;  %v14082_v38 = vpop.f32.mrf.mxu0  ;;  %v6289_v43 = vld [vmem:[#allocation3 + $0x54] sm:$0xf] }
 0x216   : > { %v5998_v5 = vor.u32 %v5996_v9, %v16500_v12  ;;  %v5999_v2 = vrot.slane %v16500_v12, 4  ;;  %v6020_v61 = vrot.slane %v6018_v13, 7  ;;  %v5684_v31 = vmax.f32 %v5652_v45, 0.0  ;;  %v5260_v13 = vld [vmem:[#allocation2 + $0x88] sm:$0xff] }
 0x217   : > { %v6001_v46 = vshrl.u32 %v13457_v30, 16  ;;  %v6004_v18 = vshll.u32 %v13457_v30, 16  ;;  %v6044_v35 = vshrl.u32 %v13462_v36, 16  ;;  %v6047_v56 = vshll.u32 %v13462_v36, 16  ;;  %v5616_v4 = vld [vmem:[#allocation2 + $0x78] sm:$0xff]  ;;  %v5614_v48 = vld [vmem:[#allocation2 + $0x68] sm:$0xff]  ;;  %v5490_v51 = vpop.f32.mrf.mxu0 }
 0x218   : > { %5587 = vst.msk [vmem:[#allocation2 + $0x90] sm:$0xff] %vm226_vm1, %v5555_v54  ;;  %5585 = vst.msk [vmem:[#allocation2 + $0x80] sm:$0xff] %vm226_vm1, %v5553_v63  ;;  %v6276_v11 = vsel %vm16391_vm14, %v5998_v5, %v6275_v15  ;;  %v16509_v58 = vor.u32 %v6021_v7, %v6020_v61  ;;  %v6025_v0 = vrot.slane %v6020_v61, 4  ;;  %v13460_v60 = vpack.c.bf16 %v5684_v31, %v5684_v31  ;;  %v5265_v7 = vld [vmem:[#allocation2 + $0xb0] sm:$0xff]  ;;  %v5263_v36 = vld [vmem:[#allocation2 + $0xa0] sm:$0xff] }
 0x219   : > { %6374 = vst.msk [vmem:[#allocation2 + $0x78] sm:$0xff] %vm226_vm1, %v14534_v34  ;;  %6372 = vst.msk [vmem:[#allocation2 + $0x68] sm:$0xff] %vm226_vm1, %v14534_v34  ;;  %v6003_v6 = vrot.slane %v6001_v46, 7  ;;  %v16515_v24 = vrot.slane %v6044_v35, 7  ;;  %v5655_v19 = vadd.f32 %v16370_v21, %v5616_v4  ;;  %v5653_v22 = vadd.f32 %v16370_v21, %v5614_v48  ;;  %v14083_v55 = vpop.f32.mrf.mxu0  ;;  %v5266_v54 = vld [vmem:[#allocation2 + $0xb8] sm:$0xff]  ;;  %v5264_v63 = vld [vmem:[#allocation2 + $0xa8] sm:$0xff] }
 0x21a   : > { %6277 = vst [vmem:[#allocation3 + $0x3c] sm:$0xf] %v6276_v11  ;;  %v6287_v20 = vsel %vm16168_vm10, %v6025_v0, %v6286_v37  ;;  %v6027_v14 = vshrl.u32 %v13460_v60, 16  ;;  %v6030_v9 = vshll.u32 %v13460_v60, 16  ;;  %v5556_v53 = vadd.f32 %v14079_v1, %v5262_v57  ;;  %v6823_v12 = vld [vmem:[#allocation3 + $0x2c] sm:$0x1] }
 0x21b   : > { %6288 = vst [vmem:[#allocation3 + $0x50] sm:$0x1] %v6287_v20  ;;  %v16521_v16 = vor.u32 %v6004_v18, %v6003_v6  ;;  %v6008_v15 = vrot.slane %v6003_v6, 4  ;;  %v16524_v40 = vor.u32 %v6047_v56, %v16515_v24  ;;  %v5493_v45 = vpop.f32.mrf.mxu0  ;;  %v5687_v37 = vmax.f32 %v5655_v19, 0.0  ;;  %v5269_v18 = vld [vmem:[#allocation2 + $0xd0] sm:$0xff] }
 0x21c   : > { %v16527_v49 = vrot.slane %v6027_v14, 7  ;;  %v5685_v30 = vmax.f32 %v5653_v22, 0.0  ;;  %5588 = vst.msk [vmem:[#allocation2 + $0x98] sm:$0xff] %vm226_vm1, %v5556_v53  ;;  %v5554_v1 = vadd.f32 %v5477_v10, %v5260_v13  ;;  %v5559_v61 = vadd.f32 %v14082_v38, %v5265_v7  ;;  %v6268_v19 = vld [vmem:[#allocation3 + $0x30] sm:$0xf] }
 0x21d   : > { %v6280_v5 = vsel %vm16168_vm10, %v6008_v15, %v6279_v50  ;;  %v5557_v31 = vadd.f32 %v5490_v51, %v5263_v36  ;;  %v5560_v46 = vadd.f32 %v14083_v55, %v5266_v54  ;;  %v14086_v35 = vpop.f32.mrf.mxu0  ;;  %v13463_v48 = vpack.c.bf16 %v5687_v37, %v5687_v37  ;;  %v6300_v13 = vld [vmem:[#allocation3 + $0x68] sm:$0x1]  ;;  %v6293_v37 = vld [vmem:[#allocation3 + $0x5c] sm:$0x1] }
 0x21e   : > { %6281 = vst [vmem:[#allocation3 + $0x44] sm:$0x1] %v6280_v5  ;;  %v6032_v56 = vor.u32 %v6030_v9, %v16527_v49  ;;  %v6033_v4 = vrot.slane %v16527_v49, 4  ;;  %v13461_v11 = vpack.c.bf16 %v5685_v30, %v5685_v30  ;;  %5586 = vst.msk [vmem:[#allocation2 + $0x88] sm:$0xff] %vm226_vm1, %v5554_v1  ;;  %v5558_v51 = vadd.f32 %v5493_v45, %v5264_v63 }
 0x21f   : > { %v5619_v0 = vld [vmem:[#allocation2 + $0x90] sm:$0xff]  ;;  %v5617_v10 = vld [vmem:[#allocation2 + $0x80] sm:$0xff]  ;;  %5591 = vst.msk [vmem:[#allocation2 + $0xb0] sm:$0xff] %vm226_vm1, %v5559_v61  ;;  %5589 = vst.msk [vmem:[#allocation2 + $0xa0] sm:$0xff] %vm226_vm1, %v5557_v31  ;;  %v5563_v6 = vadd.f32 %v14086_v35, %v5269_v18  ;;  %v6052_v57 = vshrl.u32 %v13463_v48, 16  ;;  %v6055_v55 = vshll.u32 %v13463_v48, 16  ;;  %v5973_v53 = vsel %vm16402_vm2, %v5965_v17, %v16474_v3 }
 0x220   : > { %v5658_v60 = vadd.f32 %v16370_v21, %v5619_v0  ;;  %6377 = vst.msk [vmem:[#allocation2 + $0x90] sm:$0xff] %vm226_vm1, %v14534_v34  ;;  %v5656_v38 = vadd.f32 %v16370_v21, %v5617_v10  ;;  %6375 = vst.msk [vmem:[#allocation2 + $0x80] sm:$0xff] %vm226_vm1, %v14534_v34  ;;  %v6290_v22 = vsel %vm16391_vm14, %v6032_v56, %v6289_v43  ;;  %v6035_v20 = vshrl.u32 %v13461_v11, 16  ;;  %v6303_v0 = vld [vmem:[#allocation3 + $0x6c] sm:$0xf] }
 0x221   : > { %5592 = vst.msk [vmem:[#allocation2 + $0xb8] sm:$0xff] %vm226_vm1, %v5560_v46  ;;  %6291 = vst [vmem:[#allocation3 + $0x54] sm:$0xf] %v6290_v22  ;;  %v6038_v50 = vshll.u32 %v13461_v11, 16  ;;  %v6054_v15 = vrot.slane %v6052_v57, 7  ;;  %v5990_v7 = vsel %vm16402_vm2, %v5982_v42, %v16469_v47  ;;  %v6269_v45 = vsel %vm16391_vm14, %v16453_v32, %v6268_v19 }
 0x222   : > { %v5690_v14 = vmax.f32 %v5658_v60, 0.0  ;;  %v5688_v9 = vmax.f32 %v5656_v38, 0.0  ;;  %5590 = vst.msk [vmem:[#allocation2 + $0xa8] sm:$0xff] %vm226_vm1, %v5558_v51  ;;  %5595 = vst.msk [vmem:[#allocation2 + $0xd0] sm:$0xff] %vm226_vm1, %v5563_v6  ;;  %v6037_v43 = vrot.slane %v6035_v20, 7  ;;  %v16565_v17 = vrot.slane %v6885_v29, 4 }
 0x223   : > { %6264 = vst.msk [vmem:[#allocation3 + $0x28] sm:$0xf] %vm5704_vm13, %v5973_v53  ;;  %v5620_v1 = vld [vmem:[#allocation2 + $0x98] sm:$0xff]  ;;  %6270 = vst [vmem:[#allocation3 + $0x30] sm:$0xf] %v6269_v45  ;;  %v6888_v59 = vshll.u32 %v16442_v44, 16  ;;  %v16568_v3 = vor.u32 %v6055_v55, %v6054_v15 }
 0x224   : > { %v13466_v25 = vpack.c.bf16 %v5690_v14, %v5690_v14  ;;  %v13464_v30 = vpack.c.bf16 %v5688_v9, %v5688_v9  ;;  %6271 = vst.msk [vmem:[#allocation3 + $0x34] sm:$0xf] %vm5704_vm13, %v5990_v7  ;;  %v6059_v42 = vrot.slane %v6054_v15, 4  ;;  %v16570_v47 = vor.u32 %v6038_v50, %v6037_v43 }
 0x225   : > { %v6042_v36 = vrot.slane %v6037_v43, 4  ;;  %6378 = vst.msk [vmem:[#allocation2 + $0x98] sm:$0xff] %vm226_vm1, %v14534_v34  ;;  %v5618_v61 = vld [vmem:[#allocation2 + $0x88] sm:$0xff]  ;;  %v5659_v31 = vadd.f32 %v16370_v21, %v5620_v1  ;;  %v16595_v57 = vrot.slane %v6888_v59, 5 }
 0x226   : > { %v6078_v32 = vshrl.u32 %v13466_v25, 16  ;;  %v6081_v54 = vshll.u32 %v13466_v25, 16  ;;  %v6061_v63 = vshrl.u32 %v13464_v30, 16  ;;  %v6064_v5 = vshll.u32 %v13464_v30, 16  ;;  %6376 = vst.msk [vmem:[#allocation2 + $0x88] sm:$0xff] %vm226_vm1, %v14534_v34  ;;  %v5623_v18 = vld [vmem:[#allocation2 + $0xb0] sm:$0xff] }
 0x227   : > { %v6301_v29 = vsel %vm16168_vm10, %v6059_v42, %v6300_v13  ;;  %v6294_v44 = vsel %vm16168_vm10, %v6042_v36, %v6293_v37  ;;  %v5657_v46 = vadd.f32 %v16370_v21, %v5618_v61  ;;  %v5621_v35 = vld [vmem:[#allocation2 + $0xa0] sm:$0xff]  ;;  %v5662_v10 = vadd.f32 %v16370_v21, %v5623_v18  ;;  %6381 = vst.msk [vmem:[#allocation2 + $0xb0] sm:$0xff] %vm226_vm1, %v14534_v34  ;;  %v6307_v18 = vld [vmem:[#allocation3 + $0x74] sm:$0x1] }
 0x228   : > { %v5624_v56 = vld [vmem:[#allocation2 + $0xb8] sm:$0xff]  ;;  %6302 = vst [vmem:[#allocation3 + $0x68] sm:$0x1] %v6301_v29  ;;  %6295 = vst [vmem:[#allocation3 + $0x5c] sm:$0x1] %v6294_v44  ;;  %v16582_v48 = vrot.slane %v6078_v32, 7  ;;  %v5660_v60 = vadd.f32 %v16370_v21, %v5621_v35 }
 0x229   : > { %v16584_v11 = vrot.slane %v6061_v63, 7  ;;  %6379 = vst.msk [vmem:[#allocation2 + $0xa0] sm:$0xff] %vm226_vm1, %v14534_v34  ;;  %6382 = vst.msk [vmem:[#allocation2 + $0xb8] sm:$0xff] %vm226_vm1, %v14534_v34  ;;  %v5691_v38 = vmax.f32 %v5659_v31, 0.0  ;;  %v5689_v51 = vmax.f32 %v5657_v46, 0.0  ;;  %v5663_v6 = vadd.f32 %v16370_v21, %v5624_v56  ;;  %v5622_v19 = vld [vmem:[#allocation2 + $0xa8] sm:$0xff]  ;;  %v5506_v46 = vpop.f32.mrf.mxu0 }
 0x22a   : > { %v5627_v22 = vld [vmem:[#allocation2 + $0xd0] sm:$0xff]  ;;  %v16598_v55 = vor.u32 %v6081_v54, %v16582_v48  ;;  %6380 = vst.msk [vmem:[#allocation2 + $0xa8] sm:$0xff] %vm226_vm1, %v14534_v34  ;;  %v14478_v9 = vld [vmem:[#allocation3 + $0x24] sm:$0xff]   ;;  %v5694_v13 = vmax.f32 %v5662_v10, 0.0  ;;  %v5692_v43 = vmax.f32 %v5660_v60, 0.0  ;;  %v5661_v37 = vadd.f32 %v16370_v21, %v5622_v19 }
 0x22b   : > { %v6066_v50 = vor.u32 %v6064_v5, %v16584_v11  ;;  %6385 = vst.msk [vmem:[#allocation2 + $0xd0] sm:$0xff] %vm226_vm1, %v14534_v34  ;;  %v13467_v53 = vpack.c.bf16 %v5691_v38, %v5691_v38  ;;  %v13465_v15 = vpack.c.bf16 %v5689_v51, %v5689_v51  ;;  %v5695_v45 = vmax.f32 %v5663_v6, 0.0  ;;  %14099 = vmatmul.mubr.msk.bf16.gmra.mxu1 %vm226_vm1, %v14478_v9  ;;  %v14479_v30 = vld [vmem:[#allocation3 + $0x30] sm:$0xff]   ;;  %v6314_v29 = vld [vmem:[#allocation3 + $0x80] sm:$0x1] }
 0x22c   : > { %v5666_v25 = vadd.f32 %v16370_v21, %v5627_v22  ;;  %v13470_v32 = vpack.c.bf16 %v5694_v13, %v5694_v13  ;;  %v13468_v54 = vpack.c.bf16 %v5692_v43, %v5692_v43  ;;  %v5693_v5 = vmax.f32 %v5661_v37, 0.0  ;;  %14102 = vmatprep.mubr.msk.bf16.mxu1 %vm226_vm1, %v14479_v30  ;;  %v6317_v19 = vld [vmem:[#allocation3 + $0x84] sm:$0xf]  ;;  %v5273_v30 = vld [vmem:[#allocation2 + $0xf0] sm:$0xff]  ;;  %v6822_v20 = vld [vmem:[#allocation3 + $0x28] sm:$0xf] }
 0x22d   : > { %v6304_v7 = vsel %vm16391_vm14, %v6066_v50, %v6303_v0  ;;  %v6086_v1 = vshrl.u32 %v13467_v53, 16  ;;  %v6089_v59 = vshll.u32 %v13467_v53, 16  ;;  %v6069_v42 = vshrl.u32 %v13465_v15, 16 }
 0x22e   : > { %6305 = vst [vmem:[#allocation3 + $0x6c] sm:$0xf] %v6304_v7  ;;  %v6072_v36 = vshll.u32 %v13465_v15, 16  ;;  %v13471_v63 = vpack.c.bf16 %v5695_v45, %v5695_v45  ;;  %v5698_v31 = vmax.f32 %v5666_v25, 0.0  ;;  %v6891_v21 = vor.u32 %v16595_v57, %v16565_v17  ;;  %v6816_v17 = vld [vmem:[#allocation3 + $0x10] sm:$0xf]  ;;  %v14087_v7 = vpop.f32.mrf.mxu0 }
 0x22f   : > { %v6088_v61 = vrot.slane %v6086_v1, 7  ;;  %v6071_v44 = vrot.slane %v6069_v42, 7  ;;  %v6112_v35 = vshrl.u32 %v13470_v32, 16  ;;  %v6115_v56 = vshll.u32 %v13470_v32, 16  ;;  %v6328_v1 = vld [vmem:[#allocation3 + $0x98] sm:$0x1] }
 0x230   : > { %v6095_v0 = vshrl.u32 %v13468_v54, 16  ;;  %v6098_v10 = vshll.u32 %v13468_v54, 16  ;;  %v6120_v9 = vshrl.u32 %v13471_v63, 16  ;;  %v6123_v53 = vshll.u32 %v13471_v63, 16  ;;  %v6817_v54 = vld [vmem:[#allocation3 + $0x14] sm:$0x1] }
 0x231   : > { %v16615_v60 = vor.u32 %v6089_v59, %v6088_v61  ;;  %v6093_v38 = vrot.slane %v6088_v61, 4  ;;  %v16617_v51 = vor.u32 %v6072_v36, %v6071_v44  ;;  %v6076_v6 = vrot.slane %v6071_v44, 4 }
 0x232   : > { %v16619_v22 = vrot.slane %v6112_v35, 7  ;;  %v16621_v50 = vrot.slane %v6095_v0, 7  ;;  %v13469_v13 = vpack.c.bf16 %v5693_v5, %v5693_v5  ;;  %v13474_v43 = vpack.c.bf16 %v5698_v31, %v5698_v31  ;;  %v6321_v5 = vld [vmem:[#allocation3 + $0x8c] sm:$0x1]  ;;  %v6818_v31 = vld [vmem:[#allocation3 + $0x18] sm:$0xf] }
 0x233   : > { %v6315_v57 = vsel %vm16168_vm10, %v6093_v38, %v6314_v29  ;;  %v6308_v15 = vsel %vm16168_vm10, %v6076_v6, %v6307_v18  ;;  %v6122_v59 = vrot.slane %v6120_v9, 7  ;;  %v16635_v29 = vrot.slane %v6891_v21, 4  ;;  %v6819_v38 = vld [vmem:[#allocation3 + $0x1c] sm:$0xf]  ;;  %v5509_v6 = vpop.f32.mrf.mxu0 }
 0x234   : > { %6316 = vst [vmem:[#allocation3 + $0x80] sm:$0x1] %v6315_v57  ;;  %6309 = vst [vmem:[#allocation3 + $0x74] sm:$0x1] %v6308_v15  ;;  %v16628_v45 = vor.u32 %v6115_v56, %v16619_v22  ;;  %v6100_v25 = vor.u32 %v6098_v10, %v16621_v50  ;;  %v6103_v42 = vshrl.u32 %v13469_v13, 16  ;;  %v6106_v36 = vshll.u32 %v13469_v13, 16 }
 0x235   : > { %v6146_v32 = vshrl.u32 %v13474_v43, 16  ;;  %v6149_v61 = vshll.u32 %v13474_v43, 16  ;;  %v6894_v44 = vshll.u32 %v6816_v17, 16  ;;  %v16637_v18 = vor.u32 %v6123_v53, %v6122_v59  ;;  %v5267_v10 = vld [vmem:[#allocation2 + $0xc0] sm:$0xff] }
 0x236   : > { %v6318_v63 = vsel %vm16391_vm14, %v6100_v25, %v6317_v19  ;;  %v6127_v35 = vrot.slane %v6122_v59, 4  ;;  %v6105_v56 = vrot.slane %v6103_v42, 7  ;;  %v6898_v57 = vshrl.u32 %v6816_v17, 16  ;;  %v6820_v25 = vld [vmem:[#allocation3 + $0x20] sm:$0x1]  ;;  %v5268_v59 = vld [vmem:[#allocation2 + $0xc8] sm:$0xff] }
 0x237   : > { %6319 = vst [vmem:[#allocation3 + $0x84] sm:$0xf] %v6318_v63  ;;  %v16639_v0 = vrot.slane %v6146_v32, 7  ;;  %v6896_v9 = vrot.slane %v6894_v44, 5  ;;  %v6904_v15 = vshll.u32 %v6817_v54, 16  ;;  %v5561_v19 = vadd.f32 %v5506_v46, %v5267_v10  ;;  %v5270_v63 = vld [vmem:[#allocation2 + $0xd8] sm:$0xff] }
 0x238   : > { %v6329_v21 = vsel %vm16168_vm10, %v6127_v35, %v6328_v1  ;;  %v16643_v13 = vor.u32 %v6106_v36, %v6105_v56  ;;  %v6110_v43 = vrot.slane %v6105_v56, 4  ;;  %v6900_v17 = vrot.slane %v6898_v57, 4  ;;  %v6282_v44 = vld [vmem:[#allocation3 + $0x48] sm:$0xf] }
 0x239   : > { %v16646_v53 = vor.u32 %v6149_v61, %v16639_v0  ;;  %6330 = vst [vmem:[#allocation3 + $0x98] sm:$0x1] %v6329_v21  ;;  %v6897_v42 = vsel %vm14627_vm4, %v16635_v29, %v6896_v9  ;;  %v6906_v32 = vrot.slane %v6904_v15, 5  ;;  %5593 = vst.msk [vmem:[#allocation2 + $0xc0] sm:$0xff] %vm226_vm1, %v5561_v19  ;;  %v6909_v1 = vshrl.u32 %v6818_v31, 16  ;;  %v14090_v61 = vpop.f32.mrf.mxu0 }
 0x23a   : > { %v6322_v46 = vsel %vm16168_vm10, %v6110_v43, %v6321_v5  ;;  %v6912_v36 = vshll.u32 %v6818_v31, 16  ;;  %v6918_v54 = vshll.u32 %v6819_v38, 16  ;;  %v6901_v35 = vor.u32 %v6900_v17, %v6896_v9  ;;  %v6821_v29 = vld [vmem:[#allocation3 + $0x24] sm:$0xf]  ;;  %v16678_v17 = vld [vmem:[%s18499_s2] ss:$0 sm:$0xff] }
 0x23b   : > { %6323 = vst [vmem:[#allocation3 + $0x8c] sm:$0x1] %v6322_v46  ;;  %v6922_v56 = vshrl.u32 %v6819_v38, 16  ;;  %v6928_v10 = vshll.u32 %v6820_v25, 16  ;;  %v5564_v21 = vadd.f32 %v14087_v7, %v5270_v63  ;;  %v6911_v57 = vrot.slane %v6909_v1, 4  ;;  %v5271_v63 = vld [vmem:[#allocation2 + $0xe0] sm:$0xff] }
 0x23c   : > { %v6914_v15 = vrot.slane %v6912_v36, 5  ;;  %v6920_v37 = vrot.slane %v6918_v54, 5  ;;  %v5562_v19 = vadd.f32 %v5509_v6, %v5268_v59  ;;  %v6902_v5 = vrot.slane %v6901_v35, 4  ;;  %v6824_v36 = vld [vmem:[#allocation3 + $0x30] sm:$0xf] }
 0x23d   : > { %v6924_v43 = vrot.slane %v6922_v56, 4  ;;  %v6930_v31 = vrot.slane %v6928_v10, 5  ;;  %5596 = vst.msk [vmem:[#allocation2 + $0xd8] sm:$0xff] %vm226_vm1, %v5564_v21  ;;  %v5567_v14 = vadd.f32 %v14090_v61, %v5273_v30  ;;  %v6007_v7 = vsel %vm16402_vm2, %v5999_v2, %v16521_v16  ;;  %v5522_v16 = vpop.f32.mrf.mxu0 }
 0x23e   : > { %v6915_v28 = vor.u32 %v6914_v15, %v6911_v57  ;;  %5594 = vst.msk [vmem:[#allocation2 + $0xc8] sm:$0xff] %vm226_vm1, %v5562_v19  ;;  %v6024_v38 = vsel %vm16402_vm2, %v6016_v26, %v16509_v58  ;;  %v6283_v6 = vsel %vm16391_vm14, %v16495_v23, %v6282_v44  ;;  %v6907_v30 = vsel %vm14627_vm4, %v6902_v5, %v6906_v32 }
 0x23f   : > { %v6925_v9 = vor.u32 %v6924_v43, %v6920_v37  ;;  %5599 = vst.msk [vmem:[#allocation2 + $0xf0] sm:$0xff] %vm226_vm1, %v5567_v14  ;;  %6284 = vst [vmem:[#allocation3 + $0x48] sm:$0xf] %v6283_v6  ;;  %v6933_v33 = vshrl.u32 %v6821_v29, 16  ;;  %v6936_v2 = vshll.u32 %v6821_v29, 16  ;;  %v13086_v26 = vcombine.low %v6897_v42, %v6907_v30  ;;  %v14091_v10 = vpop.f32.mrf.mxu0  ;;  %v5274_v6 = vld [vmem:[#allocation2 + $0xf8] sm:$0xff] }
 0x240   : > { %6278 = vst.msk [vmem:[#allocation3 + $0x40] sm:$0xf] %vm5704_vm13, %v6007_v7  ;;  %6285 = vst.msk [vmem:[#allocation3 + $0x4c] sm:$0xf] %vm5704_vm13, %v6024_v38  ;;  %v5625_v58 = vld [vmem:[#allocation2 + $0xc0] sm:$0xff]  ;;  %v6916_v25 = vrot.slane %v6915_v28, 4  ;;  %v5565_v56 = vadd.f32 %v5522_v16, %v5271_v63  ;;  %v5568_v16 = vadd.f32 %v14091_v10, %v5274_v6 }
 0x241   : > { %v6942_v59 = vshll.u32 %v6822_v20, 16  ;;  %v6946_v23 = vshrl.u32 %v6822_v20, 16  ;;  %v5664_v14 = vadd.f32 %v16678_v17, %v5625_v58  ;;  %6383 = vst.msk [vmem:[#allocation2 + $0xc0] sm:$0xff] %vm226_vm1, %v14534_v34  ;;  %v6926_v32 = vrot.slane %v6925_v9, 4  ;;  %14129 = vmatmul.mubr.msk.bf16.vlgmr.msra.gmra.mxu0 %vm226_vm1, %v13086_v26  ;;  %v6825_v38 = vld [vmem:[#allocation3 + $0x34] sm:$0xf] }
 0x242   : > { %v6935_v46 = vrot.slane %v6933_v33, 4  ;;  %v6938_v1 = vrot.slane %v6936_v2, 5  ;;  %v6921_v28 = vsel %vm14627_vm4, %v6916_v25, %v6920_v37  ;;  %v6952_v54 = vshll.u32 %v6823_v12, 16  ;;  %5597 = vst.msk [vmem:[#allocation2 + $0xe0] sm:$0xff] %vm226_vm1, %v5565_v56  ;;  %5600 = vst.msk [vmem:[#allocation2 + $0xf8] sm:$0xff] %vm226_vm1, %v5568_v16 }
 0x243   : > { %v6944_v20 = vrot.slane %v6942_v59, 5  ;;  %v6948_v42 = vrot.slane %v6946_v23, 4  ;;  %v5696_v61 = vmax.f32 %v5664_v14, 0.0  ;;  %v6931_v44 = vsel %vm14627_vm4, %v6926_v32, %v6930_v31  ;;  %v6331_v63 = vld [vmem:[#allocation3 + $0x9c] sm:$0xf] }
 0x244   : > { %v6939_v35 = vor.u32 %v6938_v1, %v6935_v46  ;;  %v13087_v21 = vcombine.low %v6921_v28, %v6931_v44  ;;  %v5628_v29 = vld [vmem:[#allocation2 + $0xd8] sm:$0xff]  ;;  %v6954_v15 = vrot.slane %v6952_v54, 5  ;;  %v6957_v19 = vshrl.u32 %v6824_v36, 16 }
 0x245   : > { %v6949_v57 = vor.u32 %v6948_v42, %v6944_v20  ;;  %v13472_v5 = vpack.c.bf16 %v5696_v61, %v5696_v61  ;;  %v5667_v43 = vadd.f32 %v16678_v17, %v5628_v29  ;;  %6386 = vst.msk [vmem:[#allocation2 + $0xd8] sm:$0xff] %vm226_vm1, %v14534_v34  ;;  %v5626_v37 = vld [vmem:[#allocation2 + $0xc8] sm:$0xff]  ;;  %v6960_v31 = vshll.u32 %v6824_v36, 16 }
 0x246   : > { %v6940_v7 = vrot.slane %v6939_v35, 4  ;;  %14132 = vmatprep.mubr.msk.bf16.mxu0 %vm226_vm1, %v13087_v21  ;;  %v5665_v30 = vadd.f32 %v16678_v17, %v5626_v37  ;;  %6384 = vst.msk [vmem:[#allocation2 + $0xc8] sm:$0xff] %vm226_vm1, %v14534_v34  ;;  %v5631_v9 = vld [vmem:[#allocation2 + $0xf0] sm:$0xff]  ;;  %v6959_v2 = vrot.slane %v6957_v19, 4  ;;  %v6966_v35 = vshll.u32 %v6825_v38, 16 }
 0x247   : > { %v14480_v12 = vld [vmem:[#allocation3 + $0x3c] sm:$0xff]   ;;  %v6950_v33 = vrot.slane %v6949_v57, 4  ;;  %v6129_v26 = vshrl.u32 %v13472_v5, 16  ;;  %v6132_v58 = vshll.u32 %v13472_v5, 16  ;;  %v5699_v25 = vmax.f32 %v5667_v43, 0.0  ;;  %6389 = vst.msk [vmem:[#allocation2 + $0xf0] sm:$0xff] %vm226_vm1, %v14534_v34 }
 0x248   : > { %v5670_v59 = vadd.f32 %v16678_v17, %v5631_v9  ;;  %v14481_v23 = vld [vmem:[#allocation3 + $0x48] sm:$0xff]   ;;  %v5697_v14 = vmax.f32 %v5665_v30, 0.0  ;;  %14103 = vmatmul.mubr.msk.bf16.gmra.mxu1 %vm226_vm1, %v14480_v12  ;;  %v6945_v32 = vsel %vm14627_vm4, %v6940_v7, %v6944_v20  ;;  %v6962_v1 = vrot.slane %v6960_v31, 5  ;;  %v6342_v57 = vld [vmem:[#allocation3 + $0xb0] sm:$0x1] }
 0x249   : > { %v6955_v46 = vsel %vm14627_vm4, %v6950_v33, %v6954_v15  ;;  %v16705_v36 = vrot.slane %v6129_v26, 7  ;;  %v13475_v28 = vpack.c.bf16 %v5699_v25, %v5699_v25  ;;  %14106 = vmatprep.mubr.msk.bf16.mxu1 %vm226_vm1, %v14481_v23  ;;  %v6970_v56 = vshrl.u32 %v6825_v38, 16  ;;  %v5629_v43 = vld [vmem:[#allocation2 + $0xe0] sm:$0xff]  ;;  %v6826_v33 = vld [vmem:[#allocation3 + $0x38] sm:$0x1] }
 0x24a   : > { %v5702_v42 = vmax.f32 %v5670_v59, 0.0  ;;  %v13088_v54 = vcombine.low %v6945_v32, %v6955_v46  ;;  %v13473_v61 = vpack.c.bf16 %v5697_v14, %v5697_v14  ;;  %v6963_v44 = vor.u32 %v6962_v1, %v6959_v2  ;;  %6387 = vst.msk [vmem:[#allocation2 + $0xe0] sm:$0xff] %vm226_vm1, %v14534_v34  ;;  %v5632_v23 = vld [vmem:[#allocation2 + $0xf8] sm:$0xff] }
 0x24b   : > { %v6134_v20 = vor.u32 %v6132_v58, %v16705_v36  ;;  %v6135_v10 = vrot.slane %v16705_v36, 4  ;;  %v6154_v21 = vshrl.u32 %v13475_v28, 16  ;;  %v6157_v29 = vshll.u32 %v13475_v28, 16  ;;  %v6335_v58 = vld [vmem:[#allocation3 + $0xa4] sm:$0x1]  ;;  %6390 = vst.msk [vmem:[#allocation2 + $0xf8] sm:$0xff] %vm226_vm1, %v14534_v34 }
 0x24c   : > { %14133 = vmatmul.mubr.msk.bf16.gmra.mxu0 %vm226_vm1, %v13088_v54  ;;  %v6137_v15 = vshrl.u32 %v13473_v61, 16  ;;  %v6140_v19 = vshll.u32 %v13473_v61, 16  ;;  %v13478_v5 = vpack.c.bf16 %v5702_v42, %v5702_v42  ;;  %v6964_v37 = vrot.slane %v6963_v44, 4  ;;  %v6352_v42 = vld [vmem:[#allocation3 + $0xc0] sm:$0xf]  ;;  %v5525_v44 = vpop.f32.mrf.mxu0 }
 0x24d   : > { %v6332_v7 = vsel %vm16391_vm14, %v6134_v20, %v6331_v63  ;;  %v6156_v31 = vrot.slane %v6154_v21, 7  ;;  %v5668_v38 = vadd.f32 %v16678_v17, %v5629_v43  ;;  %v6968_v6 = vrot.slane %v6966_v35, 5  ;;  %v6296_v35 = vld [vmem:[#allocation3 + $0x60] sm:$0xf] }
 0x24e   : > { %6333 = vst [vmem:[#allocation3 + $0x9c] sm:$0xf] %v6332_v7  ;;  %v6139_v30 = vrot.slane %v6137_v15, 7  ;;  %v6180_v9 = vshrl.u32 %v13478_v5, 16  ;;  %v6183_v12 = vshll.u32 %v13478_v5, 16  ;;  %v6972_v2 = vrot.slane %v6970_v56, 4 }
 0x24f   : > { %v16716_v16 = vor.u32 %v6157_v29, %v6156_v31  ;;  %v6161_v26 = vrot.slane %v6156_v31, 4  ;;  %v5700_v25 = vmax.f32 %v5668_v38, 0.0  ;;  %v6969_v59 = vsel %vm14627_vm4, %v6964_v37, %v6968_v6  ;;  %v5272_v15 = vld [vmem:[#allocation2 + $0xe8] sm:$0xff]  ;;  %v6828_v7 = vld [vmem:[#allocation3 + $0x40] sm:$0xf] }
 0x250   : > { %v16720_v14 = vor.u32 %v6140_v19, %v6139_v30  ;;  %v6144_v32 = vrot.slane %v6139_v30, 4  ;;  %v16722_v46 = vrot.slane %v6180_v9, 7  ;;  %v6973_v1 = vor.u32 %v6972_v2, %v6968_v6  ;;  %v6827_v19 = vld [vmem:[#allocation3 + $0x3c] sm:$0xf]  ;;  %v6345_v38 = vld [vmem:[#allocation3 + $0xb4] sm:$0xf] }
 0x251   : > { %v6343_v28 = vsel %vm16168_vm10, %v6161_v26, %v6342_v57  ;;  %v13476_v54 = vpack.c.bf16 %v5700_v25, %v5700_v25  ;;  %v6976_v63 = vshll.u32 %v6826_v33, 16  ;;  %v5671_v61 = vadd.f32 %v16678_v17, %v5632_v23  ;;  %v6829_v33 = vld [vmem:[#allocation3 + $0x44] sm:$0x1]  ;;  %v6831_v23 = vld [vmem:[#allocation3 + $0x4c] sm:$0xf] }
 0x252   : > { %6344 = vst [vmem:[#allocation3 + $0xb0] sm:$0x1] %v6343_v28  ;;  %v6336_v56 = vsel %vm16168_vm10, %v6144_v32, %v6335_v58  ;;  %v6185_v20 = vor.u32 %v6183_v12, %v16722_v46  ;;  %v6186_v21 = vrot.slane %v16722_v46, 4  ;;  %v6974_v29 = vrot.slane %v6973_v1, 4  ;;  %v9381_v46 = vld [vmem:[#allocation3 + $0x10] sm:$0xf] }
 0x253   : > { %6337 = vst [vmem:[#allocation3 + $0xa4] sm:$0x1] %v6336_v56  ;;  %v6163_v57 = vshrl.u32 %v13476_v54, 16  ;;  %v6166_v5 = vshll.u32 %v13476_v54, 16  ;;  %v6978_v43 = vrot.slane %v6976_v63, 5  ;;  %v5703_v37 = vmax.f32 %v5671_v61, 0.0 }
 0x254   : > { %v6353_v31 = vsel %vm16391_vm14, %v6185_v20, %v6352_v42  ;;  %v5566_v6 = vadd.f32 %v5525_v44, %v5272_v15  ;;  %v6041_v30 = vsel %vm16402_vm2, %v6033_v4, %v16570_v47  ;;  %v18515_v9 = vrot.slane %v16515_v24, 4  ;;  %v6830_v24 = vld [vmem:[#allocation3 + $0x48] sm:$0xf] }
 0x255   : > { %6354 = vst [vmem:[#allocation3 + $0xc0] sm:$0xf] %v6353_v31  ;;  %v16745_v2 = vrot.slane %v6163_v57, 7  ;;  %v6979_v26 = vsel %vm14627_vm4, %v6974_v29, %v6978_v43  ;;  %v13479_v58 = vpack.c.bf16 %v5703_v37, %v5703_v37  ;;  %6292 = vst.msk [vmem:[#allocation3 + $0x58] sm:$0xf] %vm5704_vm13, %v6041_v30  ;;  %v6297_v49 = vsel %vm16391_vm14, %v16524_v40, %v6296_v35 }
 0x256   : > { %v6058_v12 = vsel %vm16402_vm2, %v18515_v9, %v16568_v3  ;;  %v13089_v4 = vcombine.low %v6969_v59, %v6979_v26  ;;  %5598 = vst.msk [vmem:[#allocation2 + $0xe8] sm:$0xff] %vm226_vm1, %v5566_v6  ;;  %6298 = vst [vmem:[#allocation3 + $0x60] sm:$0xf] %v6297_v49  ;;  %v6981_v3 = vshrl.u32 %v6827_v19, 16  ;;  %v6984_v47 = vshll.u32 %v6827_v19, 16 }
 0x257   : > { %6299 = vst.msk [vmem:[#allocation3 + $0x64] sm:$0xf] %vm5704_vm13, %v6058_v12  ;;  %v6990_v25 = vshll.u32 %v6828_v7, 16  ;;  %v6168_v32 = vor.u32 %v6166_v5, %v16745_v2  ;;  %v6169_v1 = vrot.slane %v16745_v2, 4  ;;  %v6188_v28 = vshrl.u32 %v13479_v58, 16 }
 0x258   : > { %v6191_v42 = vshll.u32 %v13479_v58, 16  ;;  %14136 = vmatprep.mubr.msk.bf16.mxu0 %vm226_vm1, %v13089_v4  ;;  %v6983_v40 = vrot.slane %v6981_v3, 4  ;;  %v6986_v54 = vrot.slane %v6984_v47, 5  ;;  %v6994_v61 = vshrl.u32 %v6828_v7, 16  ;;  %v6310_v59 = vld [vmem:[#allocation3 + $0x78] sm:$0xf] }
 0x259   : > { %v6992_v63 = vrot.slane %v6990_v25, 5  ;;  %v6346_v44 = vsel %vm16391_vm14, %v6168_v32, %v6345_v38  ;;  %v6190_v35 = vrot.slane %v6188_v28, 7  ;;  %v6356_v56 = vld [vmem:[#allocation3 + $0xc8] sm:$0x1]  ;;  %v7000_v20 = vshll.u32 %v6829_v33, 16 }
 0x25a   : > { %v7005_v29 = vshrl.u32 %v6830_v24, 16  ;;  %6347 = vst [vmem:[#allocation3 + $0xb4] sm:$0xf] %v6346_v44  ;;  %v6987_v15 = vor.u32 %v6986_v54, %v6983_v40  ;;  %v6996_v19 = vrot.slane %v6994_v61, 4  ;;  %v6832_v57 = vld [vmem:[#allocation3 + $0x50] sm:$0x1] }
 0x25b   : > { %v7008_v5 = vshll.u32 %v6830_v24, 16  ;;  %v7014_v43 = vshll.u32 %v6831_v23, 16  ;;  %v16760_v37 = vor.u32 %v6191_v42, %v6190_v35  ;;  %v6195_v31 = vrot.slane %v6190_v35, 4  ;;  %v6833_v7 = vld [vmem:[#allocation3 + $0x54] sm:$0xf] }
 0x25c   : > { %v7002_v6 = vrot.slane %v7000_v20, 5  ;;  %v7007_v30 = vrot.slane %v7005_v29, 4  ;;  %v14482_v9 = vld [vmem:[#allocation3 + $0x54] sm:$0xff]   ;;  %v6988_v12 = vrot.slane %v6987_v15, 4  ;;  %v6997_v26 = vor.u32 %v6996_v19, %v6992_v63  ;;  %v6835_v40 = vld [vmem:[#allocation3 + $0x5c] sm:$0x1] }
 0x25d   : > { %v18516_v38 = vrot.slane %v16584_v11, 4  ;;  %v18517_v58 = vrot.slane %v16582_v48, 4  ;;  %v6357_v24 = vsel %vm16168_vm10, %v6195_v31, %v6356_v56  ;;  %v5630_v4 = vld [vmem:[#allocation2 + $0xe8] sm:$0xff]  ;;  %v7010_v47 = vrot.slane %v7008_v5, 5  ;;  %14107 = vmatmul.mubr.msk.bf16.gmra.mxu1 %vm226_vm1, %v14482_v9  ;;  %v6834_v28 = vld [vmem:[#allocation3 + $0x58] sm:$0xf] }
 0x25e   : > { %v14483_v3 = vld [vmem:[#allocation3 + $0x60] sm:$0xff]   ;;  %v7016_v25 = vrot.slane %v7014_v43, 5  ;;  %v6311_v11 = vsel %vm16391_vm14, %v16598_v55, %v6310_v59  ;;  %6358 = vst [vmem:[#allocation3 + $0xc8] sm:$0x1] %v6357_v24  ;;  %v5669_v48 = vadd.f32 %v16678_v17, %v5630_v4  ;;  %6388 = vst.msk [vmem:[#allocation2 + $0xe8] sm:$0xff] %vm226_vm1, %v14534_v34  ;;  %v7018_v32 = vshrl.u32 %v6831_v23, 16 }
 0x25f   : > { %v6075_v33 = vsel %vm16402_vm2, %v18516_v38, %v16617_v51  ;;  %v6092_v49 = vsel %vm16402_vm2, %v18517_v58, %v16615_v60  ;;  %v6993_v60 = vsel %vm14627_vm4, %v6988_v12, %v6992_v63  ;;  %v6998_v51 = vrot.slane %v6997_v26, 4  ;;  %6312 = vst [vmem:[#allocation3 + $0x78] sm:$0xf] %v6311_v11  ;;  %14110 = vmatprep.mubr.msk.bf16.mxu1 %vm226_vm1, %v14483_v3  ;;  %v6836_v35 = vld [vmem:[#allocation3 + $0x60] sm:$0xf] }
 0x260   : > { %6306 = vst.msk [vmem:[#allocation3 + $0x70] sm:$0xf] %vm5704_vm13, %v6075_v33  ;;  %6313 = vst.msk [vmem:[#allocation3 + $0x7c] sm:$0xf] %vm5704_vm13, %v6092_v49  ;;  %v7011_v55 = vor.u32 %v7010_v47, %v7007_v30  ;;  %v7024_v42 = vshll.u32 %v6832_v57, 16  ;;  %v7029_v54 = vshrl.u32 %v6833_v7, 16 }
 0x261   : > { %v7032_v61 = vshll.u32 %v6833_v7, 16  ;;  %v5701_v17 = vmax.f32 %v5669_v48, 0.0  ;;  %v7003_v34 = vsel %vm14627_vm4, %v6998_v51, %v7002_v6  ;;  %v7020_v59 = vrot.slane %v7018_v32, 4  ;;  %v6324_v43 = vld [vmem:[#allocation3 + $0x90] sm:$0xf] }
 0x262   : > { %v7038_v44 = vshll.u32 %v6834_v28, 16  ;;  %v13090_v56 = vcombine.low %v6993_v60, %v7003_v34  ;;  %v7012_v63 = vrot.slane %v7011_v55, 4  ;;  %v7026_v20 = vrot.slane %v7024_v42, 5  ;;  %v6837_v6 = vld [vmem:[#allocation3 + $0x64] sm:$0xf] }
 0x263   : > { %v7031_v23 = vrot.slane %v7029_v54, 4  ;;  %v13477_v29 = vpack.c.bf16 %v5701_v17, %v5701_v17  ;;  %v7021_v15 = vor.u32 %v7020_v59, %v7016_v25  ;;  %v7034_v19 = vrot.slane %v7032_v61, 5  ;;  %v6838_v51 = vld [vmem:[#allocation3 + $0x68] sm:$0x1] }
 0x264   : > { %v7040_v5 = vrot.slane %v7038_v44, 5  ;;  %14137 = vmatmul.mubr.msk.bf16.gmra.mxu0 %vm226_vm1, %v13090_v56  ;;  %v7017_v57 = vsel %vm14627_vm4, %v7012_v63, %v7016_v25  ;;  %v7042_v31 = vshrl.u32 %v6834_v28, 16  ;;  %v7048_v30 = vshll.u32 %v6835_v40, 16  ;;  %v6839_v28 = vld [vmem:[#allocation3 + $0x6c] sm:$0xf] }
 0x265   : > { %v7053_v7 = vshrl.u32 %v6836_v35, 16  ;;  %v6171_v9 = vshrl.u32 %v13477_v29, 16  ;;  %v6174_v12 = vshll.u32 %v13477_v29, 16  ;;  %v7022_v26 = vrot.slane %v7021_v15, 4  ;;  %v6841_v56 = vld [vmem:[#allocation3 + $0x74] sm:$0x1] }
 0x266   : > { %v7035_v33 = vor.u32 %v7034_v19, %v7031_v23  ;;  %v7044_v49 = vrot.slane %v7042_v31, 4  ;;  %v18518_v24 = vrot.slane %v16621_v50, 4  ;;  %v18519_v3 = vrot.slane %v16619_v22, 4  ;;  %v6349_v22 = vld [vmem:[#allocation3 + $0xbc] sm:$0x1] }
 0x267   : > { %v14484_v38 = vld [vmem:[#allocation3 + $0x6c] sm:$0xff]   ;;  %v14485_v58 = vld [vmem:[#allocation3 + $0x78] sm:$0xff]   ;;  %v6325_v25 = vsel %vm16391_vm14, %v16628_v45, %v6324_v43  ;;  %v6173_v11 = vrot.slane %v6171_v9, 7  ;;  %v7027_v48 = vsel %vm14627_vm4, %v7022_v26, %v7026_v20  ;;  %v7050_v60 = vrot.slane %v7048_v30, 5 }
 0x268   : > { %v6109_v4 = vsel %vm16402_vm2, %v18518_v24, %v16643_v13  ;;  %v6126_v47 = vsel %vm16402_vm2, %v18519_v3, %v16637_v18  ;;  %14111 = vmatmul.mubr.msk.bf16.gmra.mxu1 %vm226_vm1, %v14484_v38  ;;  %v7036_v50 = vrot.slane %v7035_v33, 4  ;;  %6326 = vst [vmem:[#allocation3 + $0x90] sm:$0xf] %v6325_v25  ;;  %v13091_v18 = vcombine.low %v7017_v57, %v7027_v48  ;;  %v6840_v44 = vld [vmem:[#allocation3 + $0x70] sm:$0xf] }
 0x269   : > { %6320 = vst.msk [vmem:[#allocation3 + $0x88] sm:$0xf] %vm5704_vm13, %v6109_v4  ;;  %6327 = vst.msk [vmem:[#allocation3 + $0x94] sm:$0xf] %vm5704_vm13, %v6126_v47  ;;  %14114 = vmatprep.mubr.msk.bf16.mxu1 %vm226_vm1, %v14485_v58  ;;  %v7045_v13 = vor.u32 %v7044_v49, %v7040_v5  ;;  %v7055_v45 = vrot.slane %v7053_v7, 4  ;;  %v7056_v32 = vshll.u32 %v6836_v35, 16  ;;  %v16810_v55 = vor.u32 %v6174_v12, %v6173_v11 }
 0x26a   : > { %v6178_v42 = vrot.slane %v6173_v11, 4  ;;  %v7041_v40 = vsel %vm14627_vm4, %v7036_v50, %v7040_v5  ;;  %v7062_v54 = vshll.u32 %v6837_v6, 16  ;;  %14140 = vmatprep.mubr.msk.bf16.mxu0 %vm226_vm1, %v13091_v18  ;;  %v7066_v34 = vshrl.u32 %v6837_v6, 16  ;;  %v6842_v29 = vld [vmem:[#allocation3 + $0x78] sm:$0xf] }
 0x26b   : > { %v7046_v61 = vrot.slane %v7045_v13, 4  ;;  %v7058_v17 = vrot.slane %v7056_v32, 5  ;;  %v7072_v59 = vshll.u32 %v6838_v51, 16  ;;  %v7077_v20 = vshrl.u32 %v6839_v28, 16  ;;  %v6843_v57 = vld [vmem:[#allocation3 + $0x7c] sm:$0xf] }
 0x26c   : > { %v6350_v63 = vsel %vm16168_vm10, %v6178_v42, %v6349_v22  ;;  %v7064_v35 = vrot.slane %v7062_v54, 5  ;;  %v7080_v23 = vshll.u32 %v6839_v28, 16  ;;  %v7068_v5 = vrot.slane %v7066_v34, 4  ;;  %v6338_v25 = vld [vmem:[#allocation3 + $0xa8] sm:$0xf] }
 0x26d   : > { %6351 = vst [vmem:[#allocation3 + $0xbc] sm:$0x1] %v6350_v63  ;;  %v7051_v15 = vsel %vm14627_vm4, %v7046_v61, %v7050_v60  ;;  %v7059_v19 = vor.u32 %v7058_v17, %v7055_v45  ;;  %v7074_v43 = vrot.slane %v7072_v59, 5  ;;  %v7079_v30 = vrot.slane %v7077_v20, 4  ;;  %v6845_v51 = vld [vmem:[#allocation3 + $0x84] sm:$0xf] }
 0x26e   : > { %v13092_v31 = vcombine.low %v7041_v40, %v7051_v15  ;;  %v7082_v6 = vrot.slane %v7080_v23, 5  ;;  %v7086_v7 = vshll.u32 %v6840_v44, 16  ;;  %v7069_v12 = vor.u32 %v7068_v5, %v7064_v35 }
 0x26f   : > { %v7060_v9 = vrot.slane %v7059_v19, 4  ;;  %v6143_v38 = vsel %vm16402_vm2, %v6135_v10, %v16720_v14  ;;  %v18520_v33 = vrot.slane %v16639_v0, 4  ;;  %v7090_v3 = vshrl.u32 %v6840_v44, 16  ;;  %v6844_v0 = vld [vmem:[#allocation3 + $0x80] sm:$0x1] }
 0x270   : > { %v14486_v26 = vld [vmem:[#allocation3 + $0x84] sm:$0xff]   ;;  %14141 = vmatmul.mubr.msk.bf16.gmra.mxu0 %vm226_vm1, %v13092_v31  ;;  %v14487_v49 = vld [vmem:[#allocation3 + $0x90] sm:$0xff]   ;;  %v7083_v24 = vor.u32 %v7082_v6, %v7079_v30  ;;  %v7088_v4 = vrot.slane %v7086_v7, 5  ;;  %v7096_v47 = vshll.u32 %v6841_v56, 16  ;;  %6334 = vst.msk [vmem:[#allocation3 + $0xa0] sm:$0xf] %vm5704_vm13, %v6143_v38  ;;  %v6339_v59 = vsel %vm16391_vm14, %v16646_v53, %v6338_v25 }
 0x271   : > { %v6160_v58 = vsel %vm16402_vm2, %v18520_v33, %v16716_v16  ;;  %v7065_v36 = vsel %vm14627_vm4, %v7060_v9, %v7064_v35  ;;  %v7070_v10 = vrot.slane %v7069_v12, 4  ;;  %14115 = vmatmul.mubr.msk.bf16.gmra.mxu1 %vm226_vm1, %v14486_v26  ;;  %v7101_v16 = vshrl.u32 %v6842_v29, 16  ;;  %v6846_v32 = vld [vmem:[#allocation3 + $0x88] sm:$0xf]  ;;  %v6847_v44 = vld [vmem:[#allocation3 + $0x8c] sm:$0x1] }
 0x272   : > { %6341 = vst.msk [vmem:[#allocation3 + $0xac] sm:$0xf] %vm5704_vm13, %v6160_v58  ;;  %v7104_v14 = vshll.u32 %v6842_v29, 16  ;;  %14118 = vmatprep.mubr.msk.bf16.mxu1 %vm226_vm1, %v14487_v49  ;;  %v7084_v11 = vrot.slane %v7083_v24, 4  ;;  %v7092_v48 = vrot.slane %v7090_v3, 4  ;;  %v7098_v50 = vrot.slane %v7096_v47, 5 }
 0x273   : > { %v7110_v60 = vshll.u32 %v6843_v57, 16  ;;  %v7075_v22 = vsel %vm14627_vm4, %v7070_v10, %v7074_v43  ;;  %v7103_v18 = vrot.slane %v7101_v16, 4  ;;  %v7114_v45 = vshrl.u32 %v6843_v57, 16  ;;  %v6848_v56 = vld [vmem:[#allocation3 + $0x90] sm:$0xf] }
 0x274   : > { %v7106_v13 = vrot.slane %v7104_v14, 5  ;;  %v13093_v28 = vcombine.low %v7065_v36, %v7075_v22  ;;  %v7089_v42 = vsel %vm14627_vm4, %v7084_v11, %v7088_v4  ;;  %v7093_v40 = vor.u32 %v7092_v48, %v7088_v4  ;;  %6340 = vst [vmem:[#allocation3 + $0xa8] sm:$0xf] %v6339_v59  ;;  %v6849_v29 = vld [vmem:[#allocation3 + $0x94] sm:$0xf] }
 0x275   : > { %v7112_v54 = vrot.slane %v7110_v60, 5  ;;  %v7116_v17 = vrot.slane %v7114_v45, 4  ;;  %v7120_v34 = vshll.u32 %v6844_v0, 16  ;;  %v7125_v35 = vshrl.u32 %v6845_v51, 16  ;;  %v6850_v26 = vld [vmem:[#allocation3 + $0x98] sm:$0x1] }
 0x276   : > { %v7107_v61 = vor.u32 %v7106_v13, %v7103_v18  ;;  %14144 = vmatprep.mubr.msk.bf16.mxu0 %vm226_vm1, %v13093_v28  ;;  %v7094_v63 = vrot.slane %v7093_v40, 4  ;;  %v7128_v20 = vshll.u32 %v6845_v51, 16  ;;  %v7134_v23 = vshll.u32 %v6846_v32, 16  ;;  %v6851_v25 = vld [vmem:[#allocation3 + $0x9c] sm:$0xf] }
 0x277   : > { %v7117_v19 = vor.u32 %v7116_v17, %v7112_v54  ;;  %v7122_v5 = vrot.slane %v7120_v34, 5  ;;  %v14488_v43 = vld [vmem:[#allocation3 + $0x9c] sm:$0xff]   ;;  %v7138_v57 = vshrl.u32 %v6846_v32, 16  ;;  %v7127_v62 = vrot.slane %v7125_v35, 4  ;;  %v16855_v36 = vld [vmem:[%s18500_s3 + $0xa] sm:$0x3] }
 0x278   : > { %v7108_v15 = vrot.slane %v7107_v61, 4  ;;  %v7099_v31 = vsel %vm14627_vm4, %v7094_v63, %v7098_v50  ;;  %v7130_v53 = vrot.slane %v7128_v20, 5  ;;  %v7136_v30 = vrot.slane %v7134_v23, 5  ;;  %v6852_v11 = vld [vmem:[#allocation3 + $0xa0] sm:$0xf] }
 0x279   : > { %v13094_v6 = vcombine.low %v7089_v42, %v7099_v31  ;;  %v7118_v9 = vrot.slane %v7117_v19, 4  ;;  %14119 = vmatmul.mubr.msk.bf16.gmra.mxu1 %vm226_vm1, %v14488_v43  ;;  %v7140_v12 = vrot.slane %v7138_v57, 4  ;;  %v7144_v33 = vshll.u32 %v6847_v44, 16  ;;  %v14524_v32 = vld [vmem:[%s18500_s3 + $0x6] sm:$0x3] }
 0x27a   : > { %v7113_v7 = vsel %vm14627_vm4, %v7108_v15, %v7112_v54  ;;  %v7131_v38 = vor.u32 %v7130_v53, %v7127_v62  ;;  %v7149_v58 = vshrl.u32 %v6848_v56, 16  ;;  %v7152_v49 = vshll.u32 %v6848_v56, 16  ;;  %v6853_v42 = vld [vmem:[#allocation3 + $0xa4] sm:$0x1]  ;;  %v6855_v61 = vld [vmem:[#allocation3 + $0xac] sm:$0xf] }
 0x27b   : > { %14145 = vmatmul.mubr.msk.bf16.gmra.mxu0 %vm226_vm1, %v13094_v6  ;;  %v7123_v24 = vsel %vm14627_vm4, %v7118_v9, %v7122_v5  ;;  %v7141_v4 = vor.u32 %v7140_v12, %v7136_v30  ;;  %v7158_v3 = vshll.u32 %v6849_v29, 16  ;;  %v7162_v47 = vshrl.u32 %v6849_v29, 16  ;;  %v14489_v48 = vld [vmem:[#allocation3 + $0xa8] sm:$0xff]   ;;  %v7602_v23 = vld [vmem:[#allocation3] sm:$0xe] }
 0x27c   : > { %v13095_v10 = vcombine.low %v7113_v7, %v7123_v24  ;;  %v7132_v0 = vrot.slane %v7131_v38, 4  ;;  %v7146_v16 = vrot.slane %v7144_v33, 5  ;;  %v7151_v14 = vrot.slane %v7149_v58, 4  ;;  %14122 = vmatprep.mubr.msk.bf16.mxu1 %vm226_vm1, %v14489_v48  ;;  %v6854_v54 = vld [vmem:[#allocation3 + $0xa8] sm:$0xf] }
 0x27d   : > { %v7142_v50 = vrot.slane %v7141_v4, 4  ;;  %v7154_v60 = vrot.slane %v7152_v49, 5  ;;  %v7160_v51 = vrot.slane %v7158_v3, 5  ;;  %v6177_v22 = vsel %vm16402_vm2, %v6169_v1, %v16810_v55  ;;  %v7603_v43 = vld [vmem:[#allocation3 + $0x4] sm:$0xf] }
 0x27e   : > { %14148 = vmatprep.mubr.msk.bf16.mxu0 %vm226_vm1, %v13095_v10  ;;  %v7137_v18 = vsel %vm14627_vm4, %v7132_v0, %v7136_v30  ;;  %v7164_v13 = vrot.slane %v7162_v47, 4  ;;  %v7168_v45 = vshll.u32 %v6850_v26, 16  ;;  %v8363_v28 = vsel %vm452_vm0, %v14524_v32, 0  ;;  %6348 = vst.msk [vmem:[#allocation3 + $0xb8] sm:$0xf] %vm5704_vm13, %v6177_v22 }
 0x27f   : > { %v7147_v2 = vsel %vm14627_vm4, %v7142_v50, %v7146_v16  ;;  %v7155_v1 = vor.u32 %v7154_v60, %v7151_v14  ;;  %14195 = vmatpush3.bf16.msra.mxu0 %v8363_v28  ;;  %v7173_v55 = vshrl.u32 %v6851_v25, 16  ;;  %v7176_v40 = vshll.u32 %v6851_v25, 16  ;;  %v6856_v53 = vld [vmem:[#allocation3 + $0xb0] sm:$0x1]  ;;  %v7604_v6 = vld [vmem:[#allocation3 + $0x8] sm:$0x1] }
 0x280   : > { %v13096_v17 = vcombine.low %v7137_v18, %v7147_v2  ;;  %v7165_v34 = vor.u32 %v7164_v13, %v7160_v51  ;;  %v7170_v59 = vrot.slane %v7168_v45, 5  ;;  %v7182_v44 = vshll.u32 %v6852_v11, 16  ;;  %14412 = vmatprep.subr.msk.bf16.mxu0 %vm452_vm0, %v16855_v36  ;;  %v7605_v7 = vld [vmem:[#allocation3 + $0xc] sm:$0xe]  ;;  %v7606_v3 = vld [vmem:[#allocation3 + $0x10] sm:$0xf] }
 0x281   : > { %v7156_v56 = vrot.slane %v7155_v1, 4  ;;  %v7175_v63 = vrot.slane %v7173_v55, 4  ;;  %v7178_v35 = vrot.slane %v7176_v40, 5  ;;  %v7186_v20 = vshrl.u32 %v6852_v11, 16  ;;  %v7607_v16 = vld [vmem:[#allocation3 + $0x14] sm:$0x1] }
 0x282   : > { %v7166_v29 = vrot.slane %v7165_v34, 4  ;;  %v7184_v15 = vrot.slane %v7182_v44, 5  ;;  %v7192_v19 = vshll.u32 %v6853_v42, 16  ;;  %v7197_v5 = vshrl.u32 %v6854_v54, 16  ;;  %v6857_v60 = vld [vmem:[#allocation3 + $0xb4] sm:$0xf] }
 0x283   : > { %14149 = vmatmul.mubr.msk.bf16.gmra.mxu0 %vm226_vm1, %v13096_v17  ;;  %v7161_v57 = vsel %vm14627_vm4, %v7156_v56, %v7160_v51  ;;  %v7179_v31 = vor.u32 %v7178_v35, %v7175_v63  ;;  %v7188_v62 = vrot.slane %v7186_v20, 4  ;;  %v7200_v30 = vshll.u32 %v6854_v54, 16  ;;  %v14525_v34 = vld [vmem:[%s18500_s3 + $0x8] sm:$0x3]  ;;  %v6859_v44 = vld [vmem:[#allocation3 + $0xbc] sm:$0x1] }
 0x284   : > { %v7171_v9 = vsel %vm14627_vm4, %v7166_v29, %v7170_v59  ;;  %v7194_v12 = vrot.slane %v7192_v19, 5  ;;  %v7199_v26 = vrot.slane %v7197_v5, 4  ;;  %v7206_v38 = vshll.u32 %v6855_v61, 16  ;;  %v7608_v63 = vld [vmem:[#allocation3 + $0x18] sm:$0xe] }
 0x285   : > { %v13097_v33 = vcombine.low %v7161_v57, %v7171_v9  ;;  %v14490_v58 = vld [vmem:[#allocation3 + $0xb4] sm:$0xff]   ;;  %v7180_v49 = vrot.slane %v7179_v31, 4  ;;  %v7189_v24 = vor.u32 %v7188_v62, %v7184_v15  ;;  %v7202_v4 = vrot.slane %v7200_v30, 5  ;;  %v7610_v19 = vld [vmem:[#allocation3 + $0x20] sm:$0x1] }
 0x286   : > { %v7208_v47 = vrot.slane %v7206_v38, 5  ;;  %v7210_v25 = vshrl.u32 %v6855_v61, 16  ;;  %v7216_v10 = vshll.u32 %v6856_v53, 16  ;;  %v13117_v0 = vrot.slane %v7602_v23, 9  ;;  %14123 = vmatmul.mubr.msk.bf16.gmra.mxu1 %vm226_vm1, %v14490_v58  ;;  %v6858_v54 = vld [vmem:[#allocation3 + $0xb8] sm:$0xf] }
 0x287   : > { %14152 = vmatprep.mubr.msk.bf16.mxu0 %vm226_vm1, %v13097_v33  ;;  %v7185_v14 = vsel %vm14627_vm4, %v7180_v49, %v7184_v15  ;;  %v7190_v11 = vrot.slane %v7189_v24, 4  ;;  %v7203_v48 = vor.u32 %v7202_v4, %v7199_v26  ;;  %v7700_v50 = vrot.slane %v7603_v43, 5  ;;  %v7609_v15 = vld [vmem:[#allocation3 + $0x1c] sm:$0xf]  ;;  %v7611_v62 = vld [vmem:[#allocation3 + $0x24] sm:$0xe] }
 0x288   : > { %v7212_v51 = vrot.slane %v7210_v25, 4  ;;  %v7218_v22 = vrot.slane %v7216_v10, 5  ;;  %v7703_v18 = vrot.slane %v7604_v6, 5  ;;  %v13118_v13 = vrot.slane %v7605_v7, 9  ;;  %v7612_v9 = vld [vmem:[#allocation3 + $0x28] sm:$0xf] }
 0x289   : > { %v7195_v45 = vsel %vm14627_vm4, %v7190_v11, %v7194_v12  ;;  %v7204_v32 = vrot.slane %v7203_v48, 4  ;;  %v7701_v28 = vsel %vm14757_vm7, %v13117_v0, %v7700_v50  ;;  %v7702_v42 = vrot.slane %v7700_v50, 4  ;;  %v7613_v12 = vld [vmem:[#allocation3 + $0x2c] sm:$0x1]  ;;  %v7614_v49 = vld [vmem:[#allocation3 + $0x30] sm:$0xe] }
 0x28a   : > { %v13098_v2 = vcombine.low %v7185_v14, %v7195_v45  ;;  %v7213_v1 = vor.u32 %v7212_v51, %v7208_v47  ;;  %v7707_v55 = vrot.slane %v7606_v3, 5  ;;  %v7710_v40 = vrot.slane %v7607_v16, 5  ;;  %v7615_v24 = vld [vmem:[#allocation3 + $0x34] sm:$0xf]  ;;  %v7616_v4 = vld [vmem:[#allocation3 + $0x38] sm:$0x1] }
 0x28b   : > { %v7209_v61 = vsel %vm14627_vm4, %v7204_v32, %v7208_v47  ;;  %v7704_v17 = vsel %vm14757_vm7, %v7702_v42, %v7703_v18  ;;  %v9153_v59 = vsel %vm452_vm0, %v14525_v34, 0  ;;  %v7221_v56 = vshrl.u32 %v6857_v60, 16  ;;  %v16907_v0 = vld [vmem:[%s18500_s3 + $0xc] sm:$0x3]  ;;  %v7617_v50 = vld [vmem:[#allocation3 + $0x3c] sm:$0xe] }
 0x28c   : > { %14153 = vmatmul.mubr.msk.bf16.gmra.mxu0 %vm226_vm1, %v13098_v2  ;;  %v7214_v35 = vrot.slane %v7213_v1, 4  ;;  %v13134_v20 = vcombine.low %v7701_v28, %v7704_v17  ;;  %v7708_v23 = vsel %vm14757_vm7, %v13118_v13, %v7707_v55  ;;  %v7709_v29 = vrot.slane %v7707_v55, 4  ;;  %v7618_v13 = vld [vmem:[#allocation3 + $0x40] sm:$0xf]  ;;  %v7619_v45 = vld [vmem:[#allocation3 + $0x44] sm:$0x1] }
 0x28d   : > { %v7223_v5 = vrot.slane %v7221_v56, 4  ;;  %v7224_v43 = vshll.u32 %v6857_v60, 16  ;;  %v7230_v57 = vshll.u32 %v6858_v54, 16  ;;  %v7234_v31 = vshrl.u32 %v6858_v54, 16  ;;  %v7620_v1 = vld [vmem:[#allocation3 + $0x48] sm:$0xe] }
 0x28e   : > { %v7219_v53 = vsel %vm14627_vm4, %v7214_v35, %v7218_v22  ;;  %14162 = vmatprep.mubr.msk.bf16.mxu1 %vm226_vm1, %v13134_v20  ;;  %v7711_v30 = vsel %vm14757_vm7, %v7709_v29, %v7710_v40  ;;  %v7240_v6 = vshll.u32 %v6859_v44, 16  ;;  %v13119_v7 = vrot.slane %v7608_v63, 9  ;;  %v7621_v17 = vld [vmem:[#allocation3 + $0x4c] sm:$0xf]  ;;  %v7622_v63 = vld [vmem:[#allocation3 + $0x50] sm:$0x1] }
 0x28f   : > { %v13099_v26 = vcombine.low %v7209_v61, %v7219_v53  ;;  %v13135_v38 = vcombine.low %v7708_v23, %v7711_v30  ;;  %v7226_v33 = vrot.slane %v7224_v43, 5  ;;  %v7232_v58 = vrot.slane %v7230_v57, 5  ;;  %v7623_v35 = vld [vmem:[#allocation3 + $0x54] sm:$0xe]  ;;  %v7625_v20 = vld [vmem:[#allocation3 + $0x5c] sm:$0x1] }
 0x290   : > { %v7236_v3 = vrot.slane %v7234_v31, 4  ;;  %v7242_v47 = vrot.slane %v7240_v6, 5  ;;  %v7714_v25 = vrot.slane %v7609_v15, 5  ;;  %v7717_v10 = vrot.slane %v7610_v19, 5  ;;  %v7628_v43 = vld [vmem:[#allocation3 + $0x68] sm:$0x1] }
 0x291   : > { %14156 = vmatprep.mubr.msk.bf16.mxu0 %vm226_vm1, %v13099_v26  ;;  %14163 = vmatmul.mubr.msk.bf16.vlgmr.msra.gmra.mxu1 %vm226_vm1, %v13135_v38  ;;  %v7227_v16 = vor.u32 %v7226_v33, %v7223_v5  ;;  %v13120_v14 = vrot.slane %v7611_v62, 9  ;;  %v7721_v11 = vrot.slane %v7612_v9, 5  ;;  %v7724_v48 = vrot.slane %v7613_v12, 5  ;;  %v7624_v5 = vld [vmem:[#allocation3 + $0x58] sm:$0xf]  ;;  %v14491_v31 = vld [vmem:[#allocation3 + $0xc] sm:$0xff]  }
 0x292   : > { %14229 = vmatpush3.bf16.msra.mxu1 %v9153_v59  ;;  %v7237_v60 = vor.u32 %v7236_v3, %v7232_v58  ;;  %v7715_v51 = vsel %vm14757_vm7, %v13119_v7, %v7714_v25  ;;  %v7716_v22 = vrot.slane %v7714_v25, 4  ;;  %v13121_v18 = vrot.slane %v7614_v49, 9  ;;  %v7626_v6 = vld [vmem:[#allocation3 + $0x60] sm:$0xe]  ;;  %v7627_v38 = vld [vmem:[#allocation3 + $0x64] sm:$0xf] }
 0x293   : > { %v7228_v32 = vrot.slane %v7227_v16, 4  ;;  %v7722_v28 = vsel %vm14757_vm7, %v13120_v14, %v7721_v11  ;;  %v7723_v42 = vrot.slane %v7721_v11, 4  ;;  %v7728_v2 = vrot.slane %v7615_v24, 5  ;;  %14413 = vmatprep.subr.msk.bf16.mxu1 %vm452_vm0, %v16907_v0  ;;  %v7629_v33 = vld [vmem:[#allocation3 + $0x6c] sm:$0xe] }
 0x294   : > { %v7238_v55 = vrot.slane %v7237_v60, 4  ;;  %v7718_v40 = vsel %vm14757_vm7, %v7716_v22, %v7717_v10  ;;  %v7731_v54 = vrot.slane %v7616_v4, 5  ;;  %v13122_v61 = vrot.slane %v7617_v50, 9  ;;  %v7631_v3 = vld [vmem:[#allocation3 + $0x74] sm:$0x1] }
 0x295   : > { %v7233_v34 = vsel %vm14627_vm4, %v7228_v32, %v7232_v58  ;;  %v13136_v59 = vcombine.low %v7715_v51, %v7718_v40  ;;  %v7725_v44 = vsel %vm14757_vm7, %v7723_v42, %v7724_v48  ;;  %v7729_v56 = vsel %vm14757_vm7, %v13121_v18, %v7728_v2  ;;  %v7630_v11 = vld [vmem:[#allocation3 + $0x70] sm:$0xf]  ;;  %v7632_v22 = vld [vmem:[#allocation3 + $0x78] sm:$0xe]  ;;  %v7633_v18 = vld [vmem:[#allocation3 + $0x7c] sm:$0xf] }
 0x296   : > { %v7243_v23 = vsel %vm14627_vm4, %v7238_v55, %v7242_v47  ;;  %v13137_v29 = vcombine.low %v7722_v28, %v7725_v44  ;;  %v7730_v15 = vrot.slane %v7728_v2, 4  ;;  %v7735_v19 = vrot.slane %v7618_v13, 5  ;;  %v7634_v47 = vld [vmem:[#allocation3 + $0x80] sm:$0x1]  ;;  %v7635_v42 = vld [vmem:[#allocation3 + $0x84] sm:$0xe] }
 0x297   : > { %v13100_v57 = vcombine.low %v7233_v34, %v7243_v23  ;;  %14166 = vmatprep.mubr.msk.bf16.mxu1 %vm226_vm1, %v13136_v59  ;;  %v7738_v62 = vrot.slane %v7619_v45, 5  ;;  %v13123_v53 = vrot.slane %v7620_v1, 9  ;;  %v7742_v30 = vrot.slane %v7621_v17, 5  ;;  %v7637_v2 = vld [vmem:[#allocation3 + $0x8c] sm:$0x1]  ;;  %v14492_v34 = vld [vmem:[#allocation3 + $0x18] sm:$0xff]  }
 0x298   : > { %v7732_v7 = vsel %vm14757_vm7, %v7730_v15, %v7731_v54  ;;  %v7736_v9 = vsel %vm14757_vm7, %v13122_v61, %v7735_v19  ;;  %v7737_v12 = vrot.slane %v7735_v19, 4  ;;  %v7745_v26 = vrot.slane %v7622_v63, 5  ;;  %v7636_v61 = vld [vmem:[#allocation3 + $0x88] sm:$0xf]  ;;  %v7640_v17 = vld [vmem:[#allocation3 + $0x98] sm:$0x1] }
 0x299   : > { %14157 = vmatmul.mubr.msk.bf16.gmra.mxu0 %vm226_vm1, %v13100_v57  ;;  %14167 = vmatmul.mubr.msk.bf16.gmra.mxu1 %vm226_vm1, %v13137_v29  ;;  %v13138_v58 = vcombine.low %v7729_v56, %v7732_v7  ;;  %v7743_v49 = vsel %vm14757_vm7, %v13123_v53, %v7742_v30  ;;  %v7744_v24 = vrot.slane %v7742_v30, 4  ;;  %v13124_v4 = vrot.slane %v7623_v35, 9  ;;  %v7638_v35 = vld [vmem:[#allocation3 + $0x90] sm:$0xe]  ;;  %v7642_v30 = vld [vmem:[#allocation3 + $0xa0] sm:$0xf] }
 0x29a   : > { %14196 = vmatprep.mubr.msk.bf16.mxu0 %vm226_vm1, %v14491_v31  ;;  %v7739_v25 = vsel %vm14757_vm7, %v7737_v12, %v7738_v62  ;;  %v7749_v10 = vrot.slane %v7624_v5, 5  ;;  %v7752_v16 = vrot.slane %v7625_v20, 5  ;;  %v13125_v14 = vrot.slane %v7626_v6, 9  ;;  %v14493_v20 = vld [vmem:[#allocation3 + $0x24] sm:$0xff]   ;;  %v7639_v5 = vld [vmem:[#allocation3 + $0x94] sm:$0xf] }
 0x29b   : > { %14170 = vmatprep.mubr.msk.bf16.mxu1 %vm226_vm1, %v13138_v58  ;;  %v13139_v48 = vcombine.low %v7736_v9, %v7739_v25  ;;  %v7746_v50 = vsel %vm14757_vm7, %v7744_v24, %v7745_v26  ;;  %v7756_v60 = vrot.slane %v7627_v38, 5  ;;  %v7759_v51 = vrot.slane %v7628_v43, 5  ;;  %v7641_v43 = vld [vmem:[#allocation3 + $0x9c] sm:$0xe]  ;;  %v7643_v6 = vld [vmem:[#allocation3 + $0xa4] sm:$0x1] }
 0x29c   : > { %v13140_v13 = vcombine.low %v7743_v49, %v7746_v50  ;;  %v16944_v45 = vsel %vm14757_vm7, %v13124_v4, %v7749_v10  ;;  %v7751_v32 = vrot.slane %v7749_v10, 4  ;;  %v13126_v28 = vrot.slane %v7629_v33, 9  ;;  %v7645_v38 = vld [vmem:[#allocation3 + $0xac] sm:$0xf]  ;;  %v7644_v4 = vld [vmem:[#allocation3 + $0xa8] sm:$0xe] }
 0x29d   : > { %v16948_v1 = vsel %vm14757_vm7, %v13125_v14, %v7756_v60  ;;  %v7758_v55 = vrot.slane %v7756_v60, 4  ;;  %v7763_v40 = vrot.slane %v7630_v11, 5  ;;  %v7766_v54 = vrot.slane %v7631_v3, 5  ;;  %v7646_v3 = vld [vmem:[#allocation3 + $0xb0] sm:$0x1] }
 0x29e   : > { %v16952_v59 = vsel %vm14757_vm7, %v7751_v32, %v7752_v16  ;;  %v13127_v44 = vrot.slane %v7632_v22, 9  ;;  %v7770_v56 = vrot.slane %v7633_v18, 5  ;;  %v7773_v63 = vrot.slane %v7634_v47, 5  ;;  %v7647_v14 = vld [vmem:[#allocation3 + $0xb4] sm:$0xe] }
 0x29f   : > { %v13141_v23 = vcombine.low %v16944_v45, %v16952_v59  ;;  %v16958_v29 = vsel %vm14757_vm7, %v7758_v55, %v7759_v51  ;;  %v16962_v15 = vsel %vm14757_vm7, %v13126_v28, %v7763_v40  ;;  %v7765_v19 = vrot.slane %v7763_v40, 4  ;;  %v7649_v51 = vld [vmem:[#allocation3 + $0xbc] sm:$0x1]  ;;  %v7648_v32 = vld [vmem:[#allocation3 + $0xb8] sm:$0xf]  ;;  %v14494_v40 = vld [vmem:[#allocation3 + $0x30] sm:$0xff]  }
 0x2a0   : > { %v13142_v57 = vcombine.low %v16948_v1, %v16958_v29  ;;  %v16968_v31 = vsel %vm14757_vm7, %v13127_v44, %v7770_v56  ;;  %v7772_v62 = vrot.slane %v7770_v56, 4  ;;  %v13128_v53 = vrot.slane %v7635_v42, 9  ;;  %v8590_v55 = vld [vmem:[#allocation3 + $0xc] sm:$0xf]  ;;  %v8591_v59 = vld [vmem:[#allocation3 + $0x10] sm:$0xf] }
 0x2a1   : > { %14197 = vmatmul.mubr.msk.bf16.vlgmr.msra.gmra.mxu0 %vm226_vm1, %v14492_v34  ;;  %14171 = vmatmul.mubr.msk.bf16.gmra.mxu1 %vm226_vm1, %v13139_v48  ;;  %v16974_v7 = vsel %vm14757_vm7, %v7765_v19, %v7766_v54  ;;  %v7777_v9 = vrot.slane %v7636_v61, 5  ;;  %v7780_v12 = vrot.slane %v7637_v2, 5  ;;  %v13129_v26 = vrot.slane %v7638_v35, 9  ;;  %v14495_v44 = vld [vmem:[#allocation3 + $0x3c] sm:$0xff]   ;;  %v8592_v29 = vld [vmem:[#allocation3 + $0x14] sm:$0x1] }
 0x2a2   : > { %14200 = vmatprep.mubr.msk.bf16.mxu0 %vm226_vm1, %v14493_v20  ;;  %14174 = vmatprep.mubr.msk.bf16.mxu1 %vm226_vm1, %v13140_v13  ;;  %v13143_v33 = vcombine.low %v16962_v15, %v16974_v7  ;;  %v16982_v58 = vsel %vm14757_vm7, %v7772_v62, %v7773_v63  ;;  %v7784_v49 = vrot.slane %v7639_v5, 5  ;;  %v7787_v24 = vrot.slane %v7640_v17, 5  ;;  %v8593_v62 = vld [vmem:[#allocation3 + $0x18] sm:$0xf]  ;;  %v17067_v7 = vld [vmem:[%s18500_s3 + $0xe] sm:$0x3] }
 0x2a3   : > { %v13144_v47 = vcombine.low %v16968_v31, %v16982_v58  ;;  %v16988_v25 = vsel %vm14757_vm7, %v13128_v53, %v7777_v9  ;;  %v7779_v10 = vrot.slane %v7777_v9, 4  ;;  %v13130_v16 = vrot.slane %v7641_v43, 9 }
 0x2a4   : > { %v16992_v11 = vsel %vm14757_vm7, %v13129_v26, %v7784_v49  ;;  %v7786_v48 = vrot.slane %v7784_v49, 4  ;;  %v7791_v50 = vrot.slane %v7642_v30, 5  ;;  %v7794_v60 = vrot.slane %v7643_v6, 5  ;;  %v8594_v49 = vld [vmem:[#allocation3 + $0x1c] sm:$0xf] }
 0x2a5   : > { %v16996_v22 = vsel %vm14757_vm7, %v7779_v10, %v7780_v12  ;;  %v13131_v18 = vrot.slane %v7644_v4, 9  ;;  %v7798_v13 = vrot.slane %v7645_v38, 5  ;;  %v7801_v45 = vrot.slane %v7646_v3, 5 }
 0x2a6   : > { %v13145_v28 = vcombine.low %v16988_v25, %v16996_v22  ;;  %v17002_v42 = vsel %vm14757_vm7, %v7786_v48, %v7787_v24  ;;  %v17006_v2 = vsel %vm14757_vm7, %v13130_v16, %v7791_v50  ;;  %v7793_v1 = vrot.slane %v7791_v50, 4 }
 0x2a7   : > { %v13146_v54 = vcombine.low %v16992_v11, %v17002_v42  ;;  %v17012_v61 = vsel %vm14757_vm7, %v13131_v18, %v7798_v13  ;;  %v7800_v17 = vrot.slane %v7798_v13, 4  ;;  %v9719_v34 = vsel %vm452_vm0, %v16855_v36, 0  ;;  %v9384_v42 = vld [vmem:[#allocation3 + $0x1c] sm:$0xf] }
 0x2a8   : > { %v17018_v56 = vsel %vm14757_vm7, %v7793_v1, %v7794_v60  ;;  %14263 = vmatpush3.bf16.msra.mxu0 %v9719_v34  ;;  %v13132_v63 = vrot.slane %v7647_v14, 9  ;;  %v7805_v35 = vrot.slane %v7648_v32, 5  ;;  %v7808_v20 = vrot.slane %v7649_v51, 5  ;;  %v8596_v60 = vld [vmem:[#allocation3 + $0x24] sm:$0xf]  ;;  %v14496_v1 = vld [vmem:[#allocation3 + $0x48] sm:$0xff]  }
 0x2a9   : > { %14201 = vmatmul.mubr.msk.bf16.gmra.mxu0 %vm226_vm1, %v14494_v40  ;;  %14175 = vmatmul.mubr.msk.bf16.gmra.mxu1 %vm226_vm1, %v13141_v23  ;;  %v13147_v19 = vcombine.low %v17006_v2, %v17018_v56  ;;  %v17026_v36 = vsel %vm14757_vm7, %v7800_v17, %v7801_v45  ;;  %v8639_v5 = vshrl.u32 %v8590_v55, 16  ;;  %v8642_v43 = vshll.u32 %v8590_v55, 16  ;;  %v8597_v32 = vld [vmem:[#allocation3 + $0x28] sm:$0xf] }
 0x2aa   : > { %14204 = vmatprep.mubr.msk.bf16.mxu0 %vm226_vm1, %v14495_v44  ;;  %14178 = vmatprep.mubr.msk.bf16.mxu1 %vm226_vm1, %v13142_v57  ;;  %v13148_v53 = vcombine.low %v17012_v61, %v17026_v36  ;;  %v17034_v23 = vsel %vm14757_vm7, %v13132_v63, %v7805_v35  ;;  %v7807_v30 = vrot.slane %v7805_v35, 4  ;;  %v8648_v6 = vshll.u32 %v8591_v59, 16  ;;  %v8595_v57 = vld [vmem:[#allocation3 + $0x20] sm:$0x1]  ;;  %v14497_v44 = vld [vmem:[#allocation3 + $0x54] sm:$0xff]  }
 0x2ab   : > { %v8641_v9 = vrot.slane %v8639_v5, 4  ;;  %v8644_v12 = vrot.slane %v8642_v43, 5  ;;  %v8652_v26 = vshrl.u32 %v8591_v59, 16  ;;  %v8658_v38 = vshll.u32 %v8592_v29, 16  ;;  %v8598_v59 = vld [vmem:[#allocation3 + $0x2c] sm:$0x1]  ;;  %14414 = vmatprep.subr.msk.bf16.mxu0 %vm452_vm0, %v17067_v7 }
 0x2ac   : > { %v17038_v24 = vsel %vm14757_vm7, %v7807_v30, %v7808_v20  ;;  %v8650_v4 = vrot.slane %v8648_v6, 5  ;;  %v8663_v3 = vshrl.u32 %v8593_v62, 16  ;;  %v8666_v10 = vshll.u32 %v8593_v62, 16  ;;  %v9380_v5 = vld [vmem:[#allocation3 + $0xc] sm:$0xe] }
 0x2ad   : > { %v13149_v16 = vcombine.low %v17034_v23, %v17038_v24  ;;  %v8645_v14 = vor.u32 %v8644_v12, %v8641_v9  ;;  %v8654_v48 = vrot.slane %v8652_v26, 4  ;;  %v8660_v50 = vrot.slane %v8658_v38, 5  ;;  %v9382_v26 = vld [vmem:[#allocation3 + $0x14] sm:$0x1]  ;;  %v9394_v24 = vld [vmem:[#allocation3 + $0x44] sm:$0x1] }
 0x2ae   : > { %v8665_v51 = vrot.slane %v8663_v3, 4  ;;  %v8668_v18 = vrot.slane %v8666_v10, 5  ;;  %v8672_v13 = vshll.u32 %v8594_v49, 16  ;;  %v8676_v45 = vshrl.u32 %v8594_v49, 16  ;;  %v8599_v49 = vld [vmem:[#allocation3 + $0x30] sm:$0xf] }
 0x2af   : > { %v8646_v55 = vrot.slane %v8645_v14, 4  ;;  %v8655_v40 = vor.u32 %v8654_v48, %v8650_v4  ;;  %v8682_v17 = vshll.u32 %v8595_v57, 16  ;;  %v17044_v34 = vsel %vm452_vm0, %v16907_v0, 0  ;;  %v8600_v14 = vld [vmem:[#allocation3 + $0x34] sm:$0xf] }
 0x2b0   : > { %v8669_v63 = vor.u32 %v8668_v18, %v8665_v51  ;;  %v8674_v35 = vrot.slane %v8672_v13, 5  ;;  %v8678_v20 = vrot.slane %v8676_v45, 4  ;;  %v6194_v29 = vsel %vm16402_vm2, %v6186_v21, %v16760_v37  ;;  %v8601_v18 = vld [vmem:[#allocation3 + $0x38] sm:$0x1]  ;;  %v14498_v13 = vld [vmem:[#allocation3 + $0x60] sm:$0xff]  }
 0x2b1   : > { %14205 = vmatmul.mubr.msk.bf16.gmra.mxu0 %vm226_vm1, %v14496_v1  ;;  %14179 = vmatmul.mubr.msk.bf16.gmra.mxu1 %vm226_vm1, %v13143_v33  ;;  %v8651_v0 = vsel %vm14627_vm4, %v8646_v55, %v8650_v4  ;;  %v8656_v43 = vrot.slane %v8655_v40, 4  ;;  %v8684_v62 = vrot.slane %v8682_v17, 5  ;;  %6355 = vst.msk [vmem:[#allocation3 + $0xc4] sm:$0xf] %vm5704_vm13, %v6194_v29  ;;  %v8687_v30 = vshrl.u32 %v8596_v60, 16  ;;  %v14499_v17 = vld [vmem:[#allocation3 + $0x6c] sm:$0xff]  }
 0x2b2   : > { %14208 = vmatprep.mubr.msk.bf16.mxu0 %vm226_vm1, %v14497_v44  ;;  %14182 = vmatprep.mubr.msk.bf16.mxu1 %vm226_vm1, %v13144_v47  ;;  %v8670_v41 = vrot.slane %v8669_v63, 4  ;;  %v8679_v21 = vor.u32 %v8678_v20, %v8674_v35  ;;  %v8690_v37 = vshll.u32 %v8596_v60, 16  ;;  %v8696_v15 = vshll.u32 %v8597_v32, 16  ;;  %v8602_v40 = vld [vmem:[#allocation3 + $0x3c] sm:$0xf] }
 0x2b3   : > { %v8661_v33 = vsel %vm14627_vm4, %v8656_v43, %v8660_v50  ;;  %v8689_v6 = vrot.slane %v8687_v30, 4  ;;  %v8700_v9 = vshrl.u32 %v8597_v32, 16  ;;  %v8706_v12 = vshll.u32 %v8598_v59, 16  ;;  %v8603_v20 = vld [vmem:[#allocation3 + $0x40] sm:$0xf] }
 0x2b4   : > { %v17073_v31 = vcombine.low %v8651_v0, %v8661_v33  ;;  %v8675_v58 = vsel %vm14627_vm4, %v8670_v41, %v8674_v35  ;;  %v8680_v47 = vrot.slane %v8679_v21, 4  ;;  %v8692_v38 = vrot.slane %v8690_v37, 5 }
 0x2b5   : > { %v8698_v4 = vrot.slane %v8696_v15, 5  ;;  %v8702_v57 = vrot.slane %v8700_v9, 4  ;;  %v8708_v3 = vrot.slane %v8706_v12, 5  ;;  %v13232_v10 = vrot.slane %v9380_v5, 9  ;;  %v9386_v12 = vld [vmem:[#allocation3 + $0x24] sm:$0xe] }
 0x2b6   : > { %v8685_v48 = vsel %vm14627_vm4, %v8680_v47, %v8684_v62  ;;  %v8693_v50 = vor.u32 %v8692_v38, %v8689_v6  ;;  %v9478_v60 = vrot.slane %v9381_v46, 5  ;;  %v9481_v51 = vrot.slane %v9382_v26, 5  ;;  %v8604_v62 = vld [vmem:[#allocation3 + $0x44] sm:$0x1]  ;;  %v9383_v46 = vld [vmem:[#allocation3 + $0x18] sm:$0xe] }
 0x2b7   : > { %v17079_v45 = vcombine.low %v8675_v58, %v8685_v48  ;;  %v8703_v32 = vor.u32 %v8702_v57, %v8698_v4  ;;  %v8711_v1 = vshrl.u32 %v8599_v49, 16  ;;  %v8714_v55 = vshll.u32 %v8599_v49, 16  ;;  %v9387_v26 = vld [vmem:[#allocation3 + $0x28] sm:$0xf] }
 0x2b8   : > { %v8694_v59 = vrot.slane %v8693_v50, 4  ;;  %v17083_v44 = vsel %vm14757_vm7, %v13232_v10, %v9478_v60  ;;  %v9480_v63 = vrot.slane %v9478_v60, 4  ;;  %v8720_v35 = vshll.u32 %v8600_v14, 16 }
 0x2b9   : > { %14209 = vmatmul.mubr.msk.bf16.gmra.mxu0 %vm226_vm1, %v14498_v13  ;;  %14183 = vmatmul.mubr.msk.bf16.gmra.mxu1 %vm226_vm1, %v13145_v28  ;;  %v8704_v29 = vrot.slane %v8703_v32, 4  ;;  %v8713_v5 = vrot.slane %v8711_v1, 4  ;;  %v8716_v0 = vrot.slane %v8714_v55, 5  ;;  %v8724_v43 = vshrl.u32 %v8600_v14, 16  ;;  %v14500_v14 = vld [vmem:[#allocation3 + $0x78] sm:$0xff]   ;;  %v14501_v13 = vld [vmem:[#allocation3 + $0x84] sm:$0xff]  }
 0x2ba   : > { %14212 = vmatprep.mubr.msk.bf16.mxu0 %vm226_vm1, %v14499_v17  ;;  %14186 = vmatprep.mubr.msk.bf16.mxu1 %vm226_vm1, %v13146_v54  ;;  %v8699_v30 = vsel %vm14627_vm4, %v8694_v59, %v8698_v4  ;;  %v17099_v25 = vsel %vm14757_vm7, %v9480_v63, %v9481_v51  ;;  %v8722_v22 = vrot.slane %v8720_v35, 5  ;;  %v8730_v28 = vshll.u32 %v8601_v18, 16  ;;  %v9385_v54 = vld [vmem:[#allocation3 + $0x20] sm:$0x1]  ;;  %v9388_v18 = vld [vmem:[#allocation3 + $0x2c] sm:$0x1] }
 0x2bb   : > { %v8709_v41 = vsel %vm14627_vm4, %v8704_v29, %v8708_v3  ;;  %v13249_v21 = vcombine.low %v17083_v44, %v17099_v25  ;;  %v8717_v37 = vor.u32 %v8716_v0, %v8713_v5  ;;  %v8726_v11 = vrot.slane %v8724_v43, 4  ;;  %v8605_v17 = vld [vmem:[#allocation3 + $0x48] sm:$0xf]  ;;  %v8606_v29 = vld [vmem:[#allocation3 + $0x4c] sm:$0xf] }
 0x2bc   : > { %v17105_v15 = vcombine.low %v8699_v30, %v8709_v41  ;;  %v8732_v33 = vrot.slane %v8730_v28, 5  ;;  %v8735_v6 = vshrl.u32 %v8602_v40, 16  ;;  %v8738_v9 = vshll.u32 %v8602_v40, 16  ;;  %v14502_v41 = vld [vmem:[#allocation3 + $0x90] sm:$0xff]   ;;  %v8619_v25 = vld [vmem:[#allocation3 + $0x80] sm:$0x1] }
 0x2bd   : > { %v8718_v58 = vrot.slane %v8717_v37, 4  ;;  %v8727_v47 = vor.u32 %v8726_v11, %v8722_v22  ;;  %v8744_v38 = vshll.u32 %v8603_v20, 16  ;;  %v8748_v49 = vshrl.u32 %v8603_v20, 16 }
 0x2be   : > { %v8737_v4 = vrot.slane %v8735_v6, 4  ;;  %v8740_v57 = vrot.slane %v8738_v9, 5  ;;  %v8754_v3 = vshll.u32 %v8604_v62, 16  ;;  %v13233_v10 = vrot.slane %v9383_v46, 9  ;;  %v8608_v46 = vld [vmem:[#allocation3 + $0x54] sm:$0xf] }
 0x2bf   : > { %v8723_v48 = vsel %vm14627_vm4, %v8718_v58, %v8722_v22  ;;  %v8728_v50 = vrot.slane %v8727_v47, 4  ;;  %v8746_v60 = vrot.slane %v8744_v38, 5  ;;  %v8750_v51 = vrot.slane %v8748_v49, 4  ;;  %v8610_v6 = vld [vmem:[#allocation3 + $0x5c] sm:$0x1] }
 0x2c0   : > { %v8741_v32 = vor.u32 %v8740_v57, %v8737_v4  ;;  %v8756_v1 = vrot.slane %v8754_v3, 5  ;;  %v9485_v55 = vrot.slane %v9384_v42, 5  ;;  %v9488_v40 = vrot.slane %v9385_v54, 5  ;;  %v9389_v47 = vld [vmem:[#allocation3 + $0x30] sm:$0xe] }
 0x2c1   : > { %14213 = vmatmul.mubr.msk.bf16.gmra.mxu0 %vm226_vm1, %v14500_v14  ;;  %14187 = vmatmul.mubr.msk.bf16.gmra.mxu1 %vm226_vm1, %v13147_v19  ;;  %v8733_v59 = vsel %vm14627_vm4, %v8728_v50, %v8732_v33  ;;  %v8751_v63 = vor.u32 %v8750_v51, %v8746_v60  ;;  %v13234_v35 = vrot.slane %v9386_v12, 9  ;;  %v9492_v20 = vrot.slane %v9387_v26, 5  ;;  %v8609_v33 = vld [vmem:[#allocation3 + $0x58] sm:$0xf]  ;;  %v9390_v38 = vld [vmem:[#allocation3 + $0x34] sm:$0xf] }
 0x2c2   : > { %14216 = vmatprep.mubr.msk.bf16.mxu0 %vm226_vm1, %v14501_v13  ;;  %14190 = vmatprep.mubr.msk.bf16.mxu1 %vm226_vm1, %v13148_v53  ;;  %v17121_v5 = vcombine.low %v8723_v48, %v8733_v59  ;;  %v8742_v0 = vrot.slane %v8741_v32, 4  ;;  %v17125_v2 = vsel %vm14757_vm7, %v13233_v10, %v9485_v55  ;;  %v9487_v56 = vrot.slane %v9485_v55, 4  ;;  %v8607_v53 = vld [vmem:[#allocation3 + $0x50] sm:$0x1]  ;;  %v9391_v10 = vld [vmem:[#allocation3 + $0x38] sm:$0x1] }
 0x2c3   : > { %v8752_v19 = vrot.slane %v8751_v63, 4  ;;  %v17129_v43 = vsel %vm14757_vm7, %v13234_v35, %v9492_v20  ;;  %v9494_v62 = vrot.slane %v9492_v20, 4  ;;  %v9495_v30 = vrot.slane %v9388_v18, 5  ;;  %v14503_v14 = vld [vmem:[#allocation3 + $0x9c] sm:$0xff]  }
 0x2c4   : > { %v8747_v61 = vsel %vm14627_vm4, %v8742_v0, %v8746_v60  ;;  %v17135_v36 = vsel %vm14757_vm7, %v9487_v56, %v9488_v40  ;;  %v8759_v22 = vshrl.u32 %v8605_v17, 16  ;;  %v8762_v28 = vshll.u32 %v8605_v17, 16  ;;  %v9392_v18 = vld [vmem:[#allocation3 + $0x3c] sm:$0xe]  ;;  %v9393_v40 = vld [vmem:[#allocation3 + $0x40] sm:$0xf] }
 0x2c5   : > { %v8757_v37 = vsel %vm14627_vm4, %v8752_v19, %v8756_v1  ;;  %v13250_v11 = vcombine.low %v17125_v2, %v17135_v36  ;;  %v17143_v42 = vsel %vm14757_vm7, %v9494_v62, %v9495_v30  ;;  %v8768_v54 = vshll.u32 %v8606_v29, 16  ;;  %v8611_v30 = vld [vmem:[#allocation3 + $0x60] sm:$0xf] }
 0x2c6   : > { %v17145_v9 = vcombine.low %v8747_v61, %v8757_v37  ;;  %v13251_v12 = vcombine.low %v17129_v43, %v17143_v42  ;;  %v8761_v26 = vrot.slane %v8759_v22, 4  ;;  %v8764_v58 = vrot.slane %v8762_v28, 5  ;;  %v14504_v61 = vld [vmem:[#allocation3 + $0xa8] sm:$0xff]   ;;  %v14505_v37 = vld [vmem:[#allocation3 + $0xb4] sm:$0xff]  }
 0x2c7   : > { %v8770_v49 = vrot.slane %v8768_v54, 5  ;;  %v8772_v4 = vshrl.u32 %v8606_v29, 16  ;;  %v8778_v57 = vshll.u32 %v8607_v53, 16  ;;  %v8783_v3 = vshrl.u32 %v8608_v46, 16 }
 0x2c8   : > { %v8765_v48 = vor.u32 %v8764_v58, %v8761_v26  ;;  %v8786_v50 = vshll.u32 %v8608_v46, 16  ;;  %v8792_v60 = vshll.u32 %v8609_v33, 16  ;;  %v8796_v51 = vshrl.u32 %v8609_v33, 16  ;;  %v8612_v46 = vld [vmem:[#allocation3 + $0x64] sm:$0xf] }
 0x2c9   : > { %14217 = vmatmul.mubr.msk.bf16.gmra.mxu0 %vm226_vm1, %v14502_v41  ;;  %14191 = vmatmul.mubr.msk.bf16.gmra.mxu1 %vm226_vm1, %v13149_v16  ;;  %v8774_v13 = vrot.slane %v8772_v4, 4  ;;  %v8780_v32 = vrot.slane %v8778_v57, 5  ;;  %v8785_v1 = vrot.slane %v8783_v3, 4  ;;  %v8802_v55 = vshll.u32 %v8610_v6, 16  ;;  %v8613_v41 = vld [vmem:[#allocation3 + $0x68] sm:$0x1] }
 0x2ca   : > { %14220 = vmatprep.mubr.msk.bf16.mxu0 %vm226_vm1, %v14503_v14  ;;  %14230 = vmatprep.mubr.msk.bf16.mxu1 %vm226_vm1, %v17073_v31  ;;  %v8766_v17 = vrot.slane %v8765_v48, 4  ;;  %v8788_v59 = vrot.slane %v8786_v50, 5  ;;  %v8794_v63 = vrot.slane %v8792_v60, 5  ;;  %v8798_v35 = vrot.slane %v8796_v51, 4  ;;  %v8614_v58 = vld [vmem:[#allocation3 + $0x6c] sm:$0xf] }
 0x2cb   : > { %v8775_v20 = vor.u32 %v8774_v13, %v8770_v49  ;;  %v8804_v29 = vrot.slane %v8802_v55, 5  ;;  %v13235_v0 = vrot.slane %v9389_v47, 9  ;;  %v9499_v23 = vrot.slane %v9390_v38, 5  ;;  %v8615_v47 = vld [vmem:[#allocation3 + $0x70] sm:$0xf] }
 0x2cc   : > { %v8771_v16 = vsel %vm14627_vm4, %v8766_v17, %v8770_v49  ;;  %v8789_v56 = vor.u32 %v8788_v59, %v8785_v1  ;;  %v8799_v19 = vor.u32 %v8798_v35, %v8794_v63  ;;  %v9502_v62 = vrot.slane %v9391_v10, 5  ;;  %v17172_v3 = vld [vmem:[%s18500_s3 + $0x10] sm:$0x3]  ;;  %v9395_v59 = vld [vmem:[#allocation3 + $0x48] sm:$0xe] }
 0x2cd   : > { %v8776_v53 = vrot.slane %v8775_v20, 4  ;;  %v17161_v31 = vsel %vm14757_vm7, %v13235_v0, %v9499_v23  ;;  %v9501_v22 = vrot.slane %v9499_v23, 4  ;;  %v13236_v28 = vrot.slane %v9392_v18, 9 }
 0x2ce   : > { %v8790_v54 = vrot.slane %v8789_v56, 4  ;;  %v8800_v33 = vrot.slane %v8799_v19, 4  ;;  %v9506_v6 = vrot.slane %v9393_v40, 5  ;;  %v9509_v26 = vrot.slane %v9394_v24, 5  ;;  %v9398_v56 = vld [vmem:[#allocation3 + $0x54] sm:$0xe] }
 0x2cf   : > { %v8781_v38 = vsel %vm14627_vm4, %v8776_v53, %v8780_v32  ;;  %v17167_v49 = vsel %vm14757_vm7, %v9501_v22, %v9502_v62  ;;  %v8807_v4 = vshrl.u32 %v8611_v30, 16  ;;  %v8810_v57 = vshll.u32 %v8611_v30, 16  ;;  %v8616_v32 = vld [vmem:[#allocation3 + $0x74] sm:$0x1]  ;;  %v9400_v53 = vld [vmem:[#allocation3 + $0x5c] sm:$0x1] }
 0x2d0   : > { %v17174_v10 = vcombine.low %v8771_v16, %v8781_v38  ;;  %v8795_v14 = vsel %vm14627_vm4, %v8790_v54, %v8794_v63  ;;  %v8805_v48 = vsel %vm14627_vm4, %v8800_v33, %v8804_v29  ;;  %v13252_v50 = vcombine.low %v17161_v31, %v17167_v49  ;;  %v9396_v29 = vld [vmem:[#allocation3 + $0x4c] sm:$0xf]  ;;  %v9397_v16 = vld [vmem:[#allocation3 + $0x50] sm:$0x1]  ;;  %v14506_v54 = vld [vmem:[#allocation3 + $0xc0] sm:$0xff]  }
 0x2d1   : > { %14221 = vmatmul.mubr.msk.bf16.gmra.mxu0 %vm226_vm1, %v14504_v61  ;;  %14231 = vmatmul.mubr.msk.bf16.vlgmr.msra.gmra.mxu1 %vm226_vm1, %v17079_v45  ;;  %v17185_v60 = vcombine.low %v8795_v14, %v8805_v48  ;;  %v17189_v51 = vsel %vm14757_vm7, %v13236_v28, %v9506_v6  ;;  %v9508_v18 = vrot.slane %v9506_v6, 4  ;;  %v8809_v13 = vrot.slane %v8807_v4, 4  ;;  %v9399_v61 = vld [vmem:[#allocation3 + $0x58] sm:$0xf] }
 0x2d2   : > { %14224 = vmatprep.mubr.msk.bf16.mxu0 %vm226_vm1, %v14505_v37  ;;  %14297 = vmatpush3.bf16.msra.mxu1 %v17044_v34  ;;  %v8812_v1 = vrot.slane %v8810_v57, 5  ;;  %v8816_v55 = vshll.u32 %v8612_v46, 16  ;;  %v8820_v40 = vshrl.u32 %v8612_v46, 16  ;;  %v8826_v17 = vshll.u32 %v8613_v41, 16  ;;  %v8617_v37 = vld [vmem:[#allocation3 + $0x78] sm:$0xf] }
 0x2d3   : > { %14234 = vmatprep.mubr.msk.bf16.mxu1 %vm226_vm1, %v17105_v15  ;;  %v17197_v45 = vsel %vm14757_vm7, %v9508_v18, %v9509_v26  ;;  %v8831_v63 = vshrl.u32 %v8614_v58, 16  ;;  %v8834_v35 = vshll.u32 %v8614_v58, 16  ;;  %v8840_v20 = vshll.u32 %v8615_v47, 16  ;;  %14415 = vmatprep.subr.msk.bf16.mxu1 %vm452_vm0, %v17172_v3 }
 0x2d4   : > { %v13253_v34 = vcombine.low %v17189_v51, %v17197_v45  ;;  %v8813_v0 = vor.u32 %v8812_v1, %v8809_v13  ;;  %v8818_v23 = vrot.slane %v8816_v55, 5  ;;  %v8822_v24 = vrot.slane %v8820_v40, 4  ;;  %v8618_v40 = vld [vmem:[#allocation3 + $0x7c] sm:$0xf] }
 0x2d5   : > { %v8828_v15 = vrot.slane %v8826_v17, 5  ;;  %v8833_v19 = vrot.slane %v8831_v63, 4  ;;  %v8836_v62 = vrot.slane %v8834_v35, 5  ;;  %v8842_v30 = vrot.slane %v8840_v20, 5  ;;  %v8620_v63 = vld [vmem:[#allocation3 + $0x84] sm:$0xf] }
 0x2d6   : > { %v8814_v22 = vrot.slane %v8813_v0, 4  ;;  %v8823_v28 = vor.u32 %v8822_v24, %v8818_v23  ;;  %v8844_v46 = vshrl.u32 %v8615_v47, 16  ;;  %v8850_v41 = vshll.u32 %v8616_v32, 16  ;;  %v8621_v0 = vld [vmem:[#allocation3 + $0x88] sm:$0xf] }
 0x2d7   : > { %v8837_v33 = vor.u32 %v8836_v62, %v8833_v19  ;;  %v13237_v6 = vrot.slane %v9395_v59, 9  ;;  %v9513_v26 = vrot.slane %v9396_v29, 5  ;;  %v9516_v58 = vrot.slane %v9397_v16, 5  ;;  %v9408_v51 = vld [vmem:[#allocation3 + $0x7c] sm:$0xf] }
 0x2d8   : > { %v8819_v38 = vsel %vm14627_vm4, %v8814_v22, %v8818_v23  ;;  %v8824_v4 = vrot.slane %v8823_v28, 4  ;;  %v8846_v57 = vrot.slane %v8844_v46, 4  ;;  %v8852_v14 = vrot.slane %v8850_v41, 5  ;;  %v8622_v23 = vld [vmem:[#allocation3 + $0x8c] sm:$0x1] }
 0x2d9   : > { %14225 = vmatmul.mubr.msk.bf16.gmra.mxu0 %vm226_vm1, %v14506_v54  ;;  %14235 = vmatmul.mubr.msk.bf16.gmra.mxu1 %vm226_vm1, %v17121_v5  ;;  %v8838_v48 = vrot.slane %v8837_v33, 4  ;;  %v17210_v47 = vsel %vm14757_vm7, %v13237_v6, %v9513_v26  ;;  %v9515_v18 = vrot.slane %v9513_v26, 4  ;;  %v13238_v13 = vrot.slane %v9398_v56, 9  ;;  %v9401_v41 = vld [vmem:[#allocation3 + $0x60] sm:$0xe] }
 0x2da   : > { %14264 = vmatprep.mubr.msk.bf16.mxu0 %vm226_vm1, %v13249_v21  ;;  %14238 = vmatprep.mubr.msk.bf16.mxu1 %vm226_vm1, %v17145_v9  ;;  %v8829_v32 = vsel %vm14627_vm4, %v8824_v4, %v8828_v15  ;;  %v8847_v1 = vor.u32 %v8846_v57, %v8842_v30  ;;  %v9520_v5 = vrot.slane %v9399_v61, 5  ;;  %v9523_v55 = vrot.slane %v9400_v53, 5  ;;  %v9402_v54 = vld [vmem:[#allocation3 + $0x64] sm:$0xf] }
 0x2db   : > { %v17220_v17 = vcombine.low %v8819_v38, %v8829_v32  ;;  %v8843_v59 = vsel %vm14627_vm4, %v8838_v48, %v8842_v30  ;;  %v17226_v44 = vsel %vm14757_vm7, %v9515_v18, %v9516_v58  ;;  %v8855_v21 = vshrl.u32 %v8617_v37, 16  ;;  %v9403_v58 = vld [vmem:[#allocation3 + $0x68] sm:$0x1]  ;;  %v9404_v38 = vld [vmem:[#allocation3 + $0x6c] sm:$0xe] }
 0x2dc   : > { %v8848_v9 = vrot.slane %v8847_v1, 4  ;;  %v13254_v35 = vcombine.low %v17210_v47, %v17226_v44  ;;  %v17232_v20 = vsel %vm14757_vm7, %v13238_v13, %v9520_v5  ;;  %v9522_v29 = vrot.slane %v9520_v5, 4  ;;  %v9405_v18 = vld [vmem:[#allocation3 + $0x70] sm:$0xf]  ;;  %v9406_v32 = vld [vmem:[#allocation3 + $0x74] sm:$0x1] }
 0x2dd   : > { %v8857_v24 = vrot.slane %v8855_v21, 4  ;;  %v8858_v16 = vshll.u32 %v8617_v37, 16  ;;  %v8864_v56 = vshll.u32 %v8618_v40, 16  ;;  %v8868_v15 = vshrl.u32 %v8618_v40, 16  ;;  %v8623_v40 = vld [vmem:[#allocation3 + $0x90] sm:$0xf] }
 0x2de   : > { %v8853_v19 = vsel %vm14627_vm4, %v8848_v9, %v8852_v14  ;;  %v17238_v62 = vsel %vm14757_vm7, %v9522_v29, %v9523_v55  ;;  %v8874_v30 = vshll.u32 %v8619_v25, 16  ;;  %v8879_v61 = vshrl.u32 %v8620_v63, 16 }
 0x2df   : > { %v13208_v53 = vcombine.low %v8843_v59, %v8853_v19  ;;  %v13255_v22 = vcombine.low %v17232_v20, %v17238_v62  ;;  %v8860_v28 = vrot.slane %v8858_v16, 5  ;;  %v8866_v46 = vrot.slane %v8864_v56, 5  ;;  %v8625_v19 = vld [vmem:[#allocation3 + $0x98] sm:$0x1] }
 0x2e0   : > { %v8870_v37 = vrot.slane %v8868_v15, 4  ;;  %v8876_v33 = vrot.slane %v8874_v30, 5  ;;  %v8881_v6 = vrot.slane %v8879_v61, 4  ;;  %v8882_v26 = vshll.u32 %v8620_v63, 16 }
 0x2e1   : > { %14265 = vmatmul.mubr.msk.bf16.vlgmr.msra.gmra.mxu0 %vm226_vm1, %v13250_v11  ;;  %14239 = vmatmul.mubr.msk.bf16.gmra.mxu1 %vm226_vm1, %v17174_v10  ;;  %v8861_v4 = vor.u32 %v8860_v28, %v8857_v24  ;;  %v8888_v57 = vshll.u32 %v8621_v0, 16  ;;  %v8892_v14 = vshrl.u32 %v8621_v0, 16  ;;  %v8898_v48 = vshll.u32 %v8622_v23, 16 }
 0x2e2   : > { %14268 = vmatprep.mubr.msk.bf16.mxu0 %vm226_vm1, %v13251_v12  ;;  %14242 = vmatprep.mubr.msk.bf16.mxu1 %vm226_vm1, %v17185_v60  ;;  %v8871_v13 = vor.u32 %v8870_v37, %v8866_v46  ;;  %v8884_v2 = vrot.slane %v8882_v26, 5  ;;  %v13239_v36 = vrot.slane %v9401_v41, 9  ;;  %v9527_v11 = vrot.slane %v9402_v54, 5  ;;  %v8624_v12 = vld [vmem:[#allocation3 + $0x94] sm:$0xf] }
 0x2e3   : > { %v8862_v1 = vrot.slane %v8861_v4, 4  ;;  %v8890_v10 = vrot.slane %v8888_v57, 5  ;;  %v8894_v5 = vrot.slane %v8892_v14, 4  ;;  %v8900_v55 = vrot.slane %v8898_v48, 5  ;;  %v8626_v54 = vld [vmem:[#allocation3 + $0x9c] sm:$0xf] }
 0x2e4   : > { %v8872_v59 = vrot.slane %v8871_v13, 4  ;;  %v8885_v25 = vor.u32 %v8884_v2, %v8881_v6  ;;  %v17256_v43 = vsel %vm14757_vm7, %v13239_v36, %v9527_v11  ;;  %v9529_v42 = vrot.slane %v9527_v11, 4  ;;  %v9407_v4 = vld [vmem:[#allocation3 + $0x78] sm:$0xe]  ;;  %v9409_v2 = vld [vmem:[#allocation3 + $0x80] sm:$0x1] }
 0x2e5   : > { %v8867_v60 = vsel %vm14627_vm4, %v8862_v1, %v8866_v46  ;;  %v8895_v21 = vor.u32 %v8894_v5, %v8890_v10  ;;  %v9530_v63 = vrot.slane %v9403_v58, 5  ;;  %v13240_v9 = vrot.slane %v9404_v38, 9  ;;  %v8627_v58 = vld [vmem:[#allocation3 + $0xa0] sm:$0xf]  ;;  %v8628_v38 = vld [vmem:[#allocation3 + $0xa4] sm:$0x1] }
 0x2e6   : > { %v8877_v29 = vsel %vm14627_vm4, %v8872_v59, %v8876_v33  ;;  %v8886_v0 = vrot.slane %v8885_v25, 4  ;;  %v9534_v23 = vrot.slane %v9405_v18, 5  ;;  %v9537_v24 = vrot.slane %v9406_v32, 5  ;;  %v9411_v25 = vld [vmem:[#allocation3 + $0x88] sm:$0xf] }
 0x2e7   : > { %v13209_v16 = vcombine.low %v8867_v60, %v8877_v29  ;;  %v8896_v56 = vrot.slane %v8895_v21, 4  ;;  %v17264_v15 = vsel %vm14757_vm7, %v9529_v42, %v9530_v63  ;;  %v8903_v30 = vshrl.u32 %v8623_v40, 16  ;;  %v9412_v63 = vld [vmem:[#allocation3 + $0x8c] sm:$0x1] }
 0x2e8   : > { %v8891_v61 = vsel %vm14627_vm4, %v8886_v0, %v8890_v10  ;;  %v13256_v28 = vcombine.low %v17256_v43, %v17264_v15  ;;  %v17272_v46 = vsel %vm14757_vm7, %v13240_v9, %v9534_v23  ;;  %v9536_v41 = vrot.slane %v9534_v23, 4  ;;  %v9410_v10 = vld [vmem:[#allocation3 + $0x84] sm:$0xe]  ;;  %v9417_v15 = vld [vmem:[#allocation3 + $0xa0] sm:$0xf] }
 0x2e9   : > { %14269 = vmatmul.mubr.msk.bf16.gmra.mxu0 %vm226_vm1, %v13252_v50  ;;  %14243 = vmatmul.mubr.msk.bf16.gmra.mxu1 %vm226_vm1, %v17220_v17  ;;  %v8901_v37 = vsel %vm14627_vm4, %v8896_v56, %v8900_v55  ;;  %v8905_v33 = vrot.slane %v8903_v30, 4  ;;  %v8906_v6 = vshll.u32 %v8623_v40, 16  ;;  %v8912_v26 = vshll.u32 %v8624_v12, 16  ;;  %v17293_v56 = vpop.f32.mrf.mxu1 }
 0x2ea   : > { %14272 = vmatprep.mubr.msk.bf16.mxu0 %vm226_vm1, %v13253_v34  ;;  %14246 = vmatprep.mubr.msk.bf16.mxu1 %vm226_vm1, %v13208_v53  ;;  %v13210_v31 = vcombine.low %v8891_v61, %v8901_v37  ;;  %v17289_v49 = vsel %vm14757_vm7, %v9536_v41, %v9537_v24  ;;  %v8916_v50 = vshrl.u32 %v8624_v12, 16  ;;  %v8922_v17 = vshll.u32 %v8625_v19, 16  ;;  %v8629_v24 = vld [vmem:[#allocation3 + $0xa8] sm:$0xf] }
 0x2eb   : > { %v13257_v57 = vcombine.low %v17272_v46, %v17289_v49  ;;  %v8908_v14 = vrot.slane %v8906_v6, 5  ;;  %v8914_v48 = vrot.slane %v8912_v26, 5  ;;  %v8927_v18 = vshrl.u32 %v8626_v54, 16  ;;  %v8631_v26 = vld [vmem:[#allocation3 + $0xb0] sm:$0x1] }
 0x2ec   : > { %v8918_v45 = vrot.slane %v8916_v50, 4  ;;  %v8924_v34 = vrot.slane %v8922_v17, 5  ;;  %v8930_v13 = vshll.u32 %v8626_v54, 16  ;;  %v8936_v53 = vshll.u32 %v8627_v58, 16  ;;  %v8630_v54 = vld [vmem:[#allocation3 + $0xac] sm:$0xf]  ;;  %v17325_v17 = vpop.f32.mrf.mxu1 }
 0x2ed   : > { %v8909_v36 = vor.u32 %v8908_v14, %v8905_v33  ;;  %v8929_v11 = vrot.slane %v8927_v18, 4  ;;  %v8940_v32 = vshrl.u32 %v8627_v58, 16  ;;  %v8946_v1 = vshll.u32 %v8628_v38, 16  ;;  %v8632_v50 = vld [vmem:[#allocation3 + $0xb4] sm:$0xf] }
 0x2ee   : > { %v8919_v5 = vor.u32 %v8918_v45, %v8914_v48  ;;  %v8932_v55 = vrot.slane %v8930_v13, 5  ;;  %v8938_v40 = vrot.slane %v8936_v53, 5  ;;  %v13241_v59 = vrot.slane %v9407_v4, 9  ;;  %v8633_v18 = vld [vmem:[#allocation3 + $0xb8] sm:$0xf] }
 0x2ef   : > { %v8910_v42 = vrot.slane %v8909_v36, 4  ;;  %v8942_v12 = vrot.slane %v8940_v32, 4  ;;  %v8948_v60 = vrot.slane %v8946_v1, 5  ;;  %v9541_v21 = vrot.slane %v9408_v51, 5  ;;  %v8634_v53 = vld [vmem:[#allocation3 + $0xbc] sm:$0x1] }
 0x2f0   : > { %v8920_v9 = vrot.slane %v8919_v5, 4  ;;  %v8933_v29 = vor.u32 %v8932_v55, %v8929_v11  ;;  %v9544_v0 = vrot.slane %v9409_v2, 5  ;;  %v13242_v23 = vrot.slane %v9410_v10, 9  ;;  %v9413_v2 = vld [vmem:[#allocation3 + $0x90] sm:$0xe] }
 0x2f1   : > { %14273 = vmatmul.mubr.msk.bf16.gmra.mxu0 %vm226_vm1, %v13254_v35  ;;  %14247 = vmatmul.mubr.msk.bf16.gmra.mxu1 %vm226_vm1, %v13209_v16  ;;  %v8915_v19 = vsel %vm14627_vm4, %v8910_v42, %v8914_v48  ;;  %v8943_v30 = vor.u32 %v8942_v12, %v8938_v40  ;;  %v17304_v61 = vsel %vm14757_vm7, %v13241_v59, %v9541_v21  ;;  %v9543_v41 = vrot.slane %v9541_v21, 4  ;;  %v9414_v10 = vld [vmem:[#allocation3 + $0x94] sm:$0xf]  ;;  %v17335_v42 = vpop.f32.mrf.mxu1 }
 0x2f2   : > { %14276 = vmatprep.mubr.msk.bf16.mxu0 %vm226_vm1, %v13255_v22  ;;  %14250 = vmatprep.mubr.msk.bf16.mxu1 %vm226_vm1, %v13210_v31  ;;  %v8925_v47 = vsel %vm14627_vm4, %v8920_v9, %v8924_v34  ;;  %v8934_v44 = vrot.slane %v8933_v29, 4  ;;  %v9548_v35 = vrot.slane %v9411_v25, 5  ;;  %v9551_v16 = vrot.slane %v9412_v63, 5  ;;  %v9415_v25 = vld [vmem:[#allocation3 + $0x98] sm:$0x1] }
 0x2f3   : > { %v13211_v37 = vcombine.low %v8915_v19, %v8925_v47  ;;  %v8944_v33 = vrot.slane %v8943_v30, 4  ;;  %v17315_v6 = vsel %vm14757_vm7, %v9543_v41, %v9544_v0  ;;  %v8951_v58 = vshrl.u32 %v8629_v24, 16  ;;  %v9416_v9 = vld [vmem:[#allocation3 + $0x9c] sm:$0xe]  ;;  %v9418_v41 = vld [vmem:[#allocation3 + $0xa4] sm:$0x1] }
 0x2f4   : > { %v8939_v20 = vsel %vm14627_vm4, %v8934_v44, %v8938_v40  ;;  %v13258_v62 = vcombine.low %v17304_v61, %v17315_v6  ;;  %v17323_v22 = vsel %vm14757_vm7, %v13242_v23, %v9548_v35  ;;  %v9550_v31 = vrot.slane %v9548_v35, 4 }
 0x2f5   : > { %v8949_v38 = vsel %vm14627_vm4, %v8944_v33, %v8948_v60  ;;  %v8953_v4 = vrot.slane %v8951_v58, 4  ;;  %v8954_v14 = vshll.u32 %v8629_v24, 16  ;;  %v8960_v48 = vshll.u32 %v8630_v54, 16  ;;  %v8635_v33 = vld [vmem:[#allocation3 + $0xc0] sm:$0xf] }
 0x2f6   : > { %v13212_v51 = vcombine.low %v8939_v20, %v8949_v38  ;;  %v17331_v45 = vsel %vm14757_vm7, %v9550_v31, %v9551_v16  ;;  %v8964_v34 = vshrl.u32 %v8630_v54, 16  ;;  %v8970_v13 = vshll.u32 %v8631_v26, 16  ;;  %v17347_v54 = vpop.f32.mrf.mxu1 }
 0x2f7   : > { %v13259_v36 = vcombine.low %v17323_v22, %v17331_v45  ;;  %v8956_v11 = vrot.slane %v8954_v14, 5  ;;  %v8962_v32 = vrot.slane %v8960_v48, 5  ;;  %v8975_v1 = vshrl.u32 %v8632_v50, 16 }
 0x2f8   : > { %v8966_v5 = vrot.slane %v8964_v34, 4  ;;  %v8972_v55 = vrot.slane %v8970_v13, 5  ;;  %v8978_v40 = vshll.u32 %v8632_v50, 16  ;;  %v8984_v59 = vshll.u32 %v8633_v18, 16  ;;  %v8636_v50 = vld [vmem:[#allocation3 + $0xc4] sm:$0xf] }
 0x2f9   : > { %14277 = vmatmul.mubr.msk.bf16.gmra.mxu0 %vm226_vm1, %v13256_v28  ;;  %14251 = vmatmul.mubr.msk.bf16.gmra.mxu1 %vm226_vm1, %v13211_v37  ;;  %v8957_v12 = vor.u32 %v8956_v11, %v8953_v4  ;;  %v8977_v60 = vrot.slane %v8975_v1, 4  ;;  %v8988_v21 = vshrl.u32 %v8633_v18, 16  ;;  %v8994_v63 = vshll.u32 %v8634_v53, 16  ;;  %v8637_v18 = vld [vmem:[#allocation3 + $0xc8] sm:$0x1] }
 0x2fa   : > { %14280 = vmatprep.mubr.msk.bf16.mxu0 %vm226_vm1, %v13257_v57  ;;  %14254 = vmatprep.mubr.msk.bf16.mxu1 %vm226_vm1, %v13212_v51  ;;  %v8967_v29 = vor.u32 %v8966_v5, %v8962_v32  ;;  %v8980_v0 = vrot.slane %v8978_v40, 5  ;;  %v8986_v23 = vrot.slane %v8984_v59, 5  ;;  %v13243_v43 = vrot.slane %v9413_v2, 9  ;;  %v9419_v2 = vld [vmem:[#allocation3 + $0xa8] sm:$0xe] }
 0x2fb   : > { %v8958_v28 = vrot.slane %v8957_v12, 4  ;;  %v8990_v24 = vrot.slane %v8988_v21, 4  ;;  %v8996_v19 = vrot.slane %v8994_v63, 5  ;;  %v9555_v30 = vrot.slane %v9414_v10, 5  ;;  %v9420_v11 = vld [vmem:[#allocation3 + $0xac] sm:$0xf] }
 0x2fc   : > { %v8968_v47 = vrot.slane %v8967_v29, 4  ;;  %v8981_v44 = vor.u32 %v8980_v0, %v8977_v60  ;;  %v9558_v35 = vrot.slane %v9415_v25, 5  ;;  %v13244_v16 = vrot.slane %v9416_v9, 9  ;;  %v9422_v59 = vld [vmem:[#allocation3 + $0xb4] sm:$0xe] }
 0x2fd   : > { %v8963_v46 = vsel %vm14627_vm4, %v8958_v28, %v8962_v32  ;;  %v8991_v49 = vor.u32 %v8990_v24, %v8986_v23  ;;  %v17353_v57 = vsel %vm14757_vm7, %v13243_v43, %v9555_v30  ;;  %v9557_v37 = vrot.slane %v9555_v30, 4  ;;  %v17368_v32 = vpop.f32.mrf.mxu1  ;;  %v9423_v25 = vld [vmem:[#allocation3 + $0xb8] sm:$0xf]  ;;  %v9424_v9 = vld [vmem:[#allocation3 + $0xbc] sm:$0x1]  ;;  %v6425_v0 = vld [vmem:[#allocation2 + $0x10] sm:$0xff] }
 0x2fe   : > { %v8973_v26 = vsel %vm14627_vm4, %v8968_v47, %v8972_v55  ;;  %v8982_v58 = vrot.slane %v8981_v44, 4  ;;  %v9562_v20 = vrot.slane %v9417_v15, 5  ;;  %v9565_v31 = vrot.slane %v9418_v41, 5  ;;  %v9421_v55 = vld [vmem:[#allocation3 + $0xb0] sm:$0x1] }
 0x2ff   : > { %v13213_v38 = vcombine.low %v8963_v46, %v8973_v26  ;;  %v8992_v4 = vrot.slane %v8991_v49, 4  ;;  %v9559_v14 = vsel %vm14757_vm7, %v9557_v37, %v9558_v35  ;;  %v10932_v48 = vsel %vm452_vm0, %v17067_v7, 0  ;;  %v6423_v26 = vld [vmem:[#allocation2] sm:$0xff] }
 0x300   : > { %v8987_v51 = vsel %vm14627_vm4, %v8982_v58, %v8986_v23  ;;  %v13260_v34 = vcombine.low %v17353_v57, %v9559_v14  ;;  %v17366_v13 = vsel %vm14757_vm7, %v13244_v16, %v9562_v20  ;;  %v9564_v53 = vrot.slane %v9562_v20, 4  ;;  %14331 = vmatpush3.bf16.msra.mxu0 %v10932_v48  ;;  %v17385_v23 = vpop.f32.mrf.mxu1  ;;  %v9426_v16 = vld [vmem:[#allocation3 + $0xc4] sm:$0xf] }
 0x301   : > { %14281 = vmatmul.mubr.msk.bf16.gmra.mxu0 %vm226_vm1, %v13258_v62  ;;  %14255 = vmatmul.mubr.msk.bf16.gmra.mxu1 %vm226_vm1, %v13213_v38  ;;  %v8997_v7 = vsel %vm14627_vm4, %v8992_v4, %v8996_v19  ;;  %v8999_v1 = vshrl.u32 %v8635_v33, 16  ;;  %v9002_v10 = vshll.u32 %v8635_v33, 16  ;;  %v9008_v5 = vshll.u32 %v8636_v50, 16  ;;  %v9425_v19 = vld [vmem:[#allocation3 + $0xc0] sm:$0xe]  ;;  %v17387_v30 = vpop.f32.mrf.mxu0 }
 0x302   : > { %14284 = vmatprep.mubr.msk.bf16.mxu0 %vm226_vm1, %v13259_v36  ;;  %v13214_v40 = vcombine.low %v8987_v51, %v8997_v7  ;;  %v9566_v61 = vsel %vm14757_vm7, %v9564_v53, %v9565_v31  ;;  %v9012_v6 = vshrl.u32 %v8636_v50, 16  ;;  %v9018_v62 = vshll.u32 %v8637_v18, 16  ;;  %v9427_v33 = vld [vmem:[#allocation3 + $0xc8] sm:$0x1]  ;;  %v10369_v38 = vld [vmem:[#allocation3 + $0x18] sm:$0xf]  ;;  %v17404_v4 = vpop.f32.mrf.mxu1 }
 0x303   : > { %v13261_v12 = vcombine.low %v17366_v13, %v9566_v61  ;;  %v9001_v60 = vrot.slane %v8999_v1, 4  ;;  %v9004_v21 = vrot.slane %v9002_v10, 5  ;;  %v9010_v63 = vrot.slane %v9008_v5, 5  ;;  %v10370_v51 = vld [vmem:[#allocation3 + $0x1c] sm:$0xf]  ;;  %v17413_v13 = vpop.f32.mrf.mxu0  ;;  %v6424_v1 = vld [vmem:[#allocation2 + $0x8] sm:$0xff] }
 0x304   : > { %14258 = vmatprep.mubr.msk.bf16.mxu1 %vm226_vm1, %v13214_v40  ;;  %v9014_v29 = vrot.slane %v9012_v6, 4  ;;  %v9020_v22 = vrot.slane %v9018_v62, 5  ;;  %v13245_v45 = vrot.slane %v9419_v2, 9  ;;  %v9569_v36 = vrot.slane %v9420_v11, 5  ;;  %v6426_v7 = vld [vmem:[#allocation2 + $0x18] sm:$0xff]  ;;  %v6429_v6 = vld [vmem:[#allocation2 + $0x30] sm:$0xff] }
 0x305   : > { %v9005_v43 = vor.u32 %v9004_v21, %v9001_v60  ;;  %v9572_v15 = vrot.slane %v9421_v55, 5  ;;  %v13246_v28 = vrot.slane %v9422_v59, 9  ;;  %v9576_v24 = vrot.slane %v9423_v25, 5  ;;  %v14507_v5 = vld [vmem:[#allocation3 + $0x18] sm:$0xff]   ;;  %v10372_v60 = vld [vmem:[#allocation3 + $0x24] sm:$0xf]  ;;  %v17425_v21 = vpop.f32.mrf.mxu1 }
 0x306   : > { %v9015_v41 = vor.u32 %v9014_v29, %v9010_v63  ;;  %v17391_v47 = vsel %vm14757_vm7, %v13245_v45, %v9569_v36  ;;  %v9571_v44 = vrot.slane %v9569_v36, 4  ;;  %v9579_v35 = vrot.slane %v9424_v9, 5  ;;  %v17434_v45 = vpop.f32.mrf.mxu0 }
 0x307   : > { %v9006_v46 = vrot.slane %v9005_v43, 4  ;;  %v17395_v49 = vsel %vm14757_vm7, %v13246_v28, %v9576_v24  ;;  %v9578_v57 = vrot.slane %v9576_v24, 4  ;;  %v6750_v37 = vadd.f32 %v17293_v56, %v6425_v0  ;;  %v10374_v28 = vld [vmem:[#allocation3 + $0x2c] sm:$0x1] }
 0x308   : > { %v9016_v58 = vrot.slane %v9015_v41, 4  ;;  %v9573_v20 = vsel %vm14757_vm7, %v9571_v44, %v9572_v15  ;;  %v17402_v31 = vsel %vm452_vm0, %v17172_v3, 0  ;;  %v13247_v50 = vrot.slane %v9425_v19, 9  ;;  %v10371_v3 = vld [vmem:[#allocation3 + $0x20] sm:$0x1] }
 0x309   : > { %14285 = vmatmul.mubr.msk.bf16.gmra.mxu0 %vm226_vm1, %v13260_v34  ;;  %v9011_v14 = vsel %vm14627_vm4, %v9006_v46, %v9010_v63  ;;  %v13262_v56 = vcombine.low %v17391_v47, %v9573_v20  ;;  %v9580_v48 = vsel %vm14757_vm7, %v9578_v57, %v9579_v35  ;;  %6782 = vst.msk [vmem:[#allocation2 + $0x10] sm:$0xff] %vm226_vm1, %v6750_v37  ;;  %v9583_v18 = vrot.slane %v9426_v16, 5  ;;  %v6427_v46 = vld [vmem:[#allocation2 + $0x20] sm:$0xff]  ;;  %v17442_v57 = vpop.f32.mrf.mxu1 }
 0x30a   : > { %14288 = vmatprep.mubr.msk.bf16.mxu0 %vm226_vm1, %v13261_v12  ;;  %v9021_v34 = vsel %vm14627_vm4, %v9016_v58, %v9020_v22  ;;  %v13263_v53 = vcombine.low %v17395_v49, %v9580_v48  ;;  %v9586_v2 = vrot.slane %v9427_v33, 5  ;;  %v6748_v11 = vadd.f32 %v17325_v17, %v6423_v26  ;;  %v10373_v22 = vld [vmem:[#allocation3 + $0x28] sm:$0xf]  ;;  %v10375_v49 = vld [vmem:[#allocation3 + $0x30] sm:$0xf]  ;;  %v7414_v58 = vpop.f32.mrf.mxu0 }
 0x30b   : > { %v13215_v10 = vcombine.low %v9011_v14, %v9021_v34  ;;  %v17422_v55 = vsel %vm14757_vm7, %v13247_v50, %v9583_v18  ;;  %v9585_v40 = vrot.slane %v9583_v18, 4  ;;  %v10418_v61 = vshrl.u32 %v10369_v38, 16  ;;  %v10376_v48 = vld [vmem:[#allocation3 + $0x34] sm:$0xf]  ;;  %v14508_v18 = vld [vmem:[#allocation3 + $0x24] sm:$0xff]  }
 0x30c   : > { %6780 = vst.msk [vmem:[#allocation2] sm:$0xff] %vm226_vm1, %v6748_v11  ;;  %v10421_v62 = vshll.u32 %v10369_v38, 16  ;;  %v10427_v59 = vshll.u32 %v10370_v51, 16  ;;  %v10431_v25 = vshrl.u32 %v10370_v51, 16  ;;  %v10437_v12 = vshll.u32 %v10371_v3, 16 }
 0x30d   : > { %14259 = vmatmul.mubr.msk.bf16.gmra.mxu1 %vm226_vm1, %v13215_v10  ;;  %v17430_v17 = vsel %vm14757_vm7, %v9585_v40, %v9586_v2  ;;  %v10420_v63 = vrot.slane %v10418_v61, 4  ;;  %v6751_v9 = vadd.f32 %v17335_v42, %v6426_v7  ;;  %v6749_v29 = vadd.f32 %v17347_v54, %v6424_v1  ;;  %v10377_v34 = vld [vmem:[#allocation3 + $0x38] sm:$0x1]  ;;  %v14509_v2 = vld [vmem:[#allocation3 + $0x30] sm:$0xff]   ;;  %v6653_v40 = vpop.f32.mrf.mxu1 }
 0x30e   : > { %14298 = vmatprep.mubr.msk.bf16.mxu1 %vm226_vm1, %v14507_v5  ;;  %v13264_v36 = vcombine.low %v17422_v55, %v17430_v17  ;;  %v10423_v0 = vrot.slane %v10421_v62, 5  ;;  %v10429_v43 = vrot.slane %v10427_v59, 5  ;;  %v10433_v15 = vrot.slane %v10431_v25, 4  ;;  %v6430_v5 = vld [vmem:[#allocation2 + $0x38] sm:$0xff]  ;;  %v6428_v59 = vld [vmem:[#allocation2 + $0x28] sm:$0xff]  ;;  %v14134_v25 = vpop.f32.mrf.mxu0 }
 0x30f   : > { %v10439_v24 = vrot.slane %v10437_v12, 5  ;;  %6783 = vst.msk [vmem:[#allocation2 + $0x18] sm:$0xff] %vm226_vm1, %v6751_v9  ;;  %6781 = vst.msk [vmem:[#allocation2 + $0x8] sm:$0xff] %vm226_vm1, %v6749_v29  ;;  %v6754_v42 = vadd.f32 %v17368_v32, %v6429_v6  ;;  %v10442_v54 = vshrl.u32 %v10372_v60, 16  ;;  %v10445_v19 = vshll.u32 %v10372_v60, 16 }
 0x310   : > { %v10424_v41 = vor.u32 %v10423_v0, %v10420_v63  ;;  %v10434_v47 = vor.u32 %v10433_v15, %v10429_v43  ;;  %v7246_v44 = vld [vmem:[#allocation2 + $0x10] sm:$0xff]  ;;  %v10451_v35 = vshll.u32 %v10373_v22, 16  ;;  %v10455_v16 = vshrl.u32 %v10373_v22, 16 }
 0x311   : > { %14289 = vmatmul.mubr.msk.bf16.gmra.mxu0 %vm226_vm1, %v13262_v56  ;;  %6786 = vst.msk [vmem:[#allocation2 + $0x30] sm:$0xff] %vm226_vm1, %v6754_v42  ;;  %v7540_v37 = vadd.f32 %v17387_v30, %v7246_v44  ;;  %v10444_v33 = vrot.slane %v10442_v54, 4  ;;  %v10447_v26 = vrot.slane %v10445_v19, 5  ;;  %v10461_v32 = vshll.u32 %v10374_v28, 16  ;;  %v10378_v42 = vld [vmem:[#allocation3 + $0x3c] sm:$0xf] }
 0x312   : > { %14292 = vmatprep.mubr.msk.bf16.mxu0 %vm226_vm1, %v13263_v53  ;;  %v10425_v20 = vrot.slane %v10424_v41, 4  ;;  %v10435_v50 = vrot.slane %v10434_v47, 4  ;;  %v10453_v38 = vrot.slane %v10451_v35, 5  ;;  %v10457_v14 = vrot.slane %v10455_v16, 4  ;;  %v10379_v44 = vld [vmem:[#allocation3 + $0x40] sm:$0xf]  ;;  %v17464_v35 = vpop.f32.mrf.mxu1 }
 0x313   : > { %7572 = vst.msk [vmem:[#allocation2 + $0x10] sm:$0xff] %vm226_vm1, %v7540_v37  ;;  %v10448_v51 = vor.u32 %v10447_v26, %v10444_v33  ;;  %v10463_v56 = vrot.slane %v10461_v32, 5  ;;  %v6752_v3 = vadd.f32 %v17385_v23, %v6427_v46  ;;  %v10466_v30 = vshrl.u32 %v10375_v49, 16  ;;  %v7244_v10 = vld [vmem:[#allocation2] sm:$0xff]  ;;  %v7427_v33 = vpop.f32.mrf.mxu0 }
 0x314   : > { %v10430_v11 = vsel %vm14627_vm4, %v10425_v20, %v10429_v43  ;;  %v10440_v53 = vsel %vm14627_vm4, %v10435_v50, %v10439_v24  ;;  %v10458_v7 = vor.u32 %v10457_v14, %v10453_v38  ;;  %v10469_v1 = vshll.u32 %v10375_v49, 16  ;;  %v6433_v24 = vld [vmem:[#allocation2 + $0x50] sm:$0xff]  ;;  %v10380_v49 = vld [vmem:[#allocation3 + $0x44] sm:$0x1]  ;;  %v14510_v26 = vld [vmem:[#allocation3 + $0x3c] sm:$0xff]  }
 0x315   : > { %14299 = vmatmul.mubr.msk.bf16.vlgmr.msra.gmra.mxu1 %vm226_vm1, %v14508_v18  ;;  %v13315_v61 = vcombine.low %v10430_v11, %v10440_v53  ;;  %v10449_v6 = vrot.slane %v10448_v51, 4  ;;  %6784 = vst.msk [vmem:[#allocation2 + $0x20] sm:$0xff] %vm226_vm1, %v6752_v3  ;;  %v10468_v23 = vrot.slane %v10466_v30, 4  ;;  %v10475_v62 = vshll.u32 %v10376_v48, 16  ;;  %v6431_v37 = vld [vmem:[#allocation2 + $0x40] sm:$0xff]  ;;  %v14135_v53 = vpop.f32.mrf.mxu0 }
 0x316   : > { %14365 = vmatpush3.bf16.msra.mxu1 %v17402_v31  ;;  %14302 = vmatprep.mubr.msk.bf16.mxu1 %vm226_vm1, %v14509_v2  ;;  %v10459_v12 = vrot.slane %v10458_v7, 4  ;;  %v10471_v60 = vrot.slane %v10469_v1, 5  ;;  %v10479_v63 = vshrl.u32 %v10376_v48, 16  ;;  %v10485_v9 = vshll.u32 %v10377_v34, 16  ;;  %v7247_v29 = vld [vmem:[#allocation2 + $0x18] sm:$0xff]  ;;  %v7245_v22 = vld [vmem:[#allocation2 + $0x8] sm:$0xff] }
 0x317   : > { %v10454_v0 = vsel %vm14627_vm4, %v10449_v6, %v10453_v38  ;;  %v10477_v43 = vrot.slane %v10475_v62, 5  ;;  %v7538_v15 = vadd.f32 %v17413_v13, %v7244_v10  ;;  %v6755_v28 = vadd.f32 %v17404_v4, %v6430_v5  ;;  %v10381_v50 = vld [vmem:[#allocation3 + $0x48] sm:$0xf]  ;;  %v10382_v51 = vld [vmem:[#allocation3 + $0x4c] sm:$0xf] }
 0x318   : > { %v10464_v31 = vsel %vm14627_vm4, %v10459_v12, %v10463_v56  ;;  %v10472_v54 = vor.u32 %v10471_v60, %v10468_v23  ;;  %v10481_v19 = vrot.slane %v10479_v63, 4  ;;  %v10487_v41 = vrot.slane %v10485_v9, 5  ;;  %v7250_v47 = vld [vmem:[#allocation2 + $0x30] sm:$0xff]  ;;  %v14511_v38 = vld [vmem:[#allocation3 + $0x48] sm:$0xff]   ;;  %v6656_v56 = vpop.f32.mrf.mxu1 }
 0x319   : > { %14293 = vmatmul.mubr.msk.bf16.gmra.mxu0 %vm226_vm1, %v13264_v36  ;;  %v13316_v13 = vcombine.low %v10454_v0, %v10464_v31  ;;  %7570 = vst.msk [vmem:[#allocation2] sm:$0xff] %vm226_vm1, %v7538_v15  ;;  %6787 = vst.msk [vmem:[#allocation2 + $0x38] sm:$0xff] %vm226_vm1, %v6755_v28  ;;  %v7541_v4 = vadd.f32 %v17434_v45, %v7247_v29  ;;  %v6753_v16 = vadd.f32 %v17425_v21, %v6428_v59  ;;  %v10383_v11 = vld [vmem:[#allocation3 + $0x50] sm:$0x1]  ;;  %v6434_v59 = vld [vmem:[#allocation2 + $0x58] sm:$0xff] }
 0x31a   : > { %v7539_v46 = vadd.f32 %v7414_v58, %v7245_v22  ;;  %14332 = vmatprep.mubr.msk.bf16.mxu0 %vm226_vm1, %v13315_v61  ;;  %v10473_v32 = vrot.slane %v10472_v54, 4  ;;  %v10482_v55 = vor.u32 %v10481_v19, %v10477_v43  ;;  %v6758_v17 = vadd.f32 %v17442_v57, %v6433_v24  ;;  %v6432_v29 = vld [vmem:[#allocation2 + $0x48] sm:$0xff]  ;;  %v7430_v24 = vpop.f32.mrf.mxu0 }
 0x31b   : > { %v7544_v36 = vadd.f32 %v14134_v25, %v7250_v47  ;;  %7573 = vst.msk [vmem:[#allocation2 + $0x18] sm:$0xff] %vm226_vm1, %v7541_v4  ;;  %6785 = vst.msk [vmem:[#allocation2 + $0x28] sm:$0xff] %vm226_vm1, %v6753_v16  ;;  %v10490_v45 = vshrl.u32 %v10378_v42, 16  ;;  %v10493_v21 = vshll.u32 %v10378_v42, 16  ;;  %v10499_v58 = vshll.u32 %v10379_v44, 16 }
 0x31c   : > { %7571 = vst.msk [vmem:[#allocation2 + $0x8] sm:$0xff] %vm226_vm1, %v7539_v46  ;;  %v10503_v20 = vshrl.u32 %v10379_v44, 16  ;;  %v10478_v14 = vsel %vm14627_vm4, %v10473_v32, %v10477_v43  ;;  %v10483_v48 = vrot.slane %v10482_v55, 4  ;;  %6790 = vst.msk [vmem:[#allocation2 + $0x50] sm:$0xff] %vm226_vm1, %v6758_v17  ;;  %v10509_v57 = vshll.u32 %v10380_v49, 16  ;;  %v6437_v44 = vld [vmem:[#allocation2 + $0x70] sm:$0xff] }
 0x31d   : > { %7576 = vst.msk [vmem:[#allocation2 + $0x30] sm:$0xff] %vm226_vm1, %v7544_v36  ;;  %v6756_v18 = vadd.f32 %v6653_v40, %v6431_v37  ;;  %14303 = vmatmul.mubr.msk.bf16.gmra.mxu1 %vm226_vm1, %v14510_v26  ;;  %v10492_v3 = vrot.slane %v10490_v45, 4  ;;  %v10495_v34 = vrot.slane %v10493_v21, 5  ;;  %v10501_v30 = vrot.slane %v10499_v58, 5  ;;  %v7248_v40 = vld [vmem:[#allocation2 + $0x20] sm:$0xff]  ;;  %v14108_v22 = vpop.f32.mrf.mxu1  ;;  %v14512_v46 = vld [vmem:[#allocation3 + $0x54] sm:$0xff]  }
 0x31e   : > { %v10505_v2 = vrot.slane %v10503_v20, 4  ;;  %14306 = vmatprep.mubr.msk.bf16.mxu1 %vm226_vm1, %v14511_v38  ;;  %v10488_v7 = vsel %vm14627_vm4, %v10483_v48, %v10487_v41  ;;  %v10511_v1 = vrot.slane %v10509_v57, 5  ;;  %v10514_v10 = vshrl.u32 %v10381_v50, 16  ;;  %v10384_v42 = vld [vmem:[#allocation3 + $0x54] sm:$0xf]  ;;  %v14513_v32 = vld [vmem:[#allocation3 + $0x60] sm:$0xff]  }
 0x31f   : > { %6788 = vst.msk [vmem:[#allocation2 + $0x40] sm:$0xff] %vm226_vm1, %v6756_v18  ;;  %v10517_v5 = vshll.u32 %v10381_v50, 16  ;;  %v13317_v61 = vcombine.low %v10478_v14, %v10488_v7  ;;  %v10496_v6 = vor.u32 %v10495_v34, %v10492_v3  ;;  %v10523_v62 = vshll.u32 %v10382_v51, 16  ;;  %v10385_v4 = vld [vmem:[#allocation3 + $0x58] sm:$0xf]  ;;  %v6669_v16 = vpop.f32.mrf.mxu1  ;;  %v6435_v48 = vld [vmem:[#allocation2 + $0x60] sm:$0xff] }
 0x320   : > { %v10506_v23 = vor.u32 %v10505_v2, %v10501_v30  ;;  %v10516_v25 = vrot.slane %v10514_v10, 4  ;;  %v10527_v60 = vshrl.u32 %v10382_v51, 16  ;;  %v10533_v63 = vshll.u32 %v10383_v11, 16  ;;  %v7251_v9 = vld [vmem:[#allocation2 + $0x38] sm:$0xff]  ;;  %v10387_v57 = vld [vmem:[#allocation3 + $0x60] sm:$0xf] }
 0x321   : > { %v10519_v12 = vrot.slane %v10517_v5, 5  ;;  %14333 = vmatmul.mubr.msk.bf16.vlgmr.msra.gmra.mxu0 %vm226_vm1, %v13316_v13  ;;  %v10497_v0 = vrot.slane %v10496_v6, 4  ;;  %v10525_v15 = vrot.slane %v10523_v62, 5  ;;  %v7542_v28 = vadd.f32 %v7427_v33, %v7248_v40  ;;  %v10386_v45 = vld [vmem:[#allocation3 + $0x5c] sm:$0x1]  ;;  %v14109_v21 = vpop.f32.mrf.mxu1 }
 0x322   : > { %v10507_v43 = vrot.slane %v10506_v23, 4  ;;  %14336 = vmatprep.mubr.msk.bf16.mxu0 %vm226_vm1, %v13317_v61  ;;  %v10529_v54 = vrot.slane %v10527_v60, 4  ;;  %v10535_v19 = vrot.slane %v10533_v63, 5  ;;  %v6759_v41 = vadd.f32 %v17464_v35, %v6434_v59  ;;  %v7249_v47 = vld [vmem:[#allocation2 + $0x28] sm:$0xff]  ;;  %v10388_v7 = vld [vmem:[#allocation3 + $0x64] sm:$0xf] }
 0x323   : > { %v10520_v31 = vor.u32 %v10519_v12, %v10516_v25  ;;  %v10502_v13 = vsel %vm14627_vm4, %v10497_v0, %v10501_v30  ;;  %7574 = vst.msk [vmem:[#allocation2 + $0x20] sm:$0xff] %vm226_vm1, %v7542_v28  ;;  %v7545_v37 = vadd.f32 %v14135_v53, %v7251_v9  ;;  %v6757_v33 = vadd.f32 %v6656_v56, %v6432_v29  ;;  %v7254_v26 = vld [vmem:[#allocation2 + $0x50] sm:$0xff]  ;;  %v6672_v34 = vpop.f32.mrf.mxu1  ;;  %v10389_v61 = vld [vmem:[#allocation3 + $0x68] sm:$0x1]  ;;  %v6438_v63 = vld [vmem:[#allocation2 + $0x78] sm:$0xff] }
 0x324   : > { %v10512_v49 = vsel %vm14627_vm4, %v10507_v43, %v10511_v1  ;;  %v10530_v35 = vor.u32 %v10529_v54, %v10525_v15  ;;  %6791 = vst.msk [vmem:[#allocation2 + $0x58] sm:$0xff] %vm226_vm1, %v6759_v41  ;;  %v7543_v36 = vadd.f32 %v7430_v24, %v7249_v47  ;;  %v6762_v58 = vadd.f32 %v14108_v22, %v6437_v44  ;;  %v14138_v20 = vpop.f32.mrf.mxu0  ;;  %v14514_v29 = vld [vmem:[#allocation3 + $0x6c] sm:$0xff]   ;;  %v14515_v22 = vld [vmem:[#allocation3 + $0x78] sm:$0xff]  }
 0x325   : > { %v13318_v55 = vcombine.low %v10502_v13, %v10512_v49  ;;  %v10521_v17 = vrot.slane %v10520_v31, 4  ;;  %14307 = vmatmul.mubr.msk.bf16.gmra.mxu1 %vm226_vm1, %v14512_v46  ;;  %7577 = vst.msk [vmem:[#allocation2 + $0x38] sm:$0xff] %vm226_vm1, %v7545_v37  ;;  %6789 = vst.msk [vmem:[#allocation2 + $0x48] sm:$0xff] %vm226_vm1, %v6757_v33  ;;  %v10538_v50 = vshrl.u32 %v10384_v42, 16  ;;  %v10541_v38 = vshll.u32 %v10384_v42, 16  ;;  %v6436_v47 = vld [vmem:[#allocation2 + $0x68] sm:$0xff] }
 0x326   : > { %v10547_v14 = vshll.u32 %v10385_v4, 16  ;;  %14310 = vmatprep.mubr.msk.bf16.mxu1 %vm226_vm1, %v14513_v32  ;;  %v10531_v51 = vrot.slane %v10530_v35, 4  ;;  %7575 = vst.msk [vmem:[#allocation2 + $0x28] sm:$0xff] %vm226_vm1, %v7543_v36  ;;  %v7548_v56 = vadd.f32 %v14138_v20, %v7254_v26  ;;  %v10551_v3 = vshrl.u32 %v10385_v4, 16  ;;  %6794 = vst.msk [vmem:[#allocation2 + $0x70] sm:$0xff] %vm226_vm1, %v6762_v58  ;;  %v7443_v1 = vpop.f32.mrf.mxu0  ;;  %v7252_v23 = vld [vmem:[#allocation2 + $0x40] sm:$0xff] }
 0x327   : > { %v10526_v18 = vsel %vm14627_vm4, %v10521_v17, %v10525_v15  ;;  %v10540_v30 = vrot.slane %v10538_v50, 4  ;;  %v10543_v2 = vrot.slane %v10541_v38, 5  ;;  %v10557_v53 = vshll.u32 %v10386_v45, 16  ;;  %v6441_v4 = vld [vmem:[#allocation2 + $0x90] sm:$0xff]  ;;  %v10390_v33 = vld [vmem:[#allocation3 + $0x6c] sm:$0xf] }
 0x328   : > { %v10549_v11 = vrot.slane %v10547_v14, 5  ;;  %v10536_v10 = vsel %vm14627_vm4, %v10531_v51, %v10535_v19  ;;  %7580 = vst.msk [vmem:[#allocation2 + $0x50] sm:$0xff] %vm226_vm1, %v7548_v56  ;;  %v10553_v5 = vrot.slane %v10551_v3, 4  ;;  %v6760_v40 = vadd.f32 %v6669_v16, %v6435_v48  ;;  %v14112_v62 = vpop.f32.mrf.mxu1  ;;  %v14139_v9 = vpop.f32.mrf.mxu0  ;;  %v10391_v36 = vld [vmem:[#allocation3 + $0x70] sm:$0xf]  ;;  %v6439_v56 = vld [vmem:[#allocation2 + $0x80] sm:$0xff] }
 0x329   : > { %v10562_v6 = vshrl.u32 %v10387_v57, 16  ;;  %14337 = vmatmul.mubr.msk.bf16.gmra.mxu0 %vm226_vm1, %v13318_v55  ;;  %v13319_v59 = vcombine.low %v10526_v18, %v10536_v10  ;;  %v10544_v25 = vor.u32 %v10543_v2, %v10540_v30  ;;  %v10559_v12 = vrot.slane %v10557_v53, 5  ;;  %v10392_v38 = vld [vmem:[#allocation3 + $0x74] sm:$0x1]  ;;  %v10393_v53 = vld [vmem:[#allocation3 + $0x78] sm:$0xf] }
 0x32a   : > { %v10565_v60 = vshll.u32 %v10387_v57, 16  ;;  %v10554_v0 = vor.u32 %v10553_v5, %v10549_v11  ;;  %6792 = vst.msk [vmem:[#allocation2 + $0x60] sm:$0xff] %vm226_vm1, %v6760_v40  ;;  %v10571_v15 = vshll.u32 %v10388_v7, 16  ;;  %v10575_v28 = vshrl.u32 %v10388_v7, 16  ;;  %v17510_v24 = vpop.f32.mrf.mxu1  ;;  %v7446_v44 = vpop.f32.mrf.mxu0  ;;  %v10394_v40 = vld [vmem:[#allocation3 + $0x7c] sm:$0xf] }
 0x32b   : > { %v10564_v43 = vrot.slane %v10562_v6, 4  ;;  %14340 = vmatprep.mubr.msk.bf16.mxu0 %vm226_vm1, %v13319_v59  ;;  %v10545_v42 = vrot.slane %v10544_v25, 4  ;;  %v10581_v54 = vshll.u32 %v10389_v61, 16  ;;  %v7546_v19 = vadd.f32 %v7443_v1, %v7252_v23  ;;  %v7255_v41 = vld [vmem:[#allocation2 + $0x58] sm:$0xff]  ;;  %v10395_v25 = vld [vmem:[#allocation3 + $0x80] sm:$0x1] }
 0x32c   : > { %v10567_v31 = vrot.slane %v10565_v60, 5  ;;  %v10555_v16 = vrot.slane %v10554_v0, 4  ;;  %v10573_v46 = vrot.slane %v10571_v15, 5  ;;  %v10577_v13 = vrot.slane %v10575_v28, 4  ;;  %v7253_v37 = vld [vmem:[#allocation2 + $0x48] sm:$0xff]  ;;  %v17513_v26 = vpop.f32.mrf.mxu1  ;;  %v14517_v15 = vld [vmem:[#allocation3 + $0x90] sm:$0xff]  }
 0x32d   : > { %v6763_v49 = vadd.f32 %v14109_v21, %v6438_v63  ;;  %14311 = vmatmul.mubr.msk.bf16.gmra.mxu1 %vm226_vm1, %v14514_v29  ;;  %v10550_v32 = vsel %vm14627_vm4, %v10545_v42, %v10549_v11  ;;  %v10583_v17 = vrot.slane %v10581_v54, 5  ;;  %7578 = vst.msk [vmem:[#allocation2 + $0x40] sm:$0xff] %vm226_vm1, %v7546_v19  ;;  %v7549_v35 = vadd.f32 %v14139_v9, %v7255_v41  ;;  %v7258_v50 = vld [vmem:[#allocation2 + $0x70] sm:$0xff]  ;;  %v14516_v9 = vld [vmem:[#allocation3 + $0x84] sm:$0xff]   ;;  %v6442_v19 = vld [vmem:[#allocation2 + $0x98] sm:$0xff] }
 0x32e   : > { %v10568_v55 = vor.u32 %v10567_v31, %v10564_v43  ;;  %14314 = vmatprep.mubr.msk.bf16.mxu1 %vm226_vm1, %v14515_v22  ;;  %v10560_v45 = vsel %vm14627_vm4, %v10555_v16, %v10559_v12  ;;  %v10578_v21 = vor.u32 %v10577_v13, %v10573_v46  ;;  %v6761_v58 = vadd.f32 %v6672_v34, %v6436_v47  ;;  %v17523_v14 = vpop.f32.mrf.mxu1  ;;  %v6445_v13 = vld [vmem:[#allocation2 + $0xb0] sm:$0xff] }
 0x32f   : > { %6795 = vst.msk [vmem:[#allocation2 + $0x78] sm:$0xff] %vm226_vm1, %v6763_v49  ;;  %v7547_v20 = vadd.f32 %v7446_v44, %v7253_v37  ;;  %v13320_v48 = vcombine.low %v10550_v32, %v10560_v45  ;;  %7581 = vst.msk [vmem:[#allocation2 + $0x58] sm:$0xff] %vm226_vm1, %v7549_v35  ;;  %v6766_v18 = vadd.f32 %v14112_v62, %v6441_v4  ;;  %v10586_v51 = vshrl.u32 %v10390_v33, 16  ;;  %v10396_v35 = vld [vmem:[#allocation3 + $0x84] sm:$0xf] }
 0x330   : > { %v10569_v57 = vrot.slane %v10568_v55, 4  ;;  %v10579_v3 = vrot.slane %v10578_v21, 4  ;;  %6793 = vst.msk [vmem:[#allocation2 + $0x68] sm:$0xff] %vm226_vm1, %v6761_v58  ;;  %v14142_v30 = vpop.f32.mrf.mxu0  ;;  %v10589_v2 = vshll.u32 %v10390_v33, 16  ;;  %v10595_v34 = vshll.u32 %v10391_v36, 16 }
 0x331   : > { %7579 = vst.msk [vmem:[#allocation2 + $0x48] sm:$0xff] %vm226_vm1, %v7547_v20  ;;  %v10599_v11 = vshrl.u32 %v10391_v36, 16  ;;  %14341 = vmatmul.mubr.msk.bf16.gmra.mxu0 %vm226_vm1, %v13320_v48  ;;  %6798 = vst.msk [vmem:[#allocation2 + $0x90] sm:$0xff] %vm226_vm1, %v6766_v18  ;;  %v7552_v1 = vadd.f32 %v14142_v30, %v7258_v50  ;;  %v10588_v10 = vrot.slane %v10586_v51, 4  ;;  %v10605_v5 = vshll.u32 %v10392_v38, 16  ;;  %v14116_v61 = vpop.f32.mrf.mxu1  ;;  %v7256_v12 = vld [vmem:[#allocation2 + $0x60] sm:$0xff] }
 0x332   : > { %v10574_v7 = vsel %vm14627_vm4, %v10569_v57, %v10573_v46  ;;  %v10584_v6 = vsel %vm14627_vm4, %v10579_v3, %v10583_v17  ;;  %v10591_v23 = vrot.slane %v10589_v2, 5  ;;  %v10597_v62 = vrot.slane %v10595_v34, 5  ;;  %v7459_v60 = vpop.f32.mrf.mxu0  ;;  %v6440_v46 = vld [vmem:[#allocation2 + $0x88] sm:$0xff]  ;;  %v6443_v3 = vld [vmem:[#allocation2 + $0xa0] sm:$0xff] }
 0x333   : > { %v10601_v59 = vrot.slane %v10599_v11, 4  ;;  %v13321_v63 = vcombine.low %v10574_v7, %v10584_v6  ;;  %7584 = vst.msk [vmem:[#allocation2 + $0x70] sm:$0xff] %vm226_vm1, %v7552_v1  ;;  %v10607_v29 = vrot.slane %v10605_v5, 5  ;;  %v6764_v22 = vadd.f32 %v17510_v24, %v6439_v56  ;;  %v6701_v43 = vpop.f32.mrf.mxu1  ;;  %v10397_v50 = vld [vmem:[#allocation3 + $0x88] sm:$0xf]  ;;  %v14518_v1 = vld [vmem:[#allocation3 + $0x9c] sm:$0xff]  }
 0x334   : > { %v10610_v0 = vshrl.u32 %v10393_v53, 16  ;;  %v10592_v28 = vor.u32 %v10591_v23, %v10588_v10  ;;  %v10613_v31 = vshll.u32 %v10393_v53, 16  ;;  %v10619_v54 = vshll.u32 %v10394_v40, 16  ;;  %v14143_v41 = vpop.f32.mrf.mxu0  ;;  %v10398_v56 = vld [vmem:[#allocation3 + $0x8c] sm:$0x1] }
 0x335   : > { %v10602_v42 = vor.u32 %v10601_v59, %v10597_v62  ;;  %14344 = vmatprep.mubr.msk.bf16.mxu0 %vm226_vm1, %v13321_v63  ;;  %14315 = vmatmul.mubr.msk.bf16.gmra.mxu1 %vm226_vm1, %v14516_v9  ;;  %6796 = vst.msk [vmem:[#allocation2 + $0x80] sm:$0xff] %vm226_vm1, %v6764_v22  ;;  %v10623_v44 = vshrl.u32 %v10394_v40, 16  ;;  %v10629_v4 = vshll.u32 %v10395_v25, 16  ;;  %v7550_v16 = vadd.f32 %v7459_v60, %v7256_v12  ;;  %v17539_v49 = vpop.f32.mrf.mxu1  ;;  %v14519_v23 = vld [vmem:[#allocation3 + $0xa8] sm:$0xff]   ;;  %v10399_v25 = vld [vmem:[#allocation3 + $0x90] sm:$0xf] }
 0x336   : > { %v10612_v47 = vrot.slane %v10610_v0, 4  ;;  %v7259_v24 = vld [vmem:[#allocation2 + $0x78] sm:$0xff]  ;;  %14318 = vmatprep.mubr.msk.bf16.mxu1 %vm226_vm1, %v14517_v15  ;;  %v10593_v37 = vrot.slane %v10592_v28, 4  ;;  %v10615_v32 = vrot.slane %v10613_v31, 5  ;;  %v10621_v55 = vrot.slane %v10619_v54, 5  ;;  %v7462_v17 = vpop.f32.mrf.mxu0 }
 0x337   : > { %v10603_v33 = vrot.slane %v10602_v42, 4  ;;  %v10625_v36 = vrot.slane %v10623_v44, 4  ;;  %v10631_v45 = vrot.slane %v10629_v4, 5  ;;  %7582 = vst.msk [vmem:[#allocation2 + $0x60] sm:$0xff] %vm226_vm1, %v7550_v16  ;;  %v6767_v21 = vadd.f32 %v17513_v26, %v6442_v19  ;;  %v7257_v20 = vld [vmem:[#allocation2 + $0x68] sm:$0xff]  ;;  %v17544_v38 = vpop.f32.mrf.mxu1 }
 0x338   : > { %v7553_v58 = vadd.f32 %v14143_v41, %v7259_v24  ;;  %v10598_v48 = vsel %vm14627_vm4, %v10593_v37, %v10597_v62  ;;  %v10616_v18 = vor.u32 %v10615_v32, %v10612_v47  ;;  %v6765_v51 = vadd.f32 %v17523_v14, %v6440_v46  ;;  %v7262_v11 = vld [vmem:[#allocation2 + $0x90] sm:$0xff]  ;;  %v10401_v0 = vld [vmem:[#allocation3 + $0x98] sm:$0x1] }
 0x339   : > { %v10608_v57 = vsel %vm14627_vm4, %v10603_v33, %v10607_v29  ;;  %v10626_v2 = vor.u32 %v10625_v36, %v10621_v55  ;;  %6799 = vst.msk [vmem:[#allocation2 + $0x98] sm:$0xff] %vm226_vm1, %v6767_v21  ;;  %v7551_v26 = vadd.f32 %v7462_v17, %v7257_v20  ;;  %v6770_v34 = vadd.f32 %v14116_v61, %v6445_v13  ;;  %v17553_v53 = vpop.f32.mrf.mxu1  ;;  %v10400_v22 = vld [vmem:[#allocation3 + $0x94] sm:$0xf]  ;;  %v6446_v13 = vld [vmem:[#allocation2 + $0xb8] sm:$0xff] }
 0x33a   : > { %v13322_v30 = vcombine.low %v10598_v48, %v10608_v57  ;;  %7585 = vst.msk [vmem:[#allocation2 + $0x78] sm:$0xff] %vm226_vm1, %v7553_v58  ;;  %v10617_v7 = vrot.slane %v10616_v18, 4  ;;  %6797 = vst.msk [vmem:[#allocation2 + $0x88] sm:$0xff] %vm226_vm1, %v6765_v51  ;;  %v10634_v10 = vshrl.u32 %v10396_v35, 16  ;;  %v10637_v5 = vshll.u32 %v10396_v35, 16  ;;  %v6449_v18 = vld [vmem:[#allocation2 + $0xd0] sm:$0xff] }
 0x33b   : > { %v10643_v14 = vshll.u32 %v10397_v50, 16  ;;  %v10627_v40 = vrot.slane %v10626_v2, 4  ;;  %7583 = vst.msk [vmem:[#allocation2 + $0x68] sm:$0xff] %vm226_vm1, %v7551_v26  ;;  %6802 = vst.msk [vmem:[#allocation2 + $0xb0] sm:$0xff] %vm226_vm1, %v6770_v34  ;;  %v14146_v6 = vpop.f32.mrf.mxu0  ;;  %v10647_v61 = vshrl.u32 %v10397_v50, 16  ;;  %v10653_v62 = vshll.u32 %v10398_v56, 16  ;;  %v17559_v12 = vpop.f32.mrf.mxu1 }
 0x33c   : > { %14345 = vmatmul.mubr.msk.bf16.gmra.mxu0 %vm226_vm1, %v13322_v30  ;;  %v6768_v59 = vadd.f32 %v6701_v43, %v6443_v3  ;;  %v10622_v60 = vsel %vm14627_vm4, %v10617_v7, %v10621_v55  ;;  %v7556_v63 = vadd.f32 %v14146_v6, %v7262_v11  ;;  %v10636_v9 = vrot.slane %v10634_v10, 4  ;;  %v7260_v43 = vld [vmem:[#allocation2 + $0x80] sm:$0xff]  ;;  %v10402_v26 = vld [vmem:[#allocation3 + $0x9c] sm:$0xf] }
 0x33d   : > { %v10639_v29 = vrot.slane %v10637_v5, 5  ;;  %v10632_v15 = vsel %vm14627_vm4, %v10627_v40, %v10631_v45  ;;  %14319 = vmatmul.mubr.msk.bf16.gmra.mxu1 %vm226_vm1, %v14518_v1  ;;  %v10645_v28 = vrot.slane %v10643_v14, 5  ;;  %v10649_v42 = vrot.slane %v10647_v61, 4  ;;  %v7475_v54 = vpop.f32.mrf.mxu0  ;;  %v17569_v33 = vpop.f32.mrf.mxu1  ;;  %v6444_v45 = vld [vmem:[#allocation2 + $0xa8] sm:$0xff]  ;;  %v10403_v34 = vld [vmem:[#allocation3 + $0xa0] sm:$0xf] }
 0x33e   : > { %v10655_v31 = vrot.slane %v10653_v62, 5  ;;  %6800 = vst.msk [vmem:[#allocation2 + $0xa0] sm:$0xff] %vm226_vm1, %v6768_v59  ;;  %v13323_v19 = vcombine.low %v10622_v60, %v10632_v15  ;;  %7588 = vst.msk [vmem:[#allocation2 + $0x90] sm:$0xff] %vm226_vm1, %v7556_v63  ;;  %14322 = vmatprep.mubr.msk.bf16.mxu1 %vm226_vm1, %v14519_v23  ;;  %v10658_v47 = vshrl.u32 %v10399_v25, 16  ;;  %v10661_v44 = vshll.u32 %v10399_v25, 16  ;;  %v14520_v5 = vld [vmem:[#allocation3 + $0xb4] sm:$0xff]  }
 0x33f   : > { %v10640_v41 = vor.u32 %v10639_v29, %v10636_v9  ;;  %v10650_v4 = vor.u32 %v10649_v42, %v10645_v28  ;;  %v10667_v16 = vshll.u32 %v10400_v22, 16  ;;  %v10671_v24 = vshrl.u32 %v10400_v22, 16  ;;  %v14147_v37 = vpop.f32.mrf.mxu0  ;;  %v10404_v40 = vld [vmem:[#allocation3 + $0xa4] sm:$0x1]  ;;  %v17579_v23 = vpop.f32.mrf.mxu1  ;;  %v10405_v29 = vld [vmem:[#allocation3 + $0xa8] sm:$0xf] }
 0x340   : > { %v10677_v46 = vshll.u32 %v10401_v0, 16  ;;  %14348 = vmatprep.mubr.msk.bf16.mxu0 %vm226_vm1, %v13323_v19  ;;  %v10660_v55 = vrot.slane %v10658_v47, 4  ;;  %v10663_v17 = vrot.slane %v10661_v44, 5  ;;  %v7554_v35 = vadd.f32 %v7475_v54, %v7260_v43  ;;  %v7263_v36 = vld [vmem:[#allocation2 + $0x98] sm:$0xff]  ;;  %v6447_v6 = vld [vmem:[#allocation2 + $0xc0] sm:$0xff] }
 0x341   : > { %v10641_v32 = vrot.slane %v10640_v41, 4  ;;  %v10651_v21 = vrot.slane %v10650_v4, 4  ;;  %v10669_v58 = vrot.slane %v10667_v16, 5  ;;  %v10673_v20 = vrot.slane %v10671_v24, 4  ;;  %v7261_v48 = vld [vmem:[#allocation2 + $0x88] sm:$0xff]  ;;  %v7478_v57 = vpop.f32.mrf.mxu0  ;;  %v14521_v25 = vld [vmem:[#allocation3 + $0xc0] sm:$0xff]  }
 0x342   : > { %v10679_v50 = vrot.slane %v10677_v46, 5  ;;  %v10664_v56 = vor.u32 %v10663_v17, %v10660_v55  ;;  %7586 = vst.msk [vmem:[#allocation2 + $0x80] sm:$0xff] %vm226_vm1, %v7554_v35  ;;  %v6771_v3 = vadd.f32 %v17539_v49, %v6446_v13  ;;  %v7557_v30 = vadd.f32 %v14147_v37, %v7263_v36  ;;  %v7266_v2 = vld [vmem:[#allocation2 + $0xb0] sm:$0xff]  ;;  %v10406_v42 = vld [vmem:[#allocation3 + $0xac] sm:$0xf]  ;;  %v6450_v17 = vld [vmem:[#allocation2 + $0xd8] sm:$0xff] }
 0x343   : > { %v10646_v51 = vsel %vm14627_vm4, %v10641_v32, %v10645_v28  ;;  %v10656_v11 = vsel %vm14627_vm4, %v10651_v21, %v10655_v31  ;;  %v10674_v7 = vor.u32 %v10673_v20, %v10669_v58  ;;  %v6769_v1 = vadd.f32 %v17544_v38, %v6444_v45  ;;  %v14150_v14 = vpop.f32.mrf.mxu0  ;;  %v10407_v41 = vld [vmem:[#allocation3 + $0xb0] sm:$0x1] }
 0x344   : > { %v7555_v10 = vadd.f32 %v7478_v57, %v7261_v48  ;;  %v13324_v61 = vcombine.low %v10646_v51, %v10656_v11  ;;  %v10665_v62 = vrot.slane %v10664_v56, 4  ;;  %6803 = vst.msk [vmem:[#allocation2 + $0xb8] sm:$0xff] %vm226_vm1, %v6771_v3  ;;  %7589 = vst.msk [vmem:[#allocation2 + $0x98] sm:$0xff] %vm226_vm1, %v7557_v30  ;;  %v6774_v49 = vadd.f32 %v17553_v53, %v6449_v18  ;;  %v5767_v48 = vld [vmem:[#allocation3 + $0xcc] sm:$0x1]  ;;  %v6453_v30 = vld [vmem:[#allocation2 + $0xf0] sm:$0xff] }
 0x345   : > { %v7560_v59 = vadd.f32 %v14150_v14, %v7266_v2  ;;  %v10675_v60 = vrot.slane %v10674_v7, 4  ;;  %6801 = vst.msk [vmem:[#allocation2 + $0xa8] sm:$0xff] %vm226_vm1, %v6769_v1  ;;  %14323 = vmatmul.mubr.msk.bf16.gmra.mxu1 %vm226_vm1, %v14520_v5  ;;  %v10682_v38 = vshrl.u32 %v10402_v26, 16  ;;  %v10685_v63 = vshll.u32 %v10402_v26, 16  ;;  %v7491_v22 = vpop.f32.mrf.mxu0  ;;  %v7264_v47 = vld [vmem:[#allocation2 + $0xa0] sm:$0xff] }
 0x346   : > { %7587 = vst.msk [vmem:[#allocation2 + $0x88] sm:$0xff] %vm226_vm1, %v7555_v10  ;;  %v10691_v9 = vshll.u32 %v10403_v34, 16  ;;  %14349 = vmatmul.mubr.msk.bf16.gmra.mxu0 %vm226_vm1, %v13324_v61  ;;  %v10670_v0 = vsel %vm14627_vm4, %v10665_v62, %v10669_v58  ;;  %6806 = vst.msk [vmem:[#allocation2 + $0xd0] sm:$0xff] %vm226_vm1, %v6774_v49  ;;  %14326 = vmatprep.mubr.msk.bf16.mxu1 %vm226_vm1, %v14521_v25  ;;  %v10695_v53 = vshrl.u32 %v10403_v34, 16  ;;  %v10701_v15 = vshll.u32 %v10404_v40, 16  ;;  %v14124_v4 = vpop.f32.mrf.mxu1 }
 0x347   : > { %7592 = vst.msk [vmem:[#allocation2 + $0xb0] sm:$0xff] %vm226_vm1, %v7560_v59  ;;  %v6772_v28 = vadd.f32 %v17559_v12, %v6447_v6  ;;  %v10680_v31 = vsel %vm14627_vm4, %v10675_v60, %v10679_v50  ;;  %v10684_v43 = vrot.slane %v10682_v38, 4  ;;  %v10687_v54 = vrot.slane %v10685_v63, 5  ;;  %v14151_v44 = vpop.f32.mrf.mxu0  ;;  %v6448_v50 = vld [vmem:[#allocation2 + $0xc8] sm:$0xff]  ;;  %v10408_v62 = vld [vmem:[#allocation3 + $0xb4] sm:$0xf] }
 0x348   : > { %v10693_v19 = vrot.slane %v10691_v9, 5  ;;  %v13325_v16 = vcombine.low %v10670_v0, %v10680_v31  ;;  %v10697_v24 = vrot.slane %v10695_v53, 4  ;;  %v10703_v46 = vrot.slane %v10701_v15, 5  ;;  %v17597_v36 = vpop.f32.mrf.mxu1  ;;  %v10409_v49 = vld [vmem:[#allocation3 + $0xb8] sm:$0xf] }
 0x349   : > { %6804 = vst.msk [vmem:[#allocation2 + $0xc0] sm:$0xff] %vm226_vm1, %v6772_v28  ;;  %v10706_v13 = vshrl.u32 %v10405_v29, 16  ;;  %v10688_v37 = vor.u32 %v10687_v54, %v10684_v43  ;;  %v10709_v32 = vshll.u32 %v10405_v29, 16  ;;  %v10715_v12 = vshll.u32 %v10406_v42, 16  ;;  %v7494_v35 = vpop.f32.mrf.mxu0  ;;  %v10410_v63 = vld [vmem:[#allocation3 + $0xbc] sm:$0x1] }
 0x34a   : > { %v10719_v55 = vshrl.u32 %v10406_v42, 16  ;;  %14352 = vmatprep.mubr.msk.bf16.mxu0 %vm226_vm1, %v13325_v16  ;;  %v10698_v45 = vor.u32 %v10697_v24, %v10693_v19  ;;  %v10725_v58 = vshll.u32 %v10407_v41, 16  ;;  %v7558_v20 = vadd.f32 %v7491_v22, %v7264_v47  ;;  %v17600_v2 = vpop.f32.mrf.mxu1  ;;  %v11159_v9 = vld [vmem:[#allocation3 + $0x18] sm:$0xe]  ;;  %v11160_v15 = vld [vmem:[#allocation3 + $0x1c] sm:$0xf] }
 0x34b   : > { %v10708_v21 = vrot.slane %v10706_v13, 4  ;;  %v10689_v57 = vrot.slane %v10688_v37, 4  ;;  %v10711_v18 = vrot.slane %v10709_v32, 5  ;;  %v10717_v51 = vrot.slane %v10715_v12, 5  ;;  %v7267_v3 = vld [vmem:[#allocation2 + $0xb8] sm:$0xff] }
 0x34c   : > { %v10721_v56 = vrot.slane %v10719_v55, 4  ;;  %v10699_v26 = vrot.slane %v10698_v45, 4  ;;  %v10727_v34 = vrot.slane %v10725_v58, 5  ;;  %7590 = vst.msk [vmem:[#allocation2 + $0xa0] sm:$0xff] %vm226_vm1, %v7558_v20  ;;  %v6775_v11 = vadd.f32 %v17569_v33, %v6450_v17  ;;  %v7265_v1 = vld [vmem:[#allocation2 + $0xa8] sm:$0xff]  ;;  %v14154_v10 = vpop.f32.mrf.mxu0  ;;  %v17607_v59 = vpop.f32.mrf.mxu1 }
 0x34d   : > { %v7561_v7 = vadd.f32 %v14151_v44, %v7267_v3  ;;  %v10694_v5 = vsel %vm14627_vm4, %v10689_v57, %v10693_v19  ;;  %v10712_v14 = vor.u32 %v10711_v18, %v10708_v21  ;;  %v6773_v6 = vadd.f32 %v17579_v23, %v6448_v50  ;;  %v7270_v61 = vld [vmem:[#allocation2 + $0xd0] sm:$0xff]  ;;  %v11161_v43 = vld [vmem:[#allocation3 + $0x20] sm:$0x1]  ;;  %v10412_v12 = vld [vmem:[#allocation3 + $0xc4] sm:$0xf] }
 0x34e   : > { %v10722_v40 = vor.u32 %v10721_v56, %v10717_v51  ;;  %v10704_v25 = vsel %vm14627_vm4, %v10699_v26, %v10703_v46  ;;  %6807 = vst.msk [vmem:[#allocation2 + $0xd8] sm:$0xff] %vm226_vm1, %v6775_v11  ;;  %v7559_v33 = vadd.f32 %v7494_v35, %v7265_v1  ;;  %v6778_v60 = vadd.f32 %v14124_v4, %v6453_v30  ;;  %v7507_v23 = vpop.f32.mrf.mxu0  ;;  %v6451_v44 = vld [vmem:[#allocation2 + $0xe0] sm:$0xff]  ;;  %v10413_v3 = vld [vmem:[#allocation3 + $0xc8] sm:$0x1]  ;;  %v6454_v26 = vld [vmem:[#allocation2 + $0xf8] sm:$0xff] }
 0x34f   : > { %7593 = vst.msk [vmem:[#allocation2 + $0xb8] sm:$0xff] %vm226_vm1, %v7561_v7  ;;  %v5768_v38 = vsel %vm16168_vm10, 0, %v5767_v48  ;;  %v13326_v29 = vcombine.low %v10694_v5, %v10704_v25  ;;  %v10713_v22 = vrot.slane %v10712_v14, 4  ;;  %6805 = vst.msk [vmem:[#allocation2 + $0xc8] sm:$0xff] %vm226_vm1, %v6773_v6  ;;  %v7564_v53 = vadd.f32 %v14154_v10, %v7270_v61  ;;  %v10411_v4 = vld [vmem:[#allocation3 + $0xc0] sm:$0xf] }
 0x350   : > { %v10723_v0 = vrot.slane %v10722_v40, 4  ;;  %5769 = vst [vmem:[#allocation3 + $0xcc] sm:$0x1] %v5768_v38  ;;  %7591 = vst.msk [vmem:[#allocation2 + $0xa8] sm:$0xff] %vm226_vm1, %v7559_v33  ;;  %v10730_v28 = vshrl.u32 %v10408_v62, 16  ;;  %v10733_v42 = vshll.u32 %v10408_v62, 16  ;;  %v14155_v16 = vpop.f32.mrf.mxu0  ;;  %v6776_v50 = vadd.f32 %v17597_v36, %v6451_v44 }
 0x351   : > { %6810 = vst.msk [vmem:[#allocation2 + $0xf0] sm:$0xff] %vm226_vm1, %v6778_v60  ;;  %v10739_v31 = vshll.u32 %v10409_v49, 16  ;;  %v10743_v8 = vshrl.u32 %v10409_v49, 16  ;;  %14353 = vmatmul.mubr.msk.bf16.gmra.mxu0 %vm226_vm1, %v13326_v29  ;;  %v10718_v54 = vsel %vm14627_vm4, %v10713_v22, %v10717_v51  ;;  %7596 = vst.msk [vmem:[#allocation2 + $0xd0] sm:$0xff] %vm226_vm1, %v7564_v53  ;;  %v10749_v41 = vshll.u32 %v10410_v63, 16  ;;  %v17624_v24 = vpop.f32.mrf.mxu1  ;;  %v7268_v21 = vld [vmem:[#allocation2 + $0xc0] sm:$0xff] }
 0x352   : > { %v10728_v19 = vsel %vm14627_vm4, %v10723_v0, %v10727_v34  ;;  %v13347_v47 = vrot.slane %v11159_v9, 9  ;;  %v10732_v13 = vrot.slane %v10730_v28, 4  ;;  %v10735_v37 = vrot.slane %v10733_v42, 5  ;;  %v7510_v11 = vpop.f32.mrf.mxu0  ;;  %6808 = vst.msk [vmem:[#allocation2 + $0xe0] sm:$0xff] %vm226_vm1, %v6776_v50  ;;  %v6452_v49 = vld [vmem:[#allocation2 + $0xe8] sm:$0xff] }
 0x353   : > { %v13327_v46 = vcombine.low %v10718_v54, %v10728_v19  ;;  %v10741_v32 = vrot.slane %v10739_v31, 5  ;;  %v10745_v55 = vrot.slane %v10743_v8, 4  ;;  %v10751_v17 = vrot.slane %v10749_v41, 5  ;;  %v17626_v58 = vpop.f32.mrf.mxu1  ;;  %v11162_v25 = vld [vmem:[#allocation3 + $0x24] sm:$0xe] }
 0x354   : > { %v11257_v35 = vrot.slane %v11160_v15, 5  ;;  %v11260_v45 = vrot.slane %v11161_v43, 5  ;;  %v10736_v20 = vor.u32 %v10735_v37, %v10732_v13  ;;  %v10754_v48 = vshrl.u32 %v10411_v4, 16  ;;  %v11163_v29 = vld [vmem:[#allocation3 + $0x28] sm:$0xf] }
 0x355   : > { %14356 = vmatprep.mubr.msk.bf16.mxu0 %vm226_vm1, %v13327_v46  ;;  %v10757_v57 = vshll.u32 %v10411_v4, 16  ;;  %v10746_v18 = vor.u32 %v10745_v55, %v10741_v32  ;;  %v10763_v30 = vshll.u32 %v10412_v12, 16  ;;  %v7271_v34 = vld [vmem:[#allocation2 + $0xd8] sm:$0xff]  ;;  %v17632_v7 = vpop.f32.mrf.mxu1  ;;  %v7562_v14 = vadd.f32 %v7507_v23, %v7268_v21  ;;  %v11164_v22 = vld [vmem:[#allocation3 + $0x2c] sm:$0x1]  ;;  %v7812_v4 = vld [vmem:[#allocation2 + $0x10] sm:$0xff] }
 0x356   : > { %v11258_v51 = vsel %vm14757_vm7, %v13347_v47, %v11257_v35  ;;  %v11259_v56 = vrot.slane %v11257_v35, 4  ;;  %v10737_v10 = vrot.slane %v10736_v20, 4  ;;  %v10756_v5 = vrot.slane %v10754_v48, 4  ;;  %v7269_v23 = vld [vmem:[#allocation2 + $0xc8] sm:$0xff]  ;;  %v11165_v8 = vld [vmem:[#allocation3 + $0x30] sm:$0xe] }
 0x357   : > { %v14522_v1 = vld [vmem:[#allocation3 + $0xcc] sm:$0xff]   ;;  %v10759_v36 = vrot.slane %v10757_v57, 5  ;;  %v10747_v40 = vrot.slane %v10746_v18, 4  ;;  %v17637_v61 = vrot.slane %v10763_v30, 5  ;;  %v10767_v62 = vshrl.u32 %v10412_v12, 16  ;;  %v17639_v33 = vpop.f32.mrf.mxu1  ;;  %7594 = vst.msk [vmem:[#allocation2 + $0xc0] sm:$0xff] %vm226_vm1, %v7562_v14 }
 0x358   : > { %v11261_v6 = vsel %vm14757_vm7, %v11259_v56, %v11260_v45  ;;  %14327 = vmatmul.mubr.msk.bf16.gmra.mxu1 %vm226_vm1, %v14522_v1  ;;  %v10742_v60 = vsel %vm14627_vm4, %v10737_v10, %v10741_v32  ;;  %v10773_v9 = vshll.u32 %v10413_v3, 16  ;;  %v6779_v15 = vadd.f32 %v17600_v2, %v6454_v26  ;;  %v7274_v42 = vld [vmem:[#allocation2 + $0xf0] sm:$0xff]  ;;  %v11167_v46 = vld [vmem:[#allocation3 + $0x38] sm:$0x1]  ;;  %v10414_v21 = vld [vmem:[#allocation3 + $0xcc] sm:$0xf] }
 0x359   : > { %v13364_v38 = vcombine.low %v11258_v51, %v11261_v6  ;;  %v10760_v63 = vor.u32 %v10759_v36, %v10756_v5  ;;  %v10752_v0 = vsel %vm14627_vm4, %v10747_v40, %v10751_v17  ;;  %v10769_v53 = vrot.slane %v10767_v62, 4  ;;  %v14158_v31 = vpop.f32.mrf.mxu0  ;;  %v11166_v43 = vld [vmem:[#allocation3 + $0x34] sm:$0xf]  ;;  %v17648_v54 = vpop.f32.mrf.mxu1  ;;  %v10415_v20 = vld [vmem:[#allocation3 + $0xd0] sm:$0xf]  ;;  %v7810_v18 = vld [vmem:[#allocation2] sm:$0xff] }
 0x35a   : > { %v7565_v28 = vadd.f32 %v14155_v16, %v7271_v34  ;;  %v13328_v19 = vcombine.low %v10742_v60, %v10752_v0  ;;  %v10775_v47 = vrot.slane %v10773_v9, 5  ;;  %v6777_v44 = vadd.f32 %v17607_v59, %v6452_v49  ;;  %6811 = vst.msk [vmem:[#allocation2 + $0xf8] sm:$0xff] %vm226_vm1, %v6779_v15  ;;  %v5823_v32 = vld [vmem:[#allocation3 + $0xd4] sm:$0x1]  ;;  %v7272_v36 = vld [vmem:[#allocation2 + $0xe0] sm:$0xff] }
 0x35b   : > { %14366 = vmatprep.mubr.msk.bf16.mxu1 %vm226_vm1, %v13364_v38  ;;  %v10761_v41 = vrot.slane %v10760_v63, 4  ;;  %v10770_v13 = vor.u32 %v10769_v53, %v17637_v61  ;;  %v7563_v2 = vadd.f32 %v7510_v11, %v7269_v23  ;;  %v8106_v16 = vadd.f32 %v17624_v24, %v7812_v4  ;;  %v7523_v12 = vpop.f32.mrf.mxu0  ;;  %v17656_v55 = vpop.f32.mrf.mxu1  ;;  %v11168_v40 = vld [vmem:[#allocation3 + $0x3c] sm:$0xe]  ;;  %v11169_v49 = vld [vmem:[#allocation3 + $0x40] sm:$0xf] }
 0x35c   : > { %7597 = vst.msk [vmem:[#allocation2 + $0xd8] sm:$0xff] %vm226_vm1, %v7565_v28  ;;  %v13348_v37 = vrot.slane %v11162_v25, 9  ;;  %14357 = vmatmul.mubr.msk.bf16.gmra.mxu0 %vm226_vm1, %v13328_v19  ;;  %6809 = vst.msk [vmem:[#allocation2 + $0xe8] sm:$0xff] %vm226_vm1, %v6777_v44  ;;  %v11264_v17 = vrot.slane %v11163_v29, 5  ;;  %v11267_v35 = vrot.slane %v11164_v22, 5  ;;  %v7568_v45 = vadd.f32 %v14158_v31, %v7274_v42  ;;  %v7813_v31 = vld [vmem:[#allocation2 + $0x18] sm:$0xff] }
 0x35d   : > { %v10766_v59 = vsel %vm14627_vm4, %v10761_v41, %v17637_v61  ;;  %v10771_v50 = vrot.slane %v10770_v13, 4  ;;  %7595 = vst.msk [vmem:[#allocation2 + $0xc8] sm:$0xff] %vm226_vm1, %v7563_v2  ;;  %8138 = vst.msk [vmem:[#allocation2 + $0x10] sm:$0xff] %vm226_vm1, %v8106_v16  ;;  %v13349_v24 = vrot.slane %v11165_v8, 9  ;;  %v11271_v48 = vrot.slane %v11166_v43, 5  ;;  %v14159_v51 = vpop.f32.mrf.mxu0  ;;  %v17665_v56 = vpop.f32.mrf.mxu1  ;;  %v7811_v43 = vld [vmem:[#allocation2 + $0x8] sm:$0xff] }
 0x35e   : > { %v11274_v57 = vrot.slane %v11167_v46, 5  ;;  %v11265_v3 = vsel %vm14757_vm7, %v13348_v37, %v11264_v17  ;;  %v11266_v30 = vrot.slane %v11264_v17, 4  ;;  %7600 = vst.msk [vmem:[#allocation2 + $0xf0] sm:$0xff] %vm226_vm1, %v7568_v45  ;;  %v8104_v26 = vadd.f32 %v17626_v58, %v7810_v18  ;;  %v17682_v25 = vld [vmem:[#allocation3 + $0x44] sm:$0x1]  ;;  %v7816_v46 = vld [vmem:[#allocation2 + $0x30] sm:$0xff] }
 0x35f   : > { %v5824_v34 = vsel %vm16178_vm12, 0, %v5823_v32  ;;  %v10776_v11 = vsel %vm14627_vm4, %v10771_v50, %v10775_v47  ;;  %v11272_v1 = vsel %vm14757_vm7, %v13349_v24, %v11271_v48  ;;  %v11273_v10 = vrot.slane %v11271_v48, 4  ;;  %v7526_v14 = vpop.f32.mrf.mxu0  ;;  %v17677_v6 = vpop.f32.mrf.mxu1  ;;  %v11171_v29 = vld [vmem:[#allocation3 + $0x48] sm:$0xe]  ;;  %v11172_v22 = vld [vmem:[#allocation3 + $0x4c] sm:$0xf] }
 0x360   : > { %5825 = vst [vmem:[#allocation3 + $0xd4] sm:$0x1] %v5824_v34  ;;  %v10778_v5 = vshrl.u32 %v10414_v21, 16  ;;  %v13329_v61 = vcombine.low %v10766_v59, %v10776_v11  ;;  %v11268_v58 = vsel %vm14757_vm7, %v11266_v30, %v11267_v35  ;;  %8136 = vst.msk [vmem:[#allocation2] sm:$0xff] %vm226_vm1, %v8104_v26  ;;  %v10781_v27 = vshll.u32 %v10414_v21, 16  ;;  %v7814_v26 = vld [vmem:[#allocation2 + $0x20] sm:$0xff] }
 0x361   : > { %v10787_v62 = vshll.u32 %v10415_v20, 16  ;;  %v13365_v60 = vcombine.low %v11265_v3, %v11268_v58  ;;  %v11275_v38 = vsel %vm14757_vm7, %v11273_v10, %v11274_v57  ;;  %v10791_v9 = vshrl.u32 %v10415_v20, 16  ;;  %v14198_v23 = vpop.f32.mrf.mxu0  ;;  %v17686_v0 = vpop.f32.mrf.mxu1  ;;  %v7275_v8 = vld [vmem:[#allocation2 + $0xf8] sm:$0xff]  ;;  %v11173_v13 = vld [vmem:[#allocation3 + $0x50] sm:$0x1] }
 0x362   : > { %v10780_v63 = vrot.slane %v10778_v5, 4  ;;  %14360 = vmatprep.mubr.msk.bf16.mxu0 %vm226_vm1, %v13329_v61  ;;  %v13366_v53 = vcombine.low %v11272_v1, %v11275_v38  ;;  %v10783_v15 = vrot.slane %v10781_v27, 5  ;;  %v7566_v42 = vadd.f32 %v7523_v12, %v7272_v36  ;;  %v17717_v61 = vld [vmem:[#allocation3 + $0x54] sm:$0xe]  ;;  %v17719_v58 = vld [vmem:[#allocation3 + $0x58] sm:$0xf] }
 0x363   : > { %v17689_v28 = vrot.slane %v10787_v62, 5  ;;  %14367 = vmatmul.mubr.msk.bf16.vlgmr.msra.gmra.mxu1 %vm226_vm1, %v13365_v60  ;;  %v10793_v19 = vrot.slane %v10791_v9, 4  ;;  %v8107_v41 = vadd.f32 %v17632_v7, %v7813_v31  ;;  %v7569_v47 = vadd.f32 %v14159_v51, %v7275_v8  ;;  %v7273_v4 = vld [vmem:[#allocation2 + $0xe8] sm:$0xff]  ;;  %v8399_v2 = vpop.f32.mrf.mxu0  ;;  %v17694_v16 = vpop.f32.mrf.mxu1  ;;  %v7820_v38 = vld [vmem:[#allocation2 + $0x50] sm:$0xff]  ;;  %v11178_v9 = vld [vmem:[#allocation3 + $0x64] sm:$0xf] }
 0x364   : > { %v8105_v44 = vadd.f32 %v17639_v33, %v7811_v43  ;;  %14370 = vmatprep.mubr.msk.bf16.mxu1 %vm226_vm1, %v13366_v53  ;;  %v10784_v37 = vor.u32 %v10783_v15, %v10780_v63  ;;  %7598 = vst.msk [vmem:[#allocation2 + $0xe0] sm:$0xff] %vm226_vm1, %v7566_v42  ;;  %v7567_v32 = vadd.f32 %v7526_v14, %v7273_v4  ;;  %v13350_v59 = vrot.slane %v11168_v40, 9  ;;  %v8202_v17 = vld [vmem:[#allocation2 + $0x10] sm:$0xff]  ;;  %v7817_v40 = vld [vmem:[#allocation2 + $0x38] sm:$0xff]  ;;  %v7815_v60 = vld [vmem:[#allocation2 + $0x28] sm:$0xff] }
 0x365   : > { %v8110_v12 = vadd.f32 %v17648_v54, %v7816_v46  ;;  %v10794_v7 = vor.u32 %v10793_v19, %v17689_v28  ;;  %8139 = vst.msk [vmem:[#allocation2 + $0x18] sm:$0xff] %vm226_vm1, %v8107_v41  ;;  %7601 = vst.msk [vmem:[#allocation2 + $0xf8] sm:$0xff] %vm226_vm1, %v7569_v47  ;;  %v11278_v33 = vrot.slane %v11169_v49, 5  ;;  %v11281_v35 = vrot.slane %v17682_v25, 5  ;;  %v14199_v21 = vpop.f32.mrf.mxu0  ;;  %v17704_v20 = vpop.f32.mrf.mxu1  ;;  %v11176_v15 = vld [vmem:[#allocation3 + $0x5c] sm:$0x1] }
 0x366   : > { %8137 = vst.msk [vmem:[#allocation2 + $0x8] sm:$0xff] %vm226_vm1, %v8105_v44  ;;  %v8528_v45 = vadd.f32 %v14198_v23, %v8202_v17  ;;  %v10785_v24 = vrot.slane %v10784_v37, 4  ;;  %7599 = vst.msk [vmem:[#allocation2 + $0xe8] sm:$0xff] %vm226_vm1, %v7567_v32  ;;  %v13351_v54 = vrot.slane %v11171_v29, 9  ;;  %v11285_v48 = vrot.slane %v11172_v22, 5 }
 0x367   : > { %v10416_v50 = vld [vmem:[#allocation3 + $0xd4] sm:$0x1]  ;;  %8142 = vst.msk [vmem:[#allocation2 + $0x30] sm:$0xff] %vm226_vm1, %v8110_v12  ;;  %v11288_v57 = vrot.slane %v11173_v13, 5  ;;  %v10795_v18 = vrot.slane %v10794_v7, 4  ;;  %v11279_v3 = vsel %vm14757_vm7, %v13350_v59, %v11278_v33  ;;  %v11280_v30 = vrot.slane %v11278_v33, 4  ;;  %v8402_v11 = vpop.f32.mrf.mxu0  ;;  %v8012_v1 = vpop.f32.mrf.mxu1 }
 0x368   : > { %v10797_v51 = vshll.u32 %v10416_v50, 16  ;;  %8560 = vst.msk [vmem:[#allocation2 + $0x10] sm:$0xff] %vm226_vm1, %v8528_v45  ;;  %v8200_v34 = vld [vmem:[#allocation2] sm:$0xff]  ;;  %v10790_v10 = vsel %vm14627_vm4, %v10785_v24, %v17689_v28  ;;  %v11286_v5 = vsel %vm14757_vm7, %v13351_v54, %v11285_v48  ;;  %v11287_v36 = vrot.slane %v11285_v48, 4  ;;  %v11179_v8 = vld [vmem:[#allocation3 + $0x68] sm:$0x1] }
 0x369   : > { %v8108_v14 = vadd.f32 %v17656_v55, %v7814_v26  ;;  %v11282_v62 = vsel %vm14757_vm7, %v11280_v30, %v11281_v35  ;;  %v8526_v49 = vadd.f32 %v8399_v2, %v8200_v34  ;;  %v8111_v25 = vadd.f32 %v17665_v56, %v7817_v40  ;;  %v14202_v63 = vpop.f32.mrf.mxu0  ;;  %v14176_v23 = vpop.f32.mrf.mxu1  ;;  %v11177_v31 = vld [vmem:[#allocation3 + $0x60] sm:$0xe]  ;;  %v17739_v12 = vld [vmem:[#allocation3 + $0x70] sm:$0xf]  ;;  %v7821_v50 = vld [vmem:[#allocation2 + $0x58] sm:$0xff] }
 0x36a   : > { %v10799_v27 = vrot.slane %v10797_v51, 5  ;;  %v13367_v29 = vcombine.low %v11279_v3, %v11282_v62  ;;  %v11289_v55 = vsel %vm14757_vm7, %v11287_v36, %v11288_v57  ;;  %v8109_v22 = vadd.f32 %v17677_v6, %v7815_v60  ;;  %v7818_v45 = vld [vmem:[#allocation2 + $0x40] sm:$0xff]  ;;  %v7819_v24 = vld [vmem:[#allocation2 + $0x48] sm:$0xff]  ;;  %v7824_v51 = vld [vmem:[#allocation2 + $0x70] sm:$0xff] }
 0x36b   : > { %8140 = vst.msk [vmem:[#allocation2 + $0x20] sm:$0xff] %vm226_vm1, %v8108_v14  ;;  %v8114_v53 = vadd.f32 %v17686_v0, %v7820_v38  ;;  %v13368_v56 = vcombine.low %v11286_v5, %v11289_v55  ;;  %8558 = vst.msk [vmem:[#allocation2] sm:$0xff] %vm226_vm1, %v8526_v49  ;;  %v11292_v42 = vrot.slane %v17719_v58, 5  ;;  %v8415_v43 = vpop.f32.mrf.mxu0  ;;  %v8025_v19 = vpop.f32.mrf.mxu1  ;;  %v13352_v47 = vrot.slane %v17717_v61, 9  ;;  %v17748_v3 = vld [vmem:[#allocation3 + $0x7c] sm:$0xf] }
 0x36c   : > { %v10800_v28 = vsel %vm14627_vm4, %v10795_v18, %v10799_v27  ;;  %8143 = vst.msk [vmem:[#allocation2 + $0x38] sm:$0xff] %vm226_vm1, %v8111_v25  ;;  %14371 = vmatmul.mubr.msk.bf16.gmra.mxu1 %vm226_vm1, %v13367_v29  ;;  %v8203_v6 = vld [vmem:[#allocation2 + $0x18] sm:$0xff]  ;;  %8141 = vst.msk [vmem:[#allocation2 + $0x28] sm:$0xff] %vm226_vm1, %v8109_v22  ;;  %v11299_v44 = vrot.slane %v11178_v9, 5  ;;  %v11295_v2 = vrot.slane %v11176_v15, 5  ;;  %v13353_v7 = vrot.slane %v11177_v31, 9 }
 0x36d   : > { %v13330_v41 = vcombine.low %v10790_v10, %v10800_v28  ;;  %v8201_v0 = vld [vmem:[#allocation2 + $0x8] sm:$0xff]  ;;  %8146 = vst.msk [vmem:[#allocation2 + $0x50] sm:$0xff] %vm226_vm1, %v8114_v53  ;;  %14374 = vmatprep.mubr.msk.bf16.mxu1 %vm226_vm1, %v13368_v56  ;;  %v8529_v4 = vadd.f32 %v14199_v21, %v8203_v6  ;;  %v11294_v13 = vrot.slane %v11292_v42, 4  ;;  %v14203_v32 = vpop.f32.mrf.mxu0  ;;  %v14177_v59 = vpop.f32.mrf.mxu1  ;;  %v11302_v35 = vrot.slane %v11179_v8, 5  ;;  %v7822_v36 = vld [vmem:[#allocation2 + $0x60] sm:$0xff]  ;;  %v7825_v60 = vld [vmem:[#allocation2 + $0x78] sm:$0xff] }
 0x36e   : > { %v8527_v46 = vadd.f32 %v8402_v11, %v8201_v0  ;;  %v8206_v37 = vld [vmem:[#allocation2 + $0x30] sm:$0xff]  ;;  %v11301_v33 = vrot.slane %v11299_v44, 4  ;;  %v8112_v54 = vadd.f32 %v17694_v16, %v7818_v45  ;;  %v8115_v48 = vadd.f32 %v17704_v20, %v7821_v50  ;;  %v11180_v27 = vld [vmem:[#allocation3 + $0x6c] sm:$0xe]  ;;  %v11183_v62 = vld [vmem:[#allocation3 + $0x78] sm:$0xe] }
 0x36f   : > { %14361 = vmatmul.mubr.msk.bf16.gmra.mxu0 %vm226_vm1, %v13330_v41  ;;  %v8532_v17 = vadd.f32 %v14202_v63, %v8206_v37  ;;  %8561 = vst.msk [vmem:[#allocation2 + $0x18] sm:$0xff] %vm226_vm1, %v8529_v4  ;;  %v11296_v21 = vsel %vm14757_vm7, %v11294_v13, %v11295_v2  ;;  %v8113_v57 = vadd.f32 %v8012_v1, %v7819_v24  ;;  %v8418_v18 = vpop.f32.mrf.mxu0  ;;  %v8028_v30 = vpop.f32.mrf.mxu1  ;;  %v11182_v1 = vld [vmem:[#allocation3 + $0x74] sm:$0x1]  ;;  %v11306_v10 = vrot.slane %v17739_v12, 5  ;;  %v11185_v55 = vld [vmem:[#allocation3 + $0x80] sm:$0x1] }
 0x370   : > { %8559 = vst.msk [vmem:[#allocation2 + $0x8] sm:$0xff] %vm226_vm1, %v8527_v46  ;;  %v11303_v26 = vsel %vm14757_vm7, %v11301_v33, %v11302_v35  ;;  %v8118_v34 = vadd.f32 %v14176_v23, %v7824_v51  ;;  %v11293_v11 = vsel %vm14757_vm7, %v13352_v47, %v11292_v42  ;;  %v11300_v16 = vsel %vm14757_vm7, %v13353_v7, %v11299_v44  ;;  %v7823_v31 = vld [vmem:[#allocation2 + $0x68] sm:$0xff]  ;;  %v7828_v8 = vld [vmem:[#allocation2 + $0x90] sm:$0xff]  ;;  %v7826_v12 = vld [vmem:[#allocation2 + $0x80] sm:$0xff] }
 0x371   : > { %8564 = vst.msk [vmem:[#allocation2 + $0x30] sm:$0xff] %vm226_vm1, %v8532_v17  ;;  %8144 = vst.msk [vmem:[#allocation2 + $0x40] sm:$0xff] %vm226_vm1, %v8112_v54  ;;  %v14206_v5 = vpop.f32.mrf.mxu0  ;;  %v14180_v14 = vpop.f32.mrf.mxu1  ;;  %v13369_v40 = vcombine.low %v11293_v11, %v11296_v21  ;;  %v11313_v49 = vrot.slane %v17748_v3, 5  ;;  %v8116_v25 = vadd.f32 %v8025_v19, %v7822_v36  ;;  %v13370_v38 = vcombine.low %v11300_v16, %v11303_v26  ;;  %v17771_v47 = vld [vmem:[#allocation3 + $0x94] sm:$0xf] }
 0x372   : > { %v8204_v20 = vld [vmem:[#allocation2 + $0x20] sm:$0xff]  ;;  %8147 = vst.msk [vmem:[#allocation2 + $0x58] sm:$0xff] %vm226_vm1, %v8115_v48  ;;  %8145 = vst.msk [vmem:[#allocation2 + $0x48] sm:$0xff] %vm226_vm1, %v8113_v57  ;;  %v11308_v23 = vrot.slane %v11306_v10, 4  ;;  %v8119_v53 = vadd.f32 %v14177_v59, %v7825_v60  ;;  %v11309_v19 = vrot.slane %v11182_v1, 5  ;;  %v8117_v6 = vadd.f32 %v8028_v30, %v7823_v31  ;;  %v7829_v59 = vld [vmem:[#allocation2 + $0x98] sm:$0xff] }
 0x373   : > { %v8530_v61 = vadd.f32 %v8415_v43, %v8204_v20  ;;  %v8207_v58 = vld [vmem:[#allocation2 + $0x38] sm:$0xff]  ;;  %8150 = vst.msk [vmem:[#allocation2 + $0x70] sm:$0xff] %vm226_vm1, %v8118_v34  ;;  %v8205_v9 = vld [vmem:[#allocation2 + $0x28] sm:$0xff]  ;;  %v8431_v22 = vpop.f32.mrf.mxu0  ;;  %v8041_v15 = vpop.f32.mrf.mxu1  ;;  %v11315_v42 = vrot.slane %v11313_v49, 4  ;;  %8148 = vst.msk [vmem:[#allocation2 + $0x60] sm:$0xff] %vm226_vm1, %v8116_v25  ;;  %v8122_v0 = vadd.f32 %v14180_v14, %v7828_v8  ;;  %v11316_v4 = vrot.slane %v11185_v55, 5 }
 0x374   : > { %v8533_v63 = vadd.f32 %v14203_v32, %v8207_v58  ;;  %v8210_v29 = vld [vmem:[#allocation2 + $0x50] sm:$0xff]  ;;  %14375 = vmatmul.mubr.msk.bf16.gmra.mxu1 %vm226_vm1, %v13369_v40  ;;  %v8531_v28 = vadd.f32 %v8418_v18, %v8205_v9  ;;  %v17766_v43 = vld [vmem:[#allocation3 + $0x88] sm:$0xf]  ;;  %8151 = vst.msk [vmem:[#allocation2 + $0x78] sm:$0xff] %vm226_vm1, %v8119_v53  ;;  %v13354_v46 = vrot.slane %v11180_v27, 9  ;;  %v11310_v13 = vsel %vm14757_vm7, %v11308_v23, %v11309_v19  ;;  %v7830_v55 = vld [vmem:[#allocation2 + $0xa0] sm:$0xff] }
 0x375   : > { %8562 = vst.msk [vmem:[#allocation2 + $0x20] sm:$0xff] %vm226_vm1, %v8530_v61  ;;  %v8536_v56 = vadd.f32 %v14206_v5, %v8210_v29  ;;  %14378 = vmatprep.mubr.msk.bf16.mxu1 %vm226_vm1, %v13370_v38  ;;  %v14207_v41 = vpop.f32.mrf.mxu0  ;;  %v14181_v44 = vpop.f32.mrf.mxu1  ;;  %v13355_v2 = vrot.slane %v11183_v62, 9  ;;  %8149 = vst.msk [vmem:[#allocation2 + $0x68] sm:$0xff] %vm226_vm1, %v8117_v6  ;;  %v11320_v32 = vrot.slane %v17766_v43, 5  ;;  %v11317_v7 = vsel %vm14757_vm7, %v11315_v42, %v11316_v4  ;;  %v7827_v30 = vld [vmem:[#allocation2 + $0x88] sm:$0xff]  ;;  %v7832_v5 = vld [vmem:[#allocation2 + $0xb0] sm:$0xff] }
 0x376   : > { %8565 = vst.msk [vmem:[#allocation2 + $0x38] sm:$0xff] %vm226_vm1, %v8533_v63  ;;  %8563 = vst.msk [vmem:[#allocation2 + $0x28] sm:$0xff] %vm226_vm1, %v8531_v28  ;;  %v11327_v50 = vrot.slane %v17771_v47, 5  ;;  %v8120_v24 = vadd.f32 %v8041_v15, %v7826_v12  ;;  %v8123_v21 = vadd.f32 %v14181_v44, %v7829_v59  ;;  %v11307_v54 = vsel %vm14757_vm7, %v13354_v46, %v11306_v10  ;;  %v11188_v16 = vld [vmem:[#allocation3 + $0x8c] sm:$0x1] }
 0x377   : > { %8568 = vst.msk [vmem:[#allocation2 + $0x50] sm:$0xff] %vm226_vm1, %v8536_v56  ;;  %v8434_v37 = vpop.f32.mrf.mxu0  ;;  %8154 = vst.msk [vmem:[#allocation2 + $0x90] sm:$0xff] %vm226_vm1, %v8122_v0  ;;  %v8044_v17 = vpop.f32.mrf.mxu1  ;;  %v13371_v34 = vcombine.low %v11307_v54, %v11310_v13  ;;  %v11314_v11 = vsel %vm14757_vm7, %v13355_v2, %v11313_v49  ;;  %v11186_v36 = vld [vmem:[#allocation3 + $0x84] sm:$0xe]  ;;  %v11322_v14 = vrot.slane %v11320_v32, 4  ;;  %v11323_v9 = vrot.slane %v11188_v16, 5 }
 0x378   : > { %v8208_v33 = vld [vmem:[#allocation2 + $0x40] sm:$0xff]  ;;  %8152 = vst.msk [vmem:[#allocation2 + $0x80] sm:$0xff] %vm226_vm1, %v8120_v24  ;;  %8155 = vst.msk [vmem:[#allocation2 + $0x98] sm:$0xff] %vm226_vm1, %v8123_v21  ;;  %v8121_v1 = vadd.f32 %v8044_v17, %v7827_v30  ;;  %v13372_v10 = vcombine.low %v11314_v11, %v11317_v7  ;;  %v11191_v40 = vld [vmem:[#allocation3 + $0x98] sm:$0x1]  ;;  %v11329_v25 = vrot.slane %v11327_v50, 4 }
 0x379   : > { %v8211_v35 = vld [vmem:[#allocation2 + $0x58] sm:$0xff]  ;;  %v8209_v45 = vld [vmem:[#allocation2 + $0x48] sm:$0xff]  ;;  %v8534_v48 = vadd.f32 %v8431_v22, %v8208_v33  ;;  %v14210_v3 = vpop.f32.mrf.mxu0  ;;  %v14184_v26 = vpop.f32.mrf.mxu1  ;;  %v11189_v49 = vld [vmem:[#allocation3 + $0x90] sm:$0xe]  ;;  %v11330_v15 = vrot.slane %v11191_v40, 5  ;;  %v13356_v8 = vrot.slane %v11186_v36, 9  ;;  %v11324_v19 = vsel %vm14757_vm7, %v11322_v14, %v11323_v9 }
 0x37a   : > { %v8537_v57 = vadd.f32 %v14207_v41, %v8211_v35  ;;  %v8535_v18 = vadd.f32 %v8434_v37, %v8209_v45  ;;  %v8214_v51 = vld [vmem:[#allocation2 + $0x70] sm:$0xff]  ;;  %v8212_v61 = vld [vmem:[#allocation2 + $0x60] sm:$0xff]  ;;  %v8126_v27 = vadd.f32 %v14184_v26, %v7832_v5  ;;  %8153 = vst.msk [vmem:[#allocation2 + $0x88] sm:$0xff] %vm226_vm1, %v8121_v1  ;;  %v17803_v29 = vld [vmem:[#allocation3 + $0xac] sm:$0xf]  ;;  %v13357_v41 = vrot.slane %v11189_v49, 9 }
 0x37b   : > { %v8540_v20 = vadd.f32 %v14210_v3, %v8214_v51  ;;  %8566 = vst.msk [vmem:[#allocation2 + $0x40] sm:$0xff] %vm226_vm1, %v8534_v48  ;;  %v8447_v58 = vpop.f32.mrf.mxu0  ;;  %v8057_v62 = vpop.f32.mrf.mxu1  ;;  %v8215_v38 = vld [vmem:[#allocation2 + $0x78] sm:$0xff]  ;;  %v17799_v63 = vld [vmem:[#allocation3 + $0xa0] sm:$0xf]  ;;  %v7831_v4 = vld [vmem:[#allocation2 + $0xa8] sm:$0xff]  ;;  %v11331_v13 = vsel %vm14757_vm7, %v11329_v25, %v11330_v15  ;;  %v11341_v37 = vrot.slane %v17803_v29, 5  ;;  %v11321_v59 = vsel %vm14757_vm7, %v13356_v8, %v11320_v32 }
 0x37c   : > { %8569 = vst.msk [vmem:[#allocation2 + $0x58] sm:$0xff] %vm226_vm1, %v8537_v57  ;;  %8567 = vst.msk [vmem:[#allocation2 + $0x48] sm:$0xff] %vm226_vm1, %v8535_v18  ;;  %14379 = vmatmul.mubr.msk.bf16.gmra.mxu1 %vm226_vm1, %v13371_v34  ;;  %v8538_v60 = vadd.f32 %v8447_v58, %v8212_v61  ;;  %v7833_v22 = vld [vmem:[#allocation2 + $0xb8] sm:$0xff]  ;;  %v8213_v56 = vld [vmem:[#allocation2 + $0x68] sm:$0xff]  ;;  %v8124_v42 = vadd.f32 %v8057_v62, %v7830_v55  ;;  %v11334_v0 = vrot.slane %v17799_v63, 5 }
 0x37d   : > { %8572 = vst.msk [vmem:[#allocation2 + $0x70] sm:$0xff] %vm226_vm1, %v8540_v20  ;;  %14382 = vmatprep.mubr.msk.bf16.mxu1 %vm226_vm1, %v13372_v10  ;;  %v14211_v23 = vpop.f32.mrf.mxu0  ;;  %8158 = vst.msk [vmem:[#allocation2 + $0xb0] sm:$0xff] %vm226_vm1, %v8126_v27  ;;  %v14185_v53 = vpop.f32.mrf.mxu1  ;;  %v7836_v33 = vld [vmem:[#allocation2 + $0xd0] sm:$0xff]  ;;  %v13373_v45 = vcombine.low %v11321_v59, %v11324_v19  ;;  %v11328_v24 = vsel %vm14757_vm7, %v13357_v41, %v11327_v50  ;;  %v11192_v21 = vld [vmem:[#allocation3 + $0x9c] sm:$0xe]  ;;  %v11343_v26 = vrot.slane %v11341_v37, 4 }
 0x37e   : > { %8570 = vst.msk [vmem:[#allocation2 + $0x60] sm:$0xff] %vm226_vm1, %v8538_v60  ;;  %v8541_v28 = vadd.f32 %v14211_v23, %v8215_v38  ;;  %v8127_v31 = vadd.f32 %v14185_v53, %v7833_v22  ;;  %v8218_v44 = vld [vmem:[#allocation2 + $0x90] sm:$0xff]  ;;  %8156 = vst.msk [vmem:[#allocation2 + $0xa0] sm:$0xff] %vm226_vm1, %v8124_v42  ;;  %v11194_v54 = vld [vmem:[#allocation3 + $0xa4] sm:$0x1]  ;;  %v13374_v57 = vcombine.low %v11328_v24, %v11331_v13  ;;  %v11336_v32 = vrot.slane %v11334_v0, 4 }
 0x37f   : > { %v8450_v6 = vpop.f32.mrf.mxu0  ;;  %v8060_v46 = vpop.f32.mrf.mxu1  ;;  %v8216_v7 = vld [vmem:[#allocation2 + $0x80] sm:$0xff]  ;;  %v11197_v18 = vld [vmem:[#allocation3 + $0xb0] sm:$0x1]  ;;  %v8219_v3 = vld [vmem:[#allocation2 + $0x98] sm:$0xff]  ;;  %v11337_v20 = vrot.slane %v11194_v54, 5  ;;  %v13358_v27 = vrot.slane %v11192_v21, 9 }
 0x380   : > { %8573 = vst.msk [vmem:[#allocation2 + $0x78] sm:$0xff] %vm226_vm1, %v8541_v28  ;;  %v8539_v2 = vadd.f32 %v8450_v6, %v8213_v56  ;;  %8159 = vst.msk [vmem:[#allocation2 + $0xb8] sm:$0xff] %vm226_vm1, %v8127_v31  ;;  %v8125_v12 = vadd.f32 %v8060_v46, %v7831_v4  ;;  %v7834_v30 = vld [vmem:[#allocation2 + $0xc0] sm:$0xff]  ;;  %v11195_v50 = vld [vmem:[#allocation3 + $0xa8] sm:$0xe]  ;;  %v11344_v40 = vrot.slane %v11197_v18, 5 }
 0x381   : > { %v14214_v17 = vpop.f32.mrf.mxu0  ;;  %v14188_v35 = vpop.f32.mrf.mxu1  ;;  %v17832_v11 = vld [vmem:[#allocation3 + $0xb8] sm:$0xf]  ;;  %v8217_v5 = vld [vmem:[#allocation2 + $0x88] sm:$0xff]  ;;  %v17835_v10 = vld [vmem:[#allocation3 + $0xc4] sm:$0xf]  ;;  %v11338_v62 = vsel %vm14757_vm7, %v11336_v32, %v11337_v20  ;;  %v13359_v49 = vrot.slane %v11195_v50, 9  ;;  %v11335_v28 = vsel %vm14757_vm7, %v13358_v27, %v11334_v0 }
 0x382   : > { %8571 = vst.msk [vmem:[#allocation2 + $0x68] sm:$0xff] %vm226_vm1, %v8539_v2  ;;  %v8544_v48 = vadd.f32 %v14214_v17, %v8218_v44  ;;  %8157 = vst.msk [vmem:[#allocation2 + $0xa8] sm:$0xff] %vm226_vm1, %v8125_v12  ;;  %v8130_v43 = vadd.f32 %v14188_v35, %v7836_v33  ;;  %v7837_v36 = vld [vmem:[#allocation2 + $0xd8] sm:$0xff]  ;;  %v11348_v60 = vrot.slane %v17832_v11, 5  ;;  %v7835_v9 = vld [vmem:[#allocation2 + $0xc8] sm:$0xff]  ;;  %v11345_v55 = vsel %vm14757_vm7, %v11343_v26, %v11344_v40 }
 0x383   : > { %v8463_v51 = vpop.f32.mrf.mxu0  ;;  %v8073_v47 = vpop.f32.mrf.mxu1  ;;  %v11355_v53 = vrot.slane %v17835_v10, 5  ;;  %v7840_v31 = vld [vmem:[#allocation2 + $0xf0] sm:$0xff]  ;;  %v13375_v19 = vcombine.low %v11335_v28, %v11338_v62  ;;  %v11342_v41 = vsel %vm14757_vm7, %v13359_v49, %v11341_v37  ;;  %v11200_v6 = vld [vmem:[#allocation3 + $0xbc] sm:$0x1]  ;;  %v11203_v13 = vld [vmem:[#allocation3 + $0xc8] sm:$0x1] }
 0x384   : > { %14383 = vmatmul.mubr.msk.bf16.gmra.mxu1 %vm226_vm1, %v13373_v45  ;;  %8576 = vst.msk [vmem:[#allocation2 + $0x90] sm:$0xff] %vm226_vm1, %v8544_v48  ;;  %v8542_v34 = vadd.f32 %v8463_v51, %v8216_v7  ;;  %8162 = vst.msk [vmem:[#allocation2 + $0xd0] sm:$0xff] %vm226_vm1, %v8130_v43  ;;  %v8128_v16 = vadd.f32 %v8073_v47, %v7834_v30  ;;  %v8222_v38 = vld [vmem:[#allocation2 + $0xb0] sm:$0xff]  ;;  %v13376_v0 = vcombine.low %v11342_v41, %v11345_v55  ;;  %v7838_v29 = vld [vmem:[#allocation2 + $0xe0] sm:$0xff] }
 0x385   : > { %14386 = vmatprep.mubr.msk.bf16.mxu1 %vm226_vm1, %v13374_v57  ;;  %v14215_v1 = vpop.f32.mrf.mxu0  ;;  %v14189_v14 = vpop.f32.mrf.mxu1  ;;  %v8220_v42 = vld [vmem:[#allocation2 + $0xa0] sm:$0xff]  ;;  %v17857_v4 = vld [vmem:[#allocation3 + $0xd0] sm:$0xf]  ;;  %v11350_v46 = vrot.slane %v11348_v60, 4  ;;  %v11198_v37 = vld [vmem:[#allocation3 + $0xb4] sm:$0xe] }
 0x386   : > { %8574 = vst.msk [vmem:[#allocation2 + $0x80] sm:$0xff] %vm226_vm1, %v8542_v34  ;;  %v8545_v61 = vadd.f32 %v14215_v1, %v8219_v3  ;;  %8160 = vst.msk [vmem:[#allocation2 + $0xc0] sm:$0xff] %vm226_vm1, %v8128_v16  ;;  %v8131_v58 = vadd.f32 %v14189_v14, %v7837_v36  ;;  %v11357_v17 = vrot.slane %v11355_v53, 4  ;;  %v11351_v35 = vrot.slane %v11200_v6, 5  ;;  %v11201_v45 = vld [vmem:[#allocation3 + $0xc0] sm:$0xe] }
 0x387   : > { %v8466_v25 = vpop.f32.mrf.mxu0  ;;  %v8076_v23 = vpop.f32.mrf.mxu1  ;;  %v8223_v12 = vld [vmem:[#allocation2 + $0xb8] sm:$0xff]  ;;  %v11362_v54 = vrot.slane %v17857_v4, 5  ;;  %v11358_v57 = vrot.slane %v11203_v13, 5  ;;  %v11204_v18 = vld [vmem:[#allocation3 + $0xcc] sm:$0xe]  ;;  %v13360_v30 = vrot.slane %v11198_v37, 9 }
 0x388   : > { %8577 = vst.msk [vmem:[#allocation2 + $0x98] sm:$0xff] %vm226_vm1, %v8545_v61  ;;  %v8543_v22 = vadd.f32 %v8466_v25, %v8217_v5  ;;  %8163 = vst.msk [vmem:[#allocation2 + $0xd8] sm:$0xff] %vm226_vm1, %v8131_v58  ;;  %v8129_v15 = vadd.f32 %v8076_v23, %v7835_v9  ;;  %v7841_v48 = vld [vmem:[#allocation2 + $0xf8] sm:$0xff]  ;;  %v11206_v51 = vld [vmem:[#allocation3 + $0xd4] sm:$0x1]  ;;  %v11352_v47 = vsel %vm14757_vm7, %v11350_v46, %v11351_v35  ;;  %v13361_v20 = vrot.slane %v11201_v45, 9 }
 0x389   : > { %v14218_v56 = vpop.f32.mrf.mxu0  ;;  %v14192_v8 = vpop.f32.mrf.mxu1  ;;  %v8221_v21 = vld [vmem:[#allocation2 + $0xa8] sm:$0xff]  ;;  %v11359_v1 = vsel %vm14757_vm7, %v11357_v17, %v11358_v57  ;;  %v11349_v14 = vsel %vm14757_vm7, %v13360_v30, %v11348_v60  ;;  %v13362_v40 = vrot.slane %v11204_v18, 9  ;;  %v11364_v61 = vrot.slane %v11362_v54, 4  ;;  %v9024_v49 = vld [vmem:[#allocation2 + $0x10] sm:$0xff]  ;;  %v9026_v45 = vld [vmem:[#allocation2 + $0x20] sm:$0xff] }
 0x38a   : > { %8575 = vst.msk [vmem:[#allocation2 + $0x88] sm:$0xff] %vm226_vm1, %v8543_v22  ;;  %v8548_v44 = vadd.f32 %v14218_v56, %v8222_v38  ;;  %8161 = vst.msk [vmem:[#allocation2 + $0xc8] sm:$0xff] %vm226_vm1, %v8129_v15  ;;  %v8134_v63 = vadd.f32 %v14192_v8, %v7840_v31  ;;  %v7839_v34 = vld [vmem:[#allocation2 + $0xe8] sm:$0xff]  ;;  %v11365_v58 = vrot.slane %v11206_v51, 5  ;;  %v13377_v38 = vcombine.low %v11349_v14, %v11352_v47  ;;  %v9022_v15 = vld [vmem:[#allocation2] sm:$0xff] }
 0x38b   : > { %v8479_v2 = vpop.f32.mrf.mxu0  ;;  %v8089_v59 = vpop.f32.mrf.mxu1  ;;  %v8226_v26 = vld [vmem:[#allocation2 + $0xd0] sm:$0xff]  ;;  %v11356_v9 = vsel %vm14757_vm7, %v13361_v20, %v11355_v53  ;;  %v11363_v53 = vsel %vm14757_vm7, %v13362_v40, %v11362_v54  ;;  %v9029_v57 = vld [vmem:[#allocation2 + $0x38] sm:$0xff]  ;;  %v9027_v47 = vld [vmem:[#allocation2 + $0x28] sm:$0xff] }
 0x38c   : > { %14387 = vmatmul.mubr.msk.bf16.gmra.mxu1 %vm226_vm1, %v13375_v19  ;;  %8580 = vst.msk [vmem:[#allocation2 + $0xb0] sm:$0xff] %vm226_vm1, %v8548_v44  ;;  %v8546_v7 = vadd.f32 %v8479_v2, %v8220_v42  ;;  %8166 = vst.msk [vmem:[#allocation2 + $0xf0] sm:$0xff] %vm226_vm1, %v8134_v63  ;;  %v8132_v33 = vadd.f32 %v8089_v59, %v7838_v29  ;;  %v13378_v60 = vcombine.low %v11356_v9, %v11359_v1  ;;  %v9025_v19 = vld [vmem:[#allocation2 + $0x18] sm:$0xff]  ;;  %v9028_v59 = vld [vmem:[#allocation2 + $0x30] sm:$0xff] }
 0x38d   : > { %14390 = vmatprep.mubr.msk.bf16.mxu1 %vm226_vm1, %v13376_v0  ;;  %v14219_v24 = vpop.f32.mrf.mxu0  ;;  %v14193_v43 = vpop.f32.mrf.mxu1  ;;  %v8224_v62 = vld [vmem:[#allocation2 + $0xc0] sm:$0xff]  ;;  %v11366_v42 = vsel %vm14757_vm7, %v11364_v61, %v11365_v58  ;;  %v9023_v0 = vld [vmem:[#allocation2 + $0x8] sm:$0xff]  ;;  %v9032_v1 = vld [vmem:[#allocation2 + $0x50] sm:$0xff] }
 0x38e   : > { %8578 = vst.msk [vmem:[#allocation2 + $0xa0] sm:$0xff] %vm226_vm1, %v8546_v7  ;;  %v8549_v32 = vadd.f32 %v14219_v24, %v8223_v12  ;;  %8164 = vst.msk [vmem:[#allocation2 + $0xe0] sm:$0xff] %vm226_vm1, %v8132_v33  ;;  %v8135_v3 = vadd.f32 %v14193_v43, %v7841_v48  ;;  %v13379_v13 = vcombine.low %v11363_v53, %v11366_v42  ;;  %v9030_v58 = vld [vmem:[#allocation2 + $0x40] sm:$0xff]  ;;  %v9033_v9 = vld [vmem:[#allocation2 + $0x58] sm:$0xff] }
 0x38f   : > { %v8482_v50 = vpop.f32.mrf.mxu0  ;;  %v8092_v16 = vpop.f32.mrf.mxu1  ;;  %v8227_v22 = vld [vmem:[#allocation2 + $0xd8] sm:$0xff] }
 0x390   : > { %8581 = vst.msk [vmem:[#allocation2 + $0xb8] sm:$0xff] %vm226_vm1, %v8549_v32  ;;  %v8547_v5 = vadd.f32 %v8482_v50, %v8221_v21  ;;  %8167 = vst.msk [vmem:[#allocation2 + $0xf8] sm:$0xff] %vm226_vm1, %v8135_v3  ;;  %v8133_v36 = vadd.f32 %v8092_v16, %v7839_v34 }
 0x391   : > { %v14222_v27 = vpop.f32.mrf.mxu0  ;;  %v14232_v25 = vpop.f32.mrf.mxu1  ;;  %v8225_v8 = vld [vmem:[#allocation2 + $0xc8] sm:$0xff] }
 0x392   : > { %8579 = vst.msk [vmem:[#allocation2 + $0xa8] sm:$0xff] %vm226_vm1, %v8547_v5  ;;  %v8552_v23 = vadd.f32 %v14222_v27, %v8226_v26  ;;  %8165 = vst.msk [vmem:[#allocation2 + $0xe8] sm:$0xff] %vm226_vm1, %v8133_v36  ;;  %v9318_v11 = vadd.f32 %v14232_v25, %v9024_v49 }
 0x393   : > { %v8495_v55 = vpop.f32.mrf.mxu0  ;;  %v9189_v28 = vpop.f32.mrf.mxu1  ;;  %v8230_v4 = vld [vmem:[#allocation2 + $0xf0] sm:$0xff] }
 0x394   : > { %14391 = vmatmul.mubr.msk.bf16.gmra.mxu1 %vm226_vm1, %v13377_v38  ;;  %8584 = vst.msk [vmem:[#allocation2 + $0xd0] sm:$0xff] %vm226_vm1, %v8552_v23  ;;  %v8550_v56 = vadd.f32 %v8495_v55, %v8224_v62  ;;  %9350 = vst.msk [vmem:[#allocation2 + $0x10] sm:$0xff] %vm226_vm1, %v9318_v11  ;;  %v9316_v10 = vadd.f32 %v9189_v28, %v9022_v15  ;;  %v9031_v15 = vld [vmem:[#allocation2 + $0x48] sm:$0xff] }
 0x395   : > { %14394 = vmatprep.mubr.msk.bf16.mxu1 %vm226_vm1, %v13378_v60  ;;  %v14223_v31 = vpop.f32.mrf.mxu0  ;;  %v14233_v41 = vpop.f32.mrf.mxu1  ;;  %v8228_v29 = vld [vmem:[#allocation2 + $0xe0] sm:$0xff] }
 0x396   : > { %8582 = vst.msk [vmem:[#allocation2 + $0xc0] sm:$0xff] %vm226_vm1, %v8550_v56  ;;  %v8553_v6 = vadd.f32 %v14223_v31, %v8227_v22  ;;  %9348 = vst.msk [vmem:[#allocation2] sm:$0xff] %vm226_vm1, %v9316_v10  ;;  %v9319_v44 = vadd.f32 %v14233_v41, %v9025_v19  ;;  %v9036_v31 = vld [vmem:[#allocation2 + $0x70] sm:$0xff] }
 0x397   : > { %v8498_v63 = vpop.f32.mrf.mxu0  ;;  %v9192_v46 = vpop.f32.mrf.mxu1  ;;  %v8231_v35 = vld [vmem:[#allocation2 + $0xf8] sm:$0xff] }
 0x398   : > { %8585 = vst.msk [vmem:[#allocation2 + $0xd8] sm:$0xff] %vm226_vm1, %v8553_v6  ;;  %v8551_v2 = vadd.f32 %v8498_v63, %v8225_v8  ;;  %9351 = vst.msk [vmem:[#allocation2 + $0x18] sm:$0xff] %vm226_vm1, %v9319_v44  ;;  %v9317_v52 = vadd.f32 %v9192_v46, %v9023_v0  ;;  %v9034_v63 = vld [vmem:[#allocation2 + $0x60] sm:$0xff] }
 0x399   : > { %v14226_v12 = vpop.f32.mrf.mxu0  ;;  %v14236_v37 = vpop.f32.mrf.mxu1  ;;  %v8229_v43 = vld [vmem:[#allocation2 + $0xe8] sm:$0xff] }
 0x39a   : > { %8583 = vst.msk [vmem:[#allocation2 + $0xc8] sm:$0xff] %vm226_vm1, %v8551_v2  ;;  %v8556_v17 = vadd.f32 %v14226_v12, %v8230_v4  ;;  %9349 = vst.msk [vmem:[#allocation2 + $0x8] sm:$0xff] %vm226_vm1, %v9317_v52  ;;  %v9322_v7 = vadd.f32 %v14236_v37, %v9028_v59  ;;  %v9037_v52 = vld [vmem:[#allocation2 + $0x78] sm:$0xff] }
 0x39b   : > { %v8511_v33 = vpop.f32.mrf.mxu0  ;;  %v9205_v24 = vpop.f32.mrf.mxu1  ;;  %v9590_v30 = vld [vmem:[#allocation2 + $0x10] sm:$0xff] }
 0x39c   : > { %14395 = vmatmul.mubr.msk.bf16.gmra.mxu1 %vm226_vm1, %v13379_v13  ;;  %8588 = vst.msk [vmem:[#allocation2 + $0xf0] sm:$0xff] %vm226_vm1, %v8556_v17  ;;  %v8554_v21 = vadd.f32 %v8511_v33, %v8228_v29  ;;  %9354 = vst.msk [vmem:[#allocation2 + $0x30] sm:$0xff] %vm226_vm1, %v9322_v7  ;;  %v9320_v54 = vadd.f32 %v9205_v24, %v9026_v45  ;;  %v9035_v7 = vld [vmem:[#allocation2 + $0x68] sm:$0xff] }
 0x39d   : > { %v14227_v48 = vpop.f32.mrf.mxu0  ;;  %v14237_v32 = vpop.f32.mrf.mxu1  ;;  %v9588_v20 = vld [vmem:[#allocation2] sm:$0xff] }
 0x39e   : > { %8586 = vst.msk [vmem:[#allocation2 + $0xe0] sm:$0xff] %vm226_vm1, %v8554_v21  ;;  %v8557_v18 = vadd.f32 %v14227_v48, %v8231_v35  ;;  %9352 = vst.msk [vmem:[#allocation2 + $0x20] sm:$0xff] %vm226_vm1, %v9320_v54  ;;  %v9323_v51 = vadd.f32 %v14237_v32, %v9029_v57  ;;  %v9040_v54 = vld [vmem:[#allocation2 + $0x90] sm:$0xff] }
 0x39f   : > { %v8514_v3 = vpop.f32.mrf.mxu0  ;;  %v9208_v50 = vpop.f32.mrf.mxu1  ;;  %v9591_v61 = vld [vmem:[#allocation2 + $0x18] sm:$0xff] }
 0x3a0   : > { %8589 = vst.msk [vmem:[#allocation2 + $0xf8] sm:$0xff] %vm226_vm1, %v8557_v18  ;;  %v8555_v26 = vadd.f32 %v8514_v3, %v8229_v43  ;;  %9355 = vst.msk [vmem:[#allocation2 + $0x38] sm:$0xff] %vm226_vm1, %v9323_v51  ;;  %v9321_v34 = vadd.f32 %v9208_v50, %v9027_v47  ;;  %v9038_v51 = vld [vmem:[#allocation2 + $0x80] sm:$0xff] }
 0x3a1   : > { %v14266_v16 = vpop.f32.mrf.mxu0  ;;  %v14240_v5 = vpop.f32.mrf.mxu1  ;;  %v9589_v38 = vld [vmem:[#allocation2 + $0x8] sm:$0xff] }
 0x3a2   : > { %8587 = vst.msk [vmem:[#allocation2 + $0xe8] sm:$0xff] %vm226_vm1, %v8555_v26  ;;  %v9884_v36 = vadd.f32 %v14266_v16, %v9590_v30  ;;  %9353 = vst.msk [vmem:[#allocation2 + $0x28] sm:$0xff] %vm226_vm1, %v9321_v34  ;;  %v9326_v14 = vadd.f32 %v14240_v5, %v9032_v1  ;;  %v9041_v34 = vld [vmem:[#allocation2 + $0x98] sm:$0xff] }
 0x3a3   : > { %v9755_v40 = vpop.f32.mrf.mxu0  ;;  %v9221_v27 = vpop.f32.mrf.mxu1  ;;  %v9594_v22 = vld [vmem:[#allocation2 + $0x30] sm:$0xff] }
 0x3a4   : > { %9916 = vst.msk [vmem:[#allocation2 + $0x10] sm:$0xff] %vm226_vm1, %v9884_v36  ;;  %v9882_v62 = vadd.f32 %v9755_v40, %v9588_v20  ;;  %9358 = vst.msk [vmem:[#allocation2 + $0x50] sm:$0xff] %vm226_vm1, %v9326_v14  ;;  %v9324_v49 = vadd.f32 %v9221_v27, %v9030_v58  ;;  %v9039_v14 = vld [vmem:[#allocation2 + $0x88] sm:$0xff] }
 0x3a5   : > { %v14267_v25 = vpop.f32.mrf.mxu0  ;;  %v14241_v23 = vpop.f32.mrf.mxu1  ;;  %v9592_v42 = vld [vmem:[#allocation2 + $0x20] sm:$0xff] }
 0x3a6   : > { %9914 = vst.msk [vmem:[#allocation2] sm:$0xff] %vm226_vm1, %v9882_v62  ;;  %v9885_v11 = vadd.f32 %v14267_v25, %v9591_v61  ;;  %9356 = vst.msk [vmem:[#allocation2 + $0x40] sm:$0xff] %vm226_vm1, %v9324_v49  ;;  %v9327_v60 = vadd.f32 %v14241_v23, %v9033_v9  ;;  %v9044_v49 = vld [vmem:[#allocation2 + $0xb0] sm:$0xff] }
 0x3a7   : > { %v9758_v55 = vpop.f32.mrf.mxu0  ;;  %v9224_v28 = vpop.f32.mrf.mxu1  ;;  %v9595_v44 = vld [vmem:[#allocation2 + $0x38] sm:$0xff] }
 0x3a8   : > { %9917 = vst.msk [vmem:[#allocation2 + $0x18] sm:$0xff] %vm226_vm1, %v9885_v11  ;;  %v9883_v56 = vadd.f32 %v9758_v55, %v9589_v38  ;;  %9359 = vst.msk [vmem:[#allocation2 + $0x58] sm:$0xff] %vm226_vm1, %v9327_v60  ;;  %v9325_v10 = vadd.f32 %v9224_v28, %v9031_v15  ;;  %v9042_v60 = vld [vmem:[#allocation2 + $0xa0] sm:$0xff] }
 0x3a9   : > { %v14270_v53 = vpop.f32.mrf.mxu0  ;;  %v14244_v8 = vpop.f32.mrf.mxu1  ;;  %v9593_v2 = vld [vmem:[#allocation2 + $0x28] sm:$0xff] }
 0x3aa   : > { %9915 = vst.msk [vmem:[#allocation2 + $0x8] sm:$0xff] %vm226_vm1, %v9883_v56  ;;  %v9888_v19 = vadd.f32 %v14270_v53, %v9594_v22  ;;  %9357 = vst.msk [vmem:[#allocation2 + $0x48] sm:$0xff] %vm226_vm1, %v9325_v10  ;;  %v9330_v41 = vadd.f32 %v14244_v8, %v9036_v31  ;;  %v9045_v10 = vld [vmem:[#allocation2 + $0xb8] sm:$0xff] }
 0x3ab   : > { %v9771_v6 = vpop.f32.mrf.mxu0  ;;  %v9237_v4 = vpop.f32.mrf.mxu1  ;;  %v9598_v17 = vld [vmem:[#allocation2 + $0x50] sm:$0xff] }
 0x3ac   : > { %9920 = vst.msk [vmem:[#allocation2 + $0x30] sm:$0xff] %vm226_vm1, %v9888_v19  ;;  %v9886_v0 = vadd.f32 %v9771_v6, %v9592_v42  ;;  %9362 = vst.msk [vmem:[#allocation2 + $0x70] sm:$0xff] %vm226_vm1, %v9330_v41  ;;  %v9328_v46 = vadd.f32 %v9237_v4, %v9034_v63  ;;  %v9043_v41 = vld [vmem:[#allocation2 + $0xa8] sm:$0xff] }
 0x3ad   : > { %v14271_v13 = vpop.f32.mrf.mxu0  ;;  %v14245_v12 = vpop.f32.mrf.mxu1  ;;  %v9596_v21 = vld [vmem:[#allocation2 + $0x40] sm:$0xff] }
 0x3ae   : > { %9918 = vst.msk [vmem:[#allocation2 + $0x20] sm:$0xff] %vm226_vm1, %v9886_v0  ;;  %v9889_v29 = vadd.f32 %v14271_v13, %v9595_v44  ;;  %9360 = vst.msk [vmem:[#allocation2 + $0x60] sm:$0xff] %vm226_vm1, %v9328_v46  ;;  %v9331_v59 = vadd.f32 %v14245_v12, %v9037_v52  ;;  %v9048_v46 = vld [vmem:[#allocation2 + $0xd0] sm:$0xff] }
 0x3af   : > { %v9774_v37 = vpop.f32.mrf.mxu0  ;;  %v9240_v33 = vpop.f32.mrf.mxu1  ;;  %v9599_v18 = vld [vmem:[#allocation2 + $0x58] sm:$0xff] }
 0x3b0   : > { %9921 = vst.msk [vmem:[#allocation2 + $0x38] sm:$0xff] %vm226_vm1, %v9889_v29  ;;  %v9887_v35 = vadd.f32 %v9774_v37, %v9593_v2  ;;  %9363 = vst.msk [vmem:[#allocation2 + $0x78] sm:$0xff] %vm226_vm1, %v9331_v59  ;;  %v9329_v45 = vadd.f32 %v9240_v33, %v9035_v7  ;;  %v9046_v59 = vld [vmem:[#allocation2 + $0xc0] sm:$0xff] }
 0x3b1   : > { %v14274_v24 = vpop.f32.mrf.mxu0  ;;  %v14248_v48 = vpop.f32.mrf.mxu1  ;;  %v9597_v26 = vld [vmem:[#allocation2 + $0x48] sm:$0xff] }
 0x3b2   : > { %9919 = vst.msk [vmem:[#allocation2 + $0x28] sm:$0xff] %vm226_vm1, %v9887_v35  ;;  %v9892_v43 = vadd.f32 %v14274_v24, %v9598_v17  ;;  %9361 = vst.msk [vmem:[#allocation2 + $0x68] sm:$0xff] %vm226_vm1, %v9329_v45  ;;  %v9334_v57 = vadd.f32 %v14248_v48, %v9040_v54  ;;  %v9049_v45 = vld [vmem:[#allocation2 + $0xd8] sm:$0xff] }
 0x3b3   : > { %v9787_v32 = vpop.f32.mrf.mxu0  ;;  %v9253_v3 = vpop.f32.mrf.mxu1  ;;  %v9602_v36 = vld [vmem:[#allocation2 + $0x70] sm:$0xff] }
 0x3b4   : > { %9924 = vst.msk [vmem:[#allocation2 + $0x50] sm:$0xff] %vm226_vm1, %v9892_v43  ;;  %v9890_v30 = vadd.f32 %v9787_v32, %v9596_v21  ;;  %9366 = vst.msk [vmem:[#allocation2 + $0x90] sm:$0xff] %vm226_vm1, %v9334_v57  ;;  %v9332_v47 = vadd.f32 %v9253_v3, %v9038_v51  ;;  %v9047_v57 = vld [vmem:[#allocation2 + $0xc8] sm:$0xff] }
 0x3b5   : > { %v14275_v50 = vpop.f32.mrf.mxu0  ;;  %v14249_v16 = vpop.f32.mrf.mxu1  ;;  %v9600_v62 = vld [vmem:[#allocation2 + $0x60] sm:$0xff] }
 0x3b6   : > { %9922 = vst.msk [vmem:[#allocation2 + $0x40] sm:$0xff] %vm226_vm1, %v9890_v30  ;;  %v9893_v20 = vadd.f32 %v14275_v50, %v9599_v18  ;;  %9364 = vst.msk [vmem:[#allocation2 + $0x80] sm:$0xff] %vm226_vm1, %v9332_v47  ;;  %v9335_v1 = vadd.f32 %v14249_v16, %v9041_v34 }
 0x3b7   : > { %v9790_v5 = vpop.f32.mrf.mxu0  ;;  %v9256_v40 = vpop.f32.mrf.mxu1  ;;  %v9603_v11 = vld [vmem:[#allocation2 + $0x78] sm:$0xff] }
 0x3b8   : > { %9925 = vst.msk [vmem:[#allocation2 + $0x58] sm:$0xff] %vm226_vm1, %v9893_v20  ;;  %v9891_v61 = vadd.f32 %v9790_v5, %v9597_v26  ;;  %9367 = vst.msk [vmem:[#allocation2 + $0x98] sm:$0xff] %vm226_vm1, %v9335_v1  ;;  %v9333_v58 = vadd.f32 %v9256_v40, %v9039_v14  ;;  %v9052_v1 = vld [vmem:[#allocation2 + $0xf0] sm:$0xff] }
 0x3b9   : > { %v14278_v27 = vpop.f32.mrf.mxu0  ;;  %v14252_v25 = vpop.f32.mrf.mxu1  ;;  %v9601_v56 = vld [vmem:[#allocation2 + $0x68] sm:$0xff] }
 0x3ba   : > { %9923 = vst.msk [vmem:[#allocation2 + $0x48] sm:$0xff] %vm226_vm1, %v9891_v61  ;;  %v9896_v38 = vadd.f32 %v14278_v27, %v9602_v36  ;;  %9365 = vst.msk [vmem:[#allocation2 + $0x88] sm:$0xff] %vm226_vm1, %v9333_v58  ;;  %v9338_v9 = vadd.f32 %v14252_v25, %v9044_v49  ;;  %v9050_v58 = vld [vmem:[#allocation2 + $0xe0] sm:$0xff] }
 0x3bb   : > { %v9803_v23 = vpop.f32.mrf.mxu0  ;;  %v9269_v55 = vpop.f32.mrf.mxu1  ;;  %v9606_v19 = vld [vmem:[#allocation2 + $0x90] sm:$0xff] }
 0x3bc   : > { %9928 = vst.msk [vmem:[#allocation2 + $0x70] sm:$0xff] %vm226_vm1, %v9896_v38  ;;  %v9894_v22 = vadd.f32 %v9803_v23, %v9600_v62  ;;  %9370 = vst.msk [vmem:[#allocation2 + $0xb0] sm:$0xff] %vm226_vm1, %v9338_v9  ;;  %v9336_v15 = vadd.f32 %v9269_v55, %v9042_v60  ;;  %v9053_v9 = vld [vmem:[#allocation2 + $0xf8] sm:$0xff] }
 0x3bd   : > { %v14279_v28 = vpop.f32.mrf.mxu0  ;;  %v14253_v53 = vpop.f32.mrf.mxu1  ;;  %v9604_v0 = vld [vmem:[#allocation2 + $0x80] sm:$0xff] }
 0x3be   : > { %9926 = vst.msk [vmem:[#allocation2 + $0x60] sm:$0xff] %vm226_vm1, %v9894_v22  ;;  %v9897_v42 = vadd.f32 %v14279_v28, %v9603_v11  ;;  %9368 = vst.msk [vmem:[#allocation2 + $0xa0] sm:$0xff] %vm226_vm1, %v9336_v15  ;;  %v9339_v31 = vadd.f32 %v14253_v53, %v9045_v10  ;;  %v9051_v15 = vld [vmem:[#allocation2 + $0xe8] sm:$0xff] }
 0x3bf   : > { %v9806_v8 = vpop.f32.mrf.mxu0  ;;  %v9272_v6 = vpop.f32.mrf.mxu1  ;;  %v9607_v29 = vld [vmem:[#allocation2 + $0x98] sm:$0xff] }
 0x3c0   : > { %9929 = vst.msk [vmem:[#allocation2 + $0x78] sm:$0xff] %vm226_vm1, %v9897_v42  ;;  %v9895_v44 = vadd.f32 %v9806_v8, %v9601_v56  ;;  %9371 = vst.msk [vmem:[#allocation2 + $0xb8] sm:$0xff] %vm226_vm1, %v9339_v31  ;;  %v9337_v63 = vadd.f32 %v9272_v6, %v9043_v41  ;;  %v9981_v31 = vld [vmem:[#allocation2 + $0x10] sm:$0xff] }
 0x3c1   : > { %v14282_v4 = vpop.f32.mrf.mxu0  ;;  %v14256_v13 = vpop.f32.mrf.mxu1  ;;  %v9605_v35 = vld [vmem:[#allocation2 + $0x88] sm:$0xff] }
 0x3c2   : > { %9927 = vst.msk [vmem:[#allocation2 + $0x68] sm:$0xff] %vm226_vm1, %v9895_v44  ;;  %v9900_v2 = vadd.f32 %v14282_v4, %v9606_v19  ;;  %9369 = vst.msk [vmem:[#allocation2 + $0xa8] sm:$0xff] %vm226_vm1, %v9337_v63  ;;  %v9342_v52 = vadd.f32 %v14256_v13, %v9048_v46  ;;  %v9979_v63 = vld [vmem:[#allocation2] sm:$0xff] }
 0x3c3   : > { %v9819_v12 = vpop.f32.mrf.mxu0  ;;  %v9285_v37 = vpop.f32.mrf.mxu1  ;;  %v9610_v43 = vld [vmem:[#allocation2 + $0xb0] sm:$0xff] }
 0x3c4   : > { %9932 = vst.msk [vmem:[#allocation2 + $0x90] sm:$0xff] %vm226_vm1, %v9900_v2  ;;  %v9898_v17 = vadd.f32 %v9819_v12, %v9604_v0  ;;  %9374 = vst.msk [vmem:[#allocation2 + $0xd0] sm:$0xff] %vm226_vm1, %v9342_v52  ;;  %v9340_v7 = vadd.f32 %v9285_v37, %v9046_v59  ;;  %v9982_v52 = vld [vmem:[#allocation2 + $0x18] sm:$0xff] }
 0x3c5   : > { %v14283_v33 = vpop.f32.mrf.mxu0  ;;  %v14257_v24 = vpop.f32.mrf.mxu1  ;;  %v9608_v30 = vld [vmem:[#allocation2 + $0xa0] sm:$0xff] }
 0x3c6   : > { %9930 = vst.msk [vmem:[#allocation2 + $0x80] sm:$0xff] %vm226_vm1, %v9898_v17  ;;  %v9901_v21 = vadd.f32 %v14283_v33, %v9607_v29  ;;  %9372 = vst.msk [vmem:[#allocation2 + $0xc0] sm:$0xff] %vm226_vm1, %v9340_v7  ;;  %v9343_v54 = vadd.f32 %v14257_v24, %v9049_v45  ;;  %v9980_v7 = vld [vmem:[#allocation2 + $0x8] sm:$0xff] }
 0x3c7   : > { %v9822_v48 = vpop.f32.mrf.mxu0  ;;  %v9288_v32 = vpop.f32.mrf.mxu1  ;;  %v9611_v26 = vld [vmem:[#allocation2 + $0xb8] sm:$0xff] }
 0x3c8   : > { %9933 = vst.msk [vmem:[#allocation2 + $0x98] sm:$0xff] %vm226_vm1, %v9901_v21  ;;  %v9899_v18 = vadd.f32 %v9822_v48, %v9605_v35  ;;  %9375 = vst.msk [vmem:[#allocation2 + $0xd8] sm:$0xff] %vm226_vm1, %v9343_v54  ;;  %v9341_v51 = vadd.f32 %v9288_v32, %v9047_v57  ;;  %v9985_v54 = vld [vmem:[#allocation2 + $0x30] sm:$0xff] }
 0x3c9   : > { %v14286_v3 = vpop.f32.mrf.mxu0  ;;  %v9609_v20 = vld [vmem:[#allocation2 + $0xa8] sm:$0xff] }
 0x3ca   : > { %9931 = vst.msk [vmem:[#allocation2 + $0x88] sm:$0xff] %vm226_vm1, %v9899_v18  ;;  %v9904_v47 = vadd.f32 %v14286_v3, %v9610_v43  ;;  %9373 = vst.msk [vmem:[#allocation2 + $0xc8] sm:$0xff] %vm226_vm1, %v9341_v51  ;;  %v9983_v51 = vld [vmem:[#allocation2 + $0x20] sm:$0xff] }
 0x3cb   : > { %v9835_v50 = vpop.f32.mrf.mxu0  ;;  %v9614_v61 = vld [vmem:[#allocation2 + $0xd0] sm:$0xff] }
 0x3cc   : > { %9936 = vst.msk [vmem:[#allocation2 + $0xb0] sm:$0xff] %vm226_vm1, %v9904_v47  ;;  %v9902_v34 = vadd.f32 %v9835_v50, %v9608_v30 }
 0x3cd   : > { %v14287_v16 = vpop.f32.mrf.mxu0  ;;  %v14260_v5 = vpop.f32.mrf.mxu1  ;;  %v9612_v38 = vld [vmem:[#allocation2 + $0xc0] sm:$0xff] }
 0x3ce   : > { %9934 = vst.msk [vmem:[#allocation2 + $0xa0] sm:$0xff] %vm226_vm1, %v9902_v34  ;;  %v9905_v36 = vadd.f32 %v14287_v16, %v9611_v26  ;;  %v9346_v14 = vadd.f32 %v14260_v5, %v9052_v1  ;;  %v9986_v34 = vld [vmem:[#allocation2 + $0x38] sm:$0xff] }
 0x3cf   : > { %v9838_v40 = vpop.f32.mrf.mxu0  ;;  %v9301_v27 = vpop.f32.mrf.mxu1  ;;  %v9615_v22 = vld [vmem:[#allocation2 + $0xd8] sm:$0xff] }
 0x3d0   : > { %9937 = vst.msk [vmem:[#allocation2 + $0xb8] sm:$0xff] %vm226_vm1, %v9905_v36  ;;  %v9903_v62 = vadd.f32 %v9838_v40, %v9609_v20  ;;  %9378 = vst.msk [vmem:[#allocation2 + $0xf0] sm:$0xff] %vm226_vm1, %v9346_v14  ;;  %v9344_v49 = vadd.f32 %v9301_v27, %v9050_v58  ;;  %v9984_v14 = vld [vmem:[#allocation2 + $0x28] sm:$0xff] }
 0x3d1   : > { %v14290_v25 = vpop.f32.mrf.mxu0  ;;  %v14261_v23 = vpop.f32.mrf.mxu1  ;;  %v9613_v42 = vld [vmem:[#allocation2 + $0xc8] sm:$0xff] }
 0x3d2   : > { %9935 = vst.msk [vmem:[#allocation2 + $0xa8] sm:$0xff] %vm226_vm1, %v9903_v62  ;;  %v9908_v11 = vadd.f32 %v14290_v25, %v9614_v61  ;;  %9376 = vst.msk [vmem:[#allocation2 + $0xe0] sm:$0xff] %vm226_vm1, %v9344_v49  ;;  %v9347_v60 = vadd.f32 %v14261_v23, %v9053_v9  ;;  %v9989_v49 = vld [vmem:[#allocation2 + $0x50] sm:$0xff] }
 0x3d3   : > { %v9851_v55 = vpop.f32.mrf.mxu0  ;;  %v9304_v28 = vpop.f32.mrf.mxu1 }
 0x3d4   : > { %9940 = vst.msk [vmem:[#allocation2 + $0xd0] sm:$0xff] %vm226_vm1, %v9908_v11  ;;  %v9906_v56 = vadd.f32 %v9851_v55, %v9612_v38  ;;  %9379 = vst.msk [vmem:[#allocation2 + $0xf8] sm:$0xff] %vm226_vm1, %v9347_v60  ;;  %v9345_v10 = vadd.f32 %v9304_v28, %v9051_v15  ;;  %v9987_v60 = vld [vmem:[#allocation2 + $0x40] sm:$0xff] }
 0x3d5   : > { %v14291_v53 = vpop.f32.mrf.mxu0  ;;  %v14300_v8 = vpop.f32.mrf.mxu1 }
 0x3d6   : > { %9938 = vst.msk [vmem:[#allocation2 + $0xc0] sm:$0xff] %vm226_vm1, %v9906_v56  ;;  %v9909_v19 = vadd.f32 %v14291_v53, %v9615_v22  ;;  %9377 = vst.msk [vmem:[#allocation2 + $0xe8] sm:$0xff] %vm226_vm1, %v9345_v10  ;;  %v10307_v41 = vadd.f32 %v14300_v8, %v9981_v31  ;;  %v9990_v10 = vld [vmem:[#allocation2 + $0x58] sm:$0xff] }
 0x3d7   : > { %v9854_v6 = vpop.f32.mrf.mxu0  ;;  %v9618_v44 = vld [vmem:[#allocation2 + $0xf0] sm:$0xff]  ;;  %v10178_v4 = vpop.f32.mrf.mxu1 }
 0x3d8   : > { %9941 = vst.msk [vmem:[#allocation2 + $0xd8] sm:$0xff] %vm226_vm1, %v9909_v19  ;;  %v9907_v0 = vadd.f32 %v9854_v6, %v9613_v42  ;;  %10339 = vst.msk [vmem:[#allocation2 + $0x10] sm:$0xff] %vm226_vm1, %v10307_v41  ;;  %v10305_v46 = vadd.f32 %v10178_v4, %v9979_v63  ;;  %v9988_v41 = vld [vmem:[#allocation2 + $0x48] sm:$0xff] }
 0x3d9   : > { %v14294_v13 = vpop.f32.mrf.mxu0  ;;  %v9616_v2 = vld [vmem:[#allocation2 + $0xe0] sm:$0xff]  ;;  %v14301_v12 = vpop.f32.mrf.mxu1 }
 0x3da   : > { %9939 = vst.msk [vmem:[#allocation2 + $0xc8] sm:$0xff] %vm226_vm1, %v9907_v0  ;;  %v9912_v29 = vadd.f32 %v14294_v13, %v9618_v44  ;;  %10337 = vst.msk [vmem:[#allocation2] sm:$0xff] %vm226_vm1, %v10305_v46  ;;  %v10308_v59 = vadd.f32 %v14301_v12, %v9982_v52  ;;  %v9993_v46 = vld [vmem:[#allocation2 + $0x70] sm:$0xff] }
 0x3db   : > { %v9867_v37 = vpop.f32.mrf.mxu0  ;;  %v9619_v17 = vld [vmem:[#allocation2 + $0xf8] sm:$0xff]  ;;  %v10181_v33 = vpop.f32.mrf.mxu1 }
 0x3dc   : > { %9944 = vst.msk [vmem:[#allocation2 + $0xf0] sm:$0xff] %vm226_vm1, %v9912_v29  ;;  %v9910_v35 = vadd.f32 %v9867_v37, %v9616_v2  ;;  %10340 = vst.msk [vmem:[#allocation2 + $0x18] sm:$0xff] %vm226_vm1, %v10308_v59  ;;  %v10306_v45 = vadd.f32 %v10181_v33, %v9980_v7  ;;  %v9991_v59 = vld [vmem:[#allocation2 + $0x60] sm:$0xff] }
 0x3dd   : > { %v14295_v24 = vpop.f32.mrf.mxu0  ;;  %v9617_v21 = vld [vmem:[#allocation2 + $0xe8] sm:$0xff]  ;;  %v14304_v48 = vpop.f32.mrf.mxu1 }
 0x3de   : > { %9942 = vst.msk [vmem:[#allocation2 + $0xe0] sm:$0xff] %vm226_vm1, %v9910_v35  ;;  %v9913_v43 = vadd.f32 %v14295_v24, %v9619_v17  ;;  %10338 = vst.msk [vmem:[#allocation2 + $0x8] sm:$0xff] %vm226_vm1, %v10306_v45  ;;  %v10311_v57 = vadd.f32 %v14304_v48, %v9985_v54  ;;  %v9994_v45 = vld [vmem:[#allocation2 + $0x78] sm:$0xff] }
 0x3df   : > { %v9870_v32 = vpop.f32.mrf.mxu0  ;;  %v10803_v18 = vld [vmem:[#allocation2 + $0x10] sm:$0xff]  ;;  %v10194_v3 = vpop.f32.mrf.mxu1 }
 0x3e0   : > { %9945 = vst.msk [vmem:[#allocation2 + $0xf8] sm:$0xff] %vm226_vm1, %v9913_v43  ;;  %v9911_v30 = vadd.f32 %v9870_v32, %v9617_v21  ;;  %10343 = vst.msk [vmem:[#allocation2 + $0x30] sm:$0xff] %vm226_vm1, %v10311_v57  ;;  %v10309_v47 = vadd.f32 %v10194_v3, %v9983_v51  ;;  %v9992_v57 = vld [vmem:[#allocation2 + $0x68] sm:$0xff] }
 0x3e1   : > { %v14334_v50 = vpop.f32.mrf.mxu0  ;;  %v10801_v26 = vld [vmem:[#allocation2] sm:$0xff]  ;;  %v14305_v16 = vpop.f32.mrf.mxu1 }
 0x3e2   : > { %9943 = vst.msk [vmem:[#allocation2 + $0xe8] sm:$0xff] %vm226_vm1, %v9911_v30  ;;  %v11097_v20 = vadd.f32 %v14334_v50, %v10803_v18  ;;  %10341 = vst.msk [vmem:[#allocation2 + $0x20] sm:$0xff] %vm226_vm1, %v10309_v47  ;;  %v10312_v1 = vadd.f32 %v14305_v16, %v9986_v34  ;;  %v9997_v47 = vld [vmem:[#allocation2 + $0x90] sm:$0xff] }
 0x3e3   : > { %v10968_v5 = vpop.f32.mrf.mxu0  ;;  %v10804_v36 = vld [vmem:[#allocation2 + $0x18] sm:$0xff]  ;;  %v10197_v40 = vpop.f32.mrf.mxu1 }
 0x3e4   : > { %11129 = vst.msk [vmem:[#allocation2 + $0x10] sm:$0xff] %vm226_vm1, %v11097_v20  ;;  %v11095_v61 = vadd.f32 %v10968_v5, %v10801_v26  ;;  %10344 = vst.msk [vmem:[#allocation2 + $0x38] sm:$0xff] %vm226_vm1, %v10312_v1  ;;  %v10310_v58 = vadd.f32 %v10197_v40, %v9984_v14  ;;  %v9995_v20 = vld [vmem:[#allocation2 + $0x80] sm:$0xff]  ;;  %v13400_v14 = vld [vmem:[%s14598_s6 + $0x18] sm:$0xf] }
 0x3e5   : > { %v14335_v27 = vpop.f32.mrf.mxu0  ;;  %v10802_v62 = vld [vmem:[#allocation2 + $0x8] sm:$0xff]  ;;  %v14308_v25 = vpop.f32.mrf.mxu1 }
 0x3e6   : > { %11127 = vst.msk [vmem:[#allocation2] sm:$0xff] %vm226_vm1, %v11095_v61  ;;  %v11098_v38 = vadd.f32 %v14335_v27, %v10804_v36  ;;  %10342 = vst.msk [vmem:[#allocation2 + $0x28] sm:$0xff] %vm226_vm1, %v10310_v58  ;;  %v10315_v9 = vadd.f32 %v14308_v25, %v9989_v49  ;;  %v9998_v61 = vld [vmem:[#allocation2 + $0x98] sm:$0xff]  ;;  %v13397_v49 = vld [vmem:[%s14598_s6 + $0xc] sm:$0xf] }
 0x3e7   : > { %v10971_v23 = vpop.f32.mrf.mxu0  ;;  %v10807_v11 = vld [vmem:[#allocation2 + $0x30] sm:$0xff]  ;;  %v10210_v55 = vpop.f32.mrf.mxu1  ;;  %v13401_v27 = vld [vmem:[%s14598_s6 + $0x1c] sm:$0xf] }
 0x3e8   : > { %11130 = vst.msk [vmem:[#allocation2 + $0x18] sm:$0xff] %vm226_vm1, %v11098_v38  ;;  %v11096_v22 = vadd.f32 %v10971_v23, %v10802_v62  ;;  %10347 = vst.msk [vmem:[#allocation2 + $0x50] sm:$0xff] %vm226_vm1, %v10315_v9  ;;  %v10313_v15 = vadd.f32 %v10210_v55, %v9987_v60  ;;  %v9996_v9 = vld [vmem:[#allocation2 + $0x88] sm:$0xff]  ;;  %v11872_v60 = vshll.u32 %v13400_v14, 16 }
 0x3e9   : > { %v14338_v28 = vpop.f32.mrf.mxu0  ;;  %v10805_v56 = vld [vmem:[#allocation2 + $0x20] sm:$0xff]  ;;  %v14309_v53 = vpop.f32.mrf.mxu1 }
 0x3ea   : > { %11128 = vst.msk [vmem:[#allocation2 + $0x8] sm:$0xff] %vm226_vm1, %v11096_v22  ;;  %v11101_v42 = vadd.f32 %v14338_v28, %v10807_v11  ;;  %10345 = vst.msk [vmem:[#allocation2 + $0x40] sm:$0xff] %vm226_vm1, %v10313_v15  ;;  %v10316_v31 = vadd.f32 %v14309_v53, %v9990_v10  ;;  %v11869_v11 = vshrl.u32 %v13400_v14, 16  ;;  %v11878_v15 = vshll.u32 %v13401_v27, 16  ;;  %v10001_v53 = vld [vmem:[#allocation2 + $0xb0] sm:$0xff]  ;;  %v10003_v14 = vld [vmem:[#allocation2 + $0xc0] sm:$0xff] }
 0x3eb   : > { %v10984_v8 = vpop.f32.mrf.mxu0  ;;  %v10808_v19 = vld [vmem:[#allocation2 + $0x38] sm:$0xff]  ;;  %v10213_v6 = vpop.f32.mrf.mxu1  ;;  %v11882_v28 = vshrl.u32 %v13401_v27, 16  ;;  %v13407_v27 = vld [vmem:[%s14598_s6 + $0x34] sm:$0xf] }
 0x3ec   : > { %11133 = vst.msk [vmem:[#allocation2 + $0x30] sm:$0xff] %vm226_vm1, %v11101_v42  ;;  %v11099_v44 = vadd.f32 %v10984_v8, %v10805_v56  ;;  %10348 = vst.msk [vmem:[#allocation2 + $0x58] sm:$0xff] %vm226_vm1, %v10316_v31  ;;  %v10314_v63 = vadd.f32 %v10213_v6, %v9988_v41  ;;  %v11845_v31 = vshrl.u32 %v13397_v49, 16  ;;  %v11848_v8 = vshll.u32 %v13397_v49, 16 }
 0x3ed   : > { %v14339_v4 = vpop.f32.mrf.mxu0  ;;  %v10806_v0 = vld [vmem:[#allocation2 + $0x28] sm:$0xff]  ;;  %v14312_v13 = vpop.f32.mrf.mxu1 }
 0x3ee   : > { %11131 = vst.msk [vmem:[#allocation2 + $0x20] sm:$0xff] %vm226_vm1, %v11099_v44  ;;  %v11102_v2 = vadd.f32 %v14339_v4, %v10808_v19  ;;  %10346 = vst.msk [vmem:[#allocation2 + $0x48] sm:$0xff] %vm226_vm1, %v10314_v63  ;;  %v10319_v52 = vadd.f32 %v14312_v13, %v9993_v46  ;;  %v9999_v63 = vld [vmem:[#allocation2 + $0xa0] sm:$0xff]  ;;  %v11874_v46 = vrot.slane %v11872_v60, 5 }
 0x3ef   : > { %v10987_v12 = vpop.f32.mrf.mxu0  ;;  %v10811_v29 = vld [vmem:[#allocation2 + $0x50] sm:$0xff]  ;;  %v10226_v37 = vpop.f32.mrf.mxu1 }
 0x3f0   : > { %11134 = vst.msk [vmem:[#allocation2 + $0x38] sm:$0xff] %vm226_vm1, %v11102_v2  ;;  %v11100_v17 = vadd.f32 %v10987_v12, %v10806_v0  ;;  %10351 = vst.msk [vmem:[#allocation2 + $0x70] sm:$0xff] %vm226_vm1, %v10319_v52  ;;  %v10317_v7 = vadd.f32 %v10226_v37, %v9991_v59  ;;  %v11871_v0 = vrot.slane %v11869_v11, 4  ;;  %v18003_v52 = vrot.slane %v11878_v15, 5  ;;  %v10002_v59 = vld [vmem:[#allocation2 + $0xb8] sm:$0xff] }
 0x3f1   : > { %v14342_v33 = vpop.f32.mrf.mxu0  ;;  %v10809_v35 = vld [vmem:[#allocation2 + $0x40] sm:$0xff]  ;;  %v14313_v24 = vpop.f32.mrf.mxu1  ;;  %v11884_v12 = vrot.slane %v11882_v28, 4 }
 0x3f2   : > { %11132 = vst.msk [vmem:[#allocation2 + $0x28] sm:$0xff] %vm226_vm1, %v11100_v17  ;;  %v11105_v21 = vadd.f32 %v14342_v33, %v10811_v29  ;;  %10349 = vst.msk [vmem:[#allocation2 + $0x60] sm:$0xff] %vm226_vm1, %v10317_v7  ;;  %v10320_v54 = vadd.f32 %v14313_v24, %v9994_v45  ;;  %v13398_v17 = vld [vmem:[%s14598_s6 + $0x10] sm:$0xf]  ;;  %v11847_v7 = vrot.slane %v11845_v31, 4  ;;  %v11850_v33 = vrot.slane %v11848_v8, 5 }
 0x3f3   : > { %v11000_v48 = vpop.f32.mrf.mxu0  ;;  %v10812_v43 = vld [vmem:[#allocation2 + $0x58] sm:$0xff]  ;;  %v10229_v32 = vpop.f32.mrf.mxu1  ;;  %v13406_v24 = vld [vmem:[%s14598_s6 + $0x30] sm:$0xf]  ;;  %v13403_v11 = vld [vmem:[%s14598_s6 + $0x24] sm:$0xf]  ;;  %v11926_v8 = vshll.u32 %v13407_v27, 16 }
 0x3f4   : > { %11137 = vst.msk [vmem:[#allocation2 + $0x50] sm:$0xff] %vm226_vm1, %v11105_v21  ;;  %v11103_v18 = vadd.f32 %v11000_v48, %v10809_v35  ;;  %10352 = vst.msk [vmem:[#allocation2 + $0x78] sm:$0xff] %vm226_vm1, %v10320_v54  ;;  %v10318_v51 = vadd.f32 %v10229_v32, %v9992_v57  ;;  %v10000_v21 = vld [vmem:[#allocation2 + $0xa8] sm:$0xff]  ;;  %v11875_v48 = vor.u32 %v11874_v46, %v11871_v0  ;;  %v11893_v0 = vshrl.u32 %v13403_v11, 16 }
 0x3f5   : > { %v14343_v3 = vpop.f32.mrf.mxu0  ;;  %v10810_v30 = vld [vmem:[#allocation2 + $0x48] sm:$0xff]  ;;  %v14316_v50 = vpop.f32.mrf.mxu1  ;;  %v11896_v46 = vshll.u32 %v13403_v11, 16 }
 0x3f6   : > { %11135 = vst.msk [vmem:[#allocation2 + $0x40] sm:$0xff] %vm226_vm1, %v11103_v18  ;;  %v11106_v26 = vadd.f32 %v14343_v3, %v10812_v43  ;;  %10350 = vst.msk [vmem:[#allocation2 + $0x68] sm:$0xff] %vm226_vm1, %v10318_v51  ;;  %v10323_v34 = vadd.f32 %v14316_v50, %v9997_v47  ;;  %v13402_v43 = vld [vmem:[%s14598_s6 + $0x20] sm:$0x1]  ;;  %v11854_v18 = vshll.u32 %v13398_v17, 16  ;;  %v11858_v51 = vshrl.u32 %v13398_v17, 16 }
 0x3f7   : > { %v11003_v16 = vpop.f32.mrf.mxu0  ;;  %v10242_v1 = vpop.f32.mrf.mxu1  ;;  %v10815_v40 = vld [vmem:[#allocation2 + $0x70] sm:$0xff]  ;;  %v11885_v3 = vor.u32 %v11884_v12, %v18003_v52  ;;  %v11851_v50 = vor.u32 %v11850_v33, %v11847_v7  ;;  %v13412_v7 = vld [vmem:[%s14598_s6 + $0x48] sm:$0xf] }
 0x3f8   : > { %11138 = vst.msk [vmem:[#allocation2 + $0x58] sm:$0xff] %vm226_vm1, %v11106_v26  ;;  %v11104_v5 = vadd.f32 %v11003_v16, %v10810_v30  ;;  %10355 = vst.msk [vmem:[#allocation2 + $0x90] sm:$0xff] %vm226_vm1, %v10323_v34  ;;  %v10321_v36 = vadd.f32 %v10242_v1, %v9995_v20  ;;  %v10005_v30 = vld [vmem:[#allocation2 + $0xd0] sm:$0xff]  ;;  %v11917_v26 = vshrl.u32 %v13406_v24, 16  ;;  %v11920_v34 = vshll.u32 %v13406_v24, 16 }
 0x3f9   : > { %v14317_v58 = vpop.f32.mrf.mxu1  ;;  %v10813_v38 = vld [vmem:[#allocation2 + $0x60] sm:$0xff]  ;;  %v11852_v15 = vrot.slane %v11851_v50, 4  ;;  %v13413_v24 = vld [vmem:[%s14598_s6 + $0x4c] sm:$0xf] }
 0x3fa   : > { %11136 = vst.msk [vmem:[#allocation2 + $0x48] sm:$0xff] %vm226_vm1, %v11104_v5  ;;  %10353 = vst.msk [vmem:[#allocation2 + $0x80] sm:$0xff] %vm226_vm1, %v10321_v36  ;;  %v10324_v62 = vadd.f32 %v14317_v58, %v9998_v61  ;;  %v11888_v5 = vshll.u32 %v13402_v43, 16  ;;  %v11876_v61 = vrot.slane %v11875_v48, 4  ;;  %v13399_v58 = vld [vmem:[%s14598_s6 + $0x14] sm:$0x1] }
 0x3fb   : > { %v10245_v23 = vpop.f32.mrf.mxu1  ;;  %v10816_v10 = vld [vmem:[#allocation2 + $0x78] sm:$0xff]  ;;  %v11919_v28 = vrot.slane %v11917_v26, 4  ;;  %v11895_v43 = vrot.slane %v11893_v0, 4 }
 0x3fc   : > { %v14346_v25 = vpop.f32.mrf.mxu0  ;;  %10356 = vst.msk [vmem:[#allocation2 + $0x98] sm:$0xff] %vm226_vm1, %v10324_v62  ;;  %v10322_v22 = vadd.f32 %v10245_v23, %v9996_v9  ;;  %v11886_v9 = vrot.slane %v11885_v3, 4  ;;  %v11860_v23 = vrot.slane %v11858_v51, 4  ;;  %v11890_v31 = vrot.slane %v11888_v5, 5 }
 0x3fd   : > { %v11109_v55 = vadd.f32 %v14346_v25, %v10815_v40  ;;  %v14320_v42 = vpop.f32.mrf.mxu1  ;;  %v10814_v44 = vld [vmem:[#allocation2 + $0x68] sm:$0xff]  ;;  %v11881_v12 = vsel %vm14627_vm4, %v11876_v61, %v18003_v52  ;;  %v11965_v3 = vshrl.u32 %v13412_v7, 16  ;;  %v11978_v61 = vshrl.u32 %v13413_v24, 16 }
 0x3fe   : > { %v11016_v56 = vpop.f32.mrf.mxu0  ;;  %10354 = vst.msk [vmem:[#allocation2 + $0x88] sm:$0xff] %vm226_vm1, %v10322_v22  ;;  %v10327_v41 = vadd.f32 %v14320_v42, %v10001_v53  ;;  %v11891_v33 = vsel %vm14627_vm4, %v11886_v9, %v11890_v31 }
 0x3ff   : > { %11141 = vst.msk [vmem:[#allocation2 + $0x70] sm:$0xff] %vm226_vm1, %v11109_v55  ;;  %v11107_v19 = vadd.f32 %v11016_v56, %v10813_v38  ;;  %v10258_v4 = vpop.f32.mrf.mxu1  ;;  %v10819_v57 = vld [vmem:[#allocation2 + $0x90] sm:$0xff]  ;;  %v11856_v38 = vrot.slane %v11854_v18, 5  ;;  %v10006_v55 = vld [vmem:[#allocation2 + $0xd8] sm:$0xff]  ;;  %v11922_v56 = vrot.slane %v11920_v34, 5 }
 0x400   : > { %v14347_v6 = vpop.f32.mrf.mxu0  ;;  %10359 = vst.msk [vmem:[#allocation2 + $0xb0] sm:$0xff] %vm226_vm1, %v10327_v41  ;;  %v10325_v2 = vadd.f32 %v10258_v4, %v9999_v63  ;;  %v11864_v63 = vshll.u32 %v13399_v58, 16  ;;  %v13404_v4 = vld [vmem:[%s14598_s6 + $0x28] sm:$0xf] }
 0x401   : > { %11139 = vst.msk [vmem:[#allocation2 + $0x60] sm:$0xff] %vm226_vm1, %v11107_v19  ;;  %v11110_v13 = vadd.f32 %v14347_v6, %v10816_v10  ;;  %v14321_v37 = vpop.f32.mrf.mxu1  ;;  %v10817_v20 = vld [vmem:[#allocation2 + $0x80] sm:$0xff]  ;;  %v11930_v19 = vshrl.u32 %v13407_v27, 16  ;;  %v10004_v6 = vld [vmem:[#allocation2 + $0xc8] sm:$0xff]  ;;  %v11923_v17 = vor.u32 %v11922_v56, %v11919_v28  ;;  %v11906_v51 = vshrl.u32 %v13404_v4, 16 }
 0x402   : > { %v11019_v29 = vpop.f32.mrf.mxu0  ;;  %10357 = vst.msk [vmem:[#allocation2 + $0xa0] sm:$0xff] %vm226_vm1, %v10325_v2  ;;  %v10328_v45 = vadd.f32 %v14321_v37, %v10002_v59  ;;  %v11857_v37 = vsel %vm14627_vm4, %v11852_v15, %v11856_v38  ;;  %v11866_v48 = vrot.slane %v11864_v63, 5 }
 0x403   : > { %11142 = vst.msk [vmem:[#allocation2 + $0x78] sm:$0xff] %vm226_vm1, %v11110_v13  ;;  %v11108_v35 = vadd.f32 %v11019_v29, %v10814_v44  ;;  %v10261_v54 = vpop.f32.mrf.mxu1  ;;  %v10820_v49 = vld [vmem:[#allocation2 + $0x98] sm:$0xff]  ;;  %v11861_v29 = vor.u32 %v11860_v23, %v11856_v38  ;;  %v11932_v52 = vrot.slane %v11930_v19, 4  ;;  %v18041_v34 = vunpack.c.l.bf16 %v11857_v37 }
 0x404   : > { %10360 = vst.msk [vmem:[#allocation2 + $0xb8] sm:$0xff] %vm226_vm1, %v10328_v45  ;;  %v10326_v32 = vadd.f32 %v10261_v54, %v10000_v21  ;;  %v11902_v45 = vshll.u32 %v13404_v4, 16  ;;  %v18037_v54 = vunpack.c.l.bf16 %v11881_v12  ;;  %v11908_v11 = vrot.slane %v11906_v51, 4 }
 0x405   : > { %11140 = vst.msk [vmem:[#allocation2 + $0x68] sm:$0xff] %vm226_vm1, %v11108_v35  ;;  %v14324_v47 = vpop.f32.mrf.mxu1  ;;  %v10818_v53 = vld [vmem:[#allocation2 + $0x88] sm:$0xff]  ;;  %v18033_v35 = vrot.slane %v11926_v8, 5  ;;  %v11862_v18 = vrot.slane %v11861_v29, 4  ;;  %v11980_v19 = vrot.slane %v11978_v61, 4 }
 0x406   : > { %v14350_v16 = vpop.f32.mrf.mxu0  ;;  %10358 = vst.msk [vmem:[#allocation2 + $0xa8] sm:$0xff] %vm226_vm1, %v10326_v32  ;;  %v10331_v1 = vadd.f32 %v14324_v47, %v10005_v30  ;;  %v13408_v32 = vld [vmem:[%s14598_s6 + $0x38] sm:$0x1]  ;;  %v11968_v30 = vshll.u32 %v13412_v7, 16  ;;  %v13409_v47 = vld [vmem:[%s14598_s6 + $0x3c] sm:$0xf] }
 0x407   : > { %v11113_v36 = vadd.f32 %v14350_v16, %v10819_v57  ;;  %v10274_v40 = vpop.f32.mrf.mxu1  ;;  %v10823_v21 = vld [vmem:[#allocation2 + $0xb0] sm:$0xff]  ;;  %v11898_v57 = vrot.slane %v11896_v46, 5  ;;  %v18043_v16 = vunpack.c.l.bf16 %v11891_v33  ;;  %v11941_v38 = vshrl.u32 %v13409_v47, 16  ;;  %v13419_v61 = vld [vmem:[%s14598_s6 + $0x64] sm:$0xf] }
 0x408   : > { %v11032_v62 = vpop.f32.mrf.mxu0  ;;  %10363 = vst.msk [vmem:[#allocation2 + $0xd0] sm:$0xff] %vm226_vm1, %v10331_v1  ;;  %v10329_v25 = vadd.f32 %v10274_v40, %v10003_v14  ;;  %v11974_v1 = vshll.u32 %v13413_v24, 16  ;;  %v11933_v14 = vor.u32 %v11932_v52, %v18033_v35  ;;  %v13405_v40 = vld [vmem:[%s14598_s6 + $0x2c] sm:$0x1]  ;;  %v11944_v9 = vshll.u32 %v13409_v47, 16  ;;  %v10007_v52 = vld [vmem:[#allocation2 + $0xe0] sm:$0xff] }
 0x409   : > { %11145 = vst.msk [vmem:[#allocation2 + $0x90] sm:$0xff] %vm226_vm1, %v11113_v36  ;;  %v11111_v60 = vadd.f32 %v11032_v62, %v10817_v20  ;;  %v14325_v22 = vpop.f32.mrf.mxu1  ;;  %v10821_v26 = vld [vmem:[#allocation2 + $0xa0] sm:$0xff]  ;;  %v11924_v20 = vrot.slane %v11923_v17, 4  ;;  %v18045_v36 = vrot.slane %v11902_v45, 5  ;;  %v11899_v62 = vor.u32 %v11898_v57, %v11895_v43  ;;  %v13414_v46 = vld [vmem:[%s14598_s6 + $0x50] sm:$0x1] }
 0x40a   : > { %v14351_v10 = vpop.f32.mrf.mxu0  ;;  %10361 = vst.msk [vmem:[#allocation2 + $0xc0] sm:$0xff] %vm226_vm1, %v10329_v25  ;;  %v10332_v42 = vadd.f32 %v14325_v22, %v10006_v55  ;;  %v13410_v25 = vld [vmem:[%s14598_s6 + $0x40] sm:$0xf]  ;;  %v11970_v55 = vrot.slane %v11968_v30, 5  ;;  %v11867_v28 = vsel %vm14627_vm4, %v11862_v18, %v11866_v48  ;;  %v18060_v63 = vrot.slane %v11933_v14, 4 }
 0x40b   : > { %11143 = vst.msk [vmem:[#allocation2 + $0x80] sm:$0xff] %vm226_vm1, %v11111_v60  ;;  %v11114_v41 = vadd.f32 %v14351_v10, %v10820_v49  ;;  %v10277_v44 = vpop.f32.mrf.mxu1  ;;  %v10824_v27 = vld [vmem:[#allocation2 + $0xb8] sm:$0xff]  ;;  %v11936_v49 = vshll.u32 %v13408_v32, 16  ;;  %v11967_v60 = vrot.slane %v11965_v3, 4  ;;  %v11929_v56 = vsel %vm14627_vm4, %v11924_v20, %v18033_v35  ;;  %v13411_v30 = vld [vmem:[%s14598_s6 + $0x44] sm:$0x1] }
 0x40c   : > { %v11035_v13 = vpop.f32.mrf.mxu0  ;;  %10364 = vst.msk [vmem:[#allocation2 + $0xd8] sm:$0xff] %vm226_vm1, %v10332_v42  ;;  %v10330_v2 = vadd.f32 %v10277_v44, %v10004_v6  ;;  %v11912_v10 = vshll.u32 %v13405_v40, 16  ;;  %v11950_v31 = vshll.u32 %v13410_v25, 16  ;;  %v11954_v8 = vshrl.u32 %v13410_v25, 16  ;;  %v13415_v25 = vld [vmem:[%s14598_s6 + $0x54] sm:$0xf] }
 0x40d   : > { %11146 = vst.msk [vmem:[#allocation2 + $0x98] sm:$0xff] %vm226_vm1, %v11114_v41  ;;  %v11112_v59 = vadd.f32 %v11035_v13, %v10818_v53  ;;  %v10822_v15 = vld [vmem:[#allocation2 + $0xa8] sm:$0xff]  ;;  %v18056_v53 = vrot.slane %v11974_v1, 5  ;;  %v13418_v41 = vld [vmem:[%s14598_s6 + $0x60] sm:$0xf]  ;;  %v11900_v44 = vrot.slane %v11899_v62, 4  ;;  %v11971_v37 = vor.u32 %v11970_v55, %v11967_v60 }
 0x40e   : > { %10362 = vst.msk [vmem:[#allocation2 + $0xc8] sm:$0xff] %vm226_vm1, %v10330_v2  ;;  %v11943_v4 = vrot.slane %v11941_v38, 4  ;;  %v11946_v0 = vrot.slane %v11944_v9, 5  ;;  %v10009_v2 = vld [vmem:[#allocation2 + $0xf0] sm:$0xff]  ;;  %v18064_v29 = vrot.slane %v11936_v49, 5  ;;  %v18067_v7 = vunpack.c.l.bf16 %v11867_v28 }
 0x40f   : > { %11144 = vst.msk [vmem:[#allocation2 + $0x88] sm:$0xff] %vm226_vm1, %v11112_v59  ;;  %v11909_v59 = vor.u32 %v11908_v11, %v18045_v36  ;;  %v12013_v33 = vshrl.u32 %v13418_v41, 16  ;;  %v12016_v35 = vshll.u32 %v13418_v41, 16  ;;  %v10827_v45 = vld [vmem:[#allocation2 + $0xd0] sm:$0xff]  ;;  %v11981_v48 = vor.u32 %v11980_v19, %v18056_v53  ;;  %v13416_v38 = vld [vmem:[%s14598_s6 + $0x58] sm:$0xf] }
 0x410   : > { %v11984_v43 = vshll.u32 %v13414_v46, 16  ;;  %v11956_v57 = vrot.slane %v11954_v8, 4  ;;  %v18074_v18 = vunpack.c.l.bf16 %v11929_v56  ;;  %v18076_v51 = vrot.slane %v11912_v10, 5 }
 0x411   : > { %v14354_v50 = vpop.f32.mrf.mxu0  ;;  %v11947_v3 = vor.u32 %v11946_v0, %v11943_v4  ;;  %v11905_v1 = vsel %vm14627_vm4, %v11900_v44, %v18045_v36  ;;  %v18086_v14 = vrot.slane %v11909_v59, 4  ;;  %v18088_v40 = vrot.slane %v11971_v37, 4 }
 0x412   : > { %v11117_v5 = vadd.f32 %v14354_v50, %v10823_v21  ;;  %v18070_v21 = vrot.slane %v11950_v31, 5  ;;  %v10825_v50 = vld [vmem:[#allocation2 + $0xc0] sm:$0xff]  ;;  %v12015_v62 = vrot.slane %v12013_v33, 4  ;;  %v12018_v49 = vrot.slane %v12016_v35, 5  ;;  %v13424_v33 = vld [vmem:[%s14598_s6 + $0x78] sm:$0xf] }
 0x413   : > { %v11048_v58 = vpop.f32.mrf.mxu0  ;;  %v10828_v36 = vld [vmem:[#allocation2 + $0xd8] sm:$0xff]  ;;  %v11982_v60 = vrot.slane %v11981_v48, 4  ;;  %v11986_v55 = vrot.slane %v11984_v43, 5  ;;  %v11948_v10 = vrot.slane %v11947_v3, 4  ;;  %v18097_v19 = vunpack.c.l.bf16 %v11905_v1 }
 0x414   : > { %11149 = vst.msk [vmem:[#allocation2 + $0xb0] sm:$0xff] %vm226_vm1, %v11117_v5  ;;  %v11115_v23 = vadd.f32 %v11048_v58, %v10821_v26  ;;  %v10010_v26 = vld [vmem:[#allocation2 + $0xf8] sm:$0xff]  ;;  %v11939_v5 = vsel %vm14627_vm4, %v18060_v63, %v18064_v29  ;;  %v11989_v41 = vshrl.u32 %v13415_v25, 16  ;;  %v11998_v44 = vshll.u32 %v13416_v38, 16 }
 0x415   : > { %v14355_v22 = vpop.f32.mrf.mxu0  ;;  %v10826_v8 = vld [vmem:[#allocation2 + $0xc8] sm:$0xff]  ;;  %v12019_v0 = vor.u32 %v12018_v49, %v12015_v62  ;;  %v12026_v46 = vshrl.u32 %v13419_v61, 16  ;;  %v11977_v59 = vsel %vm14627_vm4, %v18088_v40, %v18056_v53  ;;  %v11987_v48 = vsel %vm14627_vm4, %v11982_v60, %v11986_v55 }
 0x416   : > { %11147 = vst.msk [vmem:[#allocation2 + $0xa0] sm:$0xff] %vm226_vm1, %v11115_v23  ;;  %v11118_v42 = vadd.f32 %v14355_v22, %v10824_v27  ;;  %v10008_v23 = vld [vmem:[#allocation2 + $0xe8] sm:$0xff]  ;;  %v11957_v22 = vor.u32 %v11956_v57, %v18070_v21  ;;  %v11991_v53 = vrot.slane %v11989_v41, 4  ;;  %v18117_v3 = vrot.slane %v11998_v44, 5 }
 0x417   : > { %v11051_v6 = vpop.f32.mrf.mxu0  ;;  %v13420_v57 = vld [vmem:[%s14598_s6 + $0x68] sm:$0x1]  ;;  %v12061_v1 = vshrl.u32 %v13424_v33, 16  ;;  %v18127_v40 = vunpack.c.l.bf16 %v11939_v5  ;;  %v18131_v49 = vunpack.c.l.bf16 %v11977_v59 }
 0x418   : > { %11150 = vst.msk [vmem:[#allocation2 + $0xb8] sm:$0xff] %vm226_vm1, %v11118_v42  ;;  %v11116_v13 = vadd.f32 %v11051_v6, %v10822_v15  ;;  %v14328_v12 = vpop.f32.mrf.mxu1  ;;  %v11960_v15 = vshll.u32 %v13411_v30, 16  ;;  %v12022_v42 = vshll.u32 %v13419_v61, 16  ;;  %v11992_v6 = vshll.u32 %v13415_v25, 16  ;;  %v13417_v30 = vld [vmem:[%s14598_s6 + $0x5c] sm:$0x1] }
 0x419   : > { %v10335_v17 = vadd.f32 %v14328_v12, %v10009_v2  ;;  %v11915_v12 = vsel %vm14627_vm4, %v18086_v14, %v18076_v51  ;;  %v11958_v37 = vrot.slane %v11957_v22, 4  ;;  %v18133_v25 = vunpack.c.l.bf16 %v11987_v48  ;;  %v11368_v60 = vld [vmem:[#allocation2 + $0x8] sm:$0xff] }
 0x41a   : > { %11148 = vst.msk [vmem:[#allocation2 + $0xa8] sm:$0xff] %vm226_vm1, %v11116_v13  ;;  %v10290_v24 = vpop.f32.mrf.mxu1  ;;  %v12002_v13 = vshrl.u32 %v13416_v38, 16  ;;  %v12024_v43 = vrot.slane %v12022_v42, 5  ;;  %v11994_v51 = vrot.slane %v11992_v6, 5  ;;  %v18129_v61 = vunpack.c.l.bf16 %v11915_v12  ;;  %v18152_v6 = vld [vmem:[%s18501_s4] ss:$0 sm:$0xff] }
 0x41b   : > { %10367 = vst.msk [vmem:[#allocation2 + $0xf0] sm:$0xff] %vm226_vm1, %v10335_v17  ;;  %v10333_v32 = vadd.f32 %v10290_v24, %v10007_v52  ;;  %v11962_v17 = vrot.slane %v11960_v15, 5  ;;  %v11953_v24 = vsel %vm14627_vm4, %v11948_v10, %v18070_v21  ;;  %v13422_v10 = vld [vmem:[%s14598_s6 + $0x70] sm:$0xf] }
 0x41c   : > { %v14358_v47 = vpop.f32.mrf.mxu0  ;;  %v14329_v20 = vpop.f32.mrf.mxu1  ;;  %v12004_v21 = vrot.slane %v12002_v13, 4  ;;  %v18140_v29 = vunpack.c.l.bf16 %v11953_v24  ;;  %v11995_v5 = vor.u32 %v11994_v51, %v11991_v53  ;;  %v11371_v53 = vld [vmem:[#allocation2 + $0x20] sm:$0xff] }
 0x41d   : > { %v11121_v58 = vadd.f32 %v14358_v47, %v10827_v45  ;;  %10365 = vst.msk [vmem:[#allocation2 + $0xe0] sm:$0xff] %vm226_vm1, %v10333_v32  ;;  %v10336_v27 = vadd.f32 %v14329_v20, %v10010_v26  ;;  %v11369_v45 = vld [vmem:[#allocation2 + $0x10] sm:$0xff]  ;;  %v11367_v47 = vld [vmem:[#allocation2] sm:$0xff]  ;;  %v12020_v26 = vrot.slane %v12019_v0, 4  ;;  %v12028_v20 = vrot.slane %v12026_v46, 4 }
 0x41e   : > { %v11064_v9 = vpop.f32.mrf.mxu0  ;;  %v10293_v11 = vpop.f32.mrf.mxu1  ;;  %v11963_v38 = vsel %vm14627_vm4, %v11958_v37, %v11962_v17  ;;  %v11996_v37 = vrot.slane %v11995_v5, 4  ;;  %v12046_v17 = vshll.u32 %v13422_v10, 16 }
 0x41f   : > { %11153 = vst.msk [vmem:[#allocation2 + $0xd0] sm:$0xff] %vm226_vm1, %v11121_v58  ;;  %v11119_v28 = vadd.f32 %v11064_v9, %v10825_v50  ;;  %10368 = vst.msk [vmem:[#allocation2 + $0xf8] sm:$0xff] %vm226_vm1, %v10336_v27  ;;  %v10334_v56 = vadd.f32 %v10293_v11, %v10008_v23  ;;  %v12064_v58 = vshll.u32 %v13424_v33, 16  ;;  %v11370_v27 = vld [vmem:[#allocation2 + $0x18] sm:$0xff]  ;;  %v12032_v9 = vshll.u32 %v13420_v57, 16 }
 0x420   : > { %v14359_v31 = vpop.f32.mrf.mxu0  ;;  %v13421_v23 = vld [vmem:[%s14598_s6 + $0x6c] sm:$0xf]  ;;  %v12008_v11 = vshll.u32 %v13417_v30, 16  ;;  %v12025_v22 = vsel %vm14627_vm4, %v12020_v26, %v12024_v43  ;;  %v12029_v15 = vor.u32 %v12028_v20, %v12024_v43  ;;  %v18154_v44 = vunpack.c.l.bf16 %v11963_v38 }
 0x421   : > { %11151 = vst.msk [vmem:[#allocation2 + $0xc0] sm:$0xff] %vm226_vm1, %v11119_v28  ;;  %v11122_v4 = vadd.f32 %v14359_v31, %v10828_v36  ;;  %10366 = vst.msk [vmem:[#allocation2 + $0xe8] sm:$0xff] %vm226_vm1, %v10334_v56  ;;  %v13425_v36 = vld [vmem:[%s14598_s6 + $0x7c] sm:$0xf]  ;;  %v12005_v28 = vor.u32 %v12004_v21, %v18117_v3  ;;  %v18145_v56 = vrot.slane %v12061_v1, 4  ;;  %v12066_v31 = vrot.slane %v12064_v58, 5 }
 0x422   : > { %v11067_v2 = vpop.f32.mrf.mxu0  ;;  %v12037_v41 = vshrl.u32 %v13421_v23, 16  ;;  %v12074_v0 = vshrl.u32 %v13425_v36, 16  ;;  %v12040_v46 = vshll.u32 %v13421_v23, 16  ;;  %v10831_v13 = vld [vmem:[#allocation2 + $0xf0] sm:$0xff]  ;;  %v18160_v59 = vunpack.c.l.bf16 %v12025_v22 }
 0x423   : > { %11154 = vst.msk [vmem:[#allocation2 + $0xd8] sm:$0xff] %vm226_vm1, %v11122_v4  ;;  %v11120_v35 = vadd.f32 %v11067_v2, %v10826_v8  ;;  %v14368_v52 = vpop.f32.mrf.mxu1  ;;  %v12070_v8 = vshll.u32 %v13425_v36, 16  ;;  %v18156_v4 = vrot.slane %v12032_v9, 5  ;;  %v11373_v2 = vld [vmem:[#allocation2 + $0x30] sm:$0xff]  ;;  %v12050_v33 = vshrl.u32 %v13422_v10, 16  ;;  %v11374_v36 = vld [vmem:[#allocation2 + $0x38] sm:$0xff] }
 0x424   : > { %v11663_v32 = vadd.f32 %v14368_v52, %v11369_v45  ;;  %v18162_v52 = vrot.slane %v12029_v15, 4  ;;  %v18164_v24 = vrot.slane %v12005_v28, 4  ;;  %v18166_v48 = vrot.slane %v12008_v11, 5 }
 0x425   : > { %11152 = vst.msk [vmem:[#allocation2 + $0xc8] sm:$0xff] %vm226_vm1, %v11120_v35  ;;  %v11534_v50 = vpop.f32.mrf.mxu1  ;;  %v12067_v30 = vor.u32 %v12066_v31, %v18145_v56  ;;  %v18180_v1 = vrot.slane %v12040_v46, 5  ;;  %v18183_v58 = vrot.slane %v12074_v0, 4  ;;  %v12052_v5 = vrot.slane %v12050_v33, 4 }
 0x426   : > { %11695 = vst.msk [vmem:[#allocation2 + $0x10] sm:$0xff] %vm226_vm1, %v11663_v32  ;;  %v11661_v14 = vadd.f32 %v11534_v50, %v11367_v47  ;;  %v10829_v32 = vld [vmem:[#allocation2 + $0xe0] sm:$0xff]  ;;  %v18170_v47 = vrot.slane %v12070_v8, 5  ;;  %v18172_v50 = vrot.slane %v12037_v41, 4  ;;  %v10832_v9 = vld [vmem:[#allocation2 + $0xf8] sm:$0xff]  ;;  %v12035_v22 = vsel %vm14627_vm4, %v18162_v52, %v18156_v4 }
 0x427   : > { %v14369_v62 = vpop.f32.mrf.mxu1  ;;  %v18202_v8 = vrot.slane %v12067_v30, 4 }
 0x428   : > { %11693 = vst.msk [vmem:[#allocation2] sm:$0xff] %vm226_vm1, %v11661_v14  ;;  %v11664_v63 = vadd.f32 %v14369_v62, %v11370_v27  ;;  %v13426_v14 = vld [vmem:[%s14598_s6 + $0x80] sm:$0x1]  ;;  %v10830_v10 = vld [vmem:[#allocation2 + $0xe8] sm:$0xff]  ;;  %v12077_v46 = vor.u32 %v18183_v58, %v18170_v47 }
 0x429   : > { %v11537_v55 = vpop.f32.mrf.mxu1 }
 0x42a   : > { %11696 = vst.msk [vmem:[#allocation2 + $0x18] sm:$0xff] %vm226_vm1, %v11664_v63  ;;  %v11662_v42 = vadd.f32 %v11537_v55, %v11368_v60  ;;  %v18187_v63 = vrot.slane %v12046_v17, 5  ;;  %v11377_v17 = vld [vmem:[#allocation2 + $0x50] sm:$0xff] }
 0x42c   : > { %11694 = vst.msk [vmem:[#allocation2 + $0x8] sm:$0xff] %vm226_vm1, %v11662_v42  ;;  %v14372_v12 = vpop.f32.mrf.mxu1  ;;  %v11372_v42 = vld [vmem:[#allocation2 + $0x28] sm:$0xff] }
 0x42d   : > { %v11727_v35 = vld [vmem:[#allocation2 + $0x10] sm:$0xff]  ;;  %v11667_v45 = vadd.f32 %v14372_v12, %v11373_v2 }
 0x42e   : > { %v11766_v43 = vadd.f32 %v18152_v6, %v11727_v35  ;;  %v11550_v51 = vpop.f32.mrf.mxu1 }
 0x42f   : > { %v14362_v57 = vpop.f32.mrf.mxu0  ;;  %v11725_v20 = vld [vmem:[#allocation2] sm:$0xff]  ;;  %11699 = vst.msk [vmem:[#allocation2 + $0x30] sm:$0xff] %vm226_vm1, %v11667_v45  ;;  %v11665_v21 = vadd.f32 %v11550_v51, %v11371_v53  ;;  %v12053_v45 = vor.u32 %v12052_v5, %v18187_v63  ;;  %v13431_v53 = vld [vmem:[%s14598_s6 + $0x94] sm:$0xf] }
 0x430   : > { %v11125_v26 = vadd.f32 %v14362_v57, %v10831_v13  ;;  %v12294_v27 = vadd.f32 %v18037_v54, %v11766_v43  ;;  %v11764_v62 = vadd.f32 %v18152_v6, %v11725_v20  ;;  %v14373_v23 = vpop.f32.mrf.mxu1  ;;  %v12001_v54 = vsel %vm14627_vm4, %v11996_v37, %v18117_v3  ;;  %v13423_v13 = vld [vmem:[%s14598_s6 + $0x74] sm:$0x1] }
 0x431   : > { %v11080_v38 = vpop.f32.mrf.mxu0  ;;  %v11728_v60 = vld [vmem:[#allocation2 + $0x18] sm:$0xff]  ;;  %11697 = vst.msk [vmem:[#allocation2 + $0x20] sm:$0xff] %vm226_vm1, %v11665_v21  ;;  %v11668_v55 = vadd.f32 %v14373_v23, %v11374_v36  ;;  %v12080_v3 = vshll.u32 %v13426_v14, 16  ;;  %v18215_v35 = vunpack.c.l.bf16 %v12001_v54  ;;  %v18220_v57 = vunpack.c.l.bf16 %v12035_v22  ;;  %v13427_v14 = vld [vmem:[%s14598_s6 + $0x84] sm:$0xf] }
 0x432   : > { %11157 = vst.msk [vmem:[#allocation2 + $0xf0] sm:$0xff] %vm226_vm1, %v11125_v26  ;;  %v11123_v11 = vadd.f32 %v11080_v38, %v10829_v32  ;;  %12326 = vst.msk [vmem:[%s18177_s27 + $0x10] sm:$0xff] %vm226_vm1, %v12294_v27  ;;  %v12292_v15 = vadd.f32 %v18041_v34, %v11764_v62  ;;  %v11767_v28 = vadd.f32 %v18152_v6, %v11728_v60  ;;  %v11553_v31 = vpop.f32.mrf.mxu1  ;;  %v13430_v32 = vld [vmem:[%s14598_s6 + $0x90] sm:$0xf]  ;;  %v18241_v62 = vrot.slane %v12077_v46, 4  ;;  %v11378_v36 = vld [vmem:[#allocation2 + $0x58] sm:$0xff] }
 0x433   : > { %v14363_v56 = vpop.f32.mrf.mxu0  ;;  %v11726_v0 = vld [vmem:[#allocation2 + $0x8] sm:$0xff]  ;;  %11700 = vst.msk [vmem:[#allocation2 + $0x38] sm:$0xff] %vm226_vm1, %v11668_v55  ;;  %v11666_v4 = vadd.f32 %v11553_v31, %v11372_v42  ;;  %v12043_v34 = vor.u32 %v18180_v1, %v18172_v50  ;;  %v11375_v50 = vld [vmem:[#allocation2 + $0x40] sm:$0xff]  ;;  %v12073_v20 = vsel %vm14627_vm4, %v18202_v8, %v18170_v47  ;;  %v18235_v21 = vrot.slane %v12080_v3, 5 }
 0x434   : > { %11155 = vst.msk [vmem:[#allocation2 + $0xe0] sm:$0xff] %vm226_vm1, %v11123_v11  ;;  %v11126_v41 = vadd.f32 %v14363_v56, %v10832_v9  ;;  %12324 = vst.msk [vmem:[%s18177_s27] sm:$0xff] %vm226_vm1, %v12292_v15  ;;  %v12295_v2 = vadd.f32 %v18043_v16, %v11767_v28  ;;  %v11765_v12 = vadd.f32 %v18152_v6, %v11726_v0  ;;  %v14376_v33 = vpop.f32.mrf.mxu1  ;;  %v12056_v1 = vshll.u32 %v13423_v13, 16  ;;  %v13428_v38 = vld [vmem:[%s14598_s6 + $0x88] sm:$0xf] }
 0x435   : > { %v11083_v37 = vpop.f32.mrf.mxu0  ;;  %11698 = vst.msk [vmem:[#allocation2 + $0x28] sm:$0xff] %vm226_vm1, %v11666_v4  ;;  %v11671_v43 = vadd.f32 %v14376_v33, %v11377_v17  ;;  %v12011_v16 = vsel %vm14627_vm4, %v18164_v24, %v18166_v48  ;;  %v18246_v5 = vrot.slane %v12053_v45, 4  ;;  %v12109_v11 = vshrl.u32 %v13430_v32, 16 }
 0x436   : > { %11158 = vst.msk [vmem:[#allocation2 + $0xf8] sm:$0xff] %vm226_vm1, %v11126_v41  ;;  %v11124_v52 = vadd.f32 %v11083_v37, %v10830_v10  ;;  %12327 = vst.msk [vmem:[%s18177_s27 + $0x18] sm:$0xff] %vm226_vm1, %v12295_v2  ;;  %v12293_v51 = vadd.f32 %v18067_v7, %v11765_v12  ;;  %v11731_v30 = vld [vmem:[#allocation2 + $0x30] sm:$0xff]  ;;  %v11566_v26 = vpop.f32.mrf.mxu1  ;;  %v12044_v7 = vrot.slane %v12043_v34, 4  ;;  %v12112_v60 = vshll.u32 %v13430_v32, 16  ;;  %v11376_v10 = vld [vmem:[#allocation2 + $0x48] sm:$0xff] }
 0x437   : > { %v11770_v58 = vadd.f32 %v18152_v6, %v11731_v30  ;;  %11703 = vst.msk [vmem:[#allocation2 + $0x50] sm:$0xff] %vm226_vm1, %v11671_v43  ;;  %v11669_v27 = vadd.f32 %v11566_v26, %v11375_v50  ;;  %v12118_v55 = vshll.u32 %v13431_v53, 16  ;;  %v12085_v28 = vshrl.u32 %v13427_v14, 16  ;;  %v11381_v2 = vld [vmem:[#allocation2 + $0x70] sm:$0xff] }
 0x438   : > { %11156 = vst.msk [vmem:[#allocation2 + $0xe8] sm:$0xff] %vm226_vm1, %v11124_v52  ;;  %12325 = vst.msk [vmem:[%s18177_s27 + $0x8] sm:$0xff] %vm226_vm1, %v12293_v51  ;;  %v11729_v9 = vld [vmem:[#allocation2 + $0x20] sm:$0xff]  ;;  %v14377_v23 = vpop.f32.mrf.mxu1  ;;  %v12122_v31 = vshrl.u32 %v13431_v53, 16  ;;  %v12088_v3 = vshll.u32 %v13427_v14, 16  ;;  %v12094_v41 = vshll.u32 %v13428_v38, 16  ;;  %v12049_v37 = vsel %vm14627_vm4, %v12044_v7, %v18187_v63 }
 0x439   : > { %v12298_v54 = vadd.f32 %v18074_v18, %v11770_v58  ;;  %v11768_v22 = vadd.f32 %v18152_v6, %v11729_v9  ;;  %11701 = vst.msk [vmem:[#allocation2 + $0x40] sm:$0xff] %vm226_vm1, %v11669_v27  ;;  %v11672_v15 = vadd.f32 %v14377_v23, %v11378_v36  ;;  %v12098_v0 = vshrl.u32 %v13428_v38, 16  ;;  %v11379_v51 = vld [vmem:[#allocation2 + $0x60] sm:$0xff]  ;;  %v13432_v7 = vld [vmem:[%s14598_s6 + $0x98] sm:$0x1] }
 0x43a   : > { %v11732_v56 = vld [vmem:[#allocation2 + $0x38] sm:$0xff]  ;;  %v11569_v42 = vpop.f32.mrf.mxu1  ;;  %v12058_v46 = vrot.slane %v12056_v1, 5  ;;  %v18259_v17 = vrot.slane %v12109_v11, 4  ;;  %v12114_v33 = vrot.slane %v12112_v60, 5  ;;  %v18261_v45 = vrot.slane %v12118_v55, 5 }
 0x43b   : > { %12330 = vst.msk [vmem:[%s18177_s27 + $0x30] sm:$0xff] %vm226_vm1, %v12298_v54  ;;  %v12296_v4 = vadd.f32 %v18097_v19, %v11768_v22  ;;  %v11771_v18 = vadd.f32 %v18152_v6, %v11732_v56  ;;  %11704 = vst.msk [vmem:[#allocation2 + $0x58] sm:$0xff] %vm226_vm1, %v11672_v15  ;;  %v11670_v34 = vadd.f32 %v11569_v42, %v11376_v10  ;;  %v12087_v32 = vrot.slane %v12085_v28, 4  ;;  %v11382_v9 = vld [vmem:[#allocation2 + $0x78] sm:$0xff]  ;;  %v13436_v60 = vld [vmem:[%s14598_s6 + $0xa8] sm:$0xf] }
 0x43c   : > { %v11730_v13 = vld [vmem:[#allocation2 + $0x28] sm:$0xff]  ;;  %v14380_v12 = vpop.f32.mrf.mxu1  ;;  %v12090_v30 = vrot.slane %v12088_v3, 5  ;;  %v18268_v50 = vrot.slane %v12094_v41, 5  ;;  %v12124_v26 = vrot.slane %v12122_v31, 4  ;;  %v12100_v1 = vrot.slane %v12098_v0, 4  ;;  %v11385_v31 = vld [vmem:[#allocation2 + $0x90] sm:$0xff] }
 0x43d   : > { %12328 = vst.msk [vmem:[%s18177_s27 + $0x20] sm:$0xff] %vm226_vm1, %v12296_v4  ;;  %v12299_v19 = vadd.f32 %v18127_v40, %v11771_v18  ;;  %v11769_v52 = vadd.f32 %v18152_v6, %v11730_v13  ;;  %11702 = vst.msk [vmem:[#allocation2 + $0x48] sm:$0xff] %vm226_vm1, %v11670_v34  ;;  %v11675_v43 = vadd.f32 %v14380_v12, %v11381_v2  ;;  %v18280_v27 = vunpack.c.l.bf16 %v12011_v16  ;;  %v13429_v16 = vld [vmem:[%s14598_s6 + $0x8c] sm:$0x1] }
 0x43e   : > { %v11735_v53 = vld [vmem:[#allocation2 + $0x50] sm:$0xff]  ;;  %v11582_v63 = vpop.f32.mrf.mxu1  ;;  %v18290_v23 = vunpack.c.l.bf16 %v12049_v37  ;;  %v12083_v24 = vsel %vm14627_vm4, %v18241_v62, %v18235_v21  ;;  %v12059_v48 = vsel %vm14627_vm4, %v18246_v5, %v12058_v46  ;;  %v11380_v21 = vld [vmem:[#allocation2 + $0x68] sm:$0xff]  ;;  %v12091_v54 = vor.u32 %v12090_v30, %v12087_v32  ;;  %v11383_v37 = vld [vmem:[#allocation2 + $0x80] sm:$0xff] }
 0x43f   : > { %12331 = vst.msk [vmem:[%s18177_s27 + $0x38] sm:$0xff] %vm226_vm1, %v12299_v19  ;;  %v12297_v40 = vadd.f32 %v18129_v61, %v11769_v52  ;;  %v11774_v14 = vadd.f32 %v18152_v6, %v11735_v53  ;;  %11707 = vst.msk [vmem:[#allocation2 + $0x70] sm:$0xff] %vm226_vm1, %v11675_v43  ;;  %v11673_v58 = vadd.f32 %v11582_v63, %v11379_v51  ;;  %v18288_v61 = vunpack.c.l.bf16 %v12073_v20  ;;  %v13437_v2 = vld [vmem:[%s14598_s6 + $0xac] sm:$0xf]  ;;  %v13433_v63 = vld [vmem:[%s14598_s6 + $0x9c] sm:$0xf] }
 0x440   : > { %v11733_v38 = vld [vmem:[#allocation2 + $0x40] sm:$0xff]  ;;  %v14381_v36 = vpop.f32.mrf.mxu1  ;;  %v12115_v20 = vor.u32 %v12114_v33, %v18259_v17  ;;  %v12125_v5 = vor.u32 %v12124_v26, %v18261_v45  ;;  %v12128_v22 = vshll.u32 %v13432_v7, 16  ;;  %v12101_v15 = vor.u32 %v12100_v1, %v18268_v50  ;;  %v11386_v26 = vld [vmem:[#allocation2 + $0x98] sm:$0xff] }
 0x441   : > { %12329 = vst.msk [vmem:[%s18177_s27 + $0x28] sm:$0xff] %vm226_vm1, %v12297_v40  ;;  %v12302_v11 = vadd.f32 %v18131_v49, %v11774_v14  ;;  %v11772_v47 = vadd.f32 %v18152_v6, %v11733_v38  ;;  %11705 = vst.msk [vmem:[#allocation2 + $0x60] sm:$0xff] %vm226_vm1, %v11673_v58  ;;  %v11676_v8 = vadd.f32 %v14381_v36, %v11382_v9  ;;  %v12104_v10 = vshll.u32 %v13429_v16, 16  ;;  %v11384_v16 = vld [vmem:[#allocation2 + $0x88] sm:$0xff] }
 0x442   : > { %v11736_v55 = vld [vmem:[#allocation2 + $0x58] sm:$0xff]  ;;  %v11585_v62 = vpop.f32.mrf.mxu1  ;;  %v18314_v41 = vunpack.c.l.bf16 %v12083_v24  ;;  %v18316_v0 = vunpack.c.l.bf16 %v12059_v48  ;;  %v12157_v4 = vshrl.u32 %v13436_v60, 16  ;;  %v12160_v18 = vshll.u32 %v13436_v60, 16  ;;  %v13434_v24 = vld [vmem:[%s14598_s6 + $0xa0] sm:$0xf] }
 0x443   : > { %12334 = vst.msk [vmem:[%s18177_s27 + $0x50] sm:$0xff] %vm226_vm1, %v12302_v11  ;;  %v12300_v49 = vadd.f32 %v18140_v29, %v11772_v47  ;;  %v11775_v28 = vadd.f32 %v18152_v6, %v11736_v55  ;;  %11708 = vst.msk [vmem:[#allocation2 + $0x78] sm:$0xff] %vm226_vm1, %v11676_v8  ;;  %v11674_v56 = vadd.f32 %v11585_v62, %v11380_v21  ;;  %v12116_v13 = vrot.slane %v12115_v20, 4  ;;  %v11389_v62 = vld [vmem:[#allocation2 + $0xb0] sm:$0xff] }
 0x444   : > { %v11734_v42 = vld [vmem:[#allocation2 + $0x48] sm:$0xff]  ;;  %v14384_v3 = vpop.f32.mrf.mxu1  ;;  %v12092_v33 = vrot.slane %v12091_v54, 4  ;;  %v12126_v19 = vrot.slane %v12125_v5, 4  ;;  %v12130_v52 = vrot.slane %v12128_v22, 5  ;;  %v18324_v43 = vrot.slane %v12101_v15, 4 }
 0x445   : > { %12332 = vst.msk [vmem:[%s18177_s27 + $0x40] sm:$0xff] %vm226_vm1, %v12300_v49  ;;  %v12303_v29 = vadd.f32 %v18133_v25, %v11775_v28  ;;  %v11773_v34 = vadd.f32 %v18152_v6, %v11734_v42  ;;  %11706 = vst.msk [vmem:[#allocation2 + $0x68] sm:$0xff] %vm226_vm1, %v11674_v56  ;;  %v11679_v46 = vadd.f32 %v14384_v3, %v11385_v31  ;;  %v12106_v51 = vrot.slane %v12104_v10, 5  ;;  %v11387_v3 = vld [vmem:[#allocation2 + $0xa0] sm:$0xff] }
 0x446   : > { %v11739_v12 = vld [vmem:[#allocation2 + $0x70] sm:$0xff]  ;;  %v11598_v17 = vpop.f32.mrf.mxu1  ;;  %v12159_v40 = vrot.slane %v12157_v4, 4  ;;  %v12162_v14 = vrot.slane %v12160_v18, 5  ;;  %v12166_v58 = vshll.u32 %v13437_v2, 16  ;;  %v12170_v7 = vshrl.u32 %v13437_v2, 16 }
 0x447   : > { %12335 = vst.msk [vmem:[%s18177_s27 + $0x58] sm:$0xff] %vm226_vm1, %v12303_v29  ;;  %v12301_v25 = vadd.f32 %v18154_v44, %v11773_v34  ;;  %v11778_v32 = vadd.f32 %v18152_v6, %v11739_v12  ;;  %11711 = vst.msk [vmem:[#allocation2 + $0x90] sm:$0xff] %vm226_vm1, %v11679_v46  ;;  %v11677_v53 = vadd.f32 %v11598_v17, %v11383_v37  ;;  %v12133_v8 = vshrl.u32 %v13433_v63, 16  ;;  %v18377_v12 = vld [vmem:[%s14598_s6 + $0xb0] sm:$0x1] }
 0x448   : > { %v11737_v30 = vld [vmem:[#allocation2 + $0x60] sm:$0xff]  ;;  %v14385_v1 = vpop.f32.mrf.mxu1  ;;  %v12121_v36 = vsel %vm14627_vm4, %v12116_v13, %v18261_v45  ;;  %v12097_v47 = vsel %vm14627_vm4, %v12092_v33, %v18268_v50  ;;  %v12136_v20 = vshll.u32 %v13433_v63, 16  ;;  %v12107_v21 = vsel %vm14627_vm4, %v18324_v43, %v12106_v51  ;;  %v11390_v33 = vld [vmem:[#allocation2 + $0xb8] sm:$0xff] }
 0x449   : > { %12333 = vst.msk [vmem:[%s18177_s27 + $0x48] sm:$0xff] %vm226_vm1, %v12301_v25  ;;  %v12306_v44 = vadd.f32 %v18160_v59, %v11778_v32  ;;  %v11776_v38 = vadd.f32 %v18152_v6, %v11737_v30  ;;  %11709 = vst.msk [vmem:[#allocation2 + $0x80] sm:$0xff] %vm226_vm1, %v11677_v53  ;;  %v11680_v9 = vadd.f32 %v14385_v1, %v11386_v26  ;;  %v18354_v22 = vrot.slane %v12166_v58, 5  ;;  %v13442_v37 = vld [vmem:[%s14598_s6 + $0xc0] sm:$0xf] }
 0x44a   : > { %v11740_v48 = vld [vmem:[#allocation2 + $0x78] sm:$0xff]  ;;  %v11601_v11 = vpop.f32.mrf.mxu1  ;;  %v12131_v59 = vsel %vm14627_vm4, %v12126_v19, %v12130_v52  ;;  %v12163_v5 = vor.u32 %v12162_v14, %v12159_v40  ;;  %v12142_v15 = vshll.u32 %v13434_v24, 16  ;;  %v12172_v49 = vrot.slane %v12170_v7, 4  ;;  %v18388_v32 = vld [vmem:[%s14598_s6 + $0xa4] sm:$0x1]  ;;  %v11388_v40 = vld [vmem:[#allocation2 + $0xa8] sm:$0xff] }
 0x44b   : > { %12338 = vst.msk [vmem:[%s18177_s27 + $0x70] sm:$0xff] %vm226_vm1, %v12306_v44  ;;  %v12304_v60 = vadd.f32 %v18215_v35, %v11776_v38  ;;  %v11779_v45 = vadd.f32 %v18152_v6, %v11740_v48  ;;  %11712 = vst.msk [vmem:[#allocation2 + $0x98] sm:$0xff] %vm226_vm1, %v11680_v9  ;;  %v11678_v55 = vadd.f32 %v11601_v11, %v11384_v16  ;;  %v12146_v10 = vshrl.u32 %v13434_v24, 16  ;;  %v13439_v26 = vld [vmem:[%s14598_s6 + $0xb4] sm:$0xf] }
 0x44c   : > { %v11738_v50 = vld [vmem:[#allocation2 + $0x68] sm:$0xff]  ;;  %v14388_v54 = vpop.f32.mrf.mxu1  ;;  %v18361_v31 = vunpack.c.l.bf16 %v12121_v36  ;;  %v18363_v18 = vunpack.c.l.bf16 %v12097_v47  ;;  %v18365_v29 = vrot.slane %v12133_v8, 4  ;;  %v18367_v34 = vrot.slane %v12136_v20, 5  ;;  %v13443_v48 = vld [vmem:[%s14598_s6 + $0xc4] sm:$0xf]  ;;  %v11393_v11 = vld [vmem:[#allocation2 + $0xd0] sm:$0xff] }
 0x44d   : > { %12336 = vst.msk [vmem:[%s18177_s27 + $0x60] sm:$0xff] %vm226_vm1, %v12304_v60  ;;  %v12307_v35 = vadd.f32 %v18220_v57, %v11779_v45  ;;  %v11777_v28 = vadd.f32 %v18152_v6, %v11738_v50  ;;  %11710 = vst.msk [vmem:[#allocation2 + $0x88] sm:$0xff] %vm226_vm1, %v11678_v55  ;;  %v11683_v56 = vadd.f32 %v14388_v54, %v11389_v62  ;;  %v18374_v2 = vunpack.c.l.bf16 %v12131_v59  ;;  %v13440_v50 = vld [vmem:[%s14598_s6 + $0xb8] sm:$0xf]  ;;  %v11391_v54 = vld [vmem:[#allocation2 + $0xc0] sm:$0xff] }
 0x44e   : > { %v11743_v42 = vld [vmem:[#allocation2 + $0x90] sm:$0xff]  ;;  %v11614_v4 = vpop.f32.mrf.mxu1  ;;  %v18380_v52 = vunpack.c.l.bf16 %v12107_v21  ;;  %v18382_v43 = vrot.slane %v12163_v5, 4  ;;  %v18384_v25 = vrot.slane %v12142_v15, 5  ;;  %v12148_v30 = vrot.slane %v12146_v10, 4 }
 0x44f   : > { %12339 = vst.msk [vmem:[%s18177_s27 + $0x78] sm:$0xff] %vm226_vm1, %v12307_v35  ;;  %v12305_v57 = vadd.f32 %v18280_v27, %v11777_v28  ;;  %v11782_v46 = vadd.f32 %v18152_v6, %v11743_v42  ;;  %11715 = vst.msk [vmem:[#allocation2 + $0xb0] sm:$0xff] %vm226_vm1, %v11683_v56  ;;  %v11681_v13 = vadd.f32 %v11614_v4, %v11387_v3  ;;  %v12176_v7 = vshll.u32 %v18377_v12, 16  ;;  %v11394_v3 = vld [vmem:[#allocation2 + $0xd8] sm:$0xff] }
 0x450   : > { %v11741_v17 = vld [vmem:[#allocation2 + $0x80] sm:$0xff]  ;;  %v14389_v19 = vpop.f32.mrf.mxu1  ;;  %v12173_v27 = vor.u32 %v12172_v49, %v18354_v22  ;;  %v12139_v58 = vor.u32 %v18367_v34, %v18365_v29  ;;  %v12205_v44 = vshrl.u32 %v13442_v37, 16  ;;  %v12208_v38 = vshll.u32 %v13442_v37, 16 }
 0x451   : > { %12337 = vst.msk [vmem:[%s18177_s27 + $0x68] sm:$0xff] %vm226_vm1, %v12305_v57  ;;  %v12310_v53 = vadd.f32 %v18288_v61, %v11782_v46  ;;  %v11780_v51 = vadd.f32 %v18152_v6, %v11741_v17  ;;  %11713 = vst.msk [vmem:[#allocation2 + $0xa0] sm:$0xff] %vm226_vm1, %v11681_v13  ;;  %v11684_v63 = vadd.f32 %v14389_v19, %v11390_v33  ;;  %v12152_v24 = vshll.u32 %v18388_v32, 16  ;;  %v11392_v33 = vld [vmem:[#allocation2 + $0xc8] sm:$0xff] }
 0x452   : > { %v11744_v1 = vld [vmem:[#allocation2 + $0x98] sm:$0xff]  ;;  %v11617_v14 = vpop.f32.mrf.mxu1  ;;  %v12169_v59 = vsel %vm14627_vm4, %v18382_v43, %v18354_v22  ;;  %v18410_v8 = vrot.slane %v12173_v27, 4  ;;  %v12184_v20 = vshll.u32 %v13439_v26, 16  ;;  %v12149_v21 = vor.u32 %v12148_v30, %v18384_v25 }
 0x453   : > { %12342 = vst.msk [vmem:[%s18177_s27 + $0x90] sm:$0xff] %vm226_vm1, %v12310_v53  ;;  %v12308_v61 = vadd.f32 %v18290_v23, %v11780_v51  ;;  %v11783_v9 = vadd.f32 %v18152_v6, %v11744_v1  ;;  %11716 = vst.msk [vmem:[#allocation2 + $0xb8] sm:$0xff] %vm226_vm1, %v11684_v63  ;;  %v11682_v36 = vadd.f32 %v11617_v14, %v11388_v40  ;;  %v12181_v23 = vshrl.u32 %v13439_v26, 16  ;;  %v13444_v26 = vld [vmem:[%s14598_s6 + $0xc8] sm:$0x1]  ;;  %v11397_v14 = vld [vmem:[#allocation2 + $0xf0] sm:$0xff] }
 0x454   : > { %v11742_v16 = vld [vmem:[#allocation2 + $0x88] sm:$0xff]  ;;  %v14392_v47 = vpop.f32.mrf.mxu1  ;;  %v12207_v22 = vrot.slane %v12205_v44, 4  ;;  %v12210_v15 = vrot.slane %v12208_v38, 5  ;;  %v12214_v49 = vshll.u32 %v13443_v48, 16  ;;  %v12218_v35 = vshrl.u32 %v13443_v48, 16 }
 0x455   : > { %12340 = vst.msk [vmem:[%s18177_s27 + $0x80] sm:$0xff] %vm226_vm1, %v12308_v61  ;;  %v12311_v60 = vadd.f32 %v18314_v41, %v11783_v9  ;;  %v11781_v45 = vadd.f32 %v18152_v6, %v11742_v16  ;;  %11714 = vst.msk [vmem:[#allocation2 + $0xa8] sm:$0xff] %vm226_vm1, %v11682_v36  ;;  %v11687_v55 = vadd.f32 %v14392_v47, %v11393_v11  ;;  %v12140_v10 = vrot.slane %v12139_v58, 4  ;;  %v11395_v11 = vld [vmem:[#allocation2 + $0xe0] sm:$0xff] }
 0x456   : > { %v11747_v62 = vld [vmem:[#allocation2 + $0xb0] sm:$0xff]  ;;  %v11630_v5 = vpop.f32.mrf.mxu1  ;;  %v12183_v29 = vrot.slane %v12181_v23, 4  ;;  %v12186_v34 = vrot.slane %v12184_v20, 5  ;;  %v12190_v57 = vshll.u32 %v13440_v50, 16  ;;  %v12194_v46 = vshrl.u32 %v13440_v50, 16  ;;  %v11398_v50 = vld [vmem:[#allocation2 + $0xf8] sm:$0xff] }
 0x457   : > { %12343 = vst.msk [vmem:[%s18177_s27 + $0x98] sm:$0xff] %vm226_vm1, %v12311_v60  ;;  %v12309_v41 = vadd.f32 %v18316_v0, %v11781_v45  ;;  %v11786_v28 = vadd.f32 %v18152_v6, %v11747_v62  ;;  %11719 = vst.msk [vmem:[#allocation2 + $0xd0] sm:$0xff] %vm226_vm1, %v11687_v55  ;;  %v11685_v56 = vadd.f32 %v11630_v5, %v11391_v54  ;;  %v12178_v37 = vrot.slane %v12176_v7, 5 }
 0x458   : > { %v11745_v42 = vld [vmem:[#allocation2 + $0xa0] sm:$0xff]  ;;  %v14393_v4 = vpop.f32.mrf.mxu1  ;;  %v12150_v43 = vrot.slane %v12149_v21, 4  ;;  %v12211_v27 = vor.u32 %v12210_v15, %v12207_v22  ;;  %v18429_v32 = vrot.slane %v12214_v49, 5  ;;  %v12220_v53 = vrot.slane %v12218_v35, 4 }
 0x459   : > { %12341 = vst.msk [vmem:[%s18177_s27 + $0x88] sm:$0xff] %vm226_vm1, %v12309_v41  ;;  %v12314_v13 = vadd.f32 %v18361_v31, %v11786_v28  ;;  %v11784_v0 = vadd.f32 %v18152_v6, %v11745_v42  ;;  %11717 = vst.msk [vmem:[#allocation2 + $0xc0] sm:$0xff] %vm226_vm1, %v11685_v56  ;;  %v11688_v12 = vadd.f32 %v14393_v4, %v11394_v3  ;;  %v12154_v30 = vrot.slane %v12152_v24, 5  ;;  %v13441_v24 = vld [vmem:[%s14598_s6 + $0xbc] sm:$0x1] }
 0x45a   : > { %v11748_v17 = vld [vmem:[#allocation2 + $0xb8] sm:$0xff]  ;;  %v11633_v19 = vpop.f32.mrf.mxu1  ;;  %v12145_v40 = vsel %vm14627_vm4, %v12140_v10, %v18384_v25  ;;  %v12187_v7 = vor.u32 %v12186_v34, %v12183_v29  ;;  %v12192_v44 = vrot.slane %v12190_v57, 5  ;;  %v12196_v38 = vrot.slane %v12194_v46, 4  ;;  %v11396_v10 = vld [vmem:[#allocation2 + $0xe8] sm:$0xff] }
 0x45b   : > { %12346 = vst.msk [vmem:[%s18177_s27 + $0xb0] sm:$0xff] %vm226_vm1, %v12314_v13  ;;  %v12312_v31 = vadd.f32 %v18363_v18, %v11784_v0  ;;  %v11787_v51 = vadd.f32 %v18152_v6, %v11748_v17  ;;  %11720 = vst.msk [vmem:[#allocation2 + $0xd8] sm:$0xff] %vm226_vm1, %v11688_v12  ;;  %v11686_v63 = vadd.f32 %v11633_v19, %v11392_v33  ;;  %v12286_v9 = vunpack.c.l.bf16 %v12169_v59 }
 0x45c   : > { %v11746_v1 = vld [vmem:[#allocation2 + $0xa8] sm:$0xff]  ;;  %v14396_v58 = vpop.f32.mrf.mxu1  ;;  %v12179_v25 = vsel %vm14627_vm4, %v18410_v8, %v12178_v37  ;;  %v12212_v16 = vrot.slane %v12211_v27, 4  ;;  %v12221_v23 = vor.u32 %v12220_v53, %v18429_v32  ;;  %v12224_v20 = vshll.u32 %v13444_v26, 16 }
 0x45d   : > { %12344 = vst.msk [vmem:[%s18177_s27 + $0xa0] sm:$0xff] %vm226_vm1, %v12312_v31  ;;  %v12315_v18 = vadd.f32 %v18374_v2, %v11787_v51  ;;  %v11785_v61 = vadd.f32 %v18152_v6, %v11746_v1  ;;  %11718 = vst.msk [vmem:[#allocation2 + $0xc8] sm:$0xff] %vm226_vm1, %v11686_v63  ;;  %v11691_v36 = vadd.f32 %v14396_v58, %v11397_v14  ;;  %v12284_v60 = vunpack.c.l.bf16 %v12145_v40 }
 0x45e   : > { %v11751_v48 = vld [vmem:[#allocation2 + $0xd0] sm:$0xff]  ;;  %v11646_v47 = vpop.f32.mrf.mxu1  ;;  %v12155_v8 = vsel %vm14627_vm4, %v12150_v43, %v12154_v30  ;;  %v12188_v21 = vrot.slane %v12187_v7, 4  ;;  %v12197_v54 = vor.u32 %v12196_v38, %v12192_v44  ;;  %v12200_v5 = vshll.u32 %v13441_v24, 16 }
 0x45f   : > { %12347 = vst.msk [vmem:[%s18177_s27 + $0xb8] sm:$0xff] %vm226_vm1, %v12315_v18  ;;  %v12313_v2 = vadd.f32 %v18380_v52, %v11785_v61  ;;  %v11790_v59 = vadd.f32 %v18152_v6, %v11751_v48  ;;  %11723 = vst.msk [vmem:[#allocation2 + $0xf0] sm:$0xff] %vm226_vm1, %v11691_v36  ;;  %v11689_v45 = vadd.f32 %v11646_v47, %v11395_v11  ;;  %v12287_v15 = vunpack.c.l.bf16 %v12179_v25 }
 0x460   : > { %v11749_v55 = vld [vmem:[#allocation2 + $0xc0] sm:$0xff]  ;;  %v14397_v62 = vpop.f32.mrf.mxu1  ;;  %v12217_v41 = vsel %vm14627_vm4, %v12212_v16, %v18429_v32  ;;  %v12222_v28 = vrot.slane %v12221_v23, 4  ;;  %v12226_v56 = vrot.slane %v12224_v20, 5  ;;  %v12285_v29 = vunpack.c.l.bf16 %v12155_v8 }
 0x461   : > { %12345 = vst.msk [vmem:[%s18177_s27 + $0xa8] sm:$0xff] %vm226_vm1, %v12313_v2  ;;  %v12318_v22 = vadd.f32 %v12286_v9, %v11790_v59  ;;  %v11788_v52 = vadd.f32 %v18152_v6, %v11749_v55  ;;  %11721 = vst.msk [vmem:[#allocation2 + $0xe0] sm:$0xff] %vm226_vm1, %v11689_v45  ;;  %v11692_v49 = vadd.f32 %v14397_v62, %v11398_v50  ;;  %v12198_v13 = vrot.slane %v12197_v54, 4 }
 0x462   : > { %v11752_v35 = vld [vmem:[#allocation2 + $0xd8] sm:$0xff]  ;;  %v11649_v42 = vpop.f32.mrf.mxu1  ;;  %v12193_v46 = vsel %vm14627_vm4, %v12188_v21, %v12192_v44  ;;  %v12202_v0 = vrot.slane %v12200_v5, 5  ;;  %v12290_v17 = vunpack.c.l.bf16 %v12217_v41  ;;  %v12227_v19 = vsel %vm14627_vm4, %v12222_v28, %v12226_v56 }
 0x463   : > { %12350 = vst.msk [vmem:[%s18177_s27 + $0xd0] sm:$0xff] %vm226_vm1, %v12318_v22  ;;  %v12316_v3 = vadd.f32 %v12284_v60, %v11788_v52  ;;  %v11791_v4 = vadd.f32 %v18152_v6, %v11752_v35  ;;  %11724 = vst.msk [vmem:[#allocation2 + $0xf8] sm:$0xff] %vm226_vm1, %v11692_v49  ;;  %v11690_v34 = vadd.f32 %v11649_v42, %v11396_v10  ;;  %v12288_v32 = vunpack.c.l.bf16 %v12193_v46 }
 0x464   : > { %v11750_v57 = vld [vmem:[#allocation2 + $0xc8] sm:$0xff]  ;;  %v12203_v31 = vsel %vm14627_vm4, %v12198_v13, %v12202_v0  ;;  %v12291_v30 = vunpack.c.l.bf16 %v12227_v19 }
 0x465   : > { %12348 = vst.msk [vmem:[%s18177_s27 + $0xc0] sm:$0xff] %vm226_vm1, %v12316_v3  ;;  %v12319_v12 = vadd.f32 %v12287_v15, %v11791_v4  ;;  %v11789_v37 = vadd.f32 %v18152_v6, %v11750_v57  ;;  %11722 = vst.msk [vmem:[#allocation2 + $0xe8] sm:$0xff] %vm226_vm1, %v11690_v34  ;;  %v12289_v14 = vunpack.c.l.bf16 %v12203_v31 }
 0x466   : > { %v11755_v33 = vld [vmem:[#allocation2 + $0xf0] sm:$0xff] }
 0x467   : > { %12351 = vst.msk [vmem:[%s18177_s27 + $0xd8] sm:$0xff] %vm226_vm1, %v12319_v12  ;;  %v12317_v43 = vadd.f32 %v12285_v29, %v11789_v37  ;;  %v11794_v27 = vadd.f32 %v18152_v6, %v11755_v33 }
 0x468   : > { %v11753_v53 = vld [vmem:[#allocation2 + $0xe0] sm:$0xff] }
 0x469   : > { %12349 = vst.msk [vmem:[%s18177_s27 + $0xc8] sm:$0xff] %vm226_vm1, %v12317_v43  ;;  %v12322_v51 = vadd.f32 %v12290_v17, %v11794_v27  ;;  %v11792_v63 = vadd.f32 %v18152_v6, %v11753_v53 }
 0x46a   : > { %v11756_v26 = vld [vmem:[#allocation2 + $0xf8] sm:$0xff] }
 0x46b   : > { %12354 = vst.msk [vmem:[%s18177_s27 + $0xf0] sm:$0xff] %vm226_vm1, %v12322_v51  ;;  %v12320_v1 = vadd.f32 %v12288_v32, %v11792_v63  ;;  %v11795_v40 = vadd.f32 %v18152_v6, %v11756_v26 }
 0x46c   : > { %v11754_v58 = vld [vmem:[#allocation2 + $0xe8] sm:$0xff] }
 0x46d   : > { %12352 = vst.msk [vmem:[%s18177_s27 + $0xe0] sm:$0xff] %vm226_vm1, %v12320_v1  ;;  %v12323_v7 = vadd.f32 %v12291_v30, %v11795_v40  ;;  %v11793_v39 = vadd.f32 %v18152_v6, %v11754_v58 }
 0x46f   : > { %12355 = vst.msk [vmem:[%s18177_s27 + $0xf8] sm:$0xff] %vm226_vm1, %v12323_v7  ;;  %v12321_v44 = vadd.f32 %v12289_v14, %v11793_v39 }
 0x471   : > { %12353 = vst.msk [vmem:[%s18177_s27 + $0xe8] sm:$0xff] %vm226_vm1, %v12321_v44 }
 0x472 PF: > { %s15_s18 = sadd.s32 1, %s14532_s18  }
 0x473   : > { %p12_p4 = scmp.ge.s32.totalorder %s15_s18, 4  }
 0x475   :  { %14 = sbr.rel (!%p12_p4) target bundleno = 1 (0x1), region = 91 }

</bundles_post_ra>
